<compile_context>
chip_gen: v5e
topology: v5e:2x2
jax: 0.10.0
libtpu: 0.0.40
codegen_flags: <defaults>
</compile_context>

<pallas_src>
import jax
import jax.numpy as jnp
from jax import lax
from jax.experimental import pallas as pl
from jax.experimental.pallas import tpu as pltpu


def _sres_kernel(x_ref, w1_ref, b1_ref, w2_ref, b2_ref, bam_ref, bsa_ref,
                 o_ref, pad2, sapad):
    H, W, Cout = o_ref.shape
    Cin = x_ref.shape[-1]
    WP = W + 6                                     # per-channel padded width for the SA conv

    # ---------- conv1: 3x3, stride 1, pad 1  (one im2col matmul, K = 9*Cin) ----------
    cols1 = [x_ref[i:i + H, j:j + W, :].reshape(H * W, Cin)
             for i in range(3) for j in range(3)]
    p1 = jnp.concatenate(cols1, axis=1)            # (H*W, 9*Cin)
    y1 = jnp.dot(p1, w1_ref[...], preferred_element_type=jnp.float32) + b1_ref[...]
    # F.leaky_relu(out, True) -> negative_slope == 1.0 -> identity: intentionally omitted.

    # ---------- conv2: 3x3, stride 1, pad 1  (pad y1 into scratch, one im2col matmul) ----------
    # zero only the 1-wide border (interior is fully overwritten every step; idempotent)
    pad2[0:1, :, :] = jnp.zeros((1, W + 2, Cin), jnp.float32)
    pad2[H + 1:H + 2, :, :] = jnp.zeros((1, W + 2, Cin), jnp.float32)
    pad2[:, 0:1, :] = jnp.zeros((H + 2, 1, Cin), jnp.float32)
    pad2[:, W + 1:W + 2, :] = jnp.zeros((H + 2, 1, Cin), jnp.float32)
    pad2[1:H + 1, 1:W + 1, :] = y1.reshape(H, W, Cin)

    cols2 = [pad2[i:i + H, j:j + W, :].reshape(H * W, Cin)
             for i in range(3) for j in range(3)]
    p2 = jnp.concatenate(cols2, axis=1)            # (H*W, 9*Cin)
    y2 = jnp.dot(p2, w2_ref[...], preferred_element_type=jnp.float32) + b2_ref[...]
    y2hw = y2.reshape(H, W, Cout)

    # ---------- spatial attention: channel mean/max -> 7x7 conv (pad 3) -> sigmoid ----------
    # sapad columns [0, W+6) hold the 3-padded channel-mean map, [W+6, 2*(W+6)) the channel-max.
    # Zero only the pad strips (interiors are overwritten each step; idempotent).
    sapad[0:3, :] = jnp.zeros((3, 2 * WP), jnp.float32)
    sapad[H + 3:H + 6, :] = jnp.zeros((3, 2 * WP), jnp.float32)
    sapad[:, 0:3] = jnp.zeros((H + 6, 3), jnp.float32)
    sapad[:, W + 3:WP + 3] = jnp.zeros((H + 6, 6), jnp.float32)
    sapad[:, WP + W + 3:] = jnp.zeros((H + 6, 3), jnp.float32)
    sapad[3:H + 3, 3:W + 3] = jnp.mean(y2hw, axis=-1)
    sapad[3:H + 3, WP + 3:WP + 3 + W] = jnp.max(y2hw, axis=-1)

    # 7x7 conv as ONE banded matmul:
    #   p_sa[h, :] = concat_i [ avg_rows(h+i) | max_rows(h+i) ]   (K = 14*(W+6))
    #   sa = p_sa @ bam + bias
    p_sa = jnp.concatenate([sapad[i:i + H, :] for i in range(7)], axis=1)  # (H, 14*(W+6))
    sa = jnp.dot(p_sa, bam_ref[...], preferred_element_type=jnp.float32) + bsa_ref[0]
    att = pl.reciprocal(1.0 + jnp.exp(-sa), approx=True)      # sigmoid (EUP recip)

    # ---------- residual ----------
    x_in = x_ref[1:H + 1, 1:W + 1, :]              # un-padded input window
    o_ref[...] = (x_in + att[:, :, None] * y2hw).astype(o_ref.dtype)


@jax.jit
def sres_block(x, w1, b1, w2, b2, wsa, bsa):
    B, H, W, Cin = x.shape
    Cout = w2.shape[-1]
    assert Cin == Cout, "residual add requires in_channel == out_channel"

    # conv1 halo padded once in the wrapper (no pad1 scratch / per-step zero fill)
    xpad = jnp.pad(x, ((0, 0), (1, 1), (1, 1), (0, 0)))

    # im2col weights: (kh, kw, ci, co) -> (9*ci, co); column t*Cin+ci of the patch matrix
    # is tap t = kh*3+kw, channel ci, matching this row order exactly.
    w1f = w1.reshape(9 * Cin, Cin)
    w2f = w2.reshape(9 * Cin, Cout)
    b1r = b1.reshape(1, Cin)
    b2r = b2.reshape(1, Cout)

    # Banded matrices for the 7x7 SA conv: for kernel row i,
    #   sa_i = avg_rows_i @ Ba[i] + max_rows_i @ Bm[i],  Ba[i][c, w] = wa[i, c-w] for 0<=c-w<7.
    # All 7 row-blocks are stacked into ONE (14*(W+6), W) matrix -> single MXU matmul in-kernel.
    wa = wsa[:, :, 0, 0]                            # (7, 7) weights on the channel-mean map
    wm = wsa[:, :, 1, 0]                            # (7, 7) weights on the channel-max map
    c_idx = jnp.arange(W + 6)[:, None]              # (W+6, 1)
    w_idx = jnp.arange(W)[None, :]                  # (1, W)
    off = c_idx - w_idx
    valid = (off >= 0) & (off < 7)
    offc = jnp.clip(off, 0, 6)
    ba = jnp.where(valid[None], wa[:, offc], 0.0)   # (7, W+6, W)
    bm = jnp.where(valid[None], wm[:, offc], 0.0)   # (7, W+6, W)
    bam = jnp.concatenate([ba, bm], axis=1)         # (7, 2*(W+6), W)
    bamf = bam.reshape(14 * (W + 6), W)             # row-block i matches kernel row i

    bsar = bsa.reshape(1,)                          # SA bias as a single SMEM scalar

    grid_spec = pltpu.PrefetchScalarGridSpec(
        num_scalar_prefetch=0,
        grid=(B,),
        in_specs=[
            pl.BlockSpec((None, H + 2, W + 2, Cin), lambda b: (b, 0, 0, 0)),
            pl.BlockSpec((9 * Cin, Cin), lambda b: (0, 0)),
            pl.BlockSpec((1, Cin), lambda b: (0, 0)),
            pl.BlockSpec((9 * Cin, Cout), lambda b: (0, 0)),
            pl.BlockSpec((1, Cout), lambda b: (0, 0)),
            pl.BlockSpec((14 * (W + 6), W), lambda b: (0, 0)),
            pl.BlockSpec(memory_space=pltpu.MemorySpace.SMEM),       # SA bias scalar
        ],
        out_specs=pl.BlockSpec((None, H, W, Cout), lambda b: (b, 0, 0, 0)),
        scratch_shapes=[
            pltpu.VMEM((H + 2, W + 2, Cin), jnp.float32),            # conv2 padded activations
            pltpu.VMEM((H + 6, 2 * (W + 6)), jnp.float32),           # padded [mean | max] maps
        ],
    )
    return pl.pallas_call(
        _sres_kernel,
        out_shape=jax.ShapeDtypeStruct((B, H, W, Cout), x.dtype),
        grid_spec=grid_spec,
        compiler_params=pltpu.CompilerParams(dimension_semantics=("parallel",)),
    )(xpad, w1f, b1r, w2f, b2r, bamf, bsar)


def init_params(key, cin, cout):
    ks = jax.random.split(key, 6)
    w1 = jax.random.normal(ks[0], (3, 3, cin, cin), jnp.float32) * 0.1   # HWIO
    b1 = jax.random.normal(ks[1], (cin,), jnp.float32) * 0.1
    w2 = jax.random.normal(ks[2], (3, 3, cin, cout), jnp.float32) * 0.1
    b2 = jax.random.normal(ks[3], (cout,), jnp.float32) * 0.1
    wsa = jax.random.normal(ks[4], (7, 7, 2, 1), jnp.float32) * 0.1
    bsa = jax.random.normal(ks[5], (1,), jnp.float32) * 0.1
    return w1, b1, w2, b2, wsa, bsa


def sres_ref(x, w1, b1, w2, b2, wsa, bsa):
    """Pure-JAX reference (NHWC, HIGHEST precision) mirroring the PyTorch forward."""
    dn = ('NHWC', 'HWIO', 'NHWC')
    hp = lax.Precision.HIGHEST
    y1 = lax.conv_general_dilated(x, w1, (1, 1), ((1, 1), (1, 1)),
                                  dimension_numbers=dn, precision=hp) + b1
    # F.leaky_relu(y1, negative_slope=1.0) == identity
    y2 = lax.conv_general_dilated(y1, w2, (1, 1), ((1, 1), (1, 1)),
                                  dimension_numbers=dn, precision=hp) + b2
    sa_in = jnp.stack([jnp.mean(y2, axis=-1), jnp.max(y2, axis=-1)], axis=-1)
    sa = lax.conv_general_dilated(sa_in, wsa, (1, 1), ((3, 3), (3, 3)),
                                  dimension_numbers=dn, precision=hp) + bsa
    att = jax.nn.sigmoid(sa)
    return x + att * y2


if __name__ == "__main__":
    key = jax.random.PRNGKey(0)
    kx, kp = jax.random.split(key)
    B, C, H, W = 2, 4, 16, 16               # in_channel == out_channel == 4 (residual add)
    x = jax.random.normal(kx, (B, H, W, C), jnp.float32)   # NHWC (== NCHW [2,4,16,16] transposed)
    params = init_params(kp, C, C)

    out = jax.block_until_ready(sres_block(x, *params))
    ref = sres_ref(x, *params)

    assert out.shape == (B, H, W, C)
    err = float(jnp.max(jnp.abs(out - ref)))
    # Kernel runs the MXU at default precision (single-pass bf16 operands, f32 accumulation)
    # plus an EUP approx reciprocal; reference is full-f32 HIGHEST.  Structural bugs give O(1e-1).
    assert err < 3e-2, f"kernel/reference mismatch: {err}"
    print("KERNEL_OK")
</pallas_src>

<mosaic_0001>
module attributes {stable_mosaic.version = 11 : i64} {
  func.func @_sres_kernel(%arg0: i32, %arg1: memref<1x18x18x4xf32, #tpu.memory_space<vmem>>, %arg2: memref<36x4xf32, #tpu.memory_space<vmem>>, %arg3: memref<1x4xf32, #tpu.memory_space<vmem>>, %arg4: memref<36x4xf32, #tpu.memory_space<vmem>>, %arg5: memref<1x4xf32, #tpu.memory_space<vmem>>, %arg6: memref<308x16xf32, #tpu.memory_space<vmem>>, %arg7: memref<1xf32, #tpu.memory_space<smem>>, %arg8: memref<1x16x16x4xf32, #tpu.memory_space<vmem>>, %arg9: memref<18x18x4xf32, #tpu.memory_space<vmem>>, %arg10: memref<22x44xf32, #tpu.memory_space<vmem>>) attributes {dimension_semantics = [#tpu.dimension_semantics<parallel>], iteration_bounds = array<i64: 2>, scalar_prefetch = 0 : i64, scratch_operands = 2 : i64, tpu.core_type = #tpu.core_type<tc>, window_params = [{transform_indices = @transform_0, window_bounds = array<i64: 1, 18, 18, 4>}, {pipeline_mode = #tpu.pipeline_mode<synchronous>, transform_indices = @transform_1, window_bounds = array<i64: 36, 4>}, {pipeline_mode = #tpu.pipeline_mode<synchronous>, transform_indices = @transform_2, window_bounds = array<i64: 1, 4>}, {pipeline_mode = #tpu.pipeline_mode<synchronous>, transform_indices = @transform_3, window_bounds = array<i64: 36, 4>}, {pipeline_mode = #tpu.pipeline_mode<synchronous>, transform_indices = @transform_4, window_bounds = array<i64: 1, 4>}, {pipeline_mode = #tpu.pipeline_mode<synchronous>, transform_indices = @transform_5, window_bounds = array<i64: 308, 16>}, {transform_indices = @transform_6, window_bounds = array<i64: 1>}, {transform_indices = @transform_7, window_bounds = array<i64: 1, 16, 16, 4>}]} {
    %c0 = arith.constant 0 : index
    %c0_0 = arith.constant 0 : index
    %c0_1 = arith.constant 0 : index
    %c0_2 = arith.constant 0 : index
    %0 = vector.load %arg1[%c0, %c0_0, %c0_1, %c0_2] : memref<1x18x18x4xf32, #tpu.memory_space<vmem>>, vector<1x16x16x4xf32>
    %1 = vector.shape_cast %0 : vector<1x16x16x4xf32> to vector<16x16x4xf32>
    %2 = vector.shape_cast %1 : vector<16x16x4xf32> to vector<256x4xf32>
    %c0_3 = arith.constant 0 : index
    %c0_4 = arith.constant 0 : index
    %c1 = arith.constant 1 : index
    %c0_5 = arith.constant 0 : index
    %3 = vector.load %arg1[%c0_3, %c0_4, %c1, %c0_5] : memref<1x18x18x4xf32, #tpu.memory_space<vmem>>, vector<1x16x16x4xf32>
    %4 = vector.shape_cast %3 : vector<1x16x16x4xf32> to vector<16x16x4xf32>
    %5 = vector.shape_cast %4 : vector<16x16x4xf32> to vector<256x4xf32>
    %c0_6 = arith.constant 0 : index
    %c0_7 = arith.constant 0 : index
    %c2 = arith.constant 2 : index
    %c0_8 = arith.constant 0 : index
    %6 = vector.load %arg1[%c0_6, %c0_7, %c2, %c0_8] : memref<1x18x18x4xf32, #tpu.memory_space<vmem>>, vector<1x16x16x4xf32>
    %7 = vector.shape_cast %6 : vector<1x16x16x4xf32> to vector<16x16x4xf32>
    %8 = vector.shape_cast %7 : vector<16x16x4xf32> to vector<256x4xf32>
    %c0_9 = arith.constant 0 : index
    %c1_10 = arith.constant 1 : index
    %c0_11 = arith.constant 0 : index
    %c0_12 = arith.constant 0 : index
    %9 = vector.load %arg1[%c0_9, %c1_10, %c0_11, %c0_12] : memref<1x18x18x4xf32, #tpu.memory_space<vmem>>, vector<1x16x16x4xf32>
    %10 = vector.shape_cast %9 : vector<1x16x16x4xf32> to vector<16x16x4xf32>
    %11 = vector.shape_cast %10 : vector<16x16x4xf32> to vector<256x4xf32>
    %c0_13 = arith.constant 0 : index
    %c1_14 = arith.constant 1 : index
    %c1_15 = arith.constant 1 : index
    %c0_16 = arith.constant 0 : index
    %12 = vector.load %arg1[%c0_13, %c1_14, %c1_15, %c0_16] : memref<1x18x18x4xf32, #tpu.memory_space<vmem>>, vector<1x16x16x4xf32>
    %13 = vector.shape_cast %12 : vector<1x16x16x4xf32> to vector<16x16x4xf32>
    %14 = vector.shape_cast %13 : vector<16x16x4xf32> to vector<256x4xf32>
    %c0_17 = arith.constant 0 : index
    %c1_18 = arith.constant 1 : index
    %c2_19 = arith.constant 2 : index
    %c0_20 = arith.constant 0 : index
    %15 = vector.load %arg1[%c0_17, %c1_18, %c2_19, %c0_20] : memref<1x18x18x4xf32, #tpu.memory_space<vmem>>, vector<1x16x16x4xf32>
    %16 = vector.shape_cast %15 : vector<1x16x16x4xf32> to vector<16x16x4xf32>
    %17 = vector.shape_cast %16 : vector<16x16x4xf32> to vector<256x4xf32>
    %c0_21 = arith.constant 0 : index
    %c2_22 = arith.constant 2 : index
    %c0_23 = arith.constant 0 : index
    %c0_24 = arith.constant 0 : index
    %18 = vector.load %arg1[%c0_21, %c2_22, %c0_23, %c0_24] : memref<1x18x18x4xf32, #tpu.memory_space<vmem>>, vector<1x16x16x4xf32>
    %19 = vector.shape_cast %18 : vector<1x16x16x4xf32> to vector<16x16x4xf32>
    %20 = vector.shape_cast %19 : vector<16x16x4xf32> to vector<256x4xf32>
    %c0_25 = arith.constant 0 : index
    %c2_26 = arith.constant 2 : index
    %c1_27 = arith.constant 1 : index
    %c0_28 = arith.constant 0 : index
    %21 = vector.load %arg1[%c0_25, %c2_26, %c1_27, %c0_28] : memref<1x18x18x4xf32, #tpu.memory_space<vmem>>, vector<1x16x16x4xf32>
    %22 = vector.shape_cast %21 : vector<1x16x16x4xf32> to vector<16x16x4xf32>
    %23 = vector.shape_cast %22 : vector<16x16x4xf32> to vector<256x4xf32>
    %c0_29 = arith.constant 0 : index
    %c2_30 = arith.constant 2 : index
    %c2_31 = arith.constant 2 : index
    %c0_32 = arith.constant 0 : index
    %24 = vector.load %arg1[%c0_29, %c2_30, %c2_31, %c0_32] : memref<1x18x18x4xf32, #tpu.memory_space<vmem>>, vector<1x16x16x4xf32>
    %25 = vector.shape_cast %24 : vector<1x16x16x4xf32> to vector<16x16x4xf32>
    %26 = vector.shape_cast %25 : vector<16x16x4xf32> to vector<256x4xf32>
    %27 = tpu.concatenate %2, %5, %8, %11, %14, %17, %20, %23, %26 in 1 : vector<256x4xf32>, vector<256x4xf32>, vector<256x4xf32>, vector<256x4xf32>, vector<256x4xf32>, vector<256x4xf32>, vector<256x4xf32>, vector<256x4xf32>, vector<256x4xf32> -> vector<256x36xf32>
    %c0_33 = arith.constant 0 : index
    %c0_34 = arith.constant 0 : index
    %28 = vector.load %arg2[%c0_33, %c0_34] : memref<36x4xf32, #tpu.memory_space<vmem>>, vector<36x4xf32>
    %cst = arith.constant dense<0.000000e+00> : vector<256x4xf32>
    %29 = tpu.matmul %27, %28, %cst {dimension_numbers = #tpu.dot_dimension_numbers<[1], [0], [0], [1], [0, 0, 1, 1], [], []>} : vector<256x36xf32>, vector<36x4xf32>, vector<256x4xf32> -> vector<256x4xf32>
    %c0_35 = arith.constant 0 : index
    %c0_36 = arith.constant 0 : index
    %30 = vector.load %arg3[%c0_35, %c0_36] : memref<1x4xf32, #tpu.memory_space<vmem>>, vector<1x4xf32>
    %31 = vector.broadcast %30 : vector<1x4xf32> to vector<256x4xf32>
    %32 = arith.addf %29, %31 : vector<256x4xf32>
    %cst_37 = arith.constant 0.000000e+00 : f32
    %33 = vector.broadcast %cst_37 : f32 to vector<1x18x4xf32>
    %c0_38 = arith.constant 0 : index
    %c0_39 = arith.constant 0 : index
    %c0_40 = arith.constant 0 : index
    %34 = vector.load %arg9[%c0_38, %c0_39, %c0_40] : memref<18x18x4xf32, #tpu.memory_space<vmem>>, vector<1x18x4xf32>
    tpu.vector_store %arg9[%c0_38, %c0_39, %c0_40], %33 {strides = array<i32>} : memref<18x18x4xf32, #tpu.memory_space<vmem>>, vector<1x18x4xf32>,
    %cst_41 = arith.constant 0.000000e+00 : f32
    %35 = vector.broadcast %cst_41 : f32 to vector<1x18x4xf32>
    %c17 = arith.constant 17 : index
    %c0_42 = arith.constant 0 : index
    %c0_43 = arith.constant 0 : index
    %36 = vector.load %arg9[%c17, %c0_42, %c0_43] : memref<18x18x4xf32, #tpu.memory_space<vmem>>, vector<1x18x4xf32>
    tpu.vector_store %arg9[%c17, %c0_42, %c0_43], %35 {strides = array<i32>} : memref<18x18x4xf32, #tpu.memory_space<vmem>>, vector<1x18x4xf32>,
    %cst_44 = arith.constant 0.000000e+00 : f32
    %37 = vector.broadcast %cst_44 : f32 to vector<18x1x4xf32>
    %c0_45 = arith.constant 0 : index
    %c0_46 = arith.constant 0 : index
    %c0_47 = arith.constant 0 : index
    %38 = vector.load %arg9[%c0_45, %c0_46, %c0_47] : memref<18x18x4xf32, #tpu.memory_space<vmem>>, vector<18x1x4xf32>
    tpu.vector_store %arg9[%c0_45, %c0_46, %c0_47], %37 {strides = array<i32>} : memref<18x18x4xf32, #tpu.memory_space<vmem>>, vector<18x1x4xf32>,
    %cst_48 = arith.constant 0.000000e+00 : f32
    %39 = vector.broadcast %cst_48 : f32 to vector<18x1x4xf32>
    %c0_49 = arith.constant 0 : index
    %c17_50 = arith.constant 17 : index
    %c0_51 = arith.constant 0 : index
    %40 = vector.load %arg9[%c0_49, %c17_50, %c0_51] : memref<18x18x4xf32, #tpu.memory_space<vmem>>, vector<18x1x4xf32>
    tpu.vector_store %arg9[%c0_49, %c17_50, %c0_51], %39 {strides = array<i32>} : memref<18x18x4xf32, #tpu.memory_space<vmem>>, vector<18x1x4xf32>,
    %41 = vector.shape_cast %32 : vector<256x4xf32> to vector<16x16x4xf32>
    %c1_52 = arith.constant 1 : index
    %c1_53 = arith.constant 1 : index
    %c0_54 = arith.constant 0 : index
    %42 = vector.load %arg9[%c1_52, %c1_53, %c0_54] : memref<18x18x4xf32, #tpu.memory_space<vmem>>, vector<16x16x4xf32>
    tpu.vector_store %arg9[%c1_52, %c1_53, %c0_54], %41 {strides = array<i32>} : memref<18x18x4xf32, #tpu.memory_space<vmem>>, vector<16x16x4xf32>,
    %c0_55 = arith.constant 0 : index
    %c0_56 = arith.constant 0 : index
    %c0_57 = arith.constant 0 : index
    %43 = vector.load %arg9[%c0_55, %c0_56, %c0_57] : memref<18x18x4xf32, #tpu.memory_space<vmem>>, vector<16x16x4xf32>
    %44 = vector.shape_cast %43 : vector<16x16x4xf32> to vector<256x4xf32>
    %c0_58 = arith.constant 0 : index
    %c1_59 = arith.constant 1 : index
    %c0_60 = arith.constant 0 : index
    %45 = vector.load %arg9[%c0_58, %c1_59, %c0_60] : memref<18x18x4xf32, #tpu.memory_space<vmem>>, vector<16x16x4xf32>
    %46 = vector.shape_cast %45 : vector<16x16x4xf32> to vector<256x4xf32>
    %c0_61 = arith.constant 0 : index
    %c2_62 = arith.constant 2 : index
    %c0_63 = arith.constant 0 : index
    %47 = vector.load %arg9[%c0_61, %c2_62, %c0_63] : memref<18x18x4xf32, #tpu.memory_space<vmem>>, vector<16x16x4xf32>
    %48 = vector.shape_cast %47 : vector<16x16x4xf32> to vector<256x4xf32>
    %c1_64 = arith.constant 1 : index
    %c0_65 = arith.constant 0 : index
    %c0_66 = arith.constant 0 : index
    %49 = vector.load %arg9[%c1_64, %c0_65, %c0_66] : memref<18x18x4xf32, #tpu.memory_space<vmem>>, vector<16x16x4xf32>
    %50 = vector.shape_cast %49 : vector<16x16x4xf32> to vector<256x4xf32>
    %c1_67 = arith.constant 1 : index
    %c1_68 = arith.constant 1 : index
    %c0_69 = arith.constant 0 : index
    %51 = vector.load %arg9[%c1_67, %c1_68, %c0_69] : memref<18x18x4xf32, #tpu.memory_space<vmem>>, vector<16x16x4xf32>
    %52 = vector.shape_cast %51 : vector<16x16x4xf32> to vector<256x4xf32>
    %c1_70 = arith.constant 1 : index
    %c2_71 = arith.constant 2 : index
    %c0_72 = arith.constant 0 : index
    %53 = vector.load %arg9[%c1_70, %c2_71, %c0_72] : memref<18x18x4xf32, #tpu.memory_space<vmem>>, vector<16x16x4xf32>
    %54 = vector.shape_cast %53 : vector<16x16x4xf32> to vector<256x4xf32>
    %c2_73 = arith.constant 2 : index
    %c0_74 = arith.constant 0 : index
    %c0_75 = arith.constant 0 : index
    %55 = vector.load %arg9[%c2_73, %c0_74, %c0_75] : memref<18x18x4xf32, #tpu.memory_space<vmem>>, vector<16x16x4xf32>
    %56 = vector.shape_cast %55 : vector<16x16x4xf32> to vector<256x4xf32>
    %c2_76 = arith.constant 2 : index
    %c1_77 = arith.constant 1 : index
    %c0_78 = arith.constant 0 : index
    %57 = vector.load %arg9[%c2_76, %c1_77, %c0_78] : memref<18x18x4xf32, #tpu.memory_space<vmem>>, vector<16x16x4xf32>
    %58 = vector.shape_cast %57 : vector<16x16x4xf32> to vector<256x4xf32>
    %c2_79 = arith.constant 2 : index
    %c2_80 = arith.constant 2 : index
    %c0_81 = arith.constant 0 : index
    %59 = vector.load %arg9[%c2_79, %c2_80, %c0_81] : memref<18x18x4xf32, #tpu.memory_space<vmem>>, vector<16x16x4xf32>
    %60 = vector.shape_cast %59 : vector<16x16x4xf32> to vector<256x4xf32>
    %61 = tpu.concatenate %44, %46, %48, %50, %52, %54, %56, %58, %60 in 1 : vector<256x4xf32>, vector<256x4xf32>, vector<256x4xf32>, vector<256x4xf32>, vector<256x4xf32>, vector<256x4xf32>, vector<256x4xf32>, vector<256x4xf32>, vector<256x4xf32> -> vector<256x36xf32>
    %c0_82 = arith.constant 0 : index
    %c0_83 = arith.constant 0 : index
    %62 = vector.load %arg4[%c0_82, %c0_83] : memref<36x4xf32, #tpu.memory_space<vmem>>, vector<36x4xf32>
    %cst_84 = arith.constant dense<0.000000e+00> : vector<256x4xf32>
    %63 = tpu.matmul %61, %62, %cst_84 {dimension_numbers = #tpu.dot_dimension_numbers<[1], [0], [0], [1], [0, 0, 1, 1], [], []>} : vector<256x36xf32>, vector<36x4xf32>, vector<256x4xf32> -> vector<256x4xf32>
    %c0_85 = arith.constant 0 : index
    %c0_86 = arith.constant 0 : index
    %64 = vector.load %arg5[%c0_85, %c0_86] : memref<1x4xf32, #tpu.memory_space<vmem>>, vector<1x4xf32>
    %65 = vector.broadcast %64 : vector<1x4xf32> to vector<256x4xf32>
    %66 = arith.addf %63, %65 : vector<256x4xf32>
    %67 = vector.shape_cast %66 : vector<256x4xf32> to vector<16x16x4xf32>
    %cst_87 = arith.constant 0.000000e+00 : f32
    %68 = vector.broadcast %cst_87 : f32 to vector<3x44xf32>
    %c0_88 = arith.constant 0 : index
    %c0_89 = arith.constant 0 : index
    %69 = vector.load %arg10[%c0_88, %c0_89] : memref<22x44xf32, #tpu.memory_space<vmem>>, vector<3x44xf32>
    tpu.vector_store %arg10[%c0_88, %c0_89], %68 {strides = array<i32>} : memref<22x44xf32, #tpu.memory_space<vmem>>, vector<3x44xf32>,
    %cst_90 = arith.constant 0.000000e+00 : f32
    %70 = vector.broadcast %cst_90 : f32 to vector<3x44xf32>
    %c19 = arith.constant 19 : index
    %c0_91 = arith.constant 0 : index
    %71 = vector.load %arg10[%c19, %c0_91] : memref<22x44xf32, #tpu.memory_space<vmem>>, vector<3x44xf32>
    tpu.vector_store %arg10[%c19, %c0_91], %70 {strides = array<i32>} : memref<22x44xf32, #tpu.memory_space<vmem>>, vector<3x44xf32>,
    %cst_92 = arith.constant 0.000000e+00 : f32
    %72 = vector.broadcast %cst_92 : f32 to vector<22x3xf32>
    %c0_93 = arith.constant 0 : index
    %c0_94 = arith.constant 0 : index
    %73 = vector.load %arg10[%c0_93, %c0_94] : memref<22x44xf32, #tpu.memory_space<vmem>>, vector<22x3xf32>
    tpu.vector_store %arg10[%c0_93, %c0_94], %72 {strides = array<i32>} : memref<22x44xf32, #tpu.memory_space<vmem>>, vector<22x3xf32>,
    %cst_95 = arith.constant 0.000000e+00 : f32
    %74 = vector.broadcast %cst_95 : f32 to vector<22x6xf32>
    %c0_96 = arith.constant 0 : index
    %c19_97 = arith.constant 19 : index
    %75 = vector.load %arg10[%c0_96, %c19_97] : memref<22x44xf32, #tpu.memory_space<vmem>>, vector<22x6xf32>
    tpu.vector_store %arg10[%c0_96, %c19_97], %74 {strides = array<i32>} : memref<22x44xf32, #tpu.memory_space<vmem>>, vector<22x6xf32>,
    %cst_98 = arith.constant 0.000000e+00 : f32
    %76 = vector.broadcast %cst_98 : f32 to vector<22x3xf32>
    %c0_99 = arith.constant 0 : index
    %c41 = arith.constant 41 : index
    %77 = vector.load %arg10[%c0_99, %c41] : memref<22x44xf32, #tpu.memory_space<vmem>>, vector<22x3xf32>
    tpu.vector_store %arg10[%c0_99, %c41], %76 {strides = array<i32>} : memref<22x44xf32, #tpu.memory_space<vmem>>, vector<22x3xf32>,
    %cst_100 = arith.constant dense<0.000000e+00> : vector<16x16xf32>
    %78 = vector.multi_reduction <add>, %67, %cst_100 [2] : vector<16x16x4xf32> to vector<16x16xf32>
    %cst_101 = arith.constant 4.000000e+00 : f32
    %79 = vector.broadcast %cst_101 : f32 to vector<16x16xf32>
    %80 = arith.divf %78, %79 : vector<16x16xf32>
    %c3 = arith.constant 3 : index
    %c3_102 = arith.constant 3 : index
    %81 = vector.load %arg10[%c3, %c3_102] : memref<22x44xf32, #tpu.memory_space<vmem>>, vector<16x16xf32>
    tpu.vector_store %arg10[%c3, %c3_102], %80 {strides = array<i32>} : memref<22x44xf32, #tpu.memory_space<vmem>>, vector<16x16xf32>,
    %cst_103 = arith.constant dense<0xFF800000> : vector<16x16xf32>
    %82 = vector.multi_reduction <maximumf>, %67, %cst_103 [2] : vector<16x16x4xf32> to vector<16x16xf32>
    %c3_104 = arith.constant 3 : index
    %c25 = arith.constant 25 : index
    %83 = vector.load %arg10[%c3_104, %c25] : memref<22x44xf32, #tpu.memory_space<vmem>>, vector<16x16xf32>
    tpu.vector_store %arg10[%c3_104, %c25], %82 {strides = array<i32>} : memref<22x44xf32, #tpu.memory_space<vmem>>, vector<16x16xf32>,
    %c0_105 = arith.constant 0 : index
    %c0_106 = arith.constant 0 : index
    %84 = vector.load %arg10[%c0_105, %c0_106] : memref<22x44xf32, #tpu.memory_space<vmem>>, vector<16x44xf32>
    %c1_107 = arith.constant 1 : index
    %c0_108 = arith.constant 0 : index
    %85 = vector.load %arg10[%c1_107, %c0_108] : memref<22x44xf32, #tpu.memory_space<vmem>>, vector<16x44xf32>
    %c2_109 = arith.constant 2 : index
    %c0_110 = arith.constant 0 : index
    %86 = vector.load %arg10[%c2_109, %c0_110] : memref<22x44xf32, #tpu.memory_space<vmem>>, vector<16x44xf32>
    %c3_111 = arith.constant 3 : index
    %c0_112 = arith.constant 0 : index
    %87 = vector.load %arg10[%c3_111, %c0_112] : memref<22x44xf32, #tpu.memory_space<vmem>>, vector<16x44xf32>
    %c4 = arith.constant 4 : index
    %c0_113 = arith.constant 0 : index
    %88 = vector.load %arg10[%c4, %c0_113] : memref<22x44xf32, #tpu.memory_space<vmem>>, vector<16x44xf32>
    %c5 = arith.constant 5 : index
    %c0_114 = arith.constant 0 : index
    %89 = vector.load %arg10[%c5, %c0_114] : memref<22x44xf32, #tpu.memory_space<vmem>>, vector<16x44xf32>
    %c6 = arith.constant 6 : index
    %c0_115 = arith.constant 0 : index
    %90 = vector.load %arg10[%c6, %c0_115] : memref<22x44xf32, #tpu.memory_space<vmem>>, vector<16x44xf32>
    %91 = tpu.concatenate %84, %85, %86, %87, %88, %89, %90 in 1 : vector<16x44xf32>, vector<16x44xf32>, vector<16x44xf32>, vector<16x44xf32>, vector<16x44xf32>, vector<16x44xf32>, vector<16x44xf32> -> vector<16x308xf32>
    %c0_116 = arith.constant 0 : index
    %c0_117 = arith.constant 0 : index
    %92 = vector.load %arg6[%c0_116, %c0_117] : memref<308x16xf32, #tpu.memory_space<vmem>>, vector<308x16xf32>
    %cst_118 = arith.constant dense<0.000000e+00> : vector<16x16xf32>
    %93 = tpu.matmul %91, %92, %cst_118 {dimension_numbers = #tpu.dot_dimension_numbers<[1], [0], [0], [1], [0, 0, 1, 1], [], []>} : vector<16x308xf32>, vector<308x16xf32>, vector<16x16xf32> -> vector<16x16xf32>
    %c0_119 = arith.constant 0 : index
    %94 = memref.load %arg7[%c0_119] : memref<1xf32, #tpu.memory_space<smem>>
    %95 = vector.broadcast %94 : f32 to vector<16x16xf32>
    %96 = arith.addf %93, %95 : vector<16x16xf32>
    %cst_120 = arith.constant 0.000000e+00 : f32
    %97 = vector.broadcast %cst_120 : f32 to vector<16x16xf32>
    %98 = arith.subf %97, %96 : vector<16x16xf32>
    %99 = math.exp %98 : vector<16x16xf32>
    %cst_121 = arith.constant 1.000000e+00 : f32
    %100 = vector.broadcast %cst_121 : f32 to vector<16x16xf32>
    %101 = arith.addf %100, %99 : vector<16x16xf32>
    %102 = tpu.reciprocal %101 {approx = true} : vector<16x16xf32> -> vector<16x16xf32>
    %c0_122 = arith.constant 0 : index
    %c1_123 = arith.constant 1 : index
    %c1_124 = arith.constant 1 : index
    %c0_125 = arith.constant 0 : index
    %103 = vector.load %arg1[%c0_122, %c1_123, %c1_124, %c0_125] : memref<1x18x18x4xf32, #tpu.memory_space<vmem>>, vector<1x16x16x4xf32>
    %104 = vector.shape_cast %103 : vector<1x16x16x4xf32> to vector<16x16x4xf32>
    %105 = vector.shape_cast %102 : vector<16x16xf32> to vector<16x16x1xf32>
    %106 = vector.broadcast %105 : vector<16x16x1xf32> to vector<16x16x4xf32>
    %107 = arith.mulf %106, %67 : vector<16x16x4xf32>
    %108 = arith.addf %104, %107 : vector<16x16x4xf32>
    %c0_126 = arith.constant 0 : index
    %c0_127 = arith.constant 0 : index
    %c0_128 = arith.constant 0 : index
    %c0_129 = arith.constant 0 : index
    %109 = vector.load %arg8[%c0_126, %c0_127, %c0_128, %c0_129] : memref<1x16x16x4xf32, #tpu.memory_space<vmem>>, vector<1x16x16x4xf32>
    %110 = vector.shape_cast %109 : vector<1x16x16x4xf32> to vector<16x16x4xf32>
    %111 = vector.shape_cast %108 : vector<16x16x4xf32> to vector<1x16x16x4xf32>
    tpu.vector_store %arg8[%c0_126, %c0_127, %c0_128, %c0_129], %111 {strides = array<i32>} : memref<1x16x16x4xf32, #tpu.memory_space<vmem>>, vector<1x16x16x4xf32>,
    return
  }
  func.func @transform_0(%arg0: i32) -> (i32, i32, i32, i32) {
    %c0_i32 = arith.constant 0 : i32
    %c0_i32_0 = arith.constant 0 : i32
    %c0_i32_1 = arith.constant 0 : i32
    %c0_i32_2 = arith.constant 0 : i32
    return %arg0, %c0_i32, %c0_i32_0, %c0_i32_1 : i32, i32, i32, i32
  }
  func.func @transform_1(%arg0: i32) -> (i32, i32) {
    %c0_i32 = arith.constant 0 : i32
    %c0_i32_0 = arith.constant 0 : i32
    %c0_i32_1 = arith.constant 0 : i32
    return %c0_i32, %c0_i32_0 : i32, i32
  }
  func.func @transform_2(%arg0: i32) -> (i32, i32) {
    %c0_i32 = arith.constant 0 : i32
    %c0_i32_0 = arith.constant 0 : i32
    %c0_i32_1 = arith.constant 0 : i32
    return %c0_i32, %c0_i32_0 : i32, i32
  }
  func.func @transform_3(%arg0: i32) -> (i32, i32) {
    %c0_i32 = arith.constant 0 : i32
    %c0_i32_0 = arith.constant 0 : i32
    %c0_i32_1 = arith.constant 0 : i32
    return %c0_i32, %c0_i32_0 : i32, i32
  }
  func.func @transform_4(%arg0: i32) -> (i32, i32) {
    %c0_i32 = arith.constant 0 : i32
    %c0_i32_0 = arith.constant 0 : i32
    %c0_i32_1 = arith.constant 0 : i32
    return %c0_i32, %c0_i32_0 : i32, i32
  }
  func.func @transform_5(%arg0: i32) -> (i32, i32) {
    %c0_i32 = arith.constant 0 : i32
    %c0_i32_0 = arith.constant 0 : i32
    %c0_i32_1 = arith.constant 0 : i32
    return %c0_i32, %c0_i32_0 : i32, i32
  }
  func.func @transform_6(%arg0: i32) -> i32 {
    %c0_i32 = arith.constant 0 : i32
    %c0_i32_0 = arith.constant 0 : i32
    return %c0_i32 : i32
  }
  func.func @transform_7(%arg0: i32) -> (i32, i32, i32, i32) {
    %c0_i32 = arith.constant 0 : i32
    %c0_i32_0 = arith.constant 0 : i32
    %c0_i32_1 = arith.constant 0 : i32
    %c0_i32_2 = arith.constant 0 : i32
    return %arg0, %c0_i32, %c0_i32_0, %c0_i32_1 : i32, i32, i32, i32
  }
}

</mosaic_0001>

<bundles_post_ra>
// kernel: sres_block.1
= control target key start
LH: loop header
LB: loop body
LE: loop exit
PB: predicated region body
PF: predicated region fallthrough
CT: control target
= control target key end

     0   :  { %s5506_s26 = smov 0   ;;  %s9752_s0 = inlined_call_operand.vmem [shape: f32[2,18,18,4], index: 0, kind: input, shape index: {}]   ;;  %s9753_s1 = inlined_call_operand.vmem [shape: f32[36,4], index: 1, kind: input, shape index: {}]   ;;  %s9754_s2 = inlined_call_operand.vmem [shape: f32[1,4], index: 2, kind: input, shape index: {}]   ;;  %s9755_s3 = inlined_call_operand.vmem [shape: f32[36,4], index: 3, kind: input, shape index: {}]   ;;  %s9756_s4 = inlined_call_operand.vmem [shape: f32[1,4], index: 4, kind: input, shape index: {}]   ;;  %s9757_s5 = inlined_call_operand.vmem [shape: f32[308,16], index: 5, kind: input, shape index: {}]   ;;  %s9758_s6 = inlined_call_operand.<no memory space> [shape: f32[1], index: 6, kind: input, shape index: {}]   ;;  %s9759_s7 = inlined_call_operand.vmem [shape: f32[2,16,16,4], index: 7, kind: output, shape index: {}]  }
   0x1   :  { %12 = sst [smem:[#allocation4]] %s9758_s6 }
   0x2 LB: > { %s5010_s27 = sadd.s32 4294967295, %s5447_s26   ;;  %p5014_p0 = scmp.ge.s32.totalorder %s5447_s26, 1  ;;  %s5447_s26 = sphi %s5506_s26, %s18_s26  }
   0x3   : > { %p238_p1 = scmp.lt.s32.totalorder %s5447_s26, 3 }
   0x5   : > { %p239_p2 = pnand %p5014_p0, %p238_p1 }
   0x7   : > { %242 = sbr.rel (%p239_p2) target bundleno = 2683 (0xa7b), region = 48 }
   0xc   : > { %p270_p3 = scmp.lt.s32.totalorder %s5010_s27, 1  ;;  %s5449_s8 = smov 4   ;;  %vm1964_vm0 = vcmask 1043456   ;;  %vm1594_vm1 = vcmask 31744   ;;  %vm1627_vm2 = vcmask 64512   ;;  %vm1660_vm3 = vcmask 97280  }
   0xd   : > { %s5450_s9 = smov 8   ;;  %s5451_s10 = smov 12   ;;  %vm1726_vm4 = vcmask 162816   ;;  %vm1693_vm5 = vcmask 130048   ;;  %vm1759_vm6 = vcmask 195584   ;;  %vm1825_vm7 = vcmask 261120  }
   0xe   : > { %s10549_s27 = smov (!%p270_p3, %s5010_s27), 1  ;;  %s5452_s11 = smov 16   ;;  %vm1792_vm8 = vcmask 228352   ;;  %vm1867_vm9 = vcmask 293888   ;;  %vm2089_vm10 = vcmask 24576   ;;  %vm2083_vm11 = vcmask 25600  }
   0xf   : > { %s5324_s6 = smul.u32 432, %s10549_s27  ;;  %s5453_s12 = smov 20   ;;  %vm3949_vm12 = vcmask 354304   ;;  %vm3952_vm13 = vcmask 23552   ;;  %vm3957_vm14 = vcmask 203928   ;;  %vm3962_vm15 = vcmask 359752  }
  0x10   : > { %s5454_s13 = smov 24   ;;  %s5455_s14 = smov 28  }
  0x11   : > { %s5520_s30 = scalar_lea.vmem %s9752_s0, %s5324_s6  ;;  %s5456_s15 = smov 32  }
  0x12   : > { %v5523_v0 = vld [vmem:[%s5520_s30 + $0x31] sm:$0xff]  ;;  %v5526_v1 = vld [vmem:[%s5520_s30 + $0x19] sm:$0xff]  ;;  %v312_v2 = vld [vmem:[%s5520_s30 + $0x1] sm:$0xff]  ;;  %s5459_s29 = smov 88   ;;  %s4528_s23 = sld [smem:[#allocation4]] }
  0x13   : > { %610 = vrot.lane.b32.xlu2 %v5523_v0, %s5449_s8  ;;  %606 = vrot.lane.b32.xlu1 %v5526_v1, %s5449_s8  ;;  %v5535_v3 = vld [vmem:[%s5520_s30 + $0x39] sm:$0xff]  ;;  %v5538_v4 = vld [vmem:[%s5520_s30 + $0x21] sm:$0xff]  ;;  %s5313_s24 = sshll.u32 %s10549_s27, 8 }
  0x14   : > { %602 = vrot.lane.b32.xlu0 %v312_v2, %s5449_s8  ;;  %v313_v5 = vld [vmem:[%s5520_s30 + $0x9] sm:$0xff]  ;;  %v5547_v6 = vld [vmem:[%s5520_s30 + $0x61] sm:$0xff]  ;;  %v5550_v7 = vld [vmem:[%s5520_s30 + $0x51] sm:$0xff]  ;;  %s9613_s28 = scalar_lea.vmem %s9759_s7, %s5313_s24 }
  0x15   : > { %v5553_v8 = vld [vmem:[%s5520_s30 + $0x49] sm:$0xff]  ;;  %v5562_v9 = vld [vmem:[%s5520_s30 + $0x81] sm:$0xff]  ;;  %v5565_v10 = vld [vmem:[%s5520_s30 + $0x79] sm:$0xff] }
  0x16   : > { %v5568_v11 = vld [vmem:[%s5520_s30 + $0x69] sm:$0xff]  ;;  %v5580_v13 = vld [vmem:[%s5520_s30 + $0x99] sm:$0xff]  ;;  %v5583_v14 = vld [vmem:[%s5520_s30 + $0x91] sm:$0xff] }
  0x17   : > { %v5577_v12 = vld [vmem:[%s5520_s30 + $0xa9] sm:$0xff]  ;;  %v5595_v16 = vld [vmem:[%s5520_s30 + $0xc1] sm:$0xff]  ;;  %v5598_v17 = vld [vmem:[%s5520_s30 + $0xb1] sm:$0xff] }
  0x18   : > { %v5592_v15 = vld [vmem:[%s5520_s30 + $0xc9] sm:$0xff]  ;;  %v5607_v18 = vld [vmem:[%s5520_s30 + $0xf1] sm:$0xff]  ;;  %v5610_v19 = vld [vmem:[%s5520_s30 + $0xe1] sm:$0xff] }
  0x19   : > { %v5613_v20 = vld [vmem:[%s5520_s30 + $0xd9] sm:$0xff]  ;;  %v5622_v21 = vld [vmem:[%s5520_s30 + $0x111] sm:$0xff]  ;;  %v5625_v22 = vld [vmem:[%s5520_s30 + $0x109] sm:$0xff] }
  0x1a   : > { %v5628_v23 = vld [vmem:[%s5520_s30 + $0xf9] sm:$0xff]  ;;  %v5640_v25 = vld [vmem:[%s5520_s30 + $0x129] sm:$0xff]  ;;  %v5643_v26 = vld [vmem:[%s5520_s30 + $0x121] sm:$0xff] }
  0x1b   : > { %612 = vrot.lane.b32.xlu2 %v5535_v3, %s5449_s8  ;;  %608 = vrot.lane.b32.xlu1 %v5538_v4, %s5449_s8  ;;  %v5637_v24 = vld [vmem:[%s5520_s30 + $0x139] sm:$0xff]  ;;  %v5655_v28 = vld [vmem:[%s5520_s30 + $0x151] sm:$0xff] }
  0x1c   : > { %604 = vrot.lane.b32.xlu0 %v313_v5, %s5449_s8  ;;  %v5652_v27 = vld [vmem:[%s5520_s30 + $0x159] sm:$0xff]  ;;  %v5658_v29 = vld [vmem:[%s5520_s30 + $0x141] sm:$0xff]  ;;  %v5668_v31 = vld [vmem:[%s5520_s30 + $0x171] sm:$0xff] }
  0x1d   : > { %v344_v30 = vld [vmem:[%s5520_s30 + $0x2] sm:$0xff]  ;;  %v5682_v34 = vld [vmem:[%s5520_s30 + $0x1a] sm:$0xff]  ;;  %v345_v35 = vld [vmem:[%s5520_s30 + $0xa] sm:$0xff] }
  0x1e   : > { %v5671_v32 = vld [vmem:[%s5520_s30 + $0x169] sm:$0xff]  ;;  %v5696_v38 = vld [vmem:[%s5520_s30 + $0x3a] sm:$0xff]  ;;  %v5699_v39 = vld [vmem:[%s5520_s30 + $0x32] sm:$0xff] }
  0x1f   : > { %v5679_v33 = vld [vmem:[%s5520_s30 + $0x22] sm:$0xff]  ;;  %v5693_v37 = vld [vmem:[%s5520_s30 + $0x4a] sm:$0xff]  ;;  %v5716_v43 = vld [vmem:[%s5520_s30 + $0x52] sm:$0xff] }
  0x20   : > { %v5710_v41 = vld [vmem:[%s5520_s30 + $0x6a] sm:$0xff]  ;;  %v5713_v42 = vld [vmem:[%s5520_s30 + $0x62] sm:$0xff]  ;;  %v5727_v45 = vld [vmem:[%s5520_s30 + $0x92] sm:$0xff] }
  0x21   : > { %v5730_v46 = vld [vmem:[%s5520_s30 + $0x82] sm:$0xff]  ;;  %v5733_v47 = vld [vmem:[%s5520_s30 + $0x7a] sm:$0xff]  ;;  %v5748_v51 = vld [vmem:[%s5520_s30 + $0xb2] sm:$0xff] }
  0x22   : > { %v5751_v52 = vld [vmem:[%s5520_s30 + $0xaa] sm:$0xff]  ;;  %v5754_v53 = vld [vmem:[%s5520_s30 + $0x9a] sm:$0xff]  ;;  %v5775_v59 = vld [vmem:[%s5520_s30 + $0xc2] sm:$0xff] }
  0x23   : > { %618 = vrot.lane.b32.xlu2 %v5547_v6, %s5449_s8  ;;  %616 = vrot.lane.b32.xlu1 %v5550_v7, %s5449_s8  ;;  %v5769_v57 = vld [vmem:[%s5520_s30 + $0xda] sm:$0xff]  ;;  %v5772_v58 = vld [vmem:[%s5520_s30 + $0xca] sm:$0xff] }
  0x24   : > { %614 = vrot.lane.b32.xlu0 %v5553_v8, %s5449_s8  ;;  %v5790_v63 = vld [vmem:[%s5520_s30 + $0xfa] sm:$0xff]  ;;  %v5793_v2 = vld [vmem:[%s5520_s30 + $0xf2] sm:$0xff]  ;;  %v5796_v5 = vld [vmem:[%s5520_s30 + $0xe2] sm:$0xff] }
  0x2b   : > { %624 = vrot.lane.b32.xlu2 %v5562_v9, %s5449_s8  ;;  %622 = vrot.lane.b32.xlu1 %v5565_v10, %s5449_s8 }
  0x2c   : > { %620 = vrot.lane.b32.xlu0 %v5568_v11, %s5449_s8 }
  0x33   : > { %630 = vrot.lane.b32.xlu2 %v5577_v12, %s5449_s8  ;;  %628 = vrot.lane.b32.xlu1 %v5580_v13, %s5449_s8 }
  0x34   : > { %626 = vrot.lane.b32.xlu0 %v5583_v14, %s5449_s8 }
  0x3b   : > { %636 = vrot.lane.b32.xlu2 %v5592_v15, %s5449_s8  ;;  %634 = vrot.lane.b32.xlu1 %v5595_v16, %s5449_s8 }
  0x3c   : > { %632 = vrot.lane.b32.xlu0 %v5598_v17, %s5449_s8 }
  0x43   : > { %642 = vrot.lane.b32.xlu2 %v5607_v18, %s5449_s8  ;;  %640 = vrot.lane.b32.xlu1 %v5610_v19, %s5449_s8 }
  0x44   : > { %638 = vrot.lane.b32.xlu0 %v5613_v20, %s5449_s8 }
  0x4b   : > { %648 = vrot.lane.b32.xlu2 %v5622_v21, %s5449_s8  ;;  %646 = vrot.lane.b32.xlu1 %v5625_v22, %s5449_s8 }
  0x4c   : > { %644 = vrot.lane.b32.xlu0 %v5628_v23, %s5449_s8 }
  0x53   : > { %654 = vrot.lane.b32.xlu2 %v5637_v24, %s5449_s8  ;;  %652 = vrot.lane.b32.xlu1 %v5640_v25, %s5449_s8 }
  0x54   : > { %650 = vrot.lane.b32.xlu0 %v5643_v26, %s5449_s8 }
  0x5b   : > { %660 = vrot.lane.b32.xlu2 %v5652_v27, %s5449_s8  ;;  %658 = vrot.lane.b32.xlu1 %v5655_v28, %s5449_s8 }
  0x5c   : > { %656 = vrot.lane.b32.xlu0 %v5658_v29, %s5449_s8 }
  0x63   : > { %730 = vrot.lane.b32.xlu2 %v344_v30, %s5450_s9  ;;  %664 = vrot.lane.b32.xlu1 %v5668_v31, %s5449_s8 }
  0x64   : > { %662 = vrot.lane.b32.xlu0 %v5671_v32, %s5449_s8 }
  0x6b   : > { %736 = vrot.lane.b32.xlu2 %v5679_v33, %s5450_s9  ;;  %734 = vrot.lane.b32.xlu1 %v5682_v34, %s5450_s9 }
  0x6c   : > { %732 = vrot.lane.b32.xlu0 %v345_v35, %s5450_s9 }
  0x6d   : > { %v5690_v36 = vpop.permute.xlu2 %610 }
  0x6e   : > { %9814 = vst [vmem:[#allocation5_spill] sm:$0xff] %v5690_v36  ;;  %v5853_v36 = vld [vmem:[%s5520_s30 + $0x16a] sm:$0xff] }
  0x6f   : > { %9836 = vst [vmem:[#allocation27_spill] sm:$0xff] %v5853_v36 }
  0x73   : > { %742 = vrot.lane.b32.xlu2 %v5693_v37, %s5450_s9  ;;  %740 = vrot.lane.b32.xlu1 %v5696_v38, %s5450_s9 }
  0x74   : > { %738 = vrot.lane.b32.xlu0 %v5699_v39, %s5450_s9 }
  0x75   : > { %v5707_v40 = vpop.permute.xlu2 %612 }
  0x76   : > { %9815 = vst [vmem:[#allocation6_spill] sm:$0xff] %v5707_v40  ;;  %v5838_v40 = vld [vmem:[%s5520_s30 + $0x12a] sm:$0xff] }
  0x7b   : > { %748 = vrot.lane.b32.xlu2 %v5710_v41, %s5450_s9  ;;  %746 = vrot.lane.b32.xlu1 %v5713_v42, %s5450_s9 }
  0x7c   : > { %744 = vrot.lane.b32.xlu0 %v5716_v43, %s5450_s9 }
  0x7d   : > { %v5724_v44 = vpop.permute.xlu2 %618 }
  0x7e   : > { %9816 = vst [vmem:[#allocation7_spill] sm:$0xff] %v5724_v44  ;;  %v5817_v44 = vld [vmem:[%s5520_s30 + $0x10a] sm:$0xff] }
  0x83   : > { %754 = vrot.lane.b32.xlu2 %v5727_v45, %s5450_s9  ;;  %752 = vrot.lane.b32.xlu1 %v5730_v46, %s5450_s9 }
  0x84   : > { %750 = vrot.lane.b32.xlu0 %v5733_v47, %s5450_s9 }
  0x85   : > { %v5741_v48 = vpop.permute.xlu2 %624  ;;  %v5743_v49 = vpop.permute.xlu1 %606 }
  0x86   : > { %9817 = vst [vmem:[#allocation8_spill] sm:$0xff] %v5741_v48  ;;  %v5745_v50 = vpop.permute.xlu0 %602  ;;  %v5814_v48 = vld [vmem:[%s5520_s30 + $0x112] sm:$0xff] }
  0x87   : > { %9818 = vst [vmem:[#allocation9_spill] sm:$0xff] %v5743_v49  ;;  %v5859_v49 = vld [vmem:[%s5520_s30 + $0x152] sm:$0xff] }
  0x88   : > { %9819 = vst [vmem:[#allocation10_spill] sm:$0xff] %v5745_v50  ;;  %v282_v50 = vld [vmem:[%s5520_s30 + $0x18] sm:$0xff] }
  0x89   : > { %9838 = vst [vmem:[#allocation29_spill] sm:$0xff] %v5859_v49 }
  0x8b   : > { %760 = vrot.lane.b32.xlu2 %v5748_v51, %s5450_s9  ;;  %758 = vrot.lane.b32.xlu1 %v5751_v52, %s5450_s9 }
  0x8c   : > { %756 = vrot.lane.b32.xlu0 %v5754_v53, %s5450_s9 }
  0x8d   : > { %v5762_v54 = vpop.permute.xlu2 %630  ;;  %v5764_v55 = vpop.permute.xlu1 %608 }
  0x8e   : > { %9820 = vst [vmem:[#allocation11_spill] sm:$0xff] %v5762_v54  ;;  %v5766_v56 = vpop.permute.xlu0 %604  ;;  %v5811_v54 = vld [vmem:[%s5520_s30 + $0x122] sm:$0xff] }
  0x8f   : > { %9821 = vst [vmem:[#allocation12_spill] sm:$0xff] %v5764_v55  ;;  %v5856_v55 = vld [vmem:[%s5520_s30 + $0x15a] sm:$0xff] }
  0x90   : > { %9822 = vst [vmem:[#allocation13_spill] sm:$0xff] %v5766_v56  ;;  %v5874_v56 = vld [vmem:[%s5520_s30 + $0x172] sm:$0xff] }
  0x91   : > { %9837 = vst [vmem:[#allocation28_spill] sm:$0xff] %v5856_v55 }
  0x92   : > { %9842 = vst [vmem:[#allocation33_spill] sm:$0xff] %v5874_v56 }
  0x93   : > { %766 = vrot.lane.b32.xlu2 %v5769_v57, %s5450_s9  ;;  %764 = vrot.lane.b32.xlu1 %v5772_v58, %s5450_s9 }
  0x94   : > { %762 = vrot.lane.b32.xlu0 %v5775_v59, %s5450_s9 }
  0x95   : > { %v5783_v60 = vpop.permute.xlu2 %636  ;;  %v5785_v61 = vpop.permute.xlu1 %616 }
  0x96   : > { %9823 = vst [vmem:[#allocation14_spill] sm:$0xff] %v5783_v60  ;;  %v5787_v62 = vpop.permute.xlu0 %614 }
  0x97   : > { %9824 = vst [vmem:[#allocation15_spill] sm:$0xff] %v5785_v61  ;;  %v5832_v61 = vld [vmem:[%s5520_s30 + $0x142] sm:$0xff] }
  0x98   : > { %9825 = vst [vmem:[#allocation16_spill] sm:$0xff] %v5787_v62  ;;  %v5835_v62 = vld [vmem:[%s5520_s30 + $0x13a] sm:$0xff] }
  0x99   : > { %9832 = vst [vmem:[#allocation23_spill] sm:$0xff] %v5832_v61 }
  0x9b   : > { %772 = vrot.lane.b32.xlu2 %v5790_v63, %s5450_s9  ;;  %770 = vrot.lane.b32.xlu1 %v5793_v2, %s5450_s9 }
  0x9c   : > { %768 = vrot.lane.b32.xlu0 %v5796_v5, %s5450_s9 }
  0x9d   : > { %v5804_v30 = vpop.permute.xlu2 %642  ;;  %v5806_v35 = vpop.permute.xlu1 %622 }
  0x9e   : > { %9826 = vst [vmem:[#allocation17_spill] sm:$0xff] %v5804_v30  ;;  %v5808_v60 = vpop.permute.xlu0 %620 }
  0x9f   : > { %9827 = vst [vmem:[#allocation18_spill] sm:$0xff] %v5806_v35 }
  0xa0   : > { %9828 = vst [vmem:[#allocation19_spill] sm:$0xff] %v5808_v60 }
  0xa3   : > { %778 = vrot.lane.b32.xlu2 %v5811_v54, %s5450_s9  ;;  %776 = vrot.lane.b32.xlu1 %v5814_v48, %s5450_s9 }
  0xa4   : > { %774 = vrot.lane.b32.xlu0 %v5817_v44, %s5450_s9 }
  0xa5   : > { %v5825_v35 = vpop.permute.xlu2 %648  ;;  %v5827_v60 = vpop.permute.xlu1 %628 }
  0xa6   : > { %9829 = vst [vmem:[#allocation20_spill] sm:$0xff] %v5825_v35  ;;  %v5829_v30 = vpop.permute.xlu0 %626 }
  0xa7   : > { %9830 = vst [vmem:[#allocation21_spill] sm:$0xff] %v5827_v60 }
  0xa8   : > { %9831 = vst [vmem:[#allocation22_spill] sm:$0xff] %v5829_v30 }
  0xab   : > { %784 = vrot.lane.b32.xlu2 %v5832_v61, %s5450_s9  ;;  %782 = vrot.lane.b32.xlu1 %v5835_v62, %s5450_s9  ;;  %v283_v61 = vld [vmem:[%s5520_s30 + $0x20] sm:$0xff] }
  0xac   : > { %780 = vrot.lane.b32.xlu0 %v5838_v40, %s5450_s9 }
  0xad   : > { %v5846_v60 = vpop.permute.xlu2 %654  ;;  %v5848_v30 = vpop.permute.xlu1 %634 }
  0xae   : > { %9833 = vst [vmem:[#allocation24_spill] sm:$0xff] %v5846_v60  ;;  %v5850_v35 = vpop.permute.xlu0 %632 }
  0xaf   : > { %9834 = vst [vmem:[#allocation25_spill] sm:$0xff] %v5848_v30 }
  0xb0   : > { %9835 = vst [vmem:[#allocation26_spill] sm:$0xff] %v5850_v35 }
  0xb3   : > { %790 = vrot.lane.b32.xlu2 %v5853_v36, %s5450_s9  ;;  %788 = vrot.lane.b32.xlu1 %v5856_v55, %s5450_s9  ;;  %v285_v36 = vld [vmem:[%s5520_s30 + $0x38] sm:$0xff]  ;;  %v284_v55 = vld [vmem:[%s5520_s30 + $0x30] sm:$0xff] }
  0xb4   : > { %786 = vrot.lane.b32.xlu0 %v5859_v49, %s5450_s9  ;;  %v5890_v49 = vld [vmem:[%s5520_s30 + $0x48] sm:$0xff] }
  0xb5   : > { %v5867_v30 = vpop.permute.xlu2 %660  ;;  %v5869_v35 = vpop.permute.xlu1 %640  ;;  %9846 = vst [vmem:[#allocation37_spill] sm:$0xff] %v5890_v49 }
  0xb6   : > { %9839 = vst [vmem:[#allocation30_spill] sm:$0xff] %v5867_v30  ;;  %v5871_v60 = vpop.permute.xlu0 %638 }
  0xb7   : > { %9840 = vst [vmem:[#allocation31_spill] sm:$0xff] %v5869_v35 }
  0xb8   : > { %9841 = vst [vmem:[#allocation32_spill] sm:$0xff] %v5871_v60 }
  0xbb   : > { %860 = vrot.lane.b32.xlu2 %v283_v61, %s5451_s10  ;;  %858 = vrot.lane.b32.xlu1 %v282_v50, %s5451_s10 }
  0xbc   : > { %792 = vrot.lane.b32.xlu0 %v5874_v56, %s5450_s9  ;;  %v5908_v56 = vld [vmem:[%s5520_s30 + $0x50] sm:$0xff] }
  0xbd   : > { %v5882_v30 = vpop.permute.xlu2 %730  ;;  %v5884_v35 = vpop.permute.xlu1 %646  ;;  %9851 = vst [vmem:[#allocation42_spill] sm:$0xff] %v5908_v56 }
  0xbe   : > { %9843 = vst [vmem:[#allocation34_spill] sm:$0xff] %v5882_v30  ;;  %v5886_v60 = vpop.permute.xlu0 %644  ;;  %v5905_v30 = vld [vmem:[%s5520_s30 + $0x68] sm:$0xff] }
  0xbf   : > { %9844 = vst [vmem:[#allocation35_spill] sm:$0xff] %v5884_v35 }
  0xc0   : > { %9845 = vst [vmem:[#allocation36_spill] sm:$0xff] %v5886_v60  ;;  %v288_v60 = vld [vmem:[%s5520_s30 + $0x60] sm:$0xff] }
  0xc1   : > { %9850 = vst [vmem:[#allocation41_spill] sm:$0xff] %v5905_v30 }
  0xc3   : > { %866 = vrot.lane.b32.xlu2 %v5890_v49, %s5451_s10  ;;  %864 = vrot.lane.b32.xlu1 %v285_v36, %s5451_s10  ;;  %v5926_v49 = vld [vmem:[%s5520_s30 + $0x78] sm:$0xff] }
  0xc4   : > { %862 = vrot.lane.b32.xlu0 %v284_v55, %s5451_s10  ;;  %9856 = vst [vmem:[#allocation47_spill] sm:$0xff] %v5926_v49 }
  0xc5   : > { %v5897_v50 = vpop.permute.xlu2 %736  ;;  %v5899_v61 = vpop.permute.xlu1 %652 }
  0xc6   : > { %9847 = vst [vmem:[#allocation38_spill] sm:$0xff] %v5897_v50  ;;  %v5901_v35 = vpop.permute.xlu0 %650  ;;  %v5923_v50 = vld [vmem:[%s5520_s30 + $0x90] sm:$0xff] }
  0xc7   : > { %9848 = vst [vmem:[#allocation39_spill] sm:$0xff] %v5899_v61 }
  0xc8   : > { %9849 = vst [vmem:[#allocation40_spill] sm:$0xff] %v5901_v35  ;;  %v291_v35 = vld [vmem:[%s5520_s30 + $0x80] sm:$0xff] }
  0xc9   : > { %9855 = vst [vmem:[#allocation46_spill] sm:$0xff] %v5923_v50 }
  0xcb   : > { %872 = vrot.lane.b32.xlu2 %v5905_v30, %s5451_s10  ;;  %870 = vrot.lane.b32.xlu1 %v288_v60, %s5451_s10  ;;  %v5941_v30 = vld [vmem:[%s5520_s30 + $0xb0] sm:$0xff] }
  0xcc   : > { %868 = vrot.lane.b32.xlu0 %v5908_v56, %s5451_s10  ;;  %9860 = vst [vmem:[#allocation51_spill] sm:$0xff] %v5941_v30  ;;  %v5944_v56 = vld [vmem:[%s5520_s30 + $0x98] sm:$0xff] }
  0xcd   : > { %v5915_v36 = vpop.permute.xlu2 %742  ;;  %v5917_v55 = vpop.permute.xlu1 %658  ;;  %9861 = vst [vmem:[#allocation52_spill] sm:$0xff] %v5944_v56 }
  0xce   : > { %9852 = vst [vmem:[#allocation43_spill] sm:$0xff] %v5915_v36  ;;  %v5919_v61 = vpop.permute.xlu0 %656  ;;  %v294_v36 = vld [vmem:[%s5520_s30 + $0xa8] sm:$0xff] }
  0xcf   : > { %9853 = vst [vmem:[#allocation44_spill] sm:$0xff] %v5917_v55 }
  0xd0   : > { %9854 = vst [vmem:[#allocation45_spill] sm:$0xff] %v5919_v61 }
  0xd3   : > { %878 = vrot.lane.b32.xlu2 %v5923_v50, %s5451_s10  ;;  %876 = vrot.lane.b32.xlu1 %v291_v35, %s5451_s10  ;;  %v5959_v50 = vld [vmem:[%s5520_s30 + $0xd8] sm:$0xff] }
  0xd4   : > { %874 = vrot.lane.b32.xlu0 %v5926_v49, %s5451_s10  ;;  %9865 = vst [vmem:[#allocation56_spill] sm:$0xff] %v5959_v50  ;;  %v5962_v49 = vld [vmem:[%s5520_s30 + $0xc0] sm:$0xff] }
  0xd5   : > { %v5933_v60 = vpop.permute.xlu2 %748  ;;  %v5935_v55 = vpop.permute.xlu1 %664  ;;  %9866 = vst [vmem:[#allocation57_spill] sm:$0xff] %v5962_v49 }
  0xd6   : > { %9857 = vst [vmem:[#allocation48_spill] sm:$0xff] %v5933_v60  ;;  %v5937_v61 = vpop.permute.xlu0 %662  ;;  %v297_v60 = vld [vmem:[%s5520_s30 + $0xc8] sm:$0xff] }
  0xd7   : > { %9858 = vst [vmem:[#allocation49_spill] sm:$0xff] %v5935_v55 }
  0xd8   : > { %9859 = vst [vmem:[#allocation50_spill] sm:$0xff] %v5937_v61 }
  0xdb   : > { %884 = vrot.lane.b32.xlu2 %v5941_v30, %s5451_s10  ;;  %882 = vrot.lane.b32.xlu1 %v294_v36, %s5451_s10  ;;  %v5977_v30 = vld [vmem:[%s5520_s30 + $0xf8] sm:$0xff] }
  0xdc   : > { %880 = vrot.lane.b32.xlu0 %v5944_v56, %s5451_s10  ;;  %9870 = vst [vmem:[#allocation61_spill] sm:$0xff] %v5977_v30  ;;  %v5980_v56 = vld [vmem:[%s5520_s30 + $0xe0] sm:$0xff] }
  0xdd   : > { %v5951_v35 = vpop.permute.xlu2 %754  ;;  %v5953_v55 = vpop.permute.xlu1 %734  ;;  %9871 = vst [vmem:[#allocation62_spill] sm:$0xff] %v5980_v56 }
  0xde   : > { %9862 = vst [vmem:[#allocation53_spill] sm:$0xff] %v5951_v35  ;;  %v5955_v61 = vpop.permute.xlu0 %732 }
  0xdf   : > { %9863 = vst [vmem:[#allocation54_spill] sm:$0xff] %v5953_v55 }
  0xe0   : > { %9864 = vst [vmem:[#allocation55_spill] sm:$0xff] %v5955_v61  ;;  %v300_v61 = vld [vmem:[%s5520_s30 + $0xf0] sm:$0xff] }
  0xe3   : > { %890 = vrot.lane.b32.xlu2 %v5959_v50, %s5451_s10  ;;  %888 = vrot.lane.b32.xlu1 %v297_v60, %s5451_s10  ;;  %v5997_v50 = vld [vmem:[%s5520_s30 + $0x120] sm:$0xff] }
  0xe4   : > { %886 = vrot.lane.b32.xlu0 %v5962_v49, %s5451_s10  ;;  %9876 = vst [vmem:[#allocation67_spill] sm:$0xff] %v5997_v50  ;;  %v6000_v49 = vld [vmem:[%s5520_s30 + $0x108] sm:$0xff] }
  0xe5   : > { %v5969_v36 = vpop.permute.xlu2 %760  ;;  %v5971_v35 = vpop.permute.xlu1 %740  ;;  %9877 = vst [vmem:[#allocation68_spill] sm:$0xff] %v6000_v49 }
  0xe6   : > { %9867 = vst [vmem:[#allocation58_spill] sm:$0xff] %v5969_v36  ;;  %v5973_v55 = vpop.permute.xlu0 %738 }
  0xe7   : > { %9868 = vst [vmem:[#allocation59_spill] sm:$0xff] %v5971_v35 }
  0xe8   : > { %9869 = vst [vmem:[#allocation60_spill] sm:$0xff] %v5973_v55  ;;  %v5994_v55 = vld [vmem:[%s5520_s30 + $0x110] sm:$0xff] }
  0xe9   : > { %9875 = vst [vmem:[#allocation66_spill] sm:$0xff] %v5994_v55 }
  0xeb   : > { %896 = vrot.lane.b32.xlu2 %v5977_v30, %s5451_s10  ;;  %894 = vrot.lane.b32.xlu1 %v300_v61, %s5451_s10  ;;  %v6018_v30 = vld [vmem:[%s5520_s30 + $0x140] sm:$0xff] }
  0xec   : > { %892 = vrot.lane.b32.xlu0 %v5980_v56, %s5451_s10  ;;  %9882 = vst [vmem:[#allocation73_spill] sm:$0xff] %v6018_v30  ;;  %v6021_v56 = vld [vmem:[%s5520_s30 + $0x128] sm:$0xff] }
  0xed   : > { %v5987_v60 = vpop.permute.xlu2 %766  ;;  %v5989_v36 = vpop.permute.xlu1 %746  ;;  %9883 = vst [vmem:[#allocation74_spill] sm:$0xff] %v6021_v56 }
  0xee   : > { %9872 = vst [vmem:[#allocation63_spill] sm:$0xff] %v5987_v60  ;;  %v5991_v35 = vpop.permute.xlu0 %744 }
  0xef   : > { %9873 = vst [vmem:[#allocation64_spill] sm:$0xff] %v5989_v36 }
  0xf0   : > { %9874 = vst [vmem:[#allocation65_spill] sm:$0xff] %v5991_v35  ;;  %v6015_v35 = vld [vmem:[%s5520_s30 + $0x138] sm:$0xff] }
  0xf1   : > { %9881 = vst [vmem:[#allocation72_spill] sm:$0xff] %v6015_v35 }
  0xf3   : > { %902 = vrot.lane.b32.xlu2 %v5997_v50, %s5451_s10  ;;  %900 = vrot.lane.b32.xlu1 %v5994_v55, %s5451_s10  ;;  %v6036_v50 = vld [vmem:[%s5520_s30 + $0x158] sm:$0xff]  ;;  %v6042_v55 = vld [vmem:[%s5520_s30 + $0x150] sm:$0xff] }
  0xf4   : > { %898 = vrot.lane.b32.xlu0 %v6000_v49, %s5451_s10  ;;  %v6039_v49 = vld [vmem:[%s5520_s30 + $0x168] sm:$0xff] }
  0xf5   : > { %v6008_v61 = vpop.permute.xlu2 %772  ;;  %v6010_v60 = vpop.permute.xlu1 %752  ;;  %9887 = vst [vmem:[#allocation78_spill] sm:$0xff] %v6039_v49 }
  0xf6   : > { %9878 = vst [vmem:[#allocation69_spill] sm:$0xff] %v6008_v61  ;;  %v6012_v36 = vpop.permute.xlu0 %750 }
  0xf7   : > { %9879 = vst [vmem:[#allocation70_spill] sm:$0xff] %v6010_v60 }
  0xf8   : > { %9880 = vst [vmem:[#allocation71_spill] sm:$0xff] %v6012_v36 }
  0xfb   : > { %908 = vrot.lane.b32.xlu2 %v6018_v30, %s5451_s10  ;;  %906 = vrot.lane.b32.xlu1 %v6015_v35, %s5451_s10  ;;  %v6057_v30 = vld [vmem:[%s5520_s30 + $0x188] sm:$0xff]  ;;  %v6063_v35 = vld [vmem:[%s5520_s30 + $0x170] sm:$0xff] }
  0xfc   : > { %904 = vrot.lane.b32.xlu0 %v6021_v56, %s5451_s10  ;;  %9891 = vst [vmem:[#allocation82_spill] sm:$0xff] %v6057_v30  ;;  %v6060_v56 = vld [vmem:[%s5520_s30 + $0x180] sm:$0xff] }
  0xfd   : > { %v6029_v60 = vpop.permute.xlu2 %778  ;;  %v6031_v36 = vpop.permute.xlu1 %758  ;;  %9892 = vst [vmem:[#allocation83_spill] sm:$0xff] %v6063_v35 }
  0xfe   : > { %9884 = vst [vmem:[#allocation75_spill] sm:$0xff] %v6029_v60  ;;  %v6033_v61 = vpop.permute.xlu0 %756 }
  0xff   : > { %9885 = vst [vmem:[#allocation76_spill] sm:$0xff] %v6031_v36 }
 0x100   : > { %9886 = vst [vmem:[#allocation77_spill] sm:$0xff] %v6033_v61 }
 0x103   : > { %914 = vrot.lane.b32.xlu2 %v6039_v49, %s5451_s10  ;;  %912 = vrot.lane.b32.xlu1 %v6036_v50, %s5451_s10 }
 0x104   : > { %910 = vrot.lane.b32.xlu0 %v6042_v55, %s5451_s10 }
 0x105   : > { %v6050_v60 = vpop.permute.xlu2 %784  ;;  %v6052_v36 = vpop.permute.xlu1 %764 }
 0x106   : > { %9888 = vst [vmem:[#allocation79_spill] sm:$0xff] %v6050_v60  ;;  %v6054_v61 = vpop.permute.xlu0 %762 }
 0x107   : > { %9889 = vst [vmem:[#allocation80_spill] sm:$0xff] %v6052_v36 }
 0x108   : > { %9890 = vst [vmem:[#allocation81_spill] sm:$0xff] %v6054_v61 }
 0x10b   : > { %920 = vrot.lane.b32.xlu2 %v6057_v30, %s5451_s10  ;;  %918 = vrot.lane.b32.xlu1 %v6060_v56, %s5451_s10 }
 0x10c   : > { %916 = vrot.lane.b32.xlu0 %v6063_v35, %s5451_s10 }
 0x10d   : > { %v6071_v60 = vpop.permute.xlu2 %790  ;;  %v6073_v36 = vpop.permute.xlu1 %770 }
 0x10e   : > { %9893 = vst [vmem:[#allocation84_spill] sm:$0xff] %v6071_v60  ;;  %v6075_v61 = vpop.permute.xlu0 %768  ;;  %v6201_v60 = vld [vmem:[%s5520_s30 + $0x181] sm:$0xff] }
 0x113   : > { %990 = vrot.lane.b32.xlu2 %v5523_v0, %s5452_s11  ;;  %988 = vrot.lane.b32.xlu1 %v5538_v4, %s5452_s11 }
 0x114   : > { %986 = vrot.lane.b32.xlu0 %v5526_v1, %s5452_s11 }
 0x115   : > { %v6083_v30 = vpop.permute.xlu2 %860  ;;  %v6085_v49 = vpop.permute.xlu1 %776 }
 0x116   : > { %9894 = vst [vmem:[#allocation85_spill] sm:$0xff] %v6085_v49  ;;  %v6087_v35 = vpop.permute.xlu0 %774  ;;  %v5158_v49 = vld [vmem:[%s5520_s30 + $0xc1] sm:$0xff] }
 0x117   : > { %9895 = vst [vmem:[#allocation86_spill] sm:$0xff] %v6087_v35  ;;  %v5171_v35 = vld [vmem:[%s5520_s30 + $0x159] sm:$0xff] }
 0x11b   : > { %996 = vrot.lane.b32.xlu2 %v5550_v7, %s5452_s11  ;;  %994 = vrot.lane.b32.xlu1 %v5553_v8, %s5452_s11 }
 0x11c   : > { %992 = vrot.lane.b32.xlu0 %v5535_v3, %s5452_s11 }
 0x11d   : > { %v6095_v0 = vpop.permute.xlu2 %866  ;;  %v6097_v4 = vpop.permute.xlu1 %782 }
 0x11e   : > { %9896 = vst [vmem:[#allocation87_spill] sm:$0xff] %v6097_v4  ;;  %v6099_v1 = vpop.permute.xlu0 %780  ;;  %v9950_v4 = vld [vmem:[#allocation52_spill] sm:$0xff] }
 0x11f   : > { %9897 = vst [vmem:[#allocation88_spill] sm:$0xff] %v6099_v1  ;;  %v9962_v1 = vld [vmem:[#allocation68_spill] sm:$0xff] }
 0x123   : > { %1002 = vrot.lane.b32.xlu2 %v5565_v10, %s5452_s11  ;;  %1000 = vrot.lane.b32.xlu1 %v5568_v11, %s5452_s11 }
 0x124   : > { %998 = vrot.lane.b32.xlu0 %v5547_v6, %s5452_s11 }
 0x125   : > { %v6107_v7 = vpop.permute.xlu2 %872  ;;  %v6109_v8 = vpop.permute.xlu1 %788 }
 0x126   : > { %9898 = vst [vmem:[#allocation89_spill] sm:$0xff] %v6109_v8  ;;  %v6111_v3 = vpop.permute.xlu0 %786  ;;  %v9936_v8 = vld [vmem:[#allocation33_spill] sm:$0xff] }
 0x127   : > { %9899 = vst [vmem:[#allocation90_spill] sm:$0xff] %v6111_v3  ;;  %v6341_v3 = vld [vmem:[%s5520_s30 + $0x18a] sm:$0xff] }
 0x12b   : > { %1008 = vrot.lane.b32.xlu2 %v5580_v13, %s5452_s11  ;;  %1006 = vrot.lane.b32.xlu1 %v5583_v14, %s5452_s11 }
 0x12c   : > { %1004 = vrot.lane.b32.xlu0 %v5562_v9, %s5452_s11 }
 0x12d   : > { %v6119_v10 = vpop.permute.xlu2 %878  ;;  %v6121_v11 = vpop.permute.xlu1 %858 }
 0x12e   : > { %9900 = vst [vmem:[#allocation91_spill] sm:$0xff] %v6119_v10  ;;  %v6123_v6 = vpop.permute.xlu0 %792  ;;  %v5172_v10 = vld [vmem:[%s5520_s30 + $0x169] sm:$0xff] }
 0x12f   : > { %9901 = vst [vmem:[#allocation92_spill] sm:$0xff] %v6123_v6  ;;  %v6198_v6 = vld [vmem:[%s5520_s30 + $0x189] sm:$0xff] }
 0x133   : > { %1014 = vrot.lane.b32.xlu2 %v5595_v16, %s5452_s11  ;;  %1012 = vrot.lane.b32.xlu1 %v5598_v17, %s5452_s11 }
 0x134   : > { %1010 = vrot.lane.b32.xlu0 %v5577_v12, %s5452_s11 }
 0x135   : > { %v6131_v13 = vpop.permute.xlu2 %884  ;;  %v6133_v14 = vpop.permute.xlu1 %864 }
 0x136   : > { %9902 = vst [vmem:[#allocation93_spill] sm:$0xff] %v6131_v13  ;;  %v6135_v9 = vpop.permute.xlu0 %862  ;;  %v9961_v13 = vld [vmem:[#allocation66_spill] sm:$0xff] }
 0x13b   : > { %1020 = vrot.lane.b32.xlu2 %v5610_v19, %s5452_s11  ;;  %1018 = vrot.lane.b32.xlu1 %v5613_v20, %s5452_s11 }
 0x13c   : > { %1016 = vrot.lane.b32.xlu0 %v5592_v15, %s5452_s11 }
 0x13d   : > { %v6143_v16 = vpop.permute.xlu2 %890  ;;  %v6145_v17 = vpop.permute.xlu1 %870 }
 0x13e   : > { %9903 = vst [vmem:[#allocation94_spill] sm:$0xff] %v6143_v16  ;;  %v6147_v12 = vpop.permute.xlu0 %868  ;;  %v5114_v16 = vld [vmem:[%s5520_s30 + $0x30] sm:$0xff] }
 0x143   : > { %1026 = vrot.lane.b32.xlu2 %v5625_v22, %s5452_s11  ;;  %1024 = vrot.lane.b32.xlu1 %v5628_v23, %s5452_s11 }
 0x144   : > { %1022 = vrot.lane.b32.xlu0 %v5607_v18, %s5452_s11 }
 0x145   : > { %v6155_v19 = vpop.permute.xlu2 %896  ;;  %v6157_v20 = vpop.permute.xlu1 %876 }
 0x146   : > { %9904 = vst [vmem:[#allocation95_spill] sm:$0xff] %v6157_v20  ;;  %v6159_v15 = vpop.permute.xlu0 %874 }
 0x14b   : > { %1032 = vrot.lane.b32.xlu2 %v5640_v25, %s5452_s11  ;;  %1030 = vrot.lane.b32.xlu1 %v5643_v26, %s5452_s11 }
 0x14c   : > { %1028 = vrot.lane.b32.xlu0 %v5622_v21, %s5452_s11 }
 0x14d   : > { %v6167_v22 = vpop.permute.xlu2 %902  ;;  %v6169_v18 = vpop.permute.xlu1 %882 }
 0x14e   : > { %9905 = vst [vmem:[#allocation96_spill] sm:$0xff] %v6167_v22  ;;  %v6171_v23 = vpop.permute.xlu0 %880  ;;  %v5167_v22 = vld [vmem:[%s5520_s30 + $0x129] sm:$0xff] }
 0x14f   : > { %9906 = vst [vmem:[#allocation97_spill] sm:$0xff] %v6169_v18  ;;  %v5144_v18 = vld [vmem:[%s5520_s30 + $0x198] sm:$0xff] }
 0x150   : > { %9907 = vst [vmem:[#allocation98_spill] sm:$0xff] %v6171_v23  ;;  %v5155_v23 = vld [vmem:[%s5520_s30 + $0x99] sm:$0xff] }
 0x153   : > { %1038 = vrot.lane.b32.xlu2 %v5655_v28, %s5452_s11  ;;  %1036 = vrot.lane.b32.xlu1 %v5658_v29, %s5452_s11 }
 0x154   : > { %1034 = vrot.lane.b32.xlu0 %v5637_v24, %s5452_s11 }
 0x155   : > { %v6179_v25 = vpop.permute.xlu2 %908  ;;  %v6181_v21 = vpop.permute.xlu1 %888 }
 0x156   : > { %9908 = vst [vmem:[#allocation99_spill] sm:$0xff] %v6179_v25  ;;  %v6183_v26 = vpop.permute.xlu0 %886  ;;  %v5130_v25 = vld [vmem:[%s5520_s30 + $0xf0] sm:$0xff] }
 0x157   : > { %9909 = vst [vmem:[#allocation100_spill] sm:$0xff] %v6181_v21 }
 0x158   : > { %9910 = vst [vmem:[#allocation101_spill] sm:$0xff] %v6183_v26  ;;  %v5124_v26 = vld [vmem:[%s5520_s30 + $0xa8] sm:$0xff] }
 0x15b   : > { %1044 = vrot.lane.b32.xlu2 %v5668_v31, %s5452_s11  ;;  %1042 = vrot.lane.b32.xlu1 %v5671_v32, %s5452_s11 }
 0x15c   : > { %1040 = vrot.lane.b32.xlu0 %v5652_v27, %s5452_s11 }
 0x15d   : > { %v6191_v28 = vpop.permute.xlu2 %914  ;;  %v6193_v29 = vpop.permute.xlu1 %894 }
 0x15e   : > { %9911 = vst [vmem:[#allocation102_spill] sm:$0xff] %v6191_v28  ;;  %v6195_v24 = vpop.permute.xlu0 %892 }
 0x15f   : > { %9912 = vst [vmem:[#allocation103_spill] sm:$0xff] %v6193_v29 }
 0x160   : > { %9913 = vst [vmem:[#allocation104_spill] sm:$0xff] %v6195_v24 }
 0x163   : > { %1114 = vrot.lane.b32.xlu2 %v5682_v34, %s5453_s12  ;;  %1048 = vrot.lane.b32.xlu1 %v6198_v6, %s5452_s11 }
 0x164   : > { %1046 = vrot.lane.b32.xlu0 %v6201_v60, %s5452_s11 }
 0x165   : > { %v6209_v27 = vpop.permute.xlu2 %920  ;;  %v6211_v31 = vpop.permute.xlu1 %900 }
 0x166   : > { %9914 = vst [vmem:[#allocation105_spill] sm:$0xff] %v6209_v27  ;;  %v6213_v32 = vpop.permute.xlu0 %898  ;;  %v9930_v27 = vld [vmem:[#allocation28_spill] sm:$0xff] }
 0x167   : > { %9915 = vst [vmem:[#allocation106_spill] sm:$0xff] %v6211_v31  ;;  %v1860_v31 = vld [vmem:[%s9753_s1 + $0x10] sm:$0xff] }
 0x16b   : > { %1120 = vrot.lane.b32.xlu2 %v5696_v38, %s5453_s12  ;;  %1118 = vrot.lane.b32.xlu1 %v5699_v39, %s5453_s12 }
 0x16c   : > { %1116 = vrot.lane.b32.xlu0 %v5679_v33, %s5453_s12 }
 0x16d   : > { %v6221_v34 = vpop.permute.xlu2 %990  ;;  %v6223_v29 = vpop.permute.xlu1 %906 }
 0x16e   : > { %9916 = vst [vmem:[#allocation107_spill] sm:$0xff] %v6223_v29  ;;  %v6225_v24 = vpop.permute.xlu0 %904  ;;  %v9975_v29 = vld [vmem:[#allocation83_spill] sm:$0xff] }
 0x16f   : > { %9917 = vst [vmem:[#allocation108_spill] sm:$0xff] %v6225_v24  ;;  %v5152_v24 = vld [vmem:[%s5520_s30 + $0x79] sm:$0xff] }
 0x173   : > { %1126 = vrot.lane.b32.xlu2 %v5713_v42, %s5453_s12  ;;  %1124 = vrot.lane.b32.xlu1 %v5716_v43, %s5453_s12 }
 0x174   : > { %1122 = vrot.lane.b32.xlu0 %v5693_v37, %s5453_s12 }
 0x175   : > { %v6233_v38 = vpop.permute.xlu2 %996  ;;  %v6235_v39 = vpop.permute.xlu1 %912 }
 0x176   : > { %9918 = vst [vmem:[#allocation109_spill] sm:$0xff] %v6235_v39  ;;  %v6237_v33 = vpop.permute.xlu0 %910 }
 0x177   : > { %9919 = vst [vmem:[#allocation110_spill] sm:$0xff] %v6237_v33 }
 0x17b   : > { %1132 = vrot.lane.b32.xlu2 %v5730_v46, %s5453_s12  ;;  %1130 = vrot.lane.b32.xlu1 %v5733_v47, %s5453_s12 }
 0x17c   : > { %1128 = vrot.lane.b32.xlu0 %v5710_v41, %s5453_s12 }
 0x17d   : > { %v6245_v42 = vpop.permute.xlu2 %1002  ;;  %v6247_v43 = vpop.permute.xlu1 %918 }
 0x17e   : > { %9920 = vst [vmem:[#allocation111_spill] sm:$0xff] %v6247_v43  ;;  %v6249_v37 = vpop.permute.xlu0 %916 }
 0x17f   : > { %9921 = vst [vmem:[#allocation112_spill] sm:$0xff] %v6249_v37  ;;  %v6324_v37 = vld [vmem:[%s5520_s30 + $0x182] sm:$0xff] }
 0x183   : > { %1138 = vrot.lane.b32.xlu2 %v5751_v52, %s5453_s12  ;;  %1136 = vrot.lane.b32.xlu1 %v5754_v53, %s5453_s12 }
 0x184   : > { %1134 = vrot.lane.b32.xlu0 %v5727_v45, %s5453_s12 }
 0x185   : > { %v6257_v46 = vpop.permute.xlu2 %1008  ;;  %v6259_v47 = vpop.permute.xlu1 %988 }
 0x186   : > { %9922 = vst [vmem:[#allocation113_spill] sm:$0xff] %v6257_v46  ;;  %v6261_v41 = vpop.permute.xlu0 %986  ;;  %v5153_v46 = vld [vmem:[%s5520_s30 + $0x81] sm:$0xff] }
 0x18b   : > { %1144 = vrot.lane.b32.xlu2 %v5772_v58, %s5453_s12  ;;  %1142 = vrot.lane.b32.xlu1 %v5775_v59, %s5453_s12 }
 0x18c   : > { %1140 = vrot.lane.b32.xlu0 %v5748_v51, %s5453_s12 }
 0x18d   : > { %v6269_v52 = vpop.permute.xlu2 %1014  ;;  %v6271_v53 = vpop.permute.xlu1 %994 }
 0x18e   : > { %9923 = vst [vmem:[#allocation114_spill] sm:$0xff] %v6269_v52  ;;  %v6273_v45 = vpop.permute.xlu0 %992  ;;  %v9946_v52 = vld [vmem:[#allocation47_spill] sm:$0xff] }
 0x193   : > { %1150 = vrot.lane.b32.xlu2 %v5793_v2, %s5453_s12  ;;  %1148 = vrot.lane.b32.xlu1 %v5796_v5, %s5453_s12 }
 0x194   : > { %1146 = vrot.lane.b32.xlu0 %v5769_v57, %s5453_s12 }
 0x195   : > { %v6281_v58 = vpop.permute.xlu2 %1020  ;;  %v6283_v59 = vpop.permute.xlu1 %1000 }
 0x196   : > { %9924 = vst [vmem:[#allocation115_spill] sm:$0xff] %v6281_v58  ;;  %v6285_v51 = vpop.permute.xlu0 %998 }
 0x19b   : > { %1156 = vrot.lane.b32.xlu2 %v5814_v48, %s5453_s12  ;;  %1154 = vrot.lane.b32.xlu1 %v5817_v44, %s5453_s12 }
 0x19c   : > { %1152 = vrot.lane.b32.xlu0 %v5790_v63, %s5453_s12 }
 0x19d   : > { %v6293_v2 = vpop.permute.xlu2 %1026  ;;  %v6295_v5 = vpop.permute.xlu1 %1006 }
 0x19e   : > { %9925 = vst [vmem:[#allocation116_spill] sm:$0xff] %v6295_v5  ;;  %v6297_v57 = vpop.permute.xlu0 %1004  ;;  %v5168_v5 = vld [vmem:[%s5520_s30 + $0x139] sm:$0xff] }
 0x19f   : > { %9926 = vst [vmem:[#allocation117_spill] sm:$0xff] %v6297_v57  ;;  %v5194_v57 = vld [vmem:[%s5520_s30 + $0xf2] sm:$0xff] }
 0x1a3   : > { %1162 = vrot.lane.b32.xlu2 %v5835_v62, %s5453_s12  ;;  %1160 = vrot.lane.b32.xlu1 %v5838_v40, %s5453_s12  ;;  %v9931_v62 = vld [vmem:[#allocation29_spill] sm:$0xff]  ;;  %v9932_v40 = vld [vmem:[#allocation23_spill] sm:$0xff] }
 0x1a4   : > { %1158 = vrot.lane.b32.xlu0 %v5811_v54, %s5453_s12 }
 0x1a5   : > { %v6305_v44 = vpop.permute.xlu2 %1032  ;;  %v6307_v48 = vpop.permute.xlu1 %1012 }
 0x1a6   : > { %9927 = vst [vmem:[#allocation118_spill] sm:$0xff] %v6305_v44  ;;  %v6309_v63 = vpop.permute.xlu0 %1010  ;;  %v5149_v44 = vld [vmem:[%s5520_s30 + $0x51] sm:$0xff] }
 0x1a7   : > { %9928 = vst [vmem:[#allocation119_spill] sm:$0xff] %v6307_v48  ;;  %v5127_v48 = vld [vmem:[%s5520_s30 + $0xc8] sm:$0xff] }
 0x1a8   : > { %9929 = vst [vmem:[#allocation120_spill] sm:$0xff] %v6309_v63 }
 0x1ab   : > { %1168 = vrot.lane.b32.xlu2 %v9930_v27, %s5453_s12  ;;  %1166 = vrot.lane.b32.xlu1 %v9931_v62, %s5453_s12  ;;  %v9937_v27 = vld [vmem:[#allocation27_spill] sm:$0xff] }
 0x1ac   : > { %1164 = vrot.lane.b32.xlu0 %v9932_v40, %s5453_s12 }
 0x1ad   : > { %v6317_v43 = vpop.permute.xlu2 %1038  ;;  %v6319_v54 = vpop.permute.xlu1 %1018 }
 0x1ae   : > { %9933 = vst [vmem:[#allocation28_spill] sm:$0xff] %v6317_v43  ;;  %v6321_v58 = vpop.permute.xlu0 %1016  ;;  %v5121_v43 = vld [vmem:[%s5520_s30 + $0x80] sm:$0xff] }
 0x1af   : > { %9934 = vst [vmem:[#allocation29_spill] sm:$0xff] %v6319_v54  ;;  %v5115_v54 = vld [vmem:[%s5520_s30 + $0x38] sm:$0xff] }
 0x1b0   : > { %9935 = vst [vmem:[#allocation23_spill] sm:$0xff] %v6321_v58  ;;  %v9942_v58 = vld [vmem:[#allocation42_spill] sm:$0xff] }
 0x1b3   : > { %1174 = vrot.lane.b32.xlu2 %v6324_v37, %s5453_s12  ;;  %1172 = vrot.lane.b32.xlu1 %v9936_v8, %s5453_s12 }
 0x1b4   : > { %1170 = vrot.lane.b32.xlu0 %v9937_v27, %s5453_s12 }
 0x1b5   : > { %v6332_v62 = vpop.permute.xlu2 %1044  ;;  %v6334_v40 = vpop.permute.xlu1 %1024 }
 0x1b6   : > { %9938 = vst [vmem:[#allocation33_spill] sm:$0xff] %v6332_v62  ;;  %v6336_v28 = vpop.permute.xlu0 %1022 }
 0x1b7   : > { %9939 = vst [vmem:[#allocation27_spill] sm:$0xff] %v6336_v28  ;;  %v5118_v28 = vld [vmem:[%s5520_s30 + $0x60] sm:$0xff] }
 0x1bb   : > { %1244 = vrot.lane.b32.xlu2 %v5115_v54, %s5454_s13  ;;  %1242 = vrot.lane.b32.xlu1 %v5114_v16, %s5454_s13  ;;  %v9943_v54 = vld [vmem:[#allocation37_spill] sm:$0xff] }
 0x1bc   : > { %1176 = vrot.lane.b32.xlu0 %v6341_v3, %s5453_s12 }
 0x1bd   : > { %v6347_v8 = vpop.permute.xlu2 %1114  ;;  %v6349_v27 = vpop.permute.xlu1 %1030 }
 0x1be   : > { %9940 = vst [vmem:[#allocation121_spill] sm:$0xff] %v6349_v27  ;;  %v6351_v62 = vpop.permute.xlu0 %1028  ;;  %v5164_v27 = vld [vmem:[%s5520_s30 + $0x109] sm:$0xff] }
 0x1bf   : > { %9941 = vst [vmem:[#allocation122_spill] sm:$0xff] %v6351_v62  ;;  %v5195_v62 = vld [vmem:[%s5520_s30 + $0xfa] sm:$0xff] }
 0x1c3   : > { %1250 = vrot.lane.b32.xlu2 %v5118_v28, %s5454_s13  ;;  %1248 = vrot.lane.b32.xlu1 %v9942_v58, %s5454_s13  ;;  %v9947_v28 = vld [vmem:[#allocation41_spill] sm:$0xff] }
 0x1c4   : > { %1246 = vrot.lane.b32.xlu0 %v9943_v54, %s5454_s13 }
 0x1c5   : > { %v6359_v16 = vpop.permute.xlu2 %1120  ;;  %v6361_v39 = vpop.permute.xlu1 %1036 }
 0x1c6   : > { %9944 = vst [vmem:[#allocation42_spill] sm:$0xff] %v6361_v39  ;;  %v6363_v21 = vpop.permute.xlu0 %1034 }
 0x1c7   : > { %9945 = vst [vmem:[#allocation37_spill] sm:$0xff] %v6363_v21  ;;  %v9966_v21 = vld [vmem:[#allocation74_spill] sm:$0xff] }
 0x1cb   : > { %1256 = vrot.lane.b32.xlu2 %v5121_v43, %s5454_s13  ;;  %1254 = vrot.lane.b32.xlu1 %v9946_v52, %s5454_s13  ;;  %v9951_v43 = vld [vmem:[#allocation46_spill] sm:$0xff] }
 0x1cc   : > { %1252 = vrot.lane.b32.xlu0 %v9947_v28, %s5454_s13 }
 0x1cd   : > { %v6371_v58 = vpop.permute.xlu2 %1126  ;;  %v6373_v33 = vpop.permute.xlu1 %1042 }
 0x1ce   : > { %9948 = vst [vmem:[#allocation47_spill] sm:$0xff] %v6373_v33  ;;  %v6375_v54 = vpop.permute.xlu0 %1040  ;;  %v9955_v33 = vld [vmem:[#allocation57_spill] sm:$0xff] }
 0x1cf   : > { %9949 = vst [vmem:[#allocation41_spill] sm:$0xff] %v6375_v54 }
 0x1d3   : > { %1262 = vrot.lane.b32.xlu2 %v5124_v26, %s5454_s13  ;;  %1260 = vrot.lane.b32.xlu1 %v9950_v4, %s5454_s13  ;;  %v9956_v26 = vld [vmem:[#allocation51_spill] sm:$0xff] }
 0x1d4   : > { %1258 = vrot.lane.b32.xlu0 %v9951_v43, %s5454_s13 }
 0x1d5   : > { %v6383_v52 = vpop.permute.xlu2 %1132  ;;  %v6385_v39 = vpop.permute.xlu1 %1048 }
 0x1d6   : > { %9952 = vst [vmem:[#allocation52_spill] sm:$0xff] %v6383_v52  ;;  %v6387_v28 = vpop.permute.xlu0 %1046  ;;  %v5191_v52 = vld [vmem:[%s5520_s30 + $0xca] sm:$0xff] }
 0x1d7   : > { %9953 = vst [vmem:[#allocation46_spill] sm:$0xff] %v6385_v39  ;;  %v9958_v39 = vld [vmem:[#allocation62_spill] sm:$0xff] }
 0x1d8   : > { %9954 = vst [vmem:[#allocation123_spill] sm:$0xff] %v6387_v28 }
 0x1db   : > { %1268 = vrot.lane.b32.xlu2 %v5127_v48, %s5454_s13  ;;  %1266 = vrot.lane.b32.xlu1 %v9955_v33, %s5454_s13  ;;  %v9959_v48 = vld [vmem:[#allocation56_spill] sm:$0xff] }
 0x1dc   : > { %1264 = vrot.lane.b32.xlu0 %v9956_v26, %s5454_s13 }
 0x1dd   : > { %v6395_v54 = vpop.permute.xlu2 %1138  ;;  %v6397_v4 = vpop.permute.xlu1 %1118 }
 0x1de   : > { %9957 = vst [vmem:[#allocation57_spill] sm:$0xff] %v6395_v54  ;;  %v6399_v43 = vpop.permute.xlu0 %1116 }
 0x1e3   : > { %1274 = vrot.lane.b32.xlu2 %v5130_v25, %s5454_s13  ;;  %1272 = vrot.lane.b32.xlu1 %v9958_v39, %s5454_s13  ;;  %v9963_v25 = vld [vmem:[#allocation61_spill] sm:$0xff] }
 0x1e4   : > { %1270 = vrot.lane.b32.xlu0 %v9959_v48, %s5454_s13 }
 0x1e5   : > { %v6407_v28 = vpop.permute.xlu2 %1144  ;;  %v6409_v33 = vpop.permute.xlu1 %1124 }
 0x1e6   : > { %9960 = vst [vmem:[#allocation51_spill] sm:$0xff] %v6407_v28  ;;  %v6411_v26 = vpop.permute.xlu0 %1122  ;;  %v9965_v28 = vld [vmem:[#allocation72_spill] sm:$0xff] }
 0x1eb   : > { %1280 = vrot.lane.b32.xlu2 %v9961_v13, %s5454_s13  ;;  %1278 = vrot.lane.b32.xlu1 %v9962_v1, %s5454_s13  ;;  %v9967_v13 = vld [vmem:[#allocation67_spill] sm:$0xff] }
 0x1ec   : > { %1276 = vrot.lane.b32.xlu0 %v9963_v25, %s5454_s13 }
 0x1ed   : > { %v6419_v54 = vpop.permute.xlu2 %1150  ;;  %v6421_v39 = vpop.permute.xlu1 %1130 }
 0x1ee   : > { %9964 = vst [vmem:[#allocation62_spill] sm:$0xff] %v6419_v54  ;;  %v6423_v48 = vpop.permute.xlu0 %1128 }
 0x1f3   : > { %1286 = vrot.lane.b32.xlu2 %v9965_v28, %s5454_s13  ;;  %1284 = vrot.lane.b32.xlu1 %v9966_v21, %s5454_s13  ;;  %v9971_v28 = vld [vmem:[#allocation73_spill] sm:$0xff] }
 0x1f4   : > { %1282 = vrot.lane.b32.xlu0 %v9967_v13, %s5454_s13 }
 0x1f5   : > { %v6431_v1 = vpop.permute.xlu2 %1156  ;;  %v6433_v25 = vpop.permute.xlu1 %1136 }
 0x1f6   : > { %9968 = vst [vmem:[#allocation56_spill] sm:$0xff] %v6431_v1  ;;  %v6435_v54 = vpop.permute.xlu0 %1134  ;;  %v5188_v1 = vld [vmem:[%s5520_s30 + $0xaa] sm:$0xff] }
 0x1f7   : > { %9969 = vst [vmem:[#allocation66_spill] sm:$0xff] %v6433_v25  ;;  %v5150_v25 = vld [vmem:[%s5520_s30 + $0x61] sm:$0xff] }
 0x1f8   : > { %9970 = vst [vmem:[#allocation68_spill] sm:$0xff] %v6435_v54  ;;  %v5165_v54 = vld [vmem:[%s5520_s30 + $0x111] sm:$0xff] }
 0x1fb   : > { %1292 = vrot.lane.b32.xlu2 %v6036_v50, %s5454_s13  ;;  %1290 = vrot.lane.b32.xlu1 %v6042_v55, %s5454_s13  ;;  %v9976_v50 = vld [vmem:[#allocation78_spill] sm:$0xff] }
 0x1fc   : > { %1288 = vrot.lane.b32.xlu0 %v9971_v28, %s5454_s13 }
 0x1fd   : > { %v6443_v21 = vpop.permute.xlu2 %1162  ;;  %v6445_v13 = vpop.permute.xlu1 %1142 }
 0x1fe   : > { %9972 = vst [vmem:[#allocation61_spill] sm:$0xff] %v6443_v21  ;;  %v6447_v63 = vpop.permute.xlu0 %1140 }
 0x1ff   : > { %9973 = vst [vmem:[#allocation72_spill] sm:$0xff] %v6445_v13  ;;  %v5145_v13 = vld [vmem:[%s5520_s30 + $0x1a0] sm:$0xff] }
 0x200   : > { %9974 = vst [vmem:[#allocation74_spill] sm:$0xff] %v6447_v63  ;;  %v5146_v63 = vld [vmem:[%s5520_s30 + $0x31] sm:$0xff] }
 0x203   : > { %1298 = vrot.lane.b32.xlu2 %v6060_v56, %s5454_s13  ;;  %1296 = vrot.lane.b32.xlu1 %v9975_v29, %s5454_s13  ;;  %v9980_v56 = vld [vmem:[#allocation82_spill] sm:$0xff] }
 0x204   : > { %1294 = vrot.lane.b32.xlu0 %v9976_v50, %s5454_s13 }
 0x205   : > { %v6455_v55 = vpop.permute.xlu2 %1168  ;;  %v6457_v28 = vpop.permute.xlu1 %1148 }
 0x206   : > { %9977 = vst [vmem:[#allocation67_spill] sm:$0xff] %v6455_v55  ;;  %v6459_v21 = vpop.permute.xlu0 %1146 }
 0x207   : > { %9978 = vst [vmem:[#allocation73_spill] sm:$0xff] %v6457_v28  ;;  %v5148_v28 = vld [vmem:[%s5520_s30 + $0x49] sm:$0xff] }
 0x208   : > { %9979 = vst [vmem:[#allocation83_spill] sm:$0xff] %v6459_v21  ;;  %v5147_v21 = vld [vmem:[%s5520_s30 + $0x39] sm:$0xff] }
 0x20b   : > { %1304 = vrot.lane.b32.xlu2 %v5145_v13, %s5454_s13  ;;  %1302 = vrot.lane.b32.xlu1 %v5144_v18, %s5454_s13 }
 0x20c   : > { %1300 = vrot.lane.b32.xlu0 %v9980_v56, %s5454_s13 }
 0x20d   : > { %v6467_v29 = vpop.permute.xlu2 %1174  ;;  %v6469_v50 = vpop.permute.xlu1 %1154 }
 0x20e   : > { %9981 = vst [vmem:[#allocation78_spill] sm:$0xff] %v6467_v29  ;;  %v6471_v55 = vpop.permute.xlu0 %1152  ;;  %v5151_v29 = vld [vmem:[%s5520_s30 + $0x69] sm:$0xff] }
 0x213   : > { %1374 = vrot.lane.b32.xlu2 %v5148_v28, %s5455_s14  ;;  %1372 = vrot.lane.b32.xlu1 %v5147_v21, %s5455_s14 }
 0x214   : > { %1370 = vrot.lane.b32.xlu0 %v5146_v63, %s5455_s14 }
 0x215   : > { %v6479_v18 = vpop.permute.xlu2 %1244  ;;  %v6481_v13 = vpop.permute.xlu1 %1160 }
 0x216   : > { %9982 = vst [vmem:[#allocation82_spill] sm:$0xff] %v6481_v13  ;;  %v6483_v56 = vpop.permute.xlu0 %1158  ;;  %v5154_v13 = vld [vmem:[%s5520_s30 + $0x91] sm:$0xff] }
 0x217   : > { %9983 = vst [vmem:[#allocation124_spill] sm:$0xff] %v6483_v56  ;;  %v5161_v56 = vld [vmem:[%s5520_s30 + $0xe1] sm:$0xff] }
 0x21b   : > { %1380 = vrot.lane.b32.xlu2 %v5151_v29, %s5455_s14  ;;  %1378 = vrot.lane.b32.xlu1 %v5150_v25, %s5455_s14 }
 0x21c   : > { %1376 = vrot.lane.b32.xlu0 %v5149_v44, %s5455_s14 }
 0x21d   : > { %v6491_v21 = vpop.permute.xlu2 %1250  ;;  %v6493_v63 = vpop.permute.xlu1 %1166 }
 0x21e   : > { %9984 = vst [vmem:[#allocation125_spill] sm:$0xff] %v6493_v63  ;;  %v6495_v28 = vpop.permute.xlu0 %1164  ;;  %v5157_v63 = vld [vmem:[%s5520_s30 + $0xb1] sm:$0xff] }
 0x21f   : > { %9985 = vst [vmem:[#allocation126_spill] sm:$0xff] %v6495_v28  ;;  %v5156_v28 = vld [vmem:[%s5520_s30 + $0xa9] sm:$0xff] }
 0x223   : > { %1386 = vrot.lane.b32.xlu2 %v5154_v13, %s5455_s14  ;;  %1384 = vrot.lane.b32.xlu1 %v5153_v46, %s5455_s14 }
 0x224   : > { %1382 = vrot.lane.b32.xlu0 %v5152_v24, %s5455_s14 }
 0x225   : > { %v6503_v25 = vpop.permute.xlu2 %1256  ;;  %v6505_v44 = vpop.permute.xlu1 %1172 }
 0x226   : > { %9986 = vst [vmem:[#allocation127_spill] sm:$0xff] %v6505_v44  ;;  %v6507_v29 = vpop.permute.xlu0 %1170  ;;  %v5160_v44 = vld [vmem:[%s5520_s30 + $0xd9] sm:$0xff] }
 0x227   : > { %9987 = vst [vmem:[#allocation128_spill] sm:$0xff] %v6507_v29  ;;  %v5159_v29 = vld [vmem:[%s5520_s30 + $0xc9] sm:$0xff] }
 0x22b   : > { %1392 = vrot.lane.b32.xlu2 %v5157_v63, %s5455_s14  ;;  %1390 = vrot.lane.b32.xlu1 %v5156_v28, %s5455_s14 }
 0x22c   : > { %1388 = vrot.lane.b32.xlu0 %v5155_v23, %s5455_s14 }
 0x22d   : > { %v6515_v46 = vpop.permute.xlu2 %1262  ;;  %v6517_v24 = vpop.permute.xlu1 %1242 }
 0x22e   : > { %9988 = vst [vmem:[#allocation129_spill] sm:$0xff] %v6515_v46  ;;  %v6519_v13 = vpop.permute.xlu0 %1176  ;;  %v5163_v46 = vld [vmem:[%s5520_s30 + $0xf9] sm:$0xff] }
 0x22f   : > { %9989 = vst [vmem:[#allocation130_spill] sm:$0xff] %v6519_v13  ;;  %v5162_v13 = vld [vmem:[%s5520_s30 + $0xf1] sm:$0xff] }
 0x233   : > { %1398 = vrot.lane.b32.xlu2 %v5160_v44, %s5455_s14  ;;  %1396 = vrot.lane.b32.xlu1 %v5159_v29, %s5455_s14 }
 0x234   : > { %1394 = vrot.lane.b32.xlu0 %v5158_v49, %s5455_s14 }
 0x235   : > { %v6527_v63 = vpop.permute.xlu2 %1268  ;;  %v6529_v23 = vpop.permute.xlu1 %1248 }
 0x236   : > { %9990 = vst [vmem:[#allocation131_spill] sm:$0xff] %v6527_v63  ;;  %v6531_v28 = vpop.permute.xlu0 %1246  ;;  %v5166_v63 = vld [vmem:[%s5520_s30 + $0x121] sm:$0xff] }
 0x23b   : > { %1404 = vrot.lane.b32.xlu2 %v5163_v46, %s5455_s14  ;;  %1402 = vrot.lane.b32.xlu1 %v5162_v13, %s5455_s14 }
 0x23c   : > { %1400 = vrot.lane.b32.xlu0 %v5161_v56, %s5455_s14 }
 0x23d   : > { %v6539_v44 = vpop.permute.xlu2 %1274  ;;  %v6541_v49 = vpop.permute.xlu1 %1254 }
 0x23e   : > { %9991 = vst [vmem:[#allocation132_spill] sm:$0xff] %v6539_v44  ;;  %v6543_v29 = vpop.permute.xlu0 %1252  ;;  %v5169_v44 = vld [vmem:[%s5520_s30 + $0x141] sm:$0xff] }
 0x243   : > { %1410 = vrot.lane.b32.xlu2 %v5166_v63, %s5455_s14  ;;  %1408 = vrot.lane.b32.xlu1 %v5165_v54, %s5455_s14 }
 0x244   : > { %1406 = vrot.lane.b32.xlu0 %v5164_v27, %s5455_s14 }
 0x245   : > { %v6551_v46 = vpop.permute.xlu2 %1280  ;;  %v6553_v56 = vpop.permute.xlu1 %1260 }
 0x246   : > { %9992 = vst [vmem:[#allocation133_spill] sm:$0xff] %v6553_v56  ;;  %v6555_v13 = vpop.permute.xlu0 %1258  ;;  %v5170_v56 = vld [vmem:[%s5520_s30 + $0x151] sm:$0xff] }
 0x247   : > { %9993 = vst [vmem:[#allocation134_spill] sm:$0xff] %v6555_v13  ;;  %v5203_v13 = vld [vmem:[%s5520_s30 + $0x15a] sm:$0xff] }
 0x24b   : > { %1416 = vrot.lane.b32.xlu2 %v5169_v44, %s5455_s14  ;;  %1414 = vrot.lane.b32.xlu1 %v5168_v5, %s5455_s14 }
 0x24c   : > { %1412 = vrot.lane.b32.xlu0 %v5167_v22, %s5455_s14 }
 0x24d   : > { %v6563_v54 = vpop.permute.xlu2 %1286  ;;  %v6565_v63 = vpop.permute.xlu1 %1266 }
 0x24e   : > { %9994 = vst [vmem:[#allocation135_spill] sm:$0xff] %v6563_v54  ;;  %v6567_v27 = vpop.permute.xlu0 %1264  ;;  %v5182_v54 = vld [vmem:[%s5520_s30 + $0x62] sm:$0xff] }
 0x24f   : > { %9995 = vst [vmem:[#allocation136_spill] sm:$0xff] %v6565_v63  ;;  %v5173_v63 = vld [vmem:[%s5520_s30 + $0x171] sm:$0xff] }
 0x250   : > { %9996 = vst [vmem:[#allocation137_spill] sm:$0xff] %v6567_v27  ;;  %v5183_v27 = vld [vmem:[%s5520_s30 + $0x6a] sm:$0xff] }
 0x253   : > { %1422 = vrot.lane.b32.xlu2 %v5172_v10, %s5455_s14  ;;  %1420 = vrot.lane.b32.xlu1 %v5171_v35, %s5455_s14 }
 0x254   : > { %1418 = vrot.lane.b32.xlu0 %v5170_v56, %s5455_s14 }
 0x255   : > { %v6575_v5 = vpop.permute.xlu2 %1292  ;;  %v6577_v22 = vpop.permute.xlu1 %1272 }
 0x256   : > { %9997 = vst [vmem:[#allocation138_spill] sm:$0xff] %v6575_v5  ;;  %v6579_v44 = vpop.permute.xlu0 %1270  ;;  %v5176_v5 = vld [vmem:[%s5520_s30 + $0x199] sm:$0xff] }
 0x257   : > { %9998 = vst [vmem:[#allocation139_spill] sm:$0xff] %v6577_v22  ;;  %v5178_v22 = vld [vmem:[%s5520_s30 + $0x32] sm:$0xff] }
 0x258   : > { %9999 = vst [vmem:[#allocation140_spill] sm:$0xff] %v6579_v44  ;;  %v5177_v44 = vld [vmem:[%s5520_s30 + $0x1a1] sm:$0xff] }
 0x25b   : > { %1428 = vrot.lane.b32.xlu2 %v6198_v6, %s5455_s14  ;;  %1426 = vrot.lane.b32.xlu1 %v6201_v60, %s5455_s14 }
 0x25c   : > { %1424 = vrot.lane.b32.xlu0 %v5173_v63, %s5455_s14 }
 0x25d   : > { %v6587_v35 = vpop.permute.xlu2 %1298  ;;  %v6589_v10 = vpop.permute.xlu1 %1278 }
 0x25e   : > { %10000 = vst [vmem:[#allocation141_spill] sm:$0xff] %v6587_v35  ;;  %v6591_v56 = vpop.permute.xlu0 %1276  ;;  %v5179_v35 = vld [vmem:[%s5520_s30 + $0x3a] sm:$0xff] }
 0x25f   : > { %10001 = vst [vmem:[#allocation142_spill] sm:$0xff] %v6589_v10  ;;  %v5181_v10 = vld [vmem:[%s5520_s30 + $0x52] sm:$0xff] }
 0x260   : > { %10002 = vst [vmem:[#allocation143_spill] sm:$0xff] %v6591_v56  ;;  %v5180_v56 = vld [vmem:[%s5520_s30 + $0x4a] sm:$0xff] }
 0x263   : > { %1498 = vrot.lane.b32.xlu2 %v5178_v22, %s5456_s15  ;;  %1432 = vrot.lane.b32.xlu1 %v5177_v44, %s5455_s14 }
 0x264   : > { %1430 = vrot.lane.b32.xlu0 %v5176_v5, %s5455_s14 }
 0x265   : > { %v6599_v60 = vpop.permute.xlu2 %1304  ;;  %v6601_v6 = vpop.permute.xlu1 %1284 }
 0x266   : > { %10003 = vst [vmem:[#allocation144_spill] sm:$0xff] %v6599_v60  ;;  %v6603_v63 = vpop.permute.xlu0 %1282  ;;  %v5184_v60 = vld [vmem:[%s5520_s30 + $0x7a] sm:$0xff] }
 0x267   : > { %10004 = vst [vmem:[#allocation145_spill] sm:$0xff] %v6601_v6  ;;  %v5185_v6 = vld [vmem:[%s5520_s30 + $0x82] sm:$0xff] }
 0x268   : > { %10005 = vst [vmem:[#allocation146_spill] sm:$0xff] %v6603_v63 }
 0x26b   : > { %1504 = vrot.lane.b32.xlu2 %v5181_v10, %s5456_s15  ;;  %1502 = vrot.lane.b32.xlu1 %v5180_v56, %s5456_s15 }
 0x26c   : > { %1500 = vrot.lane.b32.xlu0 %v5179_v35, %s5456_s15 }
 0x26d   : > { %v6611_v22 = vpop.permute.xlu2 %1374  ;;  %v6613_v5 = vpop.permute.xlu1 %1290 }
 0x26e   : > { %10006 = vst [vmem:[#allocation147_spill] sm:$0xff] %v6613_v5  ;;  %v6615_v44 = vpop.permute.xlu0 %1288  ;;  %v5187_v5 = vld [vmem:[%s5520_s30 + $0x9a] sm:$0xff] }
 0x26f   : > { %10007 = vst [vmem:[#allocation148_spill] sm:$0xff] %v6615_v44  ;;  %v5186_v44 = vld [vmem:[%s5520_s30 + $0x92] sm:$0xff] }
 0x273   : > { %1510 = vrot.lane.b32.xlu2 %v5184_v60, %s5456_s15  ;;  %1508 = vrot.lane.b32.xlu1 %v5183_v27, %s5456_s15 }
 0x274   : > { %1506 = vrot.lane.b32.xlu0 %v5182_v54, %s5456_s15 }
 0x275   : > { %v6623_v10 = vpop.permute.xlu2 %1380  ;;  %v6625_v35 = vpop.permute.xlu1 %1296 }
 0x276   : > { %10008 = vst [vmem:[#allocation149_spill] sm:$0xff] %v6625_v35  ;;  %v6627_v56 = vpop.permute.xlu0 %1294  ;;  %v5190_v35 = vld [vmem:[%s5520_s30 + $0xc2] sm:$0xff] }
 0x277   : > { %10009 = vst [vmem:[#allocation150_spill] sm:$0xff] %v6627_v56  ;;  %v5189_v56 = vld [vmem:[%s5520_s30 + $0xb2] sm:$0xff] }
 0x27b   : > { %1516 = vrot.lane.b32.xlu2 %v5187_v5, %s5456_s15  ;;  %1514 = vrot.lane.b32.xlu1 %v5186_v44, %s5456_s15 }
 0x27c   : > { %1512 = vrot.lane.b32.xlu0 %v5185_v6, %s5456_s15 }
 0x27d   : > { %v6635_v27 = vpop.permute.xlu2 %1386  ;;  %v6637_v54 = vpop.permute.xlu1 %1302 }
 0x27e   : > { %10010 = vst [vmem:[#allocation151_spill] sm:$0xff] %v6635_v27  ;;  %v6639_v60 = vpop.permute.xlu0 %1300 }
 0x27f   : > { %10011 = vst [vmem:[#allocation152_spill] sm:$0xff] %v6637_v54  ;;  %v5193_v54 = vld [vmem:[%s5520_s30 + $0xe2] sm:$0xff] }
 0x280   : > { %10012 = vst [vmem:[#allocation153_spill] sm:$0xff] %v6639_v60  ;;  %v5192_v60 = vld [vmem:[%s5520_s30 + $0xda] sm:$0xff] }
 0x283   : > { %1522 = vrot.lane.b32.xlu2 %v5190_v35, %s5456_s15  ;;  %1520 = vrot.lane.b32.xlu1 %v5189_v56, %s5456_s15 }
 0x284   : > { %1518 = vrot.lane.b32.xlu0 %v5188_v1, %s5456_s15 }
 0x285   : > { %v6647_v5 = vpop.permute.xlu2 %1392  ;;  %v6649_v6 = vpop.permute.xlu1 %1372 }
 0x286   : > { %10013 = vst [vmem:[#allocation154_spill] sm:$0xff] %v6647_v5  ;;  %v6651_v44 = vpop.permute.xlu0 %1370  ;;  %v5196_v5 = vld [vmem:[%s5520_s30 + $0x10a] sm:$0xff] }
 0x28b   : > { %1528 = vrot.lane.b32.xlu2 %v5193_v54, %s5456_s15  ;;  %1526 = vrot.lane.b32.xlu1 %v5192_v60, %s5456_s15 }
 0x28c   : > { %1524 = vrot.lane.b32.xlu0 %v5191_v52, %s5456_s15 }
 0x28d   : > { %v6659_v35 = vpop.permute.xlu2 %1398  ;;  %v6661_v56 = vpop.permute.xlu1 %1378 }
 0x28e   : > { %10014 = vst [vmem:[#allocation155_spill] sm:$0xff] %v6659_v35  ;;  %v6663_v1 = vpop.permute.xlu0 %1376  ;;  %v1862_v35 = vld [vmem:[%s9753_s1 + $0x20] sm:$0xf] }
 0x28f   : > { %5210 = vmatpush.msk.msra.mxu0 %vm1964_vm0, %v1862_v35  ;;  %5314 = vmatpush.msk.msra.mxu3 %vm1964_vm0, %v1862_v35  ;;  %v1859_v35 = vld [vmem:[%s9753_s1 + $0x8] sm:$0xff] }
 0x293   : > { %1534 = vrot.lane.b32.xlu2 %v5196_v5, %s5456_s15  ;;  %1532 = vrot.lane.b32.xlu1 %v5195_v62, %s5456_s15  ;;  %v1861_v5 = vld [vmem:[%s9753_s1 + $0x18] sm:$0xff]  ;;  %v5198_v62 = vld [vmem:[%s5520_s30 + $0x122] sm:$0xff] }
 0x294   : > { %1530 = vrot.lane.b32.xlu0 %v5194_v57, %s5456_s15  ;;  %v5199_v57 = vld [vmem:[%s5520_s30 + $0x12a] sm:$0xff]  ;;  %1980 = vmatpush.msra.mxu0 %v1861_v5 }
 0x295   : > { %v6671_v54 = vpop.permute.xlu2 %1404  ;;  %v6673_v52 = vpop.permute.xlu1 %1384  ;;  %5315 = vmatpush.msra.mxu3 %v1861_v5  ;;  %v5202_v5 = vld [vmem:[%s5520_s30 + $0x152] sm:$0xff] }
 0x296   : > { %10015 = vst [vmem:[#allocation156_spill] sm:$0xff] %v6671_v54  ;;  %v6675_v60 = vpop.permute.xlu0 %1382  ;;  %v5197_v54 = vld [vmem:[%s5520_s30 + $0x112] sm:$0xff]  ;;  %1981 = vmatpush.msra.mxu0 %v1860_v31 }
 0x297   : > { %5316 = vmatpush.msra.mxu3 %v1860_v31 }
 0x298   : > { %1982 = vmatpush.msra.mxu0 %v1859_v35 }
 0x299   : > { %5317 = vmatpush.msra.mxu3 %v1859_v35  ;;  %v5205_v35 = vld [vmem:[%s5520_s30 + $0x172] sm:$0xff] }
 0x29b   : > { %1540 = vrot.lane.b32.xlu2 %v5199_v57, %s5456_s15  ;;  %1538 = vrot.lane.b32.xlu1 %v5198_v62, %s5456_s15  ;;  %v5201_v57 = vld [vmem:[%s5520_s30 + $0x142] sm:$0xff]  ;;  %v5200_v62 = vld [vmem:[%s5520_s30 + $0x13a] sm:$0xff] }
 0x29c   : > { %1536 = vrot.lane.b32.xlu0 %v5197_v54, %s5456_s15  ;;  %v1858_v54 = vld [vmem:[%s9753_s1] sm:$0xff] }
 0x29d   : > { %v6697_v20 = vpop.permute.xlu2 %1410  ;;  %v6699_v27 = vpop.permute.xlu1 %1390  ;;  %1983 = vmatpush.msra.mxu0 %v1858_v54  ;;  %5318 = vmatpush.msra.mxu3 %v1858_v54 }
 0x29e   : > { %10016 = vst [vmem:[#allocation157_spill] sm:$0xff] %v6697_v20  ;;  %v6701_v63 = vpop.permute.xlu0 %1388  ;;  %v5204_v20 = vld [vmem:[%s5520_s30 + $0x16a] sm:$0xff] }
 0x29f   : > { %10017 = vst [vmem:[#allocation158_spill] sm:$0xff] %v6699_v27 }
 0x2a0   : > { %10018 = vst [vmem:[#allocation159_spill] sm:$0xff] %v6701_v63 }
 0x2a3   : > { %1546 = vrot.lane.b32.xlu2 %v5202_v5, %s5456_s15  ;;  %1544 = vrot.lane.b32.xlu1 %v5201_v57, %s5456_s15 }
 0x2a4   : > { %1542 = vrot.lane.b32.xlu0 %v5200_v62, %s5456_s15  ;;  %v5208_v62 = vld [vmem:[%s5520_s30 + $0x19a] sm:$0xff] }
 0x2a5   : > { %v6712_v31 = vpop.permute.xlu2 %1416  ;;  %v6714_v27 = vpop.permute.xlu1 %1396 }
 0x2a6   : > { %10019 = vst [vmem:[#allocation160_spill] sm:$0xff] %v6714_v27  ;;  %v6716_v63 = vpop.permute.xlu0 %1394  ;;  %v280_v27 = vld [vmem:[%s5520_s30] sm:$0xff] }
 0x2a7   : > { %10020 = vst [vmem:[#allocation161_spill] sm:$0xff] %v6716_v63 }
 0x2ab   : > { %1552 = vrot.lane.b32.xlu2 %v5205_v35, %s5456_s15  ;;  %1550 = vrot.lane.b32.xlu1 %v5204_v20, %s5456_s15 }
 0x2ac   : > { %1548 = vrot.lane.b32.xlu0 %v5203_v13, %s5456_s15 }
 0x2ad   : > { %v6724_v54 = vpop.permute.xlu2 %1422  ;;  %v6726_v5 = vpop.permute.xlu1 %1402 }
 0x2ae   : > { %10021 = vst [vmem:[#allocation162_spill] sm:$0xff] %v6724_v54  ;;  %v6728_v57 = vpop.permute.xlu0 %1400  ;;  %v10027_v54 = vld [vmem:[#allocation34_spill] sm:$0xff] }
 0x2af   : > { %10022 = vst [vmem:[#allocation163_spill] sm:$0xff] %v6726_v5  ;;  %v10026_v5 = vld [vmem:[#allocation10_spill] sm:$0xff] }
 0x2b0   : > { %10023 = vst [vmem:[#allocation164_spill] sm:$0xff] %v6728_v57  ;;  %v1595_v57 = vsel %vm1594_vm1, %v280_v27, %v10026_v5 }
 0x2b3   : > { %1558 = vrot.lane.b32.xlu2 %v5208_v62, %s5456_s15  ;;  %1556 = vrot.lane.b32.xlu1 %v6341_v3, %s5456_s15  ;;  %v1628_v62 = vsel %vm1627_vm2, %v1595_v57, %v10027_v54 }
 0x2b4   : > { %1554 = vrot.lane.b32.xlu0 %v6324_v37, %s5456_s15  ;;  %v1661_v3 = vsel %vm1660_vm3, %v1628_v62, %v6121_v11  ;;  %v5209_v37 = vld [vmem:[%s5520_s30 + $0x1a2] sm:$0xff] }
 0x2b5   : > { %v6737_v20 = vpop.permute.xlu2 %1428  ;;  %v6739_v13 = vpop.permute.xlu1 %1408  ;;  %v281_v62 = vld [vmem:[%s5520_s30 + $0x8] sm:$0xff] }
 0x2b6   : > { %10024 = vst [vmem:[#allocation165_spill] sm:$0xff] %v6737_v20  ;;  %v6741_v35 = vpop.permute.xlu0 %1406  ;;  %v1694_v20 = vsel %vm1693_vm5, %v1661_v3, %v6261_v41 }
 0x2b7   : > { %10025 = vst [vmem:[#allocation166_spill] sm:$0xff] %v6741_v35  ;;  %v1727_v63 = vsel %vm1726_vm4, %v1694_v20, %v6347_v8 }
 0x2b8   : > { %v1760_v27 = vsel %vm1759_vm6, %v1727_v63, %v6517_v24 }
 0x2b9   : > { %v1793_v11 = vsel %vm1792_vm8, %v1760_v27, %v6651_v44 }
 0x2bc   : > { %1560 = vrot.lane.b32.xlu0 %v5209_v37, %s5456_s15  ;;  %v10032_v37 = vld [vmem:[#allocation13_spill] sm:$0xff] }
 0x2bd   : > { %v1499_v54 = vpop.permute.xlu2 %1498  ;;  %v6759_v5 = vpop.permute.xlu1 %1414  ;;  %v1596_v27 = vsel %vm1594_vm1, %v281_v62, %v10032_v37 }
 0x2be   : > { %v6761_v41 = vpop.permute.xlu0 %1412  ;;  %v1826_v8 = vsel %vm1825_vm7, %v1793_v11, %v1499_v54  ;;  %v10033_v11 = vld [vmem:[#allocation55_spill] sm:$0xff] }
 0x2bf   : > { %5211 = vmatmul.msk.f32.vlgmr.msra.gmra.mxu0 %vm1867_vm9, %v1826_v8  ;;  %v1629_v54 = vsel %vm1627_vm2, %v1596_v27, %v10033_v11  ;;  %v5385_v27 = vld [vmem:[%s5520_s30 + $0x18] sm:$0xff]  ;;  %v10034_v11 = vld [vmem:[#allocation9_spill] sm:$0xff] }
 0x2c0   : > { %v1662_v8 = vsel %vm1660_vm3, %v1629_v54, %v6083_v30  ;;  %v1597_v30 = vsel %vm1594_vm1, %v5385_v27, %v10034_v11  ;;  %v10036_v27 = vld [vmem:[#allocation12_spill] sm:$0xff] }
 0x2c1   : > { %v1695_v35 = vsel %vm1693_vm5, %v1662_v8, %v6259_v47  ;;  %v10035_v47 = vld [vmem:[#allocation54_spill] sm:$0xff] }
 0x2c5   : > { %v6765_v57 = vpop.permute.xlu1 %1420  ;;  %v1505_v54 = vpop.permute.xlu2 %1504 }
 0x2c6   : > { %v6767_v20 = vpop.permute.xlu0 %1418 }
 0x2cd   : > { %v6769_v24 = vpop.permute.xlu1 %1426  ;;  %v1511_v11 = vpop.permute.xlu2 %1510 }
 0x2ce   : > { %10028 = vst [vmem:[#allocation10_spill] sm:$0xff] %v6769_v24  ;;  %v6771_v63 = vpop.permute.xlu0 %1424  ;;  %v1728_v24 = vsel %vm1726_vm4, %v1695_v35, %v6399_v43  ;;  %v1630_v43 = vsel %vm1627_vm2, %v1597_v30, %v10035_v47 }
 0x2cf   : > { %10029 = vst [vmem:[#allocation34_spill] sm:$0xff] %v6771_v63 }
 0x2d5   : > { %v6774_v44 = vpop.permute.xlu1 %1432 }
 0x2d6   : > { %10030 = vst [vmem:[#allocation167_spill] sm:$0xff] %v6774_v44  ;;  %v6776_v3 = vpop.permute.xlu0 %1430  ;;  %v1761_v44 = vsel %vm1759_vm6, %v1728_v24, %v6479_v18  ;;  %v1663_v18 = vsel %vm1660_vm3, %v1630_v43, %v6135_v9 }
 0x2d7   : > { %10031 = vst [vmem:[#allocation168_spill] sm:$0xff] %v6776_v3  ;;  %v1794_v3 = vsel %vm1792_vm8, %v1761_v44, %v6649_v6  ;;  %v1696_v6 = vsel %vm1693_vm5, %v1663_v18, %v6221_v34  ;;  %v10037_v34 = vld [vmem:[#allocation38_spill] sm:$0xff] }
 0x2d8   : > { %v1729_v35 = vsel %vm1726_vm4, %v1696_v6, %v6397_v4 }
 0x2d9   : > { %v1762_v24 = vsel %vm1759_vm6, %v1729_v35, %v6531_v28  ;;  %v10038_v35 = vld [vmem:[#allocation5_spill] sm:$0xff] }
 0x2dd   : > { %v1503_v63 = vpop.permute.xlu1 %1502 }
 0x2de   : > { %v1501_v62 = vpop.permute.xlu0 %1500 }
 0x2df   : > { %v1827_v37 = vsel %vm1825_vm7, %v1794_v3, %v1501_v62  ;;  %v1795_v3 = vsel %vm1792_vm8, %v1762_v24, %v6611_v22 }
 0x2e0   : > { %5212 = vmatmul.msk.f32.gmra.mxu0 %vm1867_vm9, %v1827_v37  ;;  %v1828_v62 = vsel %vm1825_vm7, %v1795_v3, %v1503_v63  ;;  %v5386_v37 = vld [vmem:[%s5520_s30 + $0x20] sm:$0xff] }
 0x2e1   : > { %v1598_v9 = vsel %vm1594_vm1, %v5386_v37, %v10036_v27 }
 0x2e2   : > { %v1631_v4 = vsel %vm1627_vm2, %v1598_v9, %v10037_v34  ;;  %v5388_v34 = vld [vmem:[%s5520_s30 + $0x38] sm:$0xff] }
 0x2e3   : > { %v1664_v28 = vsel %vm1660_vm3, %v1631_v4, %v6133_v14  ;;  %v5387_v14 = vld [vmem:[%s5520_s30 + $0x30] sm:$0xff] }
 0x2e4   : > { %v1697_v22 = vsel %vm1693_vm5, %v1664_v28, %v6273_v45  ;;  %v1599_v24 = vsel %vm1594_vm1, %v5387_v14, %v10038_v35  ;;  %v10039_v45 = vld [vmem:[#allocation60_spill] sm:$0xff] }
 0x2e5   : > { %v1509_v44 = vpop.permute.xlu1 %1508  ;;  %v1730_v30 = vsel %vm1726_vm4, %v1697_v22, %v6359_v16  ;;  %v1632_v16 = vsel %vm1627_vm2, %v1599_v24, %v10039_v45  ;;  %v10042_v14 = vld [vmem:[#allocation16_spill] sm:$0xff] }
 0x2e6   : > { %v1507_v8 = vpop.permute.xlu0 %1506  ;;  %v1763_v63 = vsel %vm1759_vm6, %v1730_v30, %v6529_v23  ;;  %v1665_v23 = vsel %vm1660_vm3, %v1632_v16, %v6095_v0 }
 0x2e7   : > { %v1796_v43 = vsel %vm1792_vm8, %v1763_v63, %v6663_v1  ;;  %v1698_v3 = vsel %vm1693_vm5, %v1665_v23, %v6271_v53  ;;  %v10040_v53 = vld [vmem:[#allocation6_spill] sm:$0xff] }
 0x2e8   : > { %5213 = vmatmul.msk.f32.gmra.mxu0 %vm1867_vm9, %v1828_v62  ;;  %v1829_v6 = vsel %vm1825_vm7, %v1796_v43, %v1505_v54  ;;  %v1731_v1 = vsel %vm1726_vm4, %v1698_v3, %v6411_v26  ;;  %v6841_v62 = vpop.permute.xlu2 %1516  ;;  %v1600_v4 = vsel %vm1594_vm1, %v5388_v34, %v10040_v53  ;;  %v10041_v26 = vld [vmem:[#allocation59_spill] sm:$0xff] }
 0x2e9   : > { %v1764_v54 = vsel %vm1759_vm6, %v1731_v1, %v6491_v21  ;;  %v1633_v28 = vsel %vm1627_vm2, %v1600_v4, %v10041_v26  ;;  %v5390_v1 = vld [vmem:[%s5520_s30 + $0x50] sm:$0xff] }
 0x2ea   : > { %v1797_v37 = vsel %vm1792_vm8, %v1764_v54, %v6661_v56  ;;  %v1666_v21 = vsel %vm1660_vm3, %v1633_v28, %v6147_v12  ;;  %v10044_v54 = vld [vmem:[#allocation15_spill] sm:$0xff] }
 0x2eb   : > { %v1830_v0 = vsel %vm1825_vm7, %v1797_v37, %v1507_v8  ;;  %v1699_v56 = vsel %vm1693_vm5, %v1666_v21, %v6233_v38  ;;  %v5391_v37 = vld [vmem:[%s5520_s30 + $0xe0] sm:$0xff] }
 0x2ec   : > { %v1732_v22 = vsel %vm1726_vm4, %v1699_v56, %v6409_v33  ;;  %v10043_v33 = vld [vmem:[#allocation43_spill] sm:$0xff] }
 0x2ed   : > { %v6824_v47 = vpop.permute.xlu1 %1514  ;;  %v1765_v8 = vsel %vm1759_vm6, %v1732_v22, %v6543_v29 }
 0x2ee   : > { %v1513_v18 = vpop.permute.xlu0 %1512  ;;  %v1798_v30 = vsel %vm1792_vm8, %v1765_v8, %v6623_v10  ;;  %v5392_v8 = vld [vmem:[%s5520_s30 + $0x60] sm:$0xff] }
 0x2ef   : > { %v1831_v12 = vsel %vm1825_vm7, %v1798_v30, %v1509_v44  ;;  %v10047_v30 = vld [vmem:[#allocation7_spill] sm:$0xff] }
 0x2f0   : > { %5214 = vmatmul.msk.f32.gmra.mxu0 %vm1867_vm9, %v1829_v6  ;;  %v6868_v63 = vpop.permute.xlu2 %1522  ;;  %v5389_v6 = vld [vmem:[%s5520_s30 + $0x48] sm:$0xff] }
 0x2f1   : > { %v1601_v38 = vsel %vm1594_vm1, %v5389_v6, %v10042_v14 }
 0x2f2   : > { %v1634_v29 = vsel %vm1627_vm2, %v1601_v38, %v10043_v33 }
 0x2f3   : > { %v1667_v10 = vsel %vm1660_vm3, %v1634_v29, %v6145_v17  ;;  %v1602_v17 = vsel %vm1594_vm1, %v5390_v1, %v10044_v54  ;;  %v5394_v54 = vld [vmem:[%s5520_s30 + $0x68] sm:$0xff] }
 0x2f4   : > { %v1700_v24 = vsel %vm1693_vm5, %v1667_v10, %v6285_v51 }
 0x2f5   : > { %v6847_v27 = vpop.permute.xlu1 %1520  ;;  %v1733_v44 = vsel %vm1726_vm4, %v1700_v24, %v6371_v58  ;;  %v10046_v58 = vld [vmem:[#allocation65_spill] sm:$0xff] }
 0x2f6   : > { %v6849_v9 = vpop.permute.xlu0 %1518  ;;  %v1766_v45 = vsel %vm1759_vm6, %v1733_v44, %v6541_v49  ;;  %v1635_v49 = vsel %vm1627_vm2, %v1602_v17, %v10046_v58  ;;  %v10056_v58 = vld [vmem:[#allocation48_spill] sm:$0xff] }
 0x2f7   : > { %v1799_v16 = vsel %vm1792_vm8, %v1766_v45, %v6675_v60  ;;  %v10051_v45 = vld [vmem:[#allocation146_spill] sm:$0xff] }
 0x2f8   : > { %5215 = vmatmul.msk.f32.gmra.mxu0 %vm1867_vm9, %v1830_v0  ;;  %v1832_v3 = vsel %vm1825_vm7, %v1799_v16, %v1511_v11  ;;  %v10045_v0 = vld [vmem:[#allocation31_spill] sm:$0xff]  ;;  %v6900_v34 = vpop.permute.xlu2 %1528  ;;  %v1668_v11 = vsel %vm1660_vm3, %v1635_v49, %v6107_v7 }
 0x2f9   : > { %v1614_v51 = vsel %vm1594_vm1, %v5391_v37, %v10045_v0  ;;  %v1701_v26 = vsel %vm1693_vm5, %v1668_v11, %v6283_v59  ;;  %v10052_v16 = vld [vmem:[#allocation151_spill] sm:$0xff]  ;;  %v10055_v0 = vld [vmem:[#allocation36_spill] sm:$0xff] }
 0x2fa   : > { %v1647_v60 = vsel %vm1627_vm2, %v1614_v51, %v6075_v61  ;;  %v1734_v21 = vsel %vm1726_vm4, %v1701_v26, %v6423_v48  ;;  %v5395_v37 = vld [vmem:[%s5520_s30 + $0xf8] sm:$0xff]  ;;  %v10059_v26 = vld [vmem:[#allocation106_spill] sm:$0xff] }
 0x2fb   : > { %v1680_v53 = vsel %vm1660_vm3, %v1647_v60, %v6155_v19  ;;  %v1767_v7 = vsel %vm1759_vm6, %v1734_v21, %v6503_v25  ;;  %v10048_v25 = vld [vmem:[#allocation17_spill] sm:$0xff]  ;;  %v1616_v51 = vsel %vm1594_vm1, %v5395_v37, %v10055_v0  ;;  %v10058_v11 = vld [vmem:[#allocation95_spill] sm:$0xff] }
 0x2fc   : > { %v1713_v28 = vsel %vm1693_vm5, %v1680_v53, %v6334_v40  ;;  %v1800_v56 = vsel %vm1792_vm8, %v1767_v7, %v6673_v52  ;;  %v10057_v60 = vld [vmem:[#allocation69_spill] sm:$0xff]  ;;  %v10061_v7 = vld [vmem:[#allocation122_spill] sm:$0xff] }
 0x2fd   : > { %v6876_v35 = vpop.permute.xlu1 %1526  ;;  %v1746_v61 = vsel %vm1726_vm4, %v1713_v28, %v6471_v55  ;;  %v1833_v40 = vsel %vm1825_vm7, %v1800_v56, %v1513_v18  ;;  %v1603_v55 = vsel %vm1594_vm1, %v5392_v8, %v10047_v30  ;;  %v10060_v21 = vld [vmem:[#allocation117_spill] sm:$0xff]  ;;  %v10062_v56 = vld [vmem:[#allocation52_spill] sm:$0xff] }
 0x2fe   : > { %v6870_v43 = vpop.permute.xlu0 %1524  ;;  %v1779_v19 = vsel %vm1759_vm6, %v1746_v61, %v6551_v46  ;;  %v10049_v46 = vld [vmem:[#allocation64_spill] sm:$0xff]  ;;  %v10064_v8 = vld [vmem:[#allocation133_spill] sm:$0xff] }
 0x2ff   : > { %v1812_v59 = vsel %vm1792_vm8, %v1779_v19, %v6739_v13  ;;  %v1636_v52 = vsel %vm1627_vm2, %v1603_v55, %v10049_v46  ;;  %v10065_v55 = vld [vmem:[#allocation145_spill] sm:$0xff] }
 0x300   : > { %5216 = vmatmul.msk.f32.gmra.mxu0 %vm1867_vm9, %v1831_v12  ;;  %v5393_v12 = vld [vmem:[%s5520_s30 + $0xf0] sm:$0xff]  ;;  %v1669_v18 = vsel %vm1660_vm3, %v1636_v52, %v6159_v15  ;;  %v6947_v38 = vpop.permute.xlu2 %1534 }
 0x301   : > { %v1615_v6 = vsel %vm1594_vm1, %v5393_v12, %v10048_v25  ;;  %v1702_v33 = vsel %vm1693_vm5, %v1669_v18, %v6245_v42  ;;  %v10050_v15 = vld [vmem:[#allocation134_spill] sm:$0xff]  ;;  %v10053_v42 = vld [vmem:[#allocation157_spill] sm:$0xff]  ;;  %v10066_v25 = vld [vmem:[#allocation159_spill] sm:$0xff] }
 0x302   : > { %v1648_v13 = vsel %vm1627_vm2, %v1615_v6, %v6073_v36  ;;  %v1735_v10 = vsel %vm1726_vm4, %v1702_v33, %v6421_v39  ;;  %v5396_v18 = vld [vmem:[%s5520_s30 + $0x78] sm:$0xff] }
 0x303   : > { %v1681_v14 = vsel %vm1660_vm3, %v1648_v13, %v6213_v32  ;;  %v1768_v44 = vsel %vm1759_vm6, %v1735_v10, %v10050_v15  ;;  %v10068_v10 = vld [vmem:[#allocation35_spill] sm:$0xff]  ;;  %v10070_v15 = vld [vmem:[#allocation86_spill] sm:$0xff] }
 0x304   : > { %v1714_v29 = vsel %vm1693_vm5, %v1681_v14, %v6293_v2  ;;  %v10067_v14 = vld [vmem:[#allocation18_spill] sm:$0xff] }
 0x305   : > { %v6911_v4 = vpop.permute.xlu1 %1532  ;;  %v1747_v36 = vsel %vm1726_vm4, %v1714_v29, %v6469_v50  ;;  %v10054_v50 = vld [vmem:[#allocation19_spill] sm:$0xff]  ;;  %v1605_v33 = vsel %vm1594_vm1, %v5396_v18, %v10067_v14  ;;  %v5397_v29 = vld [vmem:[%s5520_s30 + $0x108] sm:$0xff]  ;;  %v10089_v18 = vld [vmem:[#allocation82_spill] sm:$0xff] }
 0x306   : > { %v6891_v23 = vpop.permute.xlu0 %1530  ;;  %v1780_v32 = vsel %vm1759_vm6, %v1747_v36, %v10051_v45  ;;  %v1604_v17 = vsel %vm1594_vm1, %v5394_v54, %v10054_v50  ;;  %v1617_v36 = vsel %vm1594_vm1, %v5397_v29, %v10068_v10  ;;  %v10071_v45 = vld [vmem:[#allocation91_spill] sm:$0xff]  ;;  %v10075_v54 = vld [vmem:[#allocation68_spill] sm:$0xff]  ;;  %v10090_v29 = vld [vmem:[#allocation137_spill] sm:$0xff] }
 0x307   : > { %v1813_v1 = vsel %vm1792_vm8, %v1780_v32, %v10053_v42  ;;  %v1637_v49 = vsel %vm1627_vm2, %v1604_v17, %v10056_v58  ;;  %v10073_v42 = vld [vmem:[#allocation116_spill] sm:$0xff] }
 0x308   : > { %5217 = vmatmul.msk.f32.gmra.mxu0 %vm1867_vm9, %v1832_v3  ;;  %v1801_v3 = vsel %vm1792_vm8, %v1768_v44, %v10052_v16  ;;  %v1670_v53 = vsel %vm1660_vm3, %v1637_v49, %v10058_v11  ;;  %v1650_v44 = vsel %vm1627_vm2, %v1617_v36, %v10070_v15  ;;  %v10072_v16 = vld [vmem:[#allocation96_spill] sm:$0xff]  ;;  %v10078_v49 = vld [vmem:[#allocation135_spill] sm:$0xff] }
 0x309   : > { %v1834_v2 = vsel %vm1825_vm7, %v1801_v3, %v6824_v47  ;;  %v1649_v47 = vsel %vm1627_vm2, %v1616_v51, %v10057_v60  ;;  %v1703_v61 = vsel %vm1693_vm5, %v1670_v53, %v10060_v21  ;;  %v1683_v3 = vsel %vm1660_vm3, %v1650_v44, %v10072_v16  ;;  %v10076_v17 = vld [vmem:[#allocation124_spill] sm:$0xff]  ;;  %v10077_v51 = vld [vmem:[#allocation129_spill] sm:$0xff]  ;;  %v5400_v16 = vld [vmem:[%s5520_s30 + $0x90] sm:$0xff] }
 0x30a   : > { %v1682_v28 = vsel %vm1660_vm3, %v1649_v47, %v10059_v26  ;;  %v10079_v47 = vld [vmem:[#allocation158_spill] sm:$0xff]  ;;  %v5398_v21 = vld [vmem:[%s5520_s30 + $0x80] sm:$0xff] }
 0x30b   : > { %v1715_v19 = vsel %vm1693_vm5, %v1682_v28, %v10061_v7  ;;  %v10091_v36 = vld [vmem:[#allocation148_spill] sm:$0xff] }
 0x30d   : > { %v1539_v24 = vpop.permute.xlu1 %1538 }
 0x30e   : > { %v1537_v22 = vpop.permute.xlu0 %1536  ;;  %v1846_v39 = vsel %vm1825_vm7, %v1813_v1, %v1539_v24  ;;  %v9785_v24 = vmov 0.0  }
 0x30f   : > { %v1845_v48 = vsel %vm1825_vm7, %v1812_v59, %v1537_v22  ;;  %v1736_v59 = vsel %vm1726_vm4, %v1703_v61, %v10062_v56  ;;  %v10063_v22 = vld [vmem:[#allocation56_spill] sm:$0xff]  ;;  %2081 = vst.msk [vmem:[#allocation2] sm:$0xff] %vm1594_vm1, %v9785_v24 }
 0x310   : > { %5218 = vmatmul.msk.f32.gmra.mxu0 %vm1867_vm9, %v1833_v40  ;;  %5230 = vmatmul.msk.f32.vlgmr.msra.gmra.mxu3 %vm1867_vm9, %v1845_v48  ;;  %v1748_v40 = vsel %vm1726_vm4, %v1715_v19, %v10063_v22  ;;  %v1541_v48 = vpop.permute.xlu2 %1540  ;;  %v1769_v30 = vsel %vm1759_vm6, %v1736_v59, %v10064_v8  ;;  %2082 = vst.msk [vmem:[#allocation2 + $0x8] sm:$0xff] %vm1594_vm1, %v9785_v24  ;;  %v10080_v61 = vld [vmem:[#allocation8_spill] sm:$0xff]  ;;  %v5399_v19 = vld [vmem:[%s5520_s30 + $0x110] sm:$0xff]  ;;  %v10083_v22 = vld [vmem:[#allocation85_spill] sm:$0xff] }
 0x311   : > { %v1781_v12 = vsel %vm1759_vm6, %v1748_v40, %v10065_v55  ;;  %v1802_v6 = vsel %vm1792_vm8, %v1769_v30, %v10066_v25  ;;  %2086 = vst.msk [vmem:[#allocation2 + $0x198] sm:$0xff] %vm1594_vm1, %v9785_v24  ;;  %v1606_v7 = vsel %vm1594_vm1, %v5398_v21, %v10080_v61  ;;  %v10081_v56 = vld [vmem:[#allocation20_spill] sm:$0xff] }
 0x312   : > { %v1814_v46 = vsel %vm1792_vm8, %v1781_v12, %v6761_v41  ;;  %v1835_v52 = vsel %vm1825_vm7, %v1802_v6, %v6841_v62  ;;  %v10069_v41 = vld [vmem:[#allocation71_spill] sm:$0xff]  ;;  %2087 = vst.msk [vmem:[#allocation2 + $0x1a0] sm:$0xff] %vm1594_vm1, %v9785_v24  ;;  %v1618_v59 = vsel %vm1594_vm1, %v5399_v19, %v10081_v56  ;;  %v10085_v30 = vld [vmem:[#allocation108_spill] sm:$0xff]  ;;  %v10086_v12 = vld [vmem:[#allocation113_spill] sm:$0xff] }
 0x313   : > { %v1847_v13 = vsel %vm1825_vm7, %v1814_v46, %v1541_v48  ;;  %v1638_v62 = vsel %vm1627_vm2, %v1605_v33, %v10069_v41  ;;  %2091 = vst.msk [vmem:[#allocation2 + $0x18] sm:$0x1] %vm2089_vm10, %v9785_v24  ;;  %v1651_v40 = vsel %vm1627_vm2, %v1618_v59, %v10083_v22  ;;  %v10084_v48 = vld [vmem:[#allocation98_spill] sm:$0xff]  ;;  %v10103_v61 = vld [vmem:[#allocation136_spill] sm:$0xff]  ;;  %v10104_v19 = vld [vmem:[#allocation147_spill] sm:$0xff] }
 0x314   : > { %v1671_v32 = vsel %vm1660_vm3, %v1638_v62, %v10071_v45  ;;  %2090 = vst.msk [vmem:[#allocation2] sm:$0x1] %vm2089_vm10, %v9785_v24  ;;  %v1684_v55 = vsel %vm1660_vm3, %v1651_v40, %v10085_v30  ;;  %v10087_v6 = vld [vmem:[#allocation118_spill] sm:$0xff]  ;;  %v10105_v59 = vld [vmem:[#allocation161_spill] sm:$0xff] }
 0x315   : > { %v1704_v1 = vsel %vm1693_vm5, %v1671_v32, %v10073_v42  ;;  %2092 = vst.msk [vmem:[#allocation2 + $0x30] sm:$0x1] %vm2089_vm10, %v9785_v24  ;;  %v1717_v46 = vsel %vm1693_vm5, %v1684_v55, %v10087_v6  ;;  %v1545_v33 = vpop.permute.xlu1 %1544  ;;  %v10092_v62 = vld [vmem:[#allocation154_spill] sm:$0xff]  ;;  %v5403_v55 = vld [vmem:[%s5520_s30 + $0x128] sm:$0xff]  ;;  %v10109_v6 = vld [vmem:[#allocation88_spill] sm:$0xff] }
 0x316   : > { %v1737_v50 = vsel %vm1726_vm4, %v1704_v1, %v10075_v54  ;;  %v1543_v0 = vpop.permute.xlu0 %1542  ;;  %2093 = vst.msk [vmem:[#allocation2 + $0x48] sm:$0x1] %vm2089_vm10, %v9785_v24  ;;  %v1750_v14 = vsel %vm1726_vm4, %v1717_v46, %v10089_v18  ;;  %v5401_v1 = vld [vmem:[%s5520_s30 + $0x120] sm:$0xff]  ;;  %v10096_v54 = vld [vmem:[#allocation75_spill] sm:$0xff] }
 0x317   : > { %v1770_v58 = vsel %vm1759_vm6, %v1737_v50, %v10077_v51  ;;  %2094 = vst.msk [vmem:[#allocation2 + $0x60] sm:$0x1] %vm2089_vm10, %v9785_v24  ;;  %v1783_v41 = vsel %vm1759_vm6, %v1750_v14, %v10091_v36  ;;  %v10111_v14 = vld [vmem:[#allocation99_spill] sm:$0xff]  ;;  %v10113_v36 = vld [vmem:[#allocation42_spill] sm:$0xff] }
 0x318   : > { %5219 = vmatmul.msk.f32.gmra.mxu0 %vm1867_vm9, %v1834_v2  ;;  %5231 = vmatmul.msk.f32.gmra.mxu3 %vm1867_vm9, %v1846_v39  ;;  %v10074_v2 = vld [vmem:[#allocation121_spill] sm:$0xff]  ;;  %v1803_v11 = vsel %vm1792_vm8, %v1770_v58, %v10079_v47  ;;  %2095 = vst.msk [vmem:[#allocation2 + $0x78] sm:$0x1] %vm2089_vm10, %v9785_v24  ;;  %v1816_v44 = vsel %vm1792_vm8, %v1783_v41, %v6712_v31  ;;  %v10099_v58 = vld [vmem:[#allocation120_spill] sm:$0xff]  ;;  %v1547_v21 = vpop.permute.xlu2 %1546 }
 0x319   : > { %v1716_v39 = vsel %vm1693_vm5, %v1683_v3, %v10074_v2  ;;  %v1836_v26 = vsel %vm1825_vm7, %v1803_v11, %v6849_v9  ;;  %2096 = vst.msk [vmem:[#allocation2 + $0x90] sm:$0x1] %vm2089_vm10, %v9785_v24  ;;  %v1849_v32 = vsel %vm1825_vm7, %v1816_v44, %v1545_v33  ;;  %v10093_v3 = vld [vmem:[#allocation22_spill] sm:$0xff]  ;;  %v10094_v2 = vld [vmem:[#allocation40_spill] sm:$0xff]  ;;  %v10095_v31 = vld [vmem:[#allocation53_spill] sm:$0xff] }
 0x31a   : > { %v1749_v37 = vsel %vm1726_vm4, %v1716_v39, %v10076_v17  ;;  %2097 = vst.msk [vmem:[#allocation2 + $0xa8] sm:$0x1] %vm2089_vm10, %v9785_v24  ;;  %v1607_v42 = vsel %vm1594_vm1, %v5400_v16, %v10093_v3  ;;  %v1619_v39 = vsel %vm1594_vm1, %v5401_v1, %v10094_v2  ;;  %v10097_v17 = vld [vmem:[#allocation97_spill] sm:$0xff]  ;;  %v10115_v44 = vld [vmem:[#allocation126_spill] sm:$0xff]  ;;  %v10116_v3 = vld [vmem:[#allocation131_spill] sm:$0xff] }
 0x31b   : > { %v1782_v60 = vsel %vm1759_vm6, %v1749_v37, %v10078_v49  ;;  %2098 = vst.msk [vmem:[#allocation2 + $0xc0] sm:$0x1] %vm2089_vm10, %v9785_v24  ;;  %v1652_v50 = vsel %vm1627_vm2, %v1619_v39, %v10096_v54  ;;  %v10101_v11 = vld [vmem:[#allocation57_spill] sm:$0xff]  ;;  %v10117_v1 = vld [vmem:[#allocation138_spill] sm:$0xff] }
 0x31c   : > { %v1815_v53 = vsel %vm1792_vm8, %v1782_v60, %v6759_v5  ;;  %v10082_v5 = vld [vmem:[#allocation70_spill] sm:$0xff]  ;;  %2099 = vst.msk [vmem:[#allocation2 + $0xd8] sm:$0x1] %vm2089_vm10, %v9785_v24  ;;  %v10100_v60 = vld [vmem:[#allocation37_spill] sm:$0xff] }
 0x31d   : > { %v1848_v28 = vsel %vm1825_vm7, %v1815_v53, %v1543_v0  ;;  %v1639_v9 = vsel %vm1627_vm2, %v1606_v7, %v10082_v5  ;;  %2100 = vst.msk [vmem:[#allocation2 + $0xf0] sm:$0x1] %vm2089_vm10, %v9785_v24  ;;  %v10098_v0 = vld [vmem:[#allocation107_spill] sm:$0xff] }
 0x31e   : > { %v1672_v8 = vsel %vm1660_vm3, %v1639_v9, %v10084_v48  ;;  %2101 = vst.msk [vmem:[#allocation2 + $0x108] sm:$0x1] %vm2089_vm10, %v9785_v24  ;;  %v1685_v51 = vsel %vm1660_vm3, %v1652_v50, %v10098_v0  ;;  %v5402_v48 = vld [vmem:[%s5520_s30 + $0x98] sm:$0xff]  ;;  %v5404_v0 = vld [vmem:[%s5520_s30 + $0xa8] sm:$0xff] }
 0x31f   : > { %v1705_v25 = vsel %vm1693_vm5, %v1672_v8, %v10086_v12  ;;  %2102 = vst.msk [vmem:[#allocation2 + $0x120] sm:$0x1] %vm2089_vm10, %v9785_v24  ;;  %v1718_v47 = vsel %vm1693_vm5, %v1685_v51, %v10100_v60  ;;  %v10106_v8 = vld [vmem:[#allocation21_spill] sm:$0xff]  ;;  %v10107_v12 = vld [vmem:[#allocation39_spill] sm:$0xff]  ;;  %v10120_v60 = vld [vmem:[#allocation24_spill] sm:$0xff] }
 0x320   : > { %5220 = vmatmul.msk.f32.gmra.mxu0 %vm1867_vm9, %v1835_v52  ;;  %5232 = vmatmul.msk.f32.gmra.mxu3 %vm1867_vm9, %v1847_v13  ;;  %v10088_v52 = vld [vmem:[#allocation66_spill] sm:$0xff]  ;;  %2103 = vst.msk [vmem:[#allocation2 + $0x138] sm:$0x1] %vm2089_vm10, %v9785_v24  ;;  %v1608_v30 = vsel %vm1594_vm1, %v5402_v48, %v10106_v8  ;;  %v10119_v51 = vld [vmem:[#allocation11_spill] sm:$0xff]  ;;  %v1551_v48 = vpop.permute.xlu1 %1550  ;;  %v10129_v8 = vld [vmem:[#allocation140_spill] sm:$0xff] }
 0x321   : > { %v1738_v13 = vsel %vm1726_vm4, %v1705_v25, %v10088_v52  ;;  %2104 = vst.msk [vmem:[#allocation2 + $0x150] sm:$0x1] %vm2089_vm10, %v9785_v24  ;;  %v1620_v25 = vsel %vm1594_vm1, %v5403_v55, %v10107_v12  ;;  %v7173_v52 = vld [vmem:[%s9754_s2] ss:$0 sm:$0xff]  ;;  %v10130_v55 = vld [vmem:[#allocation150_spill] sm:$0xff] }
 0x322   : > { %v1771_v10 = vsel %vm1759_vm6, %v1738_v13, %v10090_v29  ;;  %2105 = vst.msk [vmem:[#allocation2 + $0x168] sm:$0x1] %vm2089_vm10, %v9785_v24  ;;  %v1653_v46 = vsel %vm1627_vm2, %v1620_v25, %v10109_v6  ;;  %v10110_v13 = vld [vmem:[#allocation93_spill] sm:$0xff]  ;;  %v10112_v29 = vld [vmem:[#allocation119_spill] sm:$0xff] }
 0x323   : > { %v1804_v15 = vsel %vm1792_vm8, %v1771_v10, %v10092_v62  ;;  %2106 = vst.msk [vmem:[#allocation2 + $0x180] sm:$0x1] %vm2089_vm10, %v9785_v24  ;;  %v1686_v33 = vsel %vm1660_vm3, %v1653_v46, %v10111_v14  ;;  %v10114_v62 = vld [vmem:[#allocation74_spill] sm:$0xff]  ;;  %v10131_v25 = vld [vmem:[#allocation155_spill] sm:$0xff] }
 0x324   : > { %v1837_v45 = vsel %vm1825_vm7, %v1804_v15, %v6847_v27  ;;  %v1640_v27 = vsel %vm1627_vm2, %v1607_v42, %v10095_v31  ;;  %2107 = vst.msk [vmem:[#allocation2 + $0x198] sm:$0x1] %vm2089_vm10, %v9785_v24  ;;  %v1719_v41 = vsel %vm1693_vm5, %v1686_v33, %v10113_v36  ;;  %v10118_v31 = vld [vmem:[#allocation160_spill] sm:$0xff]  ;;  %v5406_v33 = vld [vmem:[%s5520_s30 + $0xb0] sm:$0xff] }
 0x325   : > { %v1673_v37 = vsel %vm1660_vm3, %v1640_v27, %v10097_v17  ;;  %2109 = vst.msk [vmem:[#allocation2 + $0x29] sm:$0x1] %vm2089_vm10, %v9785_v24  ;;  %v5407_v36 = vld [vmem:[%s5520_s30 + $0x140] sm:$0xff] }
 0x326   : > { %v1706_v49 = vsel %vm1693_vm5, %v1673_v37, %v10099_v58  ;;  %2110 = vst.msk [vmem:[#allocation2 + $0x41] sm:$0x1] %vm2089_vm10, %v9785_v24  ;;  %v2191_v37 = vld [vmem:[#allocation2 + $0x1] sm:$0xff]  ;;  %v1609_v58 = vsel %vm1594_vm1, %v5404_v0, %v10119_v51  ;;  %v10143_v0 = vld [vmem:[#allocation139_spill] sm:$0xff] }
 0x327   : > { %v1739_v53 = vsel %vm1726_vm4, %v1706_v49, %v10101_v11  ;;  %2111 = vst.msk [vmem:[#allocation2 + $0x59] sm:$0x1] %vm2089_vm10, %v9785_v24  ;;  %v5405_v49 = vld [vmem:[%s5520_s30 + $0x138] sm:$0xff]  ;;  %2480 = vrot.lane.b32.xlu1 %v2191_v37, %s5449_s8  ;;  %v1553_v37 = vpop.permute.xlu2 %1552 }
 0x328   : > { %5221 = vmatmul.msk.f32.gmra.mxu0 %vm1867_vm9, %v1836_v26  ;;  %5233 = vmatmul.msk.f32.gmra.mxu3 %vm1867_vm9, %v1848_v28  ;;  %v10102_v26 = vld [vmem:[#allocation61_spill] sm:$0xff]  ;;  %v1772_v7 = vsel %vm1759_vm6, %v1739_v53, %v10103_v61  ;;  %2112 = vst.msk [vmem:[#allocation2 + $0x71] sm:$0x1] %vm2089_vm10, %v9785_v24  ;;  %v10122_v11 = vld [vmem:[#allocation87_spill] sm:$0xff] }
 0x329   : > { %v1751_v28 = vsel %vm1726_vm4, %v1718_v47, %v10102_v26  ;;  %v1805_v5 = vsel %vm1792_vm8, %v1772_v7, %v10105_v59  ;;  %2113 = vst.msk [vmem:[#allocation2 + $0x89] sm:$0x1] %vm2089_vm10, %v9785_v24  ;;  %v10121_v47 = vld [vmem:[#allocation76_spill] sm:$0xff]  ;;  %v10123_v26 = vld [vmem:[#allocation101_spill] sm:$0xff]  ;;  %v10125_v7 = vld [vmem:[#allocation114_spill] sm:$0xff] }
 0x32a   : > { %v1784_v56 = vsel %vm1759_vm6, %v1751_v28, %v10104_v19  ;;  %v1838_v22 = vsel %vm1825_vm7, %v1805_v5, %v6868_v63  ;;  %2114 = vst.msk [vmem:[#allocation2 + $0xa1] sm:$0x1] %vm2089_vm10, %v9785_v24  ;;  %v10127_v5 = vld [vmem:[#allocation72_spill] sm:$0xff] }
 0x32b   : > { %v1817_v9 = vsel %vm1792_vm8, %v1784_v56, %v6767_v20  ;;  %v10108_v20 = vld [vmem:[#allocation77_spill] sm:$0xff]  ;;  %2115 = vst.msk [vmem:[#allocation2 + $0xb9] sm:$0x1] %vm2089_vm10, %v9785_v24  ;;  %v10126_v56 = vld [vmem:[#allocation28_spill] sm:$0xff] }
 0x32c   : > { %v1850_v40 = vsel %vm1825_vm7, %v1817_v9, %v1547_v21  ;;  %v1641_v63 = vsel %vm1627_vm2, %v1608_v30, %v10108_v20  ;;  %2116 = vst.msk [vmem:[#allocation2 + $0xd1] sm:$0x1] %vm2089_vm10, %v9785_v24  ;;  %v10124_v21 = vld [vmem:[#allocation110_spill] sm:$0xff] }
 0x32d   : > { %v1674_v18 = vsel %vm1660_vm3, %v1641_v63, %v10110_v13  ;;  %2117 = vst.msk [vmem:[#allocation2 + $0xe9] sm:$0x1] %vm2089_vm10, %v9785_v24  ;;  %v10132_v63 = vld [vmem:[#allocation162_spill] sm:$0xff] }
 0x32e   : > { %v1707_v10 = vsel %vm1693_vm5, %v1674_v18, %v10112_v29  ;;  %2084 = vst.msk [vmem:[#allocation2 + $0x10] sm:$0x3] %vm2083_vm11, %v9785_v24  ;;  %v10133_v29 = vld [vmem:[#allocation26_spill] sm:$0xff] }
 0x32f   : > { %v1740_v15 = vsel %vm1726_vm4, %v1707_v10, %v10114_v62  ;;  %2088 = vst.msk [vmem:[#allocation2 + $0x1a8] sm:$0x3] %vm2083_vm11, %v9785_v24  ;;  %v1610_v10 = vsel %vm1594_vm1, %v5406_v33, %v10133_v29  ;;  %v10158_v33 = vld [vmem:[#allocation141_spill] sm:$0xff]  ;;  %vm4199_vm11 = vcmask 1047559  }
 0x330   : > { %5222 = vmatmul.msk.f32.gmra.mxu0 %vm1867_vm9, %v1837_v45  ;;  %5234 = vmatmul.msk.f32.gmra.mxu3 %vm1867_vm9, %v1849_v32  ;;  %v1752_v45 = vsel %vm1726_vm4, %v1719_v41, %v10115_v44  ;;  %v1549_v32 = vpop.permute.xlu0 %1548  ;;  %v1773_v42 = vsel %vm1759_vm6, %v1740_v15, %v10116_v3  ;;  %2108 = vst.msk [vmem:[#allocation2 + $0x11] sm:$0x1] %vm2089_vm10, %v9785_v24  ;;  %v10134_v41 = vld [vmem:[#allocation45_spill] sm:$0xff]  ;;  %v10136_v44 = vld [vmem:[#allocation79_spill] sm:$0xff] }
 0x331   : > { %v1785_v2 = vsel %vm1759_vm6, %v1752_v45, %v10117_v1  ;;  %v1806_v27 = vsel %vm1792_vm8, %v1773_v42, %v10118_v31  ;;  %2118 = vst.msk [vmem:[#allocation2 + $0x101] sm:$0x1] %vm2089_vm10, %v9785_v24  ;;  %v1622_v62 = vsel %vm1594_vm1, %v5407_v36, %v10134_v41  ;;  %v10138_v3 = vld [vmem:[#allocation109_spill] sm:$0xff]  ;;  %v10139_v1 = vld [vmem:[#allocation23_spill] sm:$0xff]  ;;  %v10160_v41 = vld [vmem:[#allocation10_spill] sm:$0xff] }
 0x332   : > { %v1818_v54 = vsel %vm1792_vm8, %v1785_v2, %v6765_v57  ;;  %v1839_v50 = vsel %vm1825_vm7, %v1806_v27, %v6870_v43  ;;  %v1621_v57 = vsel %vm1594_vm1, %v5405_v49, %v10120_v60  ;;  %v1642_v43 = vsel %vm1627_vm2, %v1609_v58, %v10121_v47  ;;  %2119 = vst.msk [vmem:[#allocation2 + $0x119] sm:$0x1] %vm2089_vm10, %v9785_v24  ;;  %v10141_v27 = vld [vmem:[#allocation51_spill] sm:$0xff]  ;;  %v10144_v58 = vld [vmem:[#allocation149_spill] sm:$0xff]  ;;  %v10145_v60 = vld [vmem:[#allocation164_spill] sm:$0xff] }
 0x333   : > { %v1851_v17 = vsel %vm1825_vm7, %v1818_v54, %v1549_v32  ;;  %v1654_v53 = vsel %vm1627_vm2, %v1621_v57, %v10122_v11  ;;  %v1675_v28 = vsel %vm1660_vm3, %v1642_v43, %v10123_v26  ;;  %2120 = vst.msk [vmem:[#allocation2 + $0x131] sm:$0x1] %vm2089_vm10, %v9785_v24  ;;  %v1655_v45 = vsel %vm1627_vm2, %v1622_v62, %v10136_v44  ;;  %v10137_v32 = vld [vmem:[#allocation100_spill] sm:$0xff]  ;;  %v10146_v47 = vld [vmem:[#allocation34_spill] sm:$0xff]  ;;  %v5410_v44 = vld [vmem:[%s5520_s30 + $0xc8] sm:$0xff] }
 0x334   : > { %v1687_v61 = vsel %vm1660_vm3, %v1654_v53, %v10124_v21  ;;  %v1708_v19 = vsel %vm1693_vm5, %v1675_v28, %v10125_v7  ;;  %2121 = vst.msk [vmem:[#allocation2 + $0x149] sm:$0x1] %vm2089_vm10, %v9785_v24  ;;  %v1688_v42 = vsel %vm1660_vm3, %v1655_v45, %v10138_v3  ;;  %v5408_v26 = vld [vmem:[%s5520_s30 + $0xc0] sm:$0xff]  ;;  %v10147_v28 = vld [vmem:[#allocation25_spill] sm:$0xff]  ;;  %v10161_v45 = vld [vmem:[#allocation14_spill] sm:$0xff] }
 0x335   : > { %v1720_v59 = vsel %vm1693_vm5, %v1687_v61, %v10126_v56  ;;  %v1741_v9 = vsel %vm1726_vm4, %v1708_v19, %v10127_v5  ;;  %v2192_v14 = vld [vmem:[#allocation2 + $0x9] sm:$0xff]  ;;  %2122 = vst.msk [vmem:[#allocation2 + $0x161] sm:$0x1] %vm2089_vm10, %v9785_v24  ;;  %v1611_v21 = vsel %vm1594_vm1, %v5408_v26, %v10147_v28  ;;  %v10148_v7 = vld [vmem:[#allocation44_spill] sm:$0xff] }
 0x336   : > { %v1774_v30 = vsel %vm1759_vm6, %v1741_v9, %v10129_v8  ;;  %2123 = vst.msk [vmem:[#allocation2 + $0x179] sm:$0x1] %vm2089_vm10, %v9785_v24  ;;  %2482 = vrot.lane.b32.xlu2 %v2192_v14, %s5449_s8  ;;  %v5409_v61 = vld [vmem:[%s5520_s30 + $0x150] sm:$0xff]  ;;  %v10149_v56 = vld [vmem:[#allocation81_spill] sm:$0xff] }
 0x337   : > { %v1807_v20 = vsel %vm1792_vm8, %v1774_v30, %v10131_v25  ;;  %2124 = vst.msk [vmem:[#allocation2 + $0x191] sm:$0x1] %vm2089_vm10, %v9785_v24  ;;  %v1623_v19 = vsel %vm1594_vm1, %v5409_v61, %v10148_v7  ;;  %v10150_v5 = vld [vmem:[#allocation90_spill] sm:$0xff]  ;;  %v10153_v8 = vld [vmem:[#allocation29_spill] sm:$0xff]  ;;  %v10155_v25 = vld [vmem:[#allocation83_spill] sm:$0xff] }
 0x338   : > { %5223 = vmatmul.msk.f32.gmra.mxu0 %vm1867_vm9, %v1838_v22  ;;  %5235 = vmatmul.msk.f32.gmra.mxu3 %vm1867_vm9, %v1850_v40  ;;  %v10128_v22 = vld [vmem:[#allocation125_spill] sm:$0xff]  ;;  %v1840_v13 = vsel %vm1825_vm7, %v1807_v20, %v6876_v35  ;;  %v10135_v35 = vld [vmem:[#allocation58_spill] sm:$0xff]  ;;  %2125 = vst.msk [vmem:[#allocation2 + $0x1a9] sm:$0x1] %vm2089_vm10, %v9785_v24  ;;  %vm4197_vm10 = vcmask 1046534  }
 0x339   : > { %v1753_v40 = vsel %vm1726_vm4, %v1720_v59, %v10128_v22  ;;  %v1643_v15 = vsel %vm1627_vm2, %v1610_v10, %v10135_v35  ;;  %v1644_v59 = vsel %vm1627_vm2, %v1611_v21, %v10149_v56  ;;  %v10151_v9 = vld [vmem:[#allocation94_spill] sm:$0xff]  ;;  %v10159_v10 = vld [vmem:[#allocation163_spill] sm:$0xff]  ;;  %v10173_v21 = vld [vmem:[#allocation156_spill] sm:$0xff] }
 0x33a   : > { %v1786_v12 = vsel %vm1759_vm6, %v1753_v40, %v10130_v55  ;;  %v1677_v22 = vsel %vm1660_vm3, %v1644_v59, %v10151_v9  ;;  %v10152_v40 = vld [vmem:[#allocation102_spill] sm:$0xff]  ;;  %v10154_v55 = vld [vmem:[#allocation47_spill] sm:$0xff]  ;;  %v10174_v7 = vld [vmem:[#allocation165_spill] sm:$0xff] }
 0x33b   : > { %v1819_v6 = vsel %vm1792_vm8, %v1786_v12, %v10132_v63  ;;  %v1710_v30 = vsel %vm1693_vm5, %v1677_v22, %v10153_v8  ;;  %v10156_v63 = vld [vmem:[#allocation128_spill] sm:$0xff]  ;;  %v10162_v3 = vld [vmem:[#allocation30_spill] sm:$0xff] }
 0x33c   : > { %v1985_v16 = vpop.f32.mrf.mxu0  ;;  %v1852_v18 = vsel %vm1825_vm7, %v1819_v6, %v1551_v48  ;;  %v1743_v20 = vsel %vm1726_vm4, %v1710_v30, %v10155_v25  ;;  %v10175_v9 = vld [vmem:[#allocation32_spill] sm:$0xff]  ;;  %v10177_v30 = vld [vmem:[#allocation63_spill] sm:$0xff] }
 0x33d   : > { %v1986_v39 = vadd.f32 %v7173_v52, %v1985_v16  ;;  %v1676_v16 = vsel %vm1660_vm3, %v1643_v15, %v10137_v32  ;;  %v1612_v32 = vsel %vm1594_vm1, %v5410_v44, %v10161_v45  ;;  %v10179_v25 = vld [vmem:[#allocation103_spill] sm:$0xff]  ;;  %v10186_v44 = vld [vmem:[#allocation152_spill] sm:$0xff] }
 0x33e   : > { %v1709_v2 = vsel %vm1693_vm5, %v1676_v16, %v10139_v1  ;;  %v5411_v16 = vld [vmem:[%s5520_s30 + $0x158] sm:$0xff]  ;;  %v10163_v1 = vld [vmem:[#allocation80_spill] sm:$0xff] }
 0x33f   : > { %2127 = vst.msk [vmem:[#allocation2 + $0x19] sm:$0xff] %vm1594_vm1, %v1986_v39  ;;  %v10140_v39 = vld [vmem:[#allocation41_spill] sm:$0xff]  ;;  %v1742_v54 = vsel %vm1726_vm4, %v1709_v2, %v10141_v27  ;;  %v1645_v2 = vsel %vm1627_vm2, %v1612_v32, %v10163_v1 }
 0x340   : > { %5224 = vmatmul.msk.f32.gmra.mxu0 %vm1867_vm9, %v1839_v50  ;;  %5236 = vmatmul.msk.f32.gmra.mxu3 %vm1867_vm9, %v1851_v17  ;;  %v1721_v31 = vsel %vm1693_vm5, %v1688_v42, %v10140_v39  ;;  %v10142_v50 = vld [vmem:[#allocation67_spill] sm:$0xff]  ;;  %v1775_v51 = vsel %vm1759_vm6, %v1742_v54, %v10143_v0  ;;  %v1624_v42 = vsel %vm1594_vm1, %v5411_v16, %v10162_v3  ;;  %v10164_v39 = vld [vmem:[#allocation89_spill] sm:$0xff]  ;;  %v10166_v54 = vld [vmem:[#allocation112_spill] sm:$0xff] }
 0x341   : > { %v1754_v17 = vsel %vm1726_vm4, %v1721_v31, %v10142_v50  ;;  %v1808_v57 = vsel %vm1792_vm8, %v1775_v51, %v10145_v60  ;;  %v10165_v31 = vld [vmem:[#allocation104_spill] sm:$0xff]  ;;  %v10168_v0 = vld [vmem:[#allocation33_spill] sm:$0xff]  ;;  %v10170_v60 = vld [vmem:[#allocation127_spill] sm:$0xff] }
 0x342   : > { %v1787_v49 = vsel %vm1759_vm6, %v1754_v17, %v10144_v58  ;;  %v1841_v11 = vsel %vm1825_vm7, %v1808_v57, %v6900_v34  ;;  %v1656_v34 = vsel %vm1627_vm2, %v1623_v19, %v10150_v5  ;;  %v1678_v27 = vsel %vm1660_vm3, %v1645_v2, %v10165_v31  ;;  %v10167_v17 = vld [vmem:[#allocation115_spill] sm:$0xff]  ;;  %v10169_v58 = vld [vmem:[#allocation73_spill] sm:$0xff]  ;;  %v10187_v16 = vld [vmem:[#allocation166_spill] sm:$0xff] }
 0x343   : > { %v1820_v43 = vsel %vm1792_vm8, %v1787_v49, %v10146_v47  ;;  %v1689_v48 = vsel %vm1660_vm3, %v1656_v34, %v10152_v40  ;;  %v1557_v47 = vpop.permute.xlu1 %1556  ;;  %v5412_v34 = vld [vmem:[%s5520_s30 + $0xd8] sm:$0xff]  ;;  %v5413_v40 = vld [vmem:[%s5520_s30 + $0x168] sm:$0xff] }
 0x344   : > { %v1853_v53 = vsel %vm1825_vm7, %v1820_v43, %v1553_v37  ;;  %v1722_v12 = vsel %vm1693_vm5, %v1689_v48, %v10154_v55  ;;  %v1711_v37 = vsel %vm1693_vm5, %v1678_v27, %v10167_v17  ;;  %v10171_v43 = vld [vmem:[#allocation143_spill] sm:$0xff]  ;;  %v1613_v22 = vsel %vm1594_vm1, %v5412_v34, %v10175_v9  ;;  %v10176_v48 = vld [vmem:[#allocation50_spill] sm:$0xff]  ;;  %v10190_v17 = vld [vmem:[#allocation92_spill] sm:$0xff] }
 0x345   : > { %v1755_v6 = vsel %vm1726_vm4, %v1722_v12, %v10156_v63  ;;  %v1744_v49 = vsel %vm1726_vm4, %v1711_v37, %v10169_v58  ;;  %v1625_v8 = vsel %vm1594_vm1, %v5413_v40, %v10176_v48  ;;  %v1646_v55 = vsel %vm1627_vm2, %v1613_v22, %v10177_v30  ;;  %v10180_v63 = vld [vmem:[#allocation111_spill] sm:$0xff]  ;;  %v5414_v27 = vld [vmem:[%s5520_s30 + $0x170] sm:$0xff] }
 0x346   : > { %v7255_v46 = vld [vmem:[#allocation2 + $0x19] sm:$0xff]  ;;  %v1788_v29 = vsel %vm1759_vm6, %v1755_v6, %v10158_v33 }
 0x347   : > { %2484 = vrot.lane.b32.xlu0 %v7255_v46, %s5449_s8  ;;  %v1821_v62 = vsel %vm1792_vm8, %v1788_v29, %v10160_v41  ;;  %v10183_v29 = vld [vmem:[#allocation62_spill] sm:$0xff] }
 0x348   : > { %5225 = vmatmul.msk.f32.gmra.mxu0 %vm1867_vm9, %v1840_v13  ;;  %5237 = vmatmul.msk.f32.gmra.mxu3 %vm1867_vm9, %v1852_v18  ;;  %v1555_v13 = vpop.permute.xlu0 %1554  ;;  %v10157_v18 = vld [vmem:[#allocation132_spill] sm:$0xff] }
 0x349   : > { %v1776_v14 = vsel %vm1759_vm6, %v1743_v20, %v10157_v18  ;;  %v1854_v15 = vsel %vm1825_vm7, %v1821_v62, %v1555_v13  ;;  %v1679_v20 = vsel %vm1660_vm3, %v1646_v55, %v10179_v25  ;;  %v10181_v13 = vld [vmem:[#allocation27_spill] sm:$0xff]  ;;  %v1559_v62 = vpop.permute.xlu2 %1558 }
 0x34a   : > { %v1809_v36 = vsel %vm1792_vm8, %v1776_v14, %v10159_v10  ;;  %v1712_v18 = vsel %vm1693_vm5, %v1679_v20, %v10181_v13  ;;  %v10182_v14 = vld [vmem:[#allocation123_spill] sm:$0xff] }
 0x34b   : > { %v1842_v35 = vsel %vm1825_vm7, %v1809_v36, %v6891_v23  ;;  %v1657_v23 = vsel %vm1627_vm2, %v1624_v42, %v10164_v39  ;;  %v1745_v10 = vsel %vm1726_vm4, %v1712_v18, %v10183_v29  ;;  %v10184_v36 = vld [vmem:[#allocation78_spill] sm:$0xff]  ;;  %v10188_v42 = vld [vmem:[#allocation168_spill] sm:$0xff] }
 0x34c   : > { %v1690_v50 = vsel %vm1660_vm3, %v1657_v23, %v10166_v54  ;;  %v10189_v54 = vld [vmem:[#allocation49_spill] sm:$0xff] }
 0x34d   : > { %v1723_v51 = vsel %vm1693_vm5, %v1690_v50, %v10168_v0  ;;  %v1626_v50 = vsel %vm1594_vm1, %v5414_v27, %v10189_v54 }
 0x34e   : > { %v1756_v57 = vsel %vm1726_vm4, %v1723_v51, %v10170_v60  ;;  %v1659_v37 = vsel %vm1627_vm2, %v1626_v50, %v10190_v17  ;;  %v10192_v51 = vld [vmem:[#allocation46_spill] sm:$0xff] }
 0x350   : > { %5226 = vmatmul.msk.f32.gmra.mxu0 %vm1867_vm9, %v1841_v11  ;;  %5238 = vmatmul.msk.f32.gmra.mxu3 %vm1867_vm9, %v1853_v53  ;;  %v1777_v11 = vsel %vm1759_vm6, %v1744_v49, %v10171_v43  ;;  %v10172_v53 = vld [vmem:[#allocation153_spill] sm:$0xff]  ;;  %v10193_v49 = vld [vmem:[#allocation130_spill] sm:$0xff] }
 0x351   : > { %v1789_v26 = vsel %vm1759_vm6, %v1756_v57, %v10172_v53  ;;  %v1810_v61 = vsel %vm1792_vm8, %v1777_v11, %v10173_v21  ;;  %v1561_v57 = vpop.permute.xlu0 %1560  ;;  %v10195_v53 = vld [vmem:[#allocation167_spill] sm:$0xff] }
 0x352   : > { %v1822_v19 = vsel %vm1792_vm8, %v1789_v26, %v10174_v7  ;;  %v1843_v59 = vsel %vm1825_vm7, %v1810_v61, %v6911_v4  ;;  %v10178_v4 = vld [vmem:[#allocation84_spill] sm:$0xff] }
 0x353   : > { %v1855_v5 = vsel %vm1825_vm7, %v1822_v19, %v1557_v47  ;;  %v1658_v12 = vsel %vm1627_vm2, %v1625_v8, %v10178_v4  ;;  %v10194_v47 = vld [vmem:[#allocation144_spill] sm:$0xff] }
 0x354   : > { %v1691_v6 = vsel %vm1660_vm3, %v1658_v12, %v10180_v63 }
 0x355   : > { %v1724_v33 = vsel %vm1693_vm5, %v1691_v6, %v10182_v14 }
 0x356   : > { %v1757_v41 = vsel %vm1726_vm4, %v1724_v33, %v10184_v36 }
 0x357   : > { %v1790_v45 = vsel %vm1759_vm6, %v1757_v41, %v10186_v44 }
 0x358   : > { %5227 = vmatmul.msk.f32.gmra.mxu0 %vm1867_vm9, %v1842_v35  ;;  %5239 = vmatmul.msk.f32.gmra.mxu3 %vm1867_vm9, %v1854_v15  ;;  %v10185_v35 = vld [vmem:[#allocation142_spill] sm:$0xff]  ;;  %v1823_v1 = vsel %vm1792_vm8, %v1790_v45, %v10188_v42 }
 0x359   : > { %v1778_v15 = vsel %vm1759_vm6, %v1745_v10, %v10185_v35  ;;  %v1856_v23 = vsel %vm1825_vm7, %v1823_v1, %v1559_v62 }
 0x35a   : > { %v1811_v3 = vsel %vm1792_vm8, %v1778_v15, %v10187_v16 }
 0x35b   : > { %v1844_v39 = vsel %vm1825_vm7, %v1811_v3, %v6947_v38  ;;  %v10191_v38 = vld [vmem:[#allocation105_spill] sm:$0xff] }
 0x35c   : > { %v1692_v0 = vsel %vm1660_vm3, %v1659_v37, %v10191_v38 }
 0x35d   : > { %v1988_v28 = vpop.f32.mrf.mxu0  ;;  %v1725_v58 = vsel %vm1693_vm5, %v1692_v0, %v10192_v51 }
 0x35e   : > { %v1989_v56 = vadd.f32 %v7173_v52, %v1988_v28  ;;  %v1758_v60 = vsel %vm1726_vm4, %v1725_v58, %v10193_v49 }
 0x35f   : > { %v1791_v43 = vsel %vm1759_vm6, %v1758_v60, %v10194_v47 }
 0x360   : > { %2128 = vst.msk [vmem:[#allocation2 + $0x21] sm:$0xff] %vm1594_vm1, %v1989_v56  ;;  %5228 = vmatmul.msk.f32.gmra.mxu0 %vm1867_vm9, %v1843_v59  ;;  %5240 = vmatmul.msk.f32.gmra.mxu3 %vm1867_vm9, %v1855_v5  ;;  %v1824_v26 = vsel %vm1792_vm8, %v1791_v43, %v10195_v53 }
 0x361   : > { %v1857_v21 = vsel %vm1825_vm7, %v1824_v26, %v1561_v57 }
 0x365   : > { %v1991_v32 = vpop.f32.mrf.mxu0 }
 0x366   : > { %v1992_v2 = vadd.f32 %v7173_v52, %v1991_v32 }
 0x367   : > { %v7416_v31 = vld [vmem:[#allocation2 + $0x21] sm:$0xff] }
 0x368   : > { %2129 = vst.msk [vmem:[#allocation2 + $0x31] sm:$0xff] %vm1594_vm1, %v1992_v2  ;;  %5229 = vmatmul.msk.f32.gmra.mxu0 %vm1867_vm9, %v1844_v39  ;;  %5241 = vmatmul.msk.f32.gmra.mxu3 %vm1867_vm9, %v1856_v23 }
 0x369   : > { %2486 = vrot.lane.b32.xlu1 %v7416_v31, %s5449_s8 }
 0x36d   : > { %v1994_v11 = vpop.f32.mrf.mxu0 }
 0x36e   : > { %v1995_v28 = vadd.f32 %v7173_v52, %v1994_v11 }
 0x36f   : > { %v7440_v61 = vld [vmem:[#allocation2 + $0x31] sm:$0xff] }
 0x370   : > { %2130 = vst.msk [vmem:[#allocation2 + $0x39] sm:$0xff] %vm1594_vm1, %v1995_v28  ;;  %5242 = vmatmul.msk.f32.gmra.mxu3 %vm1867_vm9, %v1857_v21  ;;  %2488 = vrot.lane.b32.xlu2 %v7440_v61, %s5449_s8 }
 0x375   : > { %v1997_v7 = vpop.f32.mrf.mxu0 }
 0x376   : > { %v1998_v19 = vadd.f32 %v7173_v52, %v1997_v7 }
 0x377   : > { %v7447_v56 = vld [vmem:[#allocation2 + $0x39] sm:$0xff] }
 0x378   : > { %2131 = vst.msk [vmem:[#allocation2 + $0x49] sm:$0xff] %vm1594_vm1, %v1998_v19  ;;  %2490 = vrot.lane.b32.xlu0 %v7447_v56, %s5449_s8 }
 0x37d   : > { %v2000_v59 = vpop.f32.mrf.mxu0 }
 0x37e   : > { %v2001_v5 = vadd.f32 %v7173_v52, %v2000_v59 }
 0x37f   : > { %v7453_v34 = vld [vmem:[#allocation2 + $0x49] sm:$0xff] }
 0x380   : > { %2132 = vst.msk [vmem:[#allocation2 + $0x51] sm:$0xff] %vm1594_vm1, %v2001_v5  ;;  %2492 = vrot.lane.b32.xlu1 %v7453_v34, %s5449_s8 }
 0x385   : > { %v2003_v9 = vpop.f32.mrf.mxu0 }
 0x386   : > { %v2004_v22 = vadd.f32 %v7173_v52, %v2003_v9 }
 0x387   : > { %v7459_v40 = vld [vmem:[#allocation2 + $0x51] sm:$0xff] }
 0x388   : > { %2133 = vst.msk [vmem:[#allocation2 + $0x61] sm:$0xff] %vm1594_vm1, %v2004_v22  ;;  %2494 = vrot.lane.b32.xlu2 %v7459_v40, %s5449_s8 }
 0x38d   : > { %v2006_v48 = vpop.f32.mrf.mxu0 }
 0x38e   : > { %v2007_v8 = vadd.f32 %v7173_v52, %v2006_v48 }
 0x38f   : > { %v7465_v30 = vld [vmem:[#allocation2 + $0x61] sm:$0xff] }
 0x390   : > { %2134 = vst.msk [vmem:[#allocation2 + $0x69] sm:$0xff] %vm1594_vm1, %v2007_v8  ;;  %2496 = vrot.lane.b32.xlu0 %v7465_v30, %s5449_s8 }
 0x393   : > { %v2042_v55 = vpop.f32.mrf.mxu3 }
 0x394   : > { %v2043_v4 = vadd.f32 %v7173_v52, %v2042_v55 }
 0x395   : > { %v2009_v12 = vpop.f32.mrf.mxu0 }
 0x396   : > { %2146 = vst.msk [vmem:[#allocation2 + $0xf9] sm:$0xff] %vm1594_vm1, %v2043_v4  ;;  %v2010_v25 = vadd.f32 %v7173_v52, %v2009_v12 }
 0x397   : > { %v7473_v20 = vld [vmem:[#allocation2 + $0x69] sm:$0xff] }
 0x398   : > { %2135 = vst.msk [vmem:[#allocation2 + $0x79] sm:$0xff] %vm1594_vm1, %v2010_v25  ;;  %2498 = vrot.lane.b32.xlu1 %v7473_v20, %s5449_s8 }
 0x39b   : > { %v2045_v63 = vpop.f32.mrf.mxu3 }
 0x39c   : > { %v2046_v6 = vadd.f32 %v7173_v52, %v2045_v63 }
 0x39d   : > { %v2012_v13 = vpop.f32.mrf.mxu0  ;;  %v7555_v55 = vld [vmem:[#allocation2 + $0xf9] sm:$0xff] }
 0x39e   : > { %2147 = vst.msk [vmem:[#allocation2 + $0x109] sm:$0xff] %vm1594_vm1, %v2046_v6  ;;  %v2013_v18 = vadd.f32 %v7173_v52, %v2012_v13 }
 0x39f   : > { %v7481_v14 = vld [vmem:[#allocation2 + $0x79] sm:$0xff] }
 0x3a0   : > { %2136 = vst.msk [vmem:[#allocation2 + $0x81] sm:$0xff] %vm1594_vm1, %v2013_v18  ;;  %2500 = vrot.lane.b32.xlu2 %v7481_v14, %s5449_s8 }
 0x3a3   : > { %v2048_v33 = vpop.f32.mrf.mxu3 }
 0x3a4   : > { %v2049_v29 = vadd.f32 %v7173_v52, %v2048_v33 }
 0x3a5   : > { %v2015_v10 = vpop.f32.mrf.mxu0  ;;  %v7564_v25 = vld [vmem:[#allocation2 + $0x109] sm:$0xff] }
 0x3a6   : > { %2148 = vst.msk [vmem:[#allocation2 + $0x111] sm:$0xff] %vm1594_vm1, %v2049_v29  ;;  %v2016_v36 = vadd.f32 %v7173_v52, %v2015_v10 }
 0x3a7   : > { %v7489_v41 = vld [vmem:[#allocation2 + $0x81] sm:$0xff] }
 0x3a8   : > { %2137 = vst.msk [vmem:[#allocation2 + $0x91] sm:$0xff] %vm1594_vm1, %v2016_v36  ;;  %2502 = vrot.lane.b32.xlu0 %v7489_v41, %s5449_s8 }
 0x3ab   : > { %v2051_v62 = vpop.f32.mrf.mxu3 }
 0x3ac   : > { %v2052_v35 = vadd.f32 %v7173_v52, %v2051_v62 }
 0x3ad   : > { %v2018_v15 = vpop.f32.mrf.mxu0  ;;  %v7586_v10 = vld [vmem:[#allocation2 + $0x111] sm:$0xff] }
 0x3ae   : > { %2149 = vst.msk [vmem:[#allocation2 + $0x121] sm:$0xff] %vm1594_vm1, %v2052_v35  ;;  %v2019_v44 = vadd.f32 %v7173_v52, %v2018_v15  ;;  %v2224_v35 = vld [vmem:[#allocation2 + $0xa] sm:$0xff] }
 0x3af   : > { %v7497_v45 = vld [vmem:[#allocation2 + $0x91] sm:$0xff] }
 0x3b0   : > { %2138 = vst.msk [vmem:[#allocation2 + $0x99] sm:$0xff] %vm1594_vm1, %v2019_v44  ;;  %2504 = vrot.lane.b32.xlu1 %v7497_v45, %s5449_s8 }
 0x3b3   : > { %v2054_v32 = vpop.f32.mrf.mxu3 }
 0x3b4   : > { %v2055_v16 = vadd.f32 %v7173_v52, %v2054_v32  ;;  %v2223_v32 = vld [vmem:[#allocation2 + $0x2] sm:$0xff] }
 0x3b5   : > { %v2021_v3 = vpop.f32.mrf.mxu0  ;;  %v7566_v63 = vld [vmem:[#allocation2 + $0x121] sm:$0xff] }
 0x3b6   : > { %2150 = vst.msk [vmem:[#allocation2 + $0x129] sm:$0xff] %vm1594_vm1, %v2055_v16  ;;  %v2022_v42 = vadd.f32 %v7173_v52, %v2021_v3  ;;  %v7611_v16 = vld [vmem:[#allocation2 + $0x32] sm:$0xff]  ;;  %v7613_v3 = vld [vmem:[#allocation2 + $0x1a] sm:$0xff] }
 0x3b7   : > { %v7505_v1 = vld [vmem:[#allocation2 + $0x99] sm:$0xff] }
 0x3b8   : > { %2139 = vst.msk [vmem:[#allocation2 + $0xa9] sm:$0xff] %vm1594_vm1, %v2022_v42  ;;  %2506 = vrot.lane.b32.xlu2 %v7505_v1, %s5449_s8  ;;  %v7615_v42 = vpop.permute.xlu2 %2482 }
 0x3b9   : > { %10196 = vst [vmem:[#allocation13_spill] sm:$0xff] %v7615_v42  ;;  %v7776_v42 = vld [vmem:[#allocation2 + $0x18] sm:$0xff] }
 0x3ba   : > { %10225 = vst [vmem:[#allocation122_spill] sm:$0xff] %v7776_v42 }
 0x3bb   : > { %v2057_v2 = vpop.f32.mrf.mxu3 }
 0x3bc   : > { %v2058_v39 = vadd.f32 %v7173_v52, %v2057_v2  ;;  %v7622_v2 = vld [vmem:[#allocation2 + $0x52] sm:$0xff] }
 0x3bd   : > { %v2024_v23 = vpop.f32.mrf.mxu0  ;;  %v7578_v33 = vld [vmem:[#allocation2 + $0x129] sm:$0xff] }
 0x3be   : > { %2151 = vst.msk [vmem:[#allocation2 + $0x139] sm:$0xff] %vm1594_vm1, %v2058_v39  ;;  %v2025_v27 = vadd.f32 %v7173_v52, %v2024_v23  ;;  %v7624_v39 = vld [vmem:[#allocation2 + $0x3a] sm:$0xff]  ;;  %v7630_v23 = vld [vmem:[#allocation2 + $0x22] sm:$0xff] }
 0x3bf   : > { %v7513_v54 = vld [vmem:[#allocation2 + $0xa9] sm:$0xff] }
 0x3c0   : > { %2140 = vst.msk [vmem:[#allocation2 + $0xb1] sm:$0xff] %vm1594_vm1, %v2025_v27  ;;  %2508 = vrot.lane.b32.xlu0 %v7513_v54, %s5449_s8 }
 0x3c3   : > { %v2060_v50 = vpop.f32.mrf.mxu3 }
 0x3c4   : > { %v2061_v17 = vadd.f32 %v7173_v52, %v2060_v50  ;;  %v7636_v50 = vld [vmem:[#allocation2 + $0x7a] sm:$0xff] }
 0x3c5   : > { %v2027_v37 = vpop.f32.mrf.mxu0  ;;  %v7598_v62 = vld [vmem:[#allocation2 + $0x139] sm:$0xff] }
 0x3c6   : > { %2152 = vst.msk [vmem:[#allocation2 + $0x141] sm:$0xff] %vm1594_vm1, %v2061_v17  ;;  %v2028_v38 = vadd.f32 %v7173_v52, %v2027_v37  ;;  %v7638_v17 = vld [vmem:[#allocation2 + $0x62] sm:$0xff]  ;;  %v7640_v37 = vpop.permute.xlu1 %2480 }
 0x3c7   : > { %v7521_v0 = vld [vmem:[#allocation2 + $0xb1] sm:$0xff]  ;;  %10198 = vst [vmem:[#allocation9_spill] sm:$0xff] %v7640_v37 }
 0x3c8   : > { %2141 = vst.msk [vmem:[#allocation2 + $0xc1] sm:$0xff] %vm1594_vm1, %v2028_v38  ;;  %2510 = vrot.lane.b32.xlu1 %v7521_v0, %s5449_s8  ;;  %v7646_v38 = vld [vmem:[#allocation2 + $0x4a] sm:$0xff] }
 0x3c9   : > { %v2163_v37 = vld [vmem:[#allocation2 + $0x30] sm:$0xff] }
 0x3ca   : > { %v7634_v27 = vpop.permute.xlu2 %2488 }
 0x3cb   : > { %v2063_v51 = vpop.f32.mrf.mxu3  ;;  %10197 = vst [vmem:[#allocation55_spill] sm:$0xff] %v7634_v27 }
 0x3cc   : > { %v2064_v58 = vadd.f32 %v7173_v52, %v2063_v51 }
 0x3cd   : > { %v2030_v49 = vpop.f32.mrf.mxu0  ;;  %v7580_v29 = vld [vmem:[#allocation2 + $0x141] sm:$0xff] }
 0x3ce   : > { %2153 = vst.msk [vmem:[#allocation2 + $0x151] sm:$0xff] %vm1594_vm1, %v2064_v58  ;;  %v2031_v60 = vadd.f32 %v7173_v52, %v2030_v49  ;;  %v7652_v58 = vld [vmem:[#allocation2 + $0x9a] sm:$0xff]  ;;  %v7654_v49 = vld [vmem:[#allocation2 + $0x82] sm:$0xff] }
 0x3cf   : > { %v7529_v57 = vld [vmem:[#allocation2 + $0xc1] sm:$0xff] }
 0x3d0   : > { %2142 = vst.msk [vmem:[#allocation2 + $0xc9] sm:$0xff] %vm1594_vm1, %v2031_v60  ;;  %2512 = vrot.lane.b32.xlu2 %v7529_v57, %s5449_s8  ;;  %v7660_v60 = vld [vmem:[#allocation2 + $0x6a] sm:$0xff] }
 0x3d3   : > { %v2066_v47 = vpop.f32.mrf.mxu3 }
 0x3d4   : > { %v2067_v43 = vadd.f32 %v7173_v52, %v2066_v47 }
 0x3d5   : > { %v2033_v11 = vpop.f32.mrf.mxu0  ;;  %v7590_v36 = vld [vmem:[#allocation2 + $0x151] sm:$0xff] }
 0x3d6   : > { %2154 = vst.msk [vmem:[#allocation2 + $0x159] sm:$0xff] %vm1594_vm1, %v2067_v43  ;;  %v2034_v53 = vadd.f32 %v7173_v52, %v2033_v11 }
 0x3d7   : > { %v7537_v26 = vld [vmem:[#allocation2 + $0xc9] sm:$0xff] }
 0x3d8   : > { %2143 = vst.msk [vmem:[#allocation2 + $0xd9] sm:$0xff] %vm1594_vm1, %v2034_v53  ;;  %2514 = vrot.lane.b32.xlu0 %v7537_v26, %s5449_s8  ;;  %v7668_v11 = vld [vmem:[#allocation2 + $0xc2] sm:$0xff]  ;;  %v7670_v53 = vld [vmem:[#allocation2 + $0xaa] sm:$0xff] }
 0x3db   : > { %v2069_v28 = vpop.f32.mrf.mxu3  ;;  %v7664_v47 = vpop.permute.xlu1 %2486 }
 0x3dc   : > { %v2070_v21 = vadd.f32 %v7173_v52, %v2069_v28  ;;  %10200 = vst [vmem:[#allocation12_spill] sm:$0xff] %v7664_v47  ;;  %v7676_v28 = vld [vmem:[#allocation2 + $0x92] sm:$0xff] }
 0x3dd   : > { %v2036_v7 = vpop.f32.mrf.mxu0  ;;  %v7607_v44 = vld [vmem:[#allocation2 + $0x159] sm:$0xff] }
 0x3de   : > { %2155 = vst.msk [vmem:[#allocation2 + $0x169] sm:$0xff] %vm1594_vm1, %v2070_v21  ;;  %v2037_v19 = vadd.f32 %v7173_v52, %v2036_v7  ;;  %v7760_v47 = vld [vmem:[#allocation2 + $0x15a] sm:$0xff] }
 0x3df   : > { %v7545_v59 = vld [vmem:[#allocation2 + $0xd9] sm:$0xff]  ;;  %10221 = vst [vmem:[#allocation69_spill] sm:$0xff] %v7760_v47 }
 0x3e0   : > { %2144 = vst.msk [vmem:[#allocation2 + $0xe1] sm:$0xff] %vm1594_vm1, %v2037_v19  ;;  %2516 = vrot.lane.b32.xlu1 %v7545_v59, %s5449_s8  ;;  %v7684_v19 = vpop.permute.xlu0 %2484 }
 0x3e1   : > { %10204 = vst [vmem:[#allocation6_spill] sm:$0xff] %v7684_v19  ;;  %v7766_v19 = vld [vmem:[#allocation2 + $0x142] sm:$0xff] }
 0x3e2   : > { %v7650_v51 = vpop.permute.xlu2 %2494 }
 0x3e3   : > { %v2072_v5 = vpop.f32.mrf.mxu3  ;;  %10199 = vst [vmem:[#allocation54_spill] sm:$0xff] %v7650_v51 }
 0x3e4   : > { %v2073_v9 = vadd.f32 %v7173_v52, %v2072_v5 }
 0x3e5   : > { %v2039_v22 = vpop.f32.mrf.mxu0 }
 0x3e6   : > { %2156 = vst.msk [vmem:[#allocation2 + $0x171] sm:$0xff] %vm1594_vm1, %v2073_v9  ;;  %v2040_v48 = vadd.f32 %v7173_v52, %v2039_v22  ;;  %v7688_v9 = vld [vmem:[#allocation2 + $0xca] sm:$0xff]  ;;  %v7694_v22 = vld [vmem:[#allocation2 + $0xb2] sm:$0xff] }
 0x3e7   : > { %v7553_v8 = vld [vmem:[#allocation2 + $0xe1] sm:$0xff] }
 0x3e8   : > { %2145 = vst.msk [vmem:[#allocation2 + $0xf1] sm:$0xff] %vm1594_vm1, %v2040_v48  ;;  %2518 = vrot.lane.b32.xlu2 %v7553_v8, %s5449_s8  ;;  %2522 = vrot.lane.b32.xlu1 %v7555_v55, %s5449_s8  ;;  %v7686_v5 = vld [vmem:[#allocation2 + $0xe2] sm:$0xff] }
 0x3eb   : > { %v2075_v4 = vpop.f32.mrf.mxu3 }
 0x3ec   : > { %v2076_v12 = vadd.f32 %v7173_v52, %v2075_v4 }
 0x3ed   : > { %v7602_v15 = vld [vmem:[#allocation2 + $0x171] sm:$0xff] }
 0x3ee   : > { %2157 = vst.msk [vmem:[#allocation2 + $0x181] sm:$0xff] %vm1594_vm1, %v2076_v12  ;;  %v7702_v12 = vpop.permute.xlu0 %2490  ;;  %v7758_v27 = vld [vmem:[#allocation2 + $0x172] sm:$0xff] }
 0x3ef   : > { %v7568_v6 = vld [vmem:[#allocation2 + $0xf1] sm:$0xff]  ;;  %10207 = vst [vmem:[#allocation43_spill] sm:$0xff] %v7702_v12  ;;  %v7748_v12 = vld [vmem:[#allocation2 + $0x122] sm:$0xff] }
 0x3f0   : > { %2524 = vrot.lane.b32.xlu2 %v7564_v25, %s5449_s8  ;;  %2528 = vrot.lane.b32.xlu1 %v7566_v63, %s5449_s8  ;;  %10220 = vst [vmem:[#allocation48_spill] sm:$0xff] %v7758_v27 }
 0x3f1   : > { %2520 = vrot.lane.b32.xlu0 %v7568_v6, %s5449_s8 }
 0x3f2   : > { %v7680_v21 = vpop.permute.xlu1 %2492 }
 0x3f3   : > { %v2078_v13 = vpop.f32.mrf.mxu3  ;;  %10202 = vst [vmem:[#allocation5_spill] sm:$0xff] %v7680_v21  ;;  %v7740_v21 = vld [vmem:[#allocation2 + $0x152] sm:$0xff] }
 0x3f4   : > { %v2079_v18 = vadd.f32 %v7173_v52, %v2078_v13  ;;  %v7592_v52 = vld [vmem:[#allocation2 + $0x169] sm:$0xff]  ;;  %10215 = vst [vmem:[#allocation146_spill] sm:$0xff] %v7740_v21 }
 0x3f5   : > { %v7704_v13 = vld [vmem:[#allocation2 + $0x10a] sm:$0xff] }
 0x3f6   : > { %2158 = vst.msk [vmem:[#allocation2 + $0x189] sm:$0xff] %vm1594_vm1, %v2079_v18  ;;  %v7706_v18 = vld [vmem:[#allocation2 + $0xf2] sm:$0xff] }
 0x3f8   : > { %2530 = vrot.lane.b32.xlu2 %v7578_v33, %s5449_s8  ;;  %2534 = vrot.lane.b32.xlu1 %v7580_v29, %s5449_s8 }
 0x3f9   : > { %2526 = vrot.lane.b32.xlu0 %v7586_v10, %s5449_s8 }
 0x3fa   : > { %v7666_v43 = vpop.permute.xlu2 %2500 }
 0x3fb   : > { %10201 = vst [vmem:[#allocation38_spill] sm:$0xff] %v7666_v43  ;;  %v7724_v43 = vld [vmem:[#allocation2 + $0x112] sm:$0xff] }
 0x3fc   : > { %10211 = vst [vmem:[#allocation7_spill] sm:$0xff] %v7724_v43 }
 0x400   : > { %2536 = vrot.lane.b32.xlu2 %v7590_v36, %s5449_s8  ;;  %2540 = vrot.lane.b32.xlu1 %v7592_v52, %s5449_s8 }
 0x401   : > { %2532 = vrot.lane.b32.xlu0 %v7598_v62, %s5449_s8 }
 0x408   : > { %2542 = vrot.lane.b32.xlu2 %v7602_v15, %s5449_s8  ;;  %2610 = vrot.lane.b32.xlu1 %v2224_v35, %s5450_s9  ;;  %v7712_v35 = vld [vmem:[#allocation2 + $0xda] sm:$0xff] }
 0x409   : > { %2538 = vrot.lane.b32.xlu0 %v7607_v44, %s5449_s8 }
 0x40a   : > { %v7698_v48 = vpop.permute.xlu1 %2498 }
 0x40b   : > { %10205 = vst [vmem:[#allocation59_spill] sm:$0xff] %v7698_v48  ;;  %v7730_v48 = vld [vmem:[#allocation2 + $0xfa] sm:$0xff] }
 0x410   : > { %2616 = vrot.lane.b32.xlu1 %v7611_v16, %s5450_s9  ;;  %2612 = vrot.lane.b32.xlu2 %v7613_v3, %s5450_s9 }
 0x411   : > { %2608 = vrot.lane.b32.xlu0 %v2223_v32, %s5450_s9 }
 0x412   : > { %v7682_v7 = vpop.permute.xlu2 %2506 }
 0x413   : > { %10203 = vst [vmem:[#allocation60_spill] sm:$0xff] %v7682_v7  ;;  %v7722_v7 = vld [vmem:[#allocation2 + $0x12a] sm:$0xff] }
 0x418   : > { %2622 = vrot.lane.b32.xlu1 %v7622_v2, %s5450_s9  ;;  %2618 = vrot.lane.b32.xlu2 %v7624_v39, %s5450_s9 }
 0x419   : > { %2614 = vrot.lane.b32.xlu0 %v7630_v23, %s5450_s9 }
 0x420   : > { %2628 = vrot.lane.b32.xlu1 %v7636_v50, %s5450_s9  ;;  %2624 = vrot.lane.b32.xlu2 %v7638_v17, %s5450_s9 }
 0x421   : > { %2620 = vrot.lane.b32.xlu0 %v7646_v38, %s5450_s9 }
 0x422   : > { %v7716_v32 = vpop.permute.xlu1 %2504 }
 0x423   : > { %10208 = vst [vmem:[#allocation15_spill] sm:$0xff] %v7716_v32 }
 0x428   : > { %2634 = vrot.lane.b32.xlu1 %v7652_v58, %s5450_s9  ;;  %2630 = vrot.lane.b32.xlu2 %v7654_v49, %s5450_s9 }
 0x429   : > { %2626 = vrot.lane.b32.xlu0 %v7660_v60, %s5450_s9 }
 0x42a   : > { %v7700_v4 = vpop.permute.xlu2 %2512 }
 0x42b   : > { %10206 = vst [vmem:[#allocation16_spill] sm:$0xff] %v7700_v4  ;;  %v7720_v4 = vpop.permute.xlu0 %2496 }
 0x42c   : > { %10210 = vst [vmem:[#allocation65_spill] sm:$0xff] %v7720_v4 }
 0x430   : > { %2640 = vrot.lane.b32.xlu1 %v7668_v11, %s5450_s9  ;;  %2636 = vrot.lane.b32.xlu2 %v7670_v53, %s5450_s9 }
 0x431   : > { %2632 = vrot.lane.b32.xlu0 %v7676_v28, %s5450_s9 }
 0x433   : > { %v7738_v4 = vpop.permute.xlu0 %2502 }
 0x434   : > { %10214 = vst [vmem:[#allocation134_spill] sm:$0xff] %v7738_v4 }
 0x438   : > { %2646 = vrot.lane.b32.xlu1 %v7686_v5, %s5450_s9  ;;  %2642 = vrot.lane.b32.xlu2 %v7688_v9, %s5450_s9 }
 0x439   : > { %2638 = vrot.lane.b32.xlu0 %v7694_v22, %s5450_s9 }
 0x43a   : > { %v7734_v32 = vpop.permute.xlu1 %2510 }
 0x43b   : > { %10212 = vst [vmem:[#allocation17_spill] sm:$0xff] %v7734_v32  ;;  %v7756_v4 = vpop.permute.xlu0 %2508 }
 0x43c   : > { %10219 = vst [vmem:[#allocation36_spill] sm:$0xff] %v7756_v4 }
 0x440   : > { %2652 = vrot.lane.b32.xlu1 %v7704_v13, %s5450_s9  ;;  %2648 = vrot.lane.b32.xlu2 %v7706_v18, %s5450_s9 }
 0x441   : > { %2644 = vrot.lane.b32.xlu0 %v7712_v35, %s5450_s9 }
 0x442   : > { %v7718_v24 = vpop.permute.xlu2 %2518 }
 0x443   : > { %10209 = vst [vmem:[#allocation31_spill] sm:$0xff] %v7718_v24  ;;  %v7742_v24 = vld [vmem:[#allocation2 + $0x13a] sm:$0xff] }
 0x444   : > { %10216 = vst [vmem:[#allocation151_spill] sm:$0xff] %v7742_v24 }
 0x448   : > { %2658 = vrot.lane.b32.xlu1 %v7722_v7, %s5450_s9  ;;  %2654 = vrot.lane.b32.xlu2 %v7724_v43, %s5450_s9  ;;  %v2170_v43 = vld [vmem:[#allocation2 + $0x80] sm:$0xff] }
 0x449   : > { %2650 = vrot.lane.b32.xlu0 %v7730_v48, %s5450_s9 }
 0x44a   : > { %v7736_v51 = vpop.permute.xlu2 %2524  ;;  %v7774_v4 = vpop.permute.xlu0 %2514 }
 0x44b   : > { %10213 = vst [vmem:[#allocation64_spill] sm:$0xff] %v7736_v51 }
 0x44c   : > { %10224 = vst [vmem:[#allocation117_spill] sm:$0xff] %v7774_v4  ;;  %v2166_v4 = vld [vmem:[#allocation2 + $0x50] sm:$0xff] }
 0x450   : > { %2664 = vrot.lane.b32.xlu1 %v7740_v21, %s5450_s9  ;;  %2660 = vrot.lane.b32.xlu2 %v7742_v24, %s5450_s9  ;;  %v2164_v24 = vld [vmem:[#allocation2 + $0x38] sm:$0xff]  ;;  %v7791_v21 = vld [vmem:[#allocation2 + $0x20] sm:$0xff] }
 0x451   : > { %2656 = vrot.lane.b32.xlu0 %v7748_v12, %s5450_s9  ;;  %10230 = vst [vmem:[#allocation159_spill] sm:$0xff] %v7791_v21 }
 0x452   : > { %v7752_v32 = vpop.permute.xlu2 %2530  ;;  %v7754_v51 = vpop.permute.xlu1 %2516 }
 0x453   : > { %10217 = vst [vmem:[#allocation157_spill] sm:$0xff] %v7752_v32 }
 0x454   : > { %10218 = vst [vmem:[#allocation19_spill] sm:$0xff] %v7754_v51 }
 0x458   : > { %2670 = vrot.lane.b32.xlu1 %v7758_v27, %s5450_s9  ;;  %2666 = vrot.lane.b32.xlu2 %v7760_v47, %s5450_s9  ;;  %v7781_v47 = vld [vmem:[#allocation2 + $0x16a] sm:$0xff] }
 0x459   : > { %2662 = vrot.lane.b32.xlu0 %v7766_v19, %s5450_s9  ;;  %10226 = vst [vmem:[#allocation52_spill] sm:$0xff] %v7781_v47 }
 0x45a   : > { %v7770_v32 = vpop.permute.xlu2 %2536  ;;  %v7772_v51 = vpop.permute.xlu1 %2522 }
 0x45b   : > { %10222 = vst [vmem:[#allocation95_spill] sm:$0xff] %v7770_v32 }
 0x45c   : > { %10223 = vst [vmem:[#allocation106_spill] sm:$0xff] %v7772_v51 }
 0x460   : > { %2740 = vrot.lane.b32.xlu1 %v2163_v37, %s5451_s10  ;;  %2736 = vrot.lane.b32.xlu2 %v7776_v42, %s5451_s10 }
 0x461   : > { %2668 = vrot.lane.b32.xlu0 %v7781_v47, %s5450_s9  ;;  %v2167_v47 = vld [vmem:[#allocation2 + $0x60] sm:$0xff] }
 0x462   : > { %v7785_v27 = vpop.permute.xlu2 %2542  ;;  %v7787_v32 = vpop.permute.xlu1 %2528 }
 0x463   : > { %10227 = vst [vmem:[#allocation56_spill] sm:$0xff] %v7785_v27  ;;  %v7789_v51 = vpop.permute.xlu0 %2520 }
 0x464   : > { %10228 = vst [vmem:[#allocation133_spill] sm:$0xff] %v7787_v32  ;;  %v2169_v32 = vld [vmem:[#allocation2 + $0x78] sm:$0xff] }
 0x465   : > { %10229 = vst [vmem:[#allocation145_spill] sm:$0xff] %v7789_v51  ;;  %v2165_v51 = vld [vmem:[#allocation2 + $0x48] sm:$0xff] }
 0x468   : > { %2746 = vrot.lane.b32.xlu1 %v2166_v4, %s5451_s10  ;;  %2742 = vrot.lane.b32.xlu2 %v2164_v24, %s5451_s10 }
 0x469   : > { %2738 = vrot.lane.b32.xlu0 %v7791_v21, %s5451_s10 }
 0x46a   : > { %v7797_v37 = vpop.permute.xlu1 %2534  ;;  %v7799_v42 = vpop.permute.xlu2 %2612 }
 0x46b   : > { %10231 = vst [vmem:[#allocation18_spill] sm:$0xff] %v7797_v37  ;;  %v7801_v27 = vpop.permute.xlu0 %2526  ;;  %v2172_v37 = vld [vmem:[#allocation2 + $0x98] sm:$0xff] }
 0x46c   : > { %10232 = vst [vmem:[#allocation35_spill] sm:$0xff] %v7799_v42  ;;  %v7812_v42 = vld [vmem:[#allocation2 + $0x68] sm:$0xff] }
 0x46d   : > { %10233 = vst [vmem:[#allocation71_spill] sm:$0xff] %v7801_v27  ;;  %v7828_v27 = vld [vmem:[#allocation2 + $0x90] sm:$0xff] }
 0x46e   : > { %10242 = vst [vmem:[#allocation135_spill] sm:$0xff] %v7828_v27 }
 0x470   : > { %2752 = vrot.lane.b32.xlu1 %v2169_v32, %s5451_s10  ;;  %2748 = vrot.lane.b32.xlu2 %v2167_v47, %s5451_s10 }
 0x471   : > { %2744 = vrot.lane.b32.xlu0 %v2165_v51, %s5451_s10 }
 0x472   : > { %v7806_v4 = vpop.permute.xlu1 %2540  ;;  %v7808_v24 = vpop.permute.xlu2 %2618 }
 0x473   : > { %10234 = vst [vmem:[#allocation86_spill] sm:$0xff] %v7806_v4  ;;  %v7810_v21 = vpop.permute.xlu0 %2532  ;;  %v7824_v4 = vld [vmem:[#allocation2 + $0xc0] sm:$0xff] }
 0x474   : > { %10235 = vst [vmem:[#allocation91_spill] sm:$0xff] %v7808_v24  ;;  %v7844_v24 = vld [vmem:[#allocation2 + $0xc8] sm:$0xff] }
 0x475   : > { %10236 = vst [vmem:[#allocation96_spill] sm:$0xff] %v7810_v21  ;;  %v7826_v21 = vld [vmem:[#allocation2 + $0xa8] sm:$0xff] }
 0x476   : > { %10240 = vst [vmem:[#allocation124_spill] sm:$0xff] %v7824_v4 }
 0x477   : > { %10241 = vst [vmem:[#allocation129_spill] sm:$0xff] %v7826_v21 }
 0x478   : > { %2758 = vrot.lane.b32.xlu1 %v2172_v37, %s5451_s10  ;;  %2754 = vrot.lane.b32.xlu2 %v2170_v43, %s5451_s10  ;;  %10247 = vst [vmem:[#allocation85_spill] sm:$0xff] %v7844_v24 }
 0x479   : > { %2750 = vrot.lane.b32.xlu0 %v7812_v42, %s5451_s10 }
 0x47a   : > { %v7818_v47 = vpop.permute.xlu1 %2610  ;;  %v7820_v51 = vpop.permute.xlu2 %2624 }
 0x47b   : > { %10237 = vst [vmem:[#allocation116_spill] sm:$0xff] %v7818_v47  ;;  %v7822_v32 = vpop.permute.xlu0 %2538  ;;  %v7846_v47 = vld [vmem:[#allocation2 + $0xb0] sm:$0xff] }
 0x47c   : > { %10238 = vst [vmem:[#allocation121_spill] sm:$0xff] %v7820_v51  ;;  %v7842_v51 = vld [vmem:[#allocation2 + $0xe0] sm:$0xff] }
 0x47d   : > { %10239 = vst [vmem:[#allocation68_spill] sm:$0xff] %v7822_v32 }
 0x47e   : > { %10246 = vst [vmem:[#allocation70_spill] sm:$0xff] %v7842_v51 }
 0x47f   : > { %10248 = vst [vmem:[#allocation98_spill] sm:$0xff] %v7846_v47 }
 0x480   : > { %2764 = vrot.lane.b32.xlu1 %v7824_v4, %s5451_s10  ;;  %2760 = vrot.lane.b32.xlu2 %v7826_v21, %s5451_s10  ;;  %v7860_v21 = vld [vmem:[#allocation2 + $0x108] sm:$0xff]  ;;  %v7862_v4 = vld [vmem:[#allocation2 + $0xf0] sm:$0xff] }
 0x481   : > { %2756 = vrot.lane.b32.xlu0 %v7828_v27, %s5451_s10  ;;  %10252 = vst [vmem:[#allocation66_spill] sm:$0xff] %v7860_v21  ;;  %v7864_v27 = vld [vmem:[#allocation2 + $0xd8] sm:$0xff] }
 0x482   : > { %v7836_v43 = vpop.permute.xlu1 %2616  ;;  %v7838_v37 = vpop.permute.xlu2 %2630  ;;  %10253 = vst [vmem:[#allocation82_spill] sm:$0xff] %v7862_v4 }
 0x483   : > { %10243 = vst [vmem:[#allocation158_spill] sm:$0xff] %v7836_v43  ;;  %v7840_v32 = vpop.permute.xlu0 %2608 }
 0x484   : > { %10244 = vst [vmem:[#allocation8_spill] sm:$0xff] %v7838_v37 }
 0x485   : > { %10245 = vst [vmem:[#allocation20_spill] sm:$0xff] %v7840_v32 }
 0x486   : > { %10254 = vst [vmem:[#allocation137_spill] sm:$0xff] %v7864_v27 }
 0x488   : > { %2770 = vrot.lane.b32.xlu1 %v7842_v51, %s5451_s10  ;;  %2766 = vrot.lane.b32.xlu2 %v7844_v24, %s5451_s10  ;;  %v7878_v24 = vld [vmem:[#allocation2 + $0x128] sm:$0xff]  ;;  %v7880_v51 = vld [vmem:[#allocation2 + $0x110] sm:$0xff] }
 0x489   : > { %2762 = vrot.lane.b32.xlu0 %v7846_v47, %s5451_s10  ;;  %10258 = vst [vmem:[#allocation40_spill] sm:$0xff] %v7878_v24  ;;  %v7882_v47 = vld [vmem:[#allocation2 + $0xf8] sm:$0xff] }
 0x48a   : > { %v7854_v43 = vpop.permute.xlu1 %2622  ;;  %v7856_v37 = vpop.permute.xlu2 %2636  ;;  %10259 = vst [vmem:[#allocation53_spill] sm:$0xff] %v7880_v51 }
 0x48b   : > { %10249 = vst [vmem:[#allocation108_spill] sm:$0xff] %v7854_v43  ;;  %v7858_v32 = vpop.permute.xlu0 %2614 }
 0x48c   : > { %10250 = vst [vmem:[#allocation113_spill] sm:$0xff] %v7856_v37 }
 0x48d   : > { %10251 = vst [vmem:[#allocation118_spill] sm:$0xff] %v7858_v32 }
 0x48e   : > { %10260 = vst [vmem:[#allocation75_spill] sm:$0xff] %v7882_v47 }
 0x490   : > { %2776 = vrot.lane.b32.xlu1 %v7860_v21, %s5451_s10  ;;  %2772 = vrot.lane.b32.xlu2 %v7862_v4, %s5451_s10  ;;  %v7896_v4 = vld [vmem:[#allocation2 + $0x150] sm:$0xff]  ;;  %v7898_v21 = vld [vmem:[#allocation2 + $0x138] sm:$0xff] }
 0x491   : > { %2768 = vrot.lane.b32.xlu0 %v7864_v27, %s5451_s10  ;;  %10264 = vst [vmem:[#allocation37_spill] sm:$0xff] %v7896_v4  ;;  %v7900_v27 = vld [vmem:[#allocation2 + $0x120] sm:$0xff] }
 0x492   : > { %v7872_v43 = vpop.permute.xlu1 %2628  ;;  %v7874_v37 = vpop.permute.xlu2 %2642  ;;  %10265 = vst [vmem:[#allocation57_spill] sm:$0xff] %v7898_v21 }
 0x493   : > { %10255 = vst [vmem:[#allocation148_spill] sm:$0xff] %v7872_v43  ;;  %v7876_v32 = vpop.permute.xlu0 %2620 }
 0x494   : > { %10256 = vst [vmem:[#allocation154_spill] sm:$0xff] %v7874_v37 }
 0x495   : > { %10257 = vst [vmem:[#allocation22_spill] sm:$0xff] %v7876_v32 }
 0x498   : > { %2782 = vrot.lane.b32.xlu1 %v7878_v24, %s5451_s10  ;;  %2778 = vrot.lane.b32.xlu2 %v7880_v51, %s5451_s10  ;;  %v7914_v51 = vld [vmem:[#allocation2 + $0x170] sm:$0xff]  ;;  %v7916_v24 = vld [vmem:[#allocation2 + $0x158] sm:$0xff] }
 0x499   : > { %2774 = vrot.lane.b32.xlu0 %v7882_v47, %s5451_s10  ;;  %10269 = vst [vmem:[#allocation161_spill] sm:$0xff] %v7916_v24  ;;  %v7918_v47 = vld [vmem:[#allocation2 + $0x140] sm:$0xff] }
 0x49a   : > { %v7890_v43 = vpop.permute.xlu1 %2634  ;;  %v7892_v37 = vpop.permute.xlu2 %2648 }
 0x49b   : > { %10261 = vst [vmem:[#allocation97_spill] sm:$0xff] %v7890_v43  ;;  %v7894_v32 = vpop.permute.xlu0 %2626 }
 0x49c   : > { %10262 = vst [vmem:[#allocation107_spill] sm:$0xff] %v7892_v37 }
 0x49d   : > { %10263 = vst [vmem:[#allocation120_spill] sm:$0xff] %v7894_v32 }
 0x4a0   : > { %2788 = vrot.lane.b32.xlu1 %v7896_v4, %s5451_s10  ;;  %2784 = vrot.lane.b32.xlu2 %v7898_v21, %s5451_s10  ;;  %v7932_v21 = vld [vmem:[#allocation2 + $0x180] sm:$0xff]  ;;  %v7934_v4 = vld [vmem:[#allocation2 + $0x168] sm:$0xff] }
 0x4a1   : > { %2780 = vrot.lane.b32.xlu0 %v7900_v27, %s5451_s10  ;;  %10273 = vst [vmem:[#allocation88_spill] sm:$0xff] %v7932_v21 }
 0x4a2   : > { %v7908_v43 = vpop.permute.xlu1 %2640  ;;  %v7910_v37 = vpop.permute.xlu2 %2654 }
 0x4a3   : > { %10266 = vst [vmem:[#allocation61_spill] sm:$0xff] %v7908_v43  ;;  %v7912_v32 = vpop.permute.xlu0 %2632 }
 0x4a4   : > { %10267 = vst [vmem:[#allocation136_spill] sm:$0xff] %v7910_v37 }
 0x4a5   : > { %10268 = vst [vmem:[#allocation147_spill] sm:$0xff] %v7912_v32 }
 0x4a8   : > { %2794 = vrot.lane.b32.xlu1 %v7914_v51, %s5451_s10  ;;  %2790 = vrot.lane.b32.xlu2 %v7916_v24, %s5451_s10 }
 0x4a9   : > { %2786 = vrot.lane.b32.xlu0 %v7918_v47, %s5451_s10 }
 0x4aa   : > { %v7926_v43 = vpop.permute.xlu1 %2646  ;;  %v7928_v37 = vpop.permute.xlu2 %2660 }
 0x4ab   : > { %10270 = vst [vmem:[#allocation21_spill] sm:$0xff] %v7926_v43  ;;  %v7930_v32 = vpop.permute.xlu0 %2638 }
 0x4ac   : > { %10271 = vst [vmem:[#allocation39_spill] sm:$0xff] %v7928_v37 }
 0x4ad   : > { %10272 = vst [vmem:[#allocation77_spill] sm:$0xff] %v7930_v32  ;;  %v7952_v32 = vld [vmem:[#allocation2 + $0x188] sm:$0xff] }
 0x4b0   : > { %2864 = vrot.lane.b32.xlu1 %v7255_v46, %s5452_s11  ;;  %2796 = vrot.lane.b32.xlu2 %v7932_v21, %s5451_s10 }
 0x4b1   : > { %2792 = vrot.lane.b32.xlu0 %v7934_v4, %s5451_s10 }
 0x4b2   : > { %v7942_v24 = vpop.permute.xlu1 %2652  ;;  %v7944_v43 = vpop.permute.xlu2 %2666 }
 0x4b3   : > { %10274 = vst [vmem:[#allocation93_spill] sm:$0xff] %v7942_v24  ;;  %v7946_v37 = vpop.permute.xlu0 %2644 }
 0x4b4   : > { %10275 = vst [vmem:[#allocation99_spill] sm:$0xff] %v7944_v43 }
 0x4b8   : > { %2870 = vrot.lane.b32.xlu1 %v7447_v56, %s5452_s11  ;;  %2866 = vrot.lane.b32.xlu2 %v7416_v31, %s5452_s11 }
 0x4b9   : > { %2798 = vrot.lane.b32.xlu0 %v7952_v32, %s5451_s10  ;;  %s5460_s10 = smov 44  }
 0x4ba   : > { %v7956_v46 = vpop.permute.xlu1 %2658  ;;  %v7958_v21 = vpop.permute.xlu2 %2736 }
 0x4bb   : > { %10276 = vst [vmem:[#allocation119_spill] sm:$0xff] %v7956_v46  ;;  %v7960_v24 = vpop.permute.xlu0 %2650 }
 0x4bc   : > { %10277 = vst [vmem:[#allocation42_spill] sm:$0xff] %v7960_v24  ;;  %v2398_v24 = vld [vmem:[#allocation2 + $0xd9] sm:$0xff] }
 0x4c0   : > { %2876 = vrot.lane.b32.xlu1 %v7465_v30, %s5452_s11  ;;  %2872 = vrot.lane.b32.xlu2 %v7453_v34, %s5452_s11 }
 0x4c1   : > { %2868 = vrot.lane.b32.xlu0 %v7440_v61, %s5452_s11 }
 0x4c2   : > { %v7968_v31 = vpop.permute.xlu1 %2664  ;;  %v7970_v56 = vpop.permute.xlu2 %2742 }
 0x4c3   : > { %10278 = vst [vmem:[#allocation74_spill] sm:$0xff] %v7968_v31  ;;  %v7972_v43 = vpop.permute.xlu0 %2656  ;;  %v2352_v31 = vld [vmem:[#allocation2 + $0x30] sm:$0xff] }
 0x4c4   : > { %10279 = vst [vmem:[#allocation126_spill] sm:$0xff] %v7972_v43  ;;  %v2384_v43 = vld [vmem:[#allocation2 + $0x31] sm:$0xff] }
 0x4c8   : > { %2882 = vrot.lane.b32.xlu1 %v7489_v41, %s5452_s11  ;;  %2878 = vrot.lane.b32.xlu2 %v7473_v20, %s5452_s11 }
 0x4c9   : > { %2874 = vrot.lane.b32.xlu0 %v7459_v40, %s5452_s11 }
 0x4ca   : > { %v7980_v30 = vpop.permute.xlu1 %2670  ;;  %v7982_v34 = vpop.permute.xlu2 %2748 }
 0x4cb   : > { %10280 = vst [vmem:[#allocation131_spill] sm:$0xff] %v7980_v30  ;;  %v7984_v61 = vpop.permute.xlu0 %2662  ;;  %v8058_v30 = vld [vmem:[#allocation2 + $0x181] sm:$0xff] }
 0x4cc   : > { %10281 = vst [vmem:[#allocation138_spill] sm:$0xff] %v7984_v61 }
 0x4d0   : > { %2888 = vrot.lane.b32.xlu1 %v7513_v54, %s5452_s11  ;;  %2884 = vrot.lane.b32.xlu2 %v7497_v45, %s5452_s11 }
 0x4d1   : > { %2880 = vrot.lane.b32.xlu0 %v7481_v14, %s5452_s11 }
 0x4d2   : > { %v7992_v41 = vpop.permute.xlu1 %2740  ;;  %v7994_v20 = vpop.permute.xlu2 %2754 }
 0x4d3   : > { %10282 = vst [vmem:[#allocation160_spill] sm:$0xff] %v7994_v20  ;;  %v7996_v40 = vpop.permute.xlu0 %2668  ;;  %v2421_v20 = vld [vmem:[#allocation2 + $0x6a] sm:$0xff] }
 0x4d4   : > { %10283 = vst [vmem:[#allocation11_spill] sm:$0xff] %v7996_v40 }
 0x4d8   : > { %2894 = vrot.lane.b32.xlu1 %v7537_v26, %s5452_s11  ;;  %2890 = vrot.lane.b32.xlu2 %v7521_v0, %s5452_s11 }
 0x4d9   : > { %2886 = vrot.lane.b32.xlu0 %v7505_v1, %s5452_s11 }
 0x4da   : > { %v8004_v54 = vpop.permute.xlu1 %2746  ;;  %v8006_v45 = vpop.permute.xlu2 %2760 }
 0x4db   : > { %10284 = vst [vmem:[#allocation24_spill] sm:$0xff] %v8006_v45  ;;  %v8008_v14 = vpop.permute.xlu0 %2738  ;;  %v10338_v45 = vld [vmem:[#allocation129_spill] sm:$0xff] }
 0x4e0   : > { %2900 = vrot.lane.b32.xlu1 %v7568_v6, %s5452_s11  ;;  %2896 = vrot.lane.b32.xlu2 %v7545_v59, %s5452_s11 }
 0x4e1   : > { %2892 = vrot.lane.b32.xlu0 %v7529_v57, %s5452_s11 }
 0x4e2   : > { %v8016_v26 = vpop.permute.xlu1 %2752  ;;  %v8018_v0 = vpop.permute.xlu2 %2766 }
 0x4e3   : > { %10285 = vst [vmem:[#allocation76_spill] sm:$0xff] %v8016_v26  ;;  %v8020_v1 = vpop.permute.xlu0 %2744  ;;  %v2439_v26 = vld [vmem:[#allocation2 + $0x142] sm:$0xff] }
 0x4e4   : > { %10286 = vst [vmem:[#allocation87_spill] sm:$0xff] %v8018_v0  ;;  %v10321_v0 = vld [vmem:[#allocation48_spill] sm:$0xff] }
 0x4e8   : > { %2906 = vrot.lane.b32.xlu1 %v7586_v10, %s5452_s11  ;;  %2902 = vrot.lane.b32.xlu2 %v7555_v55, %s5452_s11 }
 0x4e9   : > { %2898 = vrot.lane.b32.xlu0 %v7553_v8, %s5452_s11 }
 0x4ea   : > { %v8028_v6 = vpop.permute.xlu1 %2758  ;;  %v8030_v59 = vpop.permute.xlu2 %2772 }
 0x4eb   : > { %10287 = vst [vmem:[#allocation101_spill] sm:$0xff] %v8028_v6  ;;  %v8032_v57 = vpop.permute.xlu0 %2750 }
 0x4ec   : > { %10288 = vst [vmem:[#allocation110_spill] sm:$0xff] %v8032_v57  ;;  %v2397_v57 = vld [vmem:[#allocation2 + $0xc9] sm:$0xff] }
 0x4f0   : > { %2912 = vrot.lane.b32.xlu1 %v7598_v62, %s5452_s11  ;;  %2908 = vrot.lane.b32.xlu2 %v7566_v63, %s5452_s11 }
 0x4f1   : > { %2904 = vrot.lane.b32.xlu0 %v7564_v25, %s5452_s11 }
 0x4f2   : > { %v8040_v10 = vpop.permute.xlu1 %2764  ;;  %v8042_v55 = vpop.permute.xlu2 %2778 }
 0x4f3   : > { %10289 = vst [vmem:[#allocation114_spill] sm:$0xff] %v8040_v10  ;;  %v8044_v8 = vpop.permute.xlu0 %2756  ;;  %v2354_v10 = vld [vmem:[#allocation2 + $0x48] sm:$0xff] }
 0x4f4   : > { %10290 = vst [vmem:[#allocation28_spill] sm:$0xff] %v8042_v55 }
 0x4f5   : > { %10291 = vst [vmem:[#allocation72_spill] sm:$0xff] %v8044_v8  ;;  %v2387_v8 = vld [vmem:[#allocation2 + $0x51] sm:$0xff] }
 0x4f8   : > { %2918 = vrot.lane.b32.xlu1 %v7607_v44, %s5452_s11  ;;  %2914 = vrot.lane.b32.xlu2 %v7580_v29, %s5452_s11 }
 0x4f9   : > { %2910 = vrot.lane.b32.xlu0 %v7578_v33, %s5452_s11 }
 0x4fa   : > { %v8052_v62 = vpop.permute.xlu1 %2770  ;;  %v8054_v63 = vpop.permute.xlu2 %2784 }
 0x4fb   : > { %10292 = vst [vmem:[#allocation125_spill] sm:$0xff] %v8052_v62  ;;  %v8056_v25 = vpop.permute.xlu0 %2762  ;;  %v8072_v62 = vld [vmem:[#allocation2 + $0x189] sm:$0xff] }
 0x4fc   : > { %10293 = vst [vmem:[#allocation140_spill] sm:$0xff] %v8054_v63 }
 0x4fd   : > { %10294 = vst [vmem:[#allocation150_spill] sm:$0xff] %v8056_v25  ;;  %v2356_v25 = vld [vmem:[#allocation2 + $0x60] sm:$0xff] }
 0x500   : > { %2924 = vrot.lane.b32.xlu1 %v8058_v30, %s5452_s11  ;;  %2920 = vrot.lane.b32.xlu2 %v7592_v52, %s5452_s11 }
 0x501   : > { %2916 = vrot.lane.b32.xlu0 %v7590_v36, %s5452_s11 }
 0x502   : > { %v8066_v29 = vpop.permute.xlu1 %2776  ;;  %v8068_v33 = vpop.permute.xlu2 %2790 }
 0x503   : > { %10295 = vst [vmem:[#allocation155_spill] sm:$0xff] %v8068_v33  ;;  %v8070_v44 = vpop.permute.xlu0 %2768 }
 0x504   : > { %10296 = vst [vmem:[#allocation162_spill] sm:$0xff] %v8070_v44 }
 0x508   : > { %2994 = vrot.lane.b32.xlu1 %v7630_v23, %s5453_s12  ;;  %2926 = vrot.lane.b32.xlu2 %v8072_v62, %s5452_s11 }
 0x509   : > { %2922 = vrot.lane.b32.xlu0 %v7602_v15, %s5452_s11 }
 0x50a   : > { %v8080_v52 = vpop.permute.xlu1 %2782  ;;  %v8082_v36 = vpop.permute.xlu2 %2796 }
 0x50b   : > { %10297 = vst [vmem:[#allocation26_spill] sm:$0xff] %v8080_v52  ;;  %v8084_v40 = vpop.permute.xlu0 %2774  ;;  %v2404_v52 = vld [vmem:[#allocation2 + $0x121] sm:$0xff] }
 0x50c   : > { %10298 = vst [vmem:[#allocation45_spill] sm:$0xff] %v8082_v36  ;;  %v10316_v36 = vld [vmem:[#allocation52_spill] sm:$0xff] }
 0x510   : > { %3000 = vrot.lane.b32.xlu1 %v7646_v38, %s5453_s12  ;;  %2996 = vrot.lane.b32.xlu2 %v7611_v16, %s5453_s12 }
 0x511   : > { %2992 = vrot.lane.b32.xlu0 %v7613_v3, %s5453_s12 }
 0x512   : > { %v8092_v23 = vpop.permute.xlu1 %2788  ;;  %v8094_v44 = vpop.permute.xlu2 %2866 }
 0x513   : > { %10299 = vst [vmem:[#allocation58_spill] sm:$0xff] %v8092_v23  ;;  %v8096_v15 = vpop.permute.xlu0 %2780  ;;  %v2359_v23 = vld [vmem:[#allocation2 + $0x80] sm:$0xff] }
 0x514   : > { %10300 = vst [vmem:[#allocation79_spill] sm:$0xff] %v8096_v15  ;;  %v2393_v15 = vld [vmem:[#allocation2 + $0x99] sm:$0xff] }
 0x518   : > { %3006 = vrot.lane.b32.xlu1 %v7660_v60, %s5453_s12  ;;  %3002 = vrot.lane.b32.xlu2 %v7622_v2, %s5453_s12 }
 0x519   : > { %2998 = vrot.lane.b32.xlu0 %v7624_v39, %s5453_s12 }
 0x51a   : > { %v8104_v38 = vpop.permute.xlu1 %2794  ;;  %v8106_v16 = vpop.permute.xlu2 %2872 }
 0x51b   : > { %10301 = vst [vmem:[#allocation100_spill] sm:$0xff] %v8104_v38  ;;  %v8108_v3 = vpop.permute.xlu0 %2786 }
 0x51c   : > { %10302 = vst [vmem:[#allocation109_spill] sm:$0xff] %v8108_v3 }
 0x520   : > { %3012 = vrot.lane.b32.xlu1 %v7676_v28, %s5453_s12  ;;  %3008 = vrot.lane.b32.xlu2 %v7636_v50, %s5453_s12 }
 0x521   : > { %3004 = vrot.lane.b32.xlu0 %v7638_v17, %s5453_s12 }
 0x522   : > { %v8116_v60 = vpop.permute.xlu1 %2864  ;;  %v8118_v2 = vpop.permute.xlu2 %2878 }
 0x523   : > { %10303 = vst [vmem:[#allocation23_spill] sm:$0xff] %v8118_v2  ;;  %v8120_v39 = vpop.permute.xlu0 %2792  ;;  %v10394_v2 = vld [vmem:[#allocation20_spill] sm:$0xff] }
 0x524   : > { %10304 = vst [vmem:[#allocation41_spill] sm:$0xff] %v8120_v39 }
 0x528   : > { %3018 = vrot.lane.b32.xlu1 %v7694_v22, %s5453_s12  ;;  %3014 = vrot.lane.b32.xlu2 %v7652_v58, %s5453_s12 }
 0x529   : > { %3010 = vrot.lane.b32.xlu0 %v7654_v49, %s5453_s12 }
 0x52a   : > { %v8128_v28 = vpop.permute.xlu1 %2870  ;;  %v8130_v50 = vpop.permute.xlu2 %2884 }
 0x52b   : > { %10305 = vst [vmem:[#allocation51_spill] sm:$0xff] %v8130_v50  ;;  %v8132_v17 = vpop.permute.xlu0 %2798  ;;  %v2386_v50 = vld [vmem:[#allocation2 + $0x49] sm:$0xff] }
 0x52c   : > { %10306 = vst [vmem:[#allocation67_spill] sm:$0xff] %v8132_v17 }
 0x530   : > { %3024 = vrot.lane.b32.xlu1 %v7712_v35, %s5453_s12  ;;  %3020 = vrot.lane.b32.xlu2 %v7668_v11, %s5453_s12 }
 0x531   : > { %3016 = vrot.lane.b32.xlu0 %v7670_v53, %s5453_s12 }
 0x532   : > { %v8140_v22 = vpop.permute.xlu1 %2876  ;;  %v8142_v58 = vpop.permute.xlu2 %2890 }
 0x533   : > { %10307 = vst [vmem:[#allocation139_spill] sm:$0xff] %v8142_v58  ;;  %v8144_v49 = vpop.permute.xlu0 %2868  ;;  %v2358_v58 = vld [vmem:[#allocation2 + $0x78] sm:$0xff] }
 0x538   : > { %3030 = vrot.lane.b32.xlu1 %v7730_v48, %s5453_s12  ;;  %3026 = vrot.lane.b32.xlu2 %v7686_v5, %s5453_s12 }
 0x539   : > { %3022 = vrot.lane.b32.xlu0 %v7688_v9, %s5453_s12 }
 0x53a   : > { %v8152_v35 = vpop.permute.xlu1 %2882  ;;  %v8154_v11 = vpop.permute.xlu2 %2896 }
 0x53b   : > { %10308 = vst [vmem:[#allocation149_spill] sm:$0xff] %v8152_v35  ;;  %v8156_v53 = vpop.permute.xlu0 %2874  ;;  %v2420_v35 = vld [vmem:[#allocation2 + $0x62] sm:$0xff] }
 0x53c   : > { %10309 = vst [vmem:[#allocation164_spill] sm:$0xff] %v8154_v11  ;;  %v10317_v11 = vld [vmem:[#allocation146_spill] sm:$0xff] }
 0x540   : > { %3036 = vrot.lane.b32.xlu1 %v7748_v12, %s5453_s12  ;;  %3032 = vrot.lane.b32.xlu2 %v7704_v13, %s5453_s12  ;;  %v10312_v12 = vld [vmem:[#allocation7_spill] sm:$0xff] }
 0x541   : > { %3028 = vrot.lane.b32.xlu0 %v7706_v18, %s5453_s12 }
 0x542   : > { %v8164_v48 = vpop.permute.xlu1 %2888  ;;  %v8166_v5 = vpop.permute.xlu2 %2902 }
 0x543   : > { %10310 = vst [vmem:[#allocation34_spill] sm:$0xff] %v8164_v48  ;;  %v8168_v9 = vpop.permute.xlu0 %2880  ;;  %v10333_v48 = vld [vmem:[#allocation98_spill] sm:$0xff] }
 0x544   : > { %10311 = vst [vmem:[#allocation25_spill] sm:$0xff] %v8168_v9  ;;  %v2437_v9 = vld [vmem:[#allocation2 + $0x12a] sm:$0xff] }
 0x548   : > { %3042 = vrot.lane.b32.xlu1 %v7766_v19, %s5453_s12  ;;  %3038 = vrot.lane.b32.xlu2 %v7722_v7, %s5453_s12  ;;  %v10318_v19 = vld [vmem:[#allocation151_spill] sm:$0xff] }
 0x549   : > { %3034 = vrot.lane.b32.xlu0 %v10312_v12, %s5453_s12 }
 0x54a   : > { %v8176_v17 = vpop.permute.xlu1 %2894  ;;  %v8178_v13 = vpop.permute.xlu2 %2908 }
 0x54b   : > { %10313 = vst [vmem:[#allocation44_spill] sm:$0xff] %v8176_v17  ;;  %v8180_v18 = vpop.permute.xlu0 %2886  ;;  %v8194_v17 = vld [vmem:[#allocation2 + $0x18a] sm:$0xff] }
 0x54c   : > { %10314 = vst [vmem:[#allocation81_spill] sm:$0xff] %v8178_v13  ;;  %v2406_v13 = vld [vmem:[#allocation2 + $0x139] sm:$0xff] }
 0x54d   : > { %10315 = vst [vmem:[#allocation90_spill] sm:$0xff] %v8180_v18  ;;  %v10342_v18 = vld [vmem:[#allocation85_spill] sm:$0xff] }
 0x550   : > { %3048 = vrot.lane.b32.xlu1 %v10316_v36, %s5453_s12  ;;  %3044 = vrot.lane.b32.xlu2 %v10317_v11, %s5453_s12  ;;  %v10322_v36 = vld [vmem:[#allocation69_spill] sm:$0xff] }
 0x551   : > { %3040 = vrot.lane.b32.xlu0 %v10318_v19, %s5453_s12 }
 0x552   : > { %v8188_v38 = vpop.permute.xlu1 %2900  ;;  %v8190_v7 = vpop.permute.xlu2 %2914 }
 0x553   : > { %10319 = vst [vmem:[#allocation94_spill] sm:$0xff] %v8190_v7  ;;  %v8192_v12 = vpop.permute.xlu0 %2892  ;;  %v10340_v7 = vld [vmem:[#allocation75_spill] sm:$0xff] }
 0x554   : > { %10320 = vst [vmem:[#allocation102_spill] sm:$0xff] %v8192_v12  ;;  %v8210_v12 = vld [vmem:[#allocation2 + $0x182] sm:$0xff] }
 0x558   : > { %3054 = vrot.lane.b32.xlu1 %v8194_v17, %s5453_s12  ;;  %3050 = vrot.lane.b32.xlu2 %v10321_v0, %s5453_s12 }
 0x559   : > { %3046 = vrot.lane.b32.xlu0 %v10322_v36, %s5453_s12 }
 0x55a   : > { %v8202_v11 = vpop.permute.xlu1 %2906  ;;  %v8204_v19 = vpop.permute.xlu2 %2920 }
 0x55b   : > { %10323 = vst [vmem:[#allocation29_spill] sm:$0xff] %v8202_v11  ;;  %v8206_v39 = vpop.permute.xlu0 %2898 }
 0x55c   : > { %10324 = vst [vmem:[#allocation47_spill] sm:$0xff] %v8204_v19  ;;  %v2355_v19 = vld [vmem:[#allocation2 + $0x50] sm:$0xff] }
 0x55d   : > { %10325 = vst [vmem:[#allocation83_spill] sm:$0xff] %v8206_v39 }
 0x560   : > { %3124 = vrot.lane.b32.xlu1 %v2354_v10, %s5454_s13  ;;  %3120 = vrot.lane.b32.xlu2 %v2352_v31, %s5454_s13  ;;  %v2353_v10 = vld [vmem:[#allocation2 + $0x38] sm:$0xff] }
 0x561   : > { %3052 = vrot.lane.b32.xlu0 %v8210_v12, %s5453_s12 }
 0x562   : > { %v8214_v0 = vpop.permute.xlu1 %2912  ;;  %v8216_v36 = vpop.permute.xlu2 %2926 }
 0x563   : > { %10326 = vst [vmem:[#allocation128_spill] sm:$0xff] %v8214_v0  ;;  %v8218_v33 = vpop.permute.xlu0 %2904 }
 0x564   : > { %10327 = vst [vmem:[#allocation132_spill] sm:$0xff] %v8216_v36  ;;  %v10330_v36 = vld [vmem:[#allocation135_spill] sm:$0xff] }
 0x568   : > { %3130 = vrot.lane.b32.xlu1 %v7812_v42, %s5454_s13  ;;  %3126 = vrot.lane.b32.xlu2 %v2355_v19, %s5454_s13 }
 0x569   : > { %3122 = vrot.lane.b32.xlu0 %v2353_v10, %s5454_s13 }
 0x56a   : > { %v8224_v31 = vpop.permute.xlu1 %2918  ;;  %v8226_v39 = vpop.permute.xlu2 %2996 }
 0x56b   : > { %10328 = vst [vmem:[#allocation141_spill] sm:$0xff] %v8224_v31  ;;  %v8228_v61 = vpop.permute.xlu0 %2910  ;;  %v2361_v31 = vld [vmem:[#allocation2 + $0x98] sm:$0xff] }
 0x56c   : > { %10329 = vst [vmem:[#allocation163_spill] sm:$0xff] %v8228_v61  ;;  %v2419_v61 = vld [vmem:[#allocation2 + $0x52] sm:$0xff] }
 0x570   : > { %3136 = vrot.lane.b32.xlu1 %v10330_v36, %s5454_s13  ;;  %3132 = vrot.lane.b32.xlu2 %v2358_v58, %s5454_s13 }
 0x571   : > { %3128 = vrot.lane.b32.xlu0 %v2356_v25, %s5454_s13 }
 0x572   : > { %v8234_v42 = vpop.permute.xlu1 %2924  ;;  %v8236_v19 = vpop.permute.xlu2 %3002 }
 0x573   : > { %10331 = vst [vmem:[#allocation10_spill] sm:$0xff] %v8234_v42  ;;  %v8238_v10 = vpop.permute.xlu0 %2916  ;;  %v10336_v42 = vld [vmem:[#allocation137_spill] sm:$0xff] }
 0x574   : > { %10332 = vst [vmem:[#allocation14_spill] sm:$0xff] %v8238_v10  ;;  %v10337_v10 = vld [vmem:[#allocation124_spill] sm:$0xff] }
 0x578   : > { %3142 = vrot.lane.b32.xlu1 %v10333_v48, %s5454_s13  ;;  %3138 = vrot.lane.b32.xlu2 %v2361_v31, %s5454_s13 }
 0x579   : > { %3134 = vrot.lane.b32.xlu0 %v2359_v23, %s5454_s13 }
 0x57a   : > { %v8244_v36 = vpop.permute.xlu1 %2994  ;;  %v8246_v58 = vpop.permute.xlu2 %3008 }
 0x57b   : > { %10334 = vst [vmem:[#allocation30_spill] sm:$0xff] %v8246_v58  ;;  %v8248_v25 = vpop.permute.xlu0 %2922  ;;  %v2423_v58 = vld [vmem:[#allocation2 + $0x82] sm:$0xff] }
 0x57c   : > { %10335 = vst [vmem:[#allocation80_spill] sm:$0xff] %v8248_v25  ;;  %v10341_v25 = vld [vmem:[#allocation70_spill] sm:$0xff] }
 0x580   : > { %3148 = vrot.lane.b32.xlu1 %v10336_v42, %s5454_s13  ;;  %3144 = vrot.lane.b32.xlu2 %v10337_v10, %s5454_s13 }
 0x581   : > { %3140 = vrot.lane.b32.xlu0 %v10338_v45, %s5454_s13 }
 0x582   : > { %v8256_v48 = vpop.permute.xlu1 %3000  ;;  %v8258_v31 = vpop.permute.xlu2 %3014 }
 0x583   : > { %10339 = vst [vmem:[#allocation89_spill] sm:$0xff] %v8258_v31  ;;  %v8260_v23 = vpop.permute.xlu0 %2992  ;;  %v10345_v31 = vld [vmem:[#allocation66_spill] sm:$0xff] }
 0x588   : > { %3154 = vrot.lane.b32.xlu1 %v10340_v7, %s5454_s13  ;;  %3150 = vrot.lane.b32.xlu2 %v10341_v25, %s5454_s13  ;;  %v10346_v7 = vld [vmem:[#allocation82_spill] sm:$0xff] }
 0x589   : > { %3146 = vrot.lane.b32.xlu0 %v10342_v18, %s5454_s13 }
 0x58a   : > { %v8268_v3 = vpop.permute.xlu1 %3006  ;;  %v8270_v10 = vpop.permute.xlu2 %3020 }
 0x58b   : > { %10343 = vst [vmem:[#allocation104_spill] sm:$0xff] %v8268_v3  ;;  %v8272_v45 = vpop.permute.xlu0 %2998 }
 0x58c   : > { %10344 = vst [vmem:[#allocation112_spill] sm:$0xff] %v8270_v10  ;;  %v10349_v10 = vld [vmem:[#allocation40_spill] sm:$0xff] }
 0x590   : > { %3160 = vrot.lane.b32.xlu1 %v7900_v27, %s5454_s13  ;;  %3156 = vrot.lane.b32.xlu2 %v10345_v31, %s5454_s13  ;;  %v10350_v27 = vld [vmem:[#allocation53_spill] sm:$0xff] }
 0x591   : > { %3152 = vrot.lane.b32.xlu0 %v10346_v7, %s5454_s13 }
 0x592   : > { %v8280_v6 = vpop.permute.xlu1 %3012  ;;  %v8282_v46 = vpop.permute.xlu2 %3026 }
 0x593   : > { %10347 = vst [vmem:[#allocation115_spill] sm:$0xff] %v8280_v6  ;;  %v8284_v18 = vpop.permute.xlu0 %3004  ;;  %v2383_v6 = vld [vmem:[#allocation2 + $0x1a0] sm:$0xff] }
 0x594   : > { %10348 = vst [vmem:[#allocation33_spill] sm:$0xff] %v8282_v46  ;;  %v10353_v46 = vld [vmem:[#allocation37_spill] sm:$0xff] }
 0x598   : > { %3166 = vrot.lane.b32.xlu1 %v7918_v47, %s5454_s13  ;;  %3162 = vrot.lane.b32.xlu2 %v10349_v10, %s5454_s13  ;;  %v10354_v47 = vld [vmem:[#allocation57_spill] sm:$0xff] }
 0x599   : > { %3158 = vrot.lane.b32.xlu0 %v10350_v27, %s5454_s13 }
 0x59a   : > { %v8292_v0 = vpop.permute.xlu1 %3018  ;;  %v8294_v31 = vpop.permute.xlu2 %3032 }
 0x59b   : > { %10351 = vst [vmem:[#allocation73_spill] sm:$0xff] %v8292_v0  ;;  %v8296_v7 = vpop.permute.xlu0 %3010 }
 0x59c   : > { %10352 = vst [vmem:[#allocation127_spill] sm:$0xff] %v8296_v7  ;;  %v2417_v7 = vld [vmem:[#allocation2 + $0x3a] sm:$0xff] }
 0x5a0   : > { %3172 = vrot.lane.b32.xlu1 %v7934_v4, %s5454_s13  ;;  %3168 = vrot.lane.b32.xlu2 %v10353_v46, %s5454_s13  ;;  %v10358_v4 = vld [vmem:[#allocation161_spill] sm:$0xff] }
 0x5a1   : > { %3164 = vrot.lane.b32.xlu0 %v10354_v47, %s5454_s13 }
 0x5a2   : > { %v8304_v63 = vpop.permute.xlu1 %3024  ;;  %v8306_v10 = vpop.permute.xlu2 %3038 }
 0x5a3   : > { %10355 = vst [vmem:[#allocation143_spill] sm:$0xff] %v8304_v63  ;;  %v8308_v27 = vpop.permute.xlu0 %3016  ;;  %v2382_v63 = vld [vmem:[#allocation2 + $0x198] sm:$0xff] }
 0x5a4   : > { %10356 = vst [vmem:[#allocation153_spill] sm:$0xff] %v8306_v10  ;;  %v2418_v10 = vld [vmem:[#allocation2 + $0x4a] sm:$0xff] }
 0x5a5   : > { %10357 = vst [vmem:[#allocation156_spill] sm:$0xff] %v8308_v27 }
 0x5a8   : > { %3178 = vrot.lane.b32.xlu1 %v7952_v32, %s5454_s13  ;;  %3174 = vrot.lane.b32.xlu2 %v7914_v51, %s5454_s13  ;;  %v10361_v32 = vld [vmem:[#allocation88_spill] sm:$0xff] }
 0x5a9   : > { %3170 = vrot.lane.b32.xlu0 %v10358_v4, %s5454_s13 }
 0x5aa   : > { %v8316_v0 = vpop.permute.xlu1 %3030  ;;  %v8318_v46 = vpop.permute.xlu2 %3044 }
 0x5ab   : > { %10359 = vst [vmem:[#allocation165_spill] sm:$0xff] %v8318_v46  ;;  %v8320_v47 = vpop.permute.xlu0 %3022  ;;  %v2385_v46 = vld [vmem:[#allocation2 + $0x39] sm:$0xff] }
 0x5ac   : > { %10360 = vst [vmem:[#allocation32_spill] sm:$0xff] %v8320_v47  ;;  %v2388_v47 = vld [vmem:[#allocation2 + $0x61] sm:$0xff] }
 0x5b0   : > { %3248 = vrot.lane.b32.xlu1 %v2384_v43, %s5455_s14  ;;  %3180 = vrot.lane.b32.xlu2 %v2382_v63, %s5454_s13 }
 0x5b1   : > { %3176 = vrot.lane.b32.xlu0 %v10361_v32, %s5454_s13 }
 0x5b2   : > { %v8326_v27 = vpop.permute.xlu1 %3036  ;;  %v8328_v51 = vpop.permute.xlu2 %3050 }
 0x5b3   : > { %10362 = vst [vmem:[#allocation50_spill] sm:$0xff] %v8326_v27  ;;  %v8330_v4 = vpop.permute.xlu0 %3028  ;;  %v2422_v27 = vld [vmem:[#allocation2 + $0x7a] sm:$0xff] }
 0x5b4   : > { %10363 = vst [vmem:[#allocation63_spill] sm:$0xff] %v8328_v51  ;;  %v2416_v51 = vld [vmem:[#allocation2 + $0x32] sm:$0xff] }
 0x5b8   : > { %3252 = vrot.lane.b32.xlu1 %v2386_v50, %s5455_s14  ;;  %3250 = vrot.lane.b32.xlu2 %v2385_v46, %s5455_s14 }
 0x5b9   : > { %3182 = vrot.lane.b32.xlu0 %v2383_v6, %s5454_s13 }
 0x5ba   : > { %v8335_v43 = vpop.permute.xlu1 %3042  ;;  %v8337_v63 = vpop.permute.xlu2 %3120 }
 0x5bb   : > { %10364 = vst [vmem:[#allocation84_spill] sm:$0xff] %v8335_v43  ;;  %v8339_v32 = vpop.permute.xlu0 %3034  ;;  %v2390_v43 = vld [vmem:[#allocation2 + $0x79] sm:$0xff] }
 0x5bc   : > { %10365 = vst [vmem:[#allocation103_spill] sm:$0xff] %v8339_v32  ;;  %v2428_v32 = vld [vmem:[#allocation2 + $0xc2] sm:$0xff] }
 0x5c0   : > { %3256 = vrot.lane.b32.xlu1 %v2388_v47, %s5455_s14  ;;  %3254 = vrot.lane.b32.xlu2 %v2387_v8, %s5455_s14 }
 0x5c1   : > { %3376 = vrot.lane.b32.xlu0 %v2416_v51, %s5456_s15 }
 0x5c2   : > { %v8344_v50 = vpop.permute.xlu1 %3048  ;;  %v8346_v46 = vpop.permute.xlu2 %3126 }
 0x5c3   : > { %10366 = vst [vmem:[#allocation111_spill] sm:$0xff] %v8344_v50  ;;  %v8348_v6 = vpop.permute.xlu0 %3040  ;;  %v2402_v50 = vld [vmem:[#allocation2 + $0x109] sm:$0xff] }
 0x5c4   : > { %10367 = vst [vmem:[#allocation27_spill] sm:$0xff] %v8348_v6  ;;  %v2389_v6 = vld [vmem:[#allocation2 + $0x69] sm:$0xff] }
 0x5c8   : > { %3260 = vrot.lane.b32.xlu1 %v2390_v43, %s5455_s14  ;;  %3380 = vrot.lane.b32.xlu2 %v2418_v10, %s5456_s15 }
 0x5c9   : > { %3378 = vrot.lane.b32.xlu0 %v2417_v7, %s5456_s15 }
 0x5ca   : > { %v8353_v47 = vpop.permute.xlu1 %3054  ;;  %v8355_v8 = vpop.permute.xlu2 %3132 }
 0x5cb   : > { %10368 = vst [vmem:[#allocation123_spill] sm:$0xff] %v8353_v47  ;;  %v8357_v51 = vpop.permute.xlu0 %3046  ;;  %v2403_v47 = vld [vmem:[#allocation2 + $0x111] sm:$0xff] }
 0x5cc   : > { %10369 = vst [vmem:[#allocation62_spill] sm:$0xff] %v8357_v51  ;;  %v2391_v51 = vld [vmem:[#allocation2 + $0x81] sm:$0xff] }
 0x5d0   : > { %3284 = vrot.lane.b32.xlu1 %v2402_v50, %s5455_s14  ;;  %3382 = vrot.lane.b32.xlu2 %v2419_v61, %s5456_s15 }
 0x5d1   : > { %3258 = vrot.lane.b32.xlu0 %v2389_v6, %s5455_s14 }
 0x5d2   : > { %v8362_v43 = vpop.permute.xlu1 %3124  ;;  %v8364_v10 = vpop.permute.xlu2 %3138 }
 0x5d3   : > { %10370 = vst [vmem:[#allocation78_spill] sm:$0xff] %v8364_v10  ;;  %v8366_v7 = vpop.permute.xlu0 %3052  ;;  %v2405_v10 = vld [vmem:[#allocation2 + $0x129] sm:$0xff] }
 0x5d4   : > { %10371 = vst [vmem:[#allocation142_spill] sm:$0xff] %v8366_v7  ;;  %v2434_v7 = vld [vmem:[#allocation2 + $0x10a] sm:$0xff] }
 0x5d8   : > { %3286 = vrot.lane.b32.xlu1 %v2403_v47, %s5455_s14  ;;  %3384 = vrot.lane.b32.xlu2 %v2420_v35, %s5456_s15 }
 0x5d9   : > { %3262 = vrot.lane.b32.xlu0 %v2391_v51, %s5455_s14 }
 0x5da   : > { %v8371_v50 = vpop.permute.xlu1 %3130  ;;  %v8373_v61 = vpop.permute.xlu2 %3144 }
 0x5db   : > { %10372 = vst [vmem:[#allocation152_spill] sm:$0xff] %v8373_v61  ;;  %v8375_v6 = vpop.permute.xlu0 %3122  ;;  %v2435_v61 = vld [vmem:[#allocation2 + $0x112] sm:$0xff] }
 0x5e0   : > { %3288 = vrot.lane.b32.xlu1 %v2404_v52, %s5455_s14  ;;  %3386 = vrot.lane.b32.xlu2 %v2421_v20, %s5456_s15 }
 0x5e1   : > { %3412 = vrot.lane.b32.xlu0 %v2434_v7, %s5456_s15 }
 0x5e2   : > { %v8380_v47 = vpop.permute.xlu1 %3136  ;;  %v8382_v35 = vpop.permute.xlu2 %3150 }
 0x5e3   : > { %10373 = vst [vmem:[#allocation166_spill] sm:$0xff] %v8380_v47  ;;  %v8384_v51 = vpop.permute.xlu0 %3128  ;;  %v2392_v47 = vld [vmem:[#allocation2 + $0x91] sm:$0xff] }
 0x5e4   : > { %10374 = vst [vmem:[#allocation168_spill] sm:$0xff] %v8382_v35  ;;  %v2436_v35 = vld [vmem:[#allocation2 + $0x122] sm:$0xff] }
 0x5e8   : > { %3290 = vrot.lane.b32.xlu1 %v2405_v10, %s5455_s14  ;;  %3388 = vrot.lane.b32.xlu2 %v2422_v27, %s5456_s15 }
 0x5e9   : > { %3414 = vrot.lane.b32.xlu0 %v2435_v61, %s5456_s15 }
 0x5ea   : > { %v8389_v52 = vpop.permute.xlu1 %3142  ;;  %v8391_v20 = vpop.permute.xlu2 %3156 }
 0x5eb   : > { %10375 = vst [vmem:[#allocation49_spill] sm:$0xff] %v8389_v52  ;;  %v8393_v7 = vpop.permute.xlu0 %3134  ;;  %v2438_v52 = vld [vmem:[#allocation2 + $0x13a] sm:$0xff] }
 0x5ec   : > { %10376 = vst [vmem:[#allocation92_spill] sm:$0xff] %v8393_v7  ;;  %v2396_v7 = vld [vmem:[#allocation2 + $0xc1] sm:$0xff] }
 0x5f0   : > { %3264 = vrot.lane.b32.xlu1 %v2392_v47, %s5455_s14  ;;  %3390 = vrot.lane.b32.xlu2 %v2423_v58, %s5456_s15 }
 0x5f1   : > { %3416 = vrot.lane.b32.xlu0 %v2436_v35, %s5456_s15 }
 0x5f2   : > { %v8398_v10 = vpop.permute.xlu1 %3148  ;;  %v8400_v27 = vpop.permute.xlu2 %3162 }
 0x5f3   : > { %10377 = vst [vmem:[#allocation105_spill] sm:$0xff] %v8398_v10  ;;  %v8402_v61 = vpop.permute.xlu0 %3140  ;;  %v2425_v10 = vld [vmem:[#allocation2 + $0x9a] sm:$0xff] }
 0x5f4   : > { %10378 = vst [vmem:[#allocation46_spill] sm:$0xff] %v8400_v27 }
 0x5f5   : > { %10379 = vst [vmem:[#allocation130_spill] sm:$0xff] %v8402_v61  ;;  %v2424_v61 = vld [vmem:[#allocation2 + $0x92] sm:$0xff] }
 0x5f8   : > { %3420 = vrot.lane.b32.xlu1 %v2438_v52, %s5456_s15  ;;  %3292 = vrot.lane.b32.xlu2 %v2406_v13, %s5455_s14 }
 0x5f9   : > { %3418 = vrot.lane.b32.xlu0 %v2437_v9, %s5456_s15 }
 0x5fa   : > { %v8407_v47 = vpop.permute.xlu1 %3154  ;;  %v8409_v58 = vpop.permute.xlu2 %3168 }
 0x5fb   : > { %10380 = vst [vmem:[#allocation144_spill] sm:$0xff] %v8407_v47  ;;  %v8411_v35 = vpop.permute.xlu0 %3146  ;;  %v2408_v47 = vld [vmem:[#allocation2 + $0x151] sm:$0xff] }
 0x5fc   : > { %10381 = vst [vmem:[#allocation167_spill] sm:$0xff] %v8409_v58 }
 0x5fd   : > { %10382 = vst [vmem:[#allocation7_spill] sm:$0xff] %v8411_v35  ;;  %v2407_v35 = vld [vmem:[#allocation2 + $0x141] sm:$0xff] }
 0x600   : > { %3394 = vrot.lane.b32.xlu1 %v2425_v10, %s5456_s15  ;;  %3266 = vrot.lane.b32.xlu2 %v2393_v15, %s5455_s14 }
 0x601   : > { %3392 = vrot.lane.b32.xlu0 %v2424_v61, %s5456_s15 }
 0x602   : > { %v8416_v52 = vpop.permute.xlu1 %3160  ;;  %v8418_v13 = vpop.permute.xlu2 %3174 }
 0x603   : > { %10383 = vst [vmem:[#allocation52_spill] sm:$0xff] %v8418_v13  ;;  %v8420_v9 = vpop.permute.xlu0 %3152  ;;  %v3732_v13 = vld [vmem:[%s9755_s3 + $0x20] sm:$0xf] }
 0x604   : > { %10384 = vst [vmem:[#allocation146_spill] sm:$0xff] %v8420_v9  ;;  %v3731_v9 = vld [vmem:[%s9755_s3 + $0x18] sm:$0xff]  ;;  %5243 = vmatpush.msk.msra.mxu1 %vm1964_vm0, %v3732_v13  ;;  %5319 = vmatpush.msk.msra.mxu2 %vm1964_vm0, %v3732_v13  ;;  %v3729_v13 = vld [vmem:[%s9755_s3 + $0x8] sm:$0xff] }
 0x606   : > { %3848 = vmatpush.msra.mxu1 %v3731_v9  ;;  %5320 = vmatpush.msra.mxu2 %v3731_v9  ;;  %v3728_v9 = vld [vmem:[%s9755_s3] sm:$0xff] }
 0x608   : > { %3296 = vrot.lane.b32.xlu1 %v2408_v47, %s5455_s14  ;;  %3422 = vrot.lane.b32.xlu2 %v2439_v26, %s5456_s15  ;;  %v3730_v26 = vld [vmem:[%s9755_s3 + $0x10] sm:$0xff] }
 0x609   : > { %3294 = vrot.lane.b32.xlu0 %v2407_v35, %s5455_s14  ;;  %v2395_v47 = vld [vmem:[#allocation2 + $0xb1] sm:$0xff]  ;;  %3849 = vmatpush.msra.mxu1 %v3730_v26 }
 0x60a   : > { %v8425_v10 = vpop.permute.xlu1 %3166  ;;  %v8427_v15 = vpop.permute.xlu2 %3180  ;;  %v2426_v35 = vld [vmem:[#allocation2 + $0xaa] sm:$0xff]  ;;  %5321 = vmatpush.msra.mxu2 %v3730_v26 }
 0x60b   : > { %10385 = vst [vmem:[#allocation151_spill] sm:$0xff] %v8425_v10  ;;  %v8429_v61 = vpop.permute.xlu0 %3158  ;;  %3850 = vmatpush.msra.mxu1 %v3729_v13 }
 0x60c   : > { %10386 = vst [vmem:[#allocation48_spill] sm:$0xff] %v8427_v15  ;;  %v2394_v15 = vld [vmem:[#allocation2 + $0xa9] sm:$0xff]  ;;  %5322 = vmatpush.msra.mxu2 %v3729_v13  ;;  %v2427_v13 = vld [vmem:[#allocation2 + $0xb2] sm:$0xff] }
 0x60d   : > { %3851 = vmatpush.msra.mxu1 %v3728_v9 }
 0x60e   : > { %5323 = vmatpush.msra.mxu2 %v3728_v9 }
 0x610   : > { %3270 = vrot.lane.b32.xlu1 %v2395_v47, %s5455_s14  ;;  %3396 = vrot.lane.b32.xlu2 %v2426_v35, %s5456_s15  ;;  %v2409_v47 = vld [vmem:[#allocation2 + $0x159] sm:$0xff] }
 0x611   : > { %3268 = vrot.lane.b32.xlu0 %v2394_v15, %s5455_s14  ;;  %v2441_v15 = vld [vmem:[#allocation2 + $0x15a] sm:$0xff]  ;;  %v2440_v35 = vld [vmem:[#allocation2 + $0x152] sm:$0xff] }
 0x612   : > { %v8448_v58 = vpop.permute.xlu1 %3172  ;;  %v8450_v10 = vpop.permute.xlu2 %3250 }
 0x613   : > { %10387 = vst [vmem:[#allocation69_spill] sm:$0xff] %v8448_v58  ;;  %v8452_v27 = vpop.permute.xlu0 %3164 }
 0x614   : > { %10388 = vst [vmem:[#allocation135_spill] sm:$0xff] %v8452_v27 }
 0x618   : > { %3426 = vrot.lane.b32.xlu1 %v2441_v15, %s5456_s15  ;;  %3298 = vrot.lane.b32.xlu2 %v2409_v47, %s5455_s14 }
 0x619   : > { %3424 = vrot.lane.b32.xlu0 %v2440_v35, %s5456_s15  ;;  %v2411_v35 = vld [vmem:[#allocation2 + $0x171] sm:$0xff] }
 0x61a   : > { %v8460_v26 = vpop.permute.xlu1 %3178  ;;  %v8462_v58 = vpop.permute.xlu2 %3254 }
 0x61b   : > { %10389 = vst [vmem:[#allocation98_spill] sm:$0xff] %v8460_v26  ;;  %v8464_v27 = vpop.permute.xlu0 %3170  ;;  %v2442_v26 = vld [vmem:[#allocation2 + $0x16a] sm:$0xff] }
 0x61c   : > { %10390 = vst [vmem:[#allocation137_spill] sm:$0xff] %v8464_v27  ;;  %v2410_v27 = vld [vmem:[#allocation2 + $0x169] sm:$0xff] }
 0x620   : > { %3400 = vrot.lane.b32.xlu1 %v2428_v32, %s5456_s15  ;;  %3272 = vrot.lane.b32.xlu2 %v2396_v7, %s5455_s14  ;;  %v2159_v32 = vld [vmem:[#allocation2] sm:$0xff] }
 0x621   : > { %3398 = vrot.lane.b32.xlu0 %v2427_v13, %s5456_s15  ;;  %v10393_v13 = vld [vmem:[#allocation9_spill] sm:$0xff] }
 0x622   : > { %v3249_v9 = vpop.permute.xlu1 %3248  ;;  %v8469_v15 = vpop.permute.xlu2 %3380  ;;  %v3472_v55 = vsel %vm1594_vm1, %v2159_v32, %v10393_v13  ;;  %v2160_v32 = vld [vmem:[#allocation2 + $0x8] sm:$0xff] }
 0x623   : > { %v8471_v47 = vpop.permute.xlu0 %3176  ;;  %v10395_v13 = vld [vmem:[#allocation13_spill] sm:$0xff] }
 0x624   : > { %10391 = vst [vmem:[#allocation124_spill] sm:$0xff] %v8471_v47  ;;  %v3504_v47 = vsel %vm1627_vm2, %v3472_v55, %v10394_v2 }
 0x628   : > { %3302 = vrot.lane.b32.xlu1 %v2411_v35, %s5455_s14  ;;  %3428 = vrot.lane.b32.xlu2 %v2442_v26, %s5456_s15  ;;  %v3536_v35 = vsel %vm1660_vm3, %v3504_v47, %v7958_v21  ;;  %v2429_v26 = vld [vmem:[#allocation2 + $0xca] sm:$0xff] }
 0x629   : > { %3300 = vrot.lane.b32.xlu0 %v2410_v27, %s5455_s14  ;;  %v3568_v27 = vsel %vm1693_vm5, %v3536_v35, %v8116_v60  ;;  %v3473_v35 = vsel %vm1594_vm1, %v2160_v32, %v10395_v13 }
 0x62a   : > { %v3253_v11 = vpop.permute.xlu1 %3252  ;;  %v8476_v7 = vpop.permute.xlu2 %3382 }
 0x62b   : > { %v8478_v3 = vpop.permute.xlu0 %3182 }
 0x62c   : > { %10392 = vst [vmem:[#allocation129_spill] sm:$0xff] %v8478_v3  ;;  %v3600_v3 = vsel %vm1726_vm4, %v3568_v27, %v8260_v23  ;;  %v10396_v23 = vld [vmem:[#allocation116_spill] sm:$0xff] }
 0x62d   : > { %v3632_v55 = vsel %vm1759_vm6, %v3600_v3, %v8337_v63 }
 0x62e   : > { %v3664_v60 = vsel %vm1792_vm8, %v3632_v55, %v3249_v9  ;;  %v2443_v9 = vld [vmem:[#allocation2 + $0x172] sm:$0xff] }
 0x62f   : > { %v10398_v55 = vld [vmem:[#allocation122_spill] sm:$0xff] }
 0x630   : > { %3276 = vrot.lane.b32.xlu1 %v2398_v24, %s5455_s14  ;;  %3402 = vrot.lane.b32.xlu2 %v2429_v26, %s5456_s15 }
 0x631   : > { %3274 = vrot.lane.b32.xlu0 %v2397_v57, %s5455_s14  ;;  %v3505_v57 = vsel %vm1627_vm2, %v3473_v35, %v10396_v23  ;;  %v2431_v23 = vld [vmem:[#allocation2 + $0xe2] sm:$0xff] }
 0x632   : > { %v8495_v21 = vpop.permute.xlu1 %3256  ;;  %v8497_v2 = vpop.permute.xlu2 %3384  ;;  %v3537_v3 = vsel %vm1660_vm3, %v3505_v57, %v8008_v14  ;;  %v2399_v57 = vld [vmem:[#allocation2 + $0xe1] sm:$0xff] }
 0x633   : > { %v3377_v47 = vpop.permute.xlu0 %3376  ;;  %v3569_v63 = vsel %vm1693_vm5, %v3537_v3, %v8094_v44  ;;  %v10397_v44 = vld [vmem:[#allocation6_spill] sm:$0xff]  ;;  %v2430_v3 = vld [vmem:[#allocation2 + $0xda] sm:$0xff] }
 0x634   : > { %v3696_v24 = vsel %vm1825_vm7, %v3664_v60, %v3377_v47  ;;  %v3601_v26 = vsel %vm1726_vm4, %v3569_v63, %v8244_v36  ;;  %v10399_v47 = vld [vmem:[#allocation35_spill] sm:$0xff] }
 0x635   : > { %5244 = vmatmul.msk.f32.vlgmr.msra.gmra.mxu1 %vm1867_vm9, %v3696_v24  ;;  %v3633_v27 = vsel %vm1759_vm6, %v3601_v26, %v8375_v6  ;;  %v10400_v26 = vld [vmem:[#allocation12_spill] sm:$0xff] }
 0x638   : > { %3432 = vrot.lane.b32.xlu1 %v8210_v12, %s5456_s15  ;;  %3304 = vrot.lane.b32.xlu2 %v8058_v30, %s5455_s14  ;;  %v3474_v12 = vsel %vm1594_vm1, %v10398_v55, %v10397_v44  ;;  %v3665_v30 = vsel %vm1792_vm8, %v3633_v27, %v8450_v10  ;;  %v10401_v27 = vld [vmem:[#allocation159_spill] sm:$0xff]  ;;  %v10402_v55 = vld [vmem:[#allocation118_spill] sm:$0xff] }
 0x639   : > { %3430 = vrot.lane.b32.xlu0 %v2443_v9, %s5456_s15  ;;  %v3506_v36 = vsel %vm1627_vm2, %v3474_v12, %v10399_v47  ;;  %v2414_v44 = vld [vmem:[#allocation2 + $0x199] sm:$0xff] }
 0x63a   : > { %v8519_v32 = vpop.permute.xlu1 %3260  ;;  %v8521_v14 = vpop.permute.xlu2 %3386  ;;  %v3538_v6 = vsel %vm1660_vm3, %v3506_v36, %v7992_v41  ;;  %v5415_v36 = vld [vmem:[#allocation2 + $0x30] sm:$0xff] }
 0x63b   : > { %v3379_v60 = vpop.permute.xlu0 %3378  ;;  %v3570_v13 = vsel %vm1693_vm5, %v3538_v6, %v8144_v49 }
 0x63c   : > { %v3697_v24 = vsel %vm1825_vm7, %v3665_v30, %v3379_v60  ;;  %v3602_v35 = vsel %vm1726_vm4, %v3570_v13, %v8226_v39 }
 0x63d   : > { %5245 = vmatmul.msk.f32.gmra.mxu1 %vm1867_vm9, %v3697_v24  ;;  %v3634_v10 = vsel %vm1759_vm6, %v3602_v35, %v8362_v43  ;;  %v3475_v43 = vsel %vm1594_vm1, %v10401_v27, %v10400_v26  ;;  %v10405_v35 = vld [vmem:[#allocation19_spill] sm:$0xff] }
 0x63e   : > { %v3666_v41 = vsel %vm1792_vm8, %v3634_v10, %v3253_v11  ;;  %v3507_v11 = vsel %vm1627_vm2, %v3475_v43, %v10402_v55  ;;  %v10406_v26 = vld [vmem:[#allocation43_spill] sm:$0xff] }
 0x63f   : > { %v3698_v39 = vsel %vm1825_vm7, %v3666_v41, %v8469_v15  ;;  %v3539_v12 = vsel %vm1660_vm3, %v3507_v11, %v7970_v56  ;;  %v10403_v56 = vld [vmem:[#allocation55_spill] sm:$0xff] }
 0x640   : > { %3406 = vrot.lane.b32.xlu1 %v2431_v23, %s5456_s15  ;;  %3278 = vrot.lane.b32.xlu2 %v2399_v57, %s5455_s14  ;;  %v3571_v30 = vsel %vm1693_vm5, %v3539_v12, %v8128_v28  ;;  %v3476_v24 = vsel %vm1594_vm1, %v5415_v36, %v10403_v56  ;;  %v2432_v41 = vld [vmem:[#allocation2 + $0xf2] sm:$0xff]  ;;  %v2446_v56 = vld [vmem:[#allocation2 + $0x19a] sm:$0xff] }
 0x641   : > { %3404 = vrot.lane.b32.xlu0 %v2430_v3, %s5456_s15  ;;  %v3603_v15 = vsel %vm1726_vm4, %v3571_v30, %v8272_v45  ;;  %v2401_v3 = vld [vmem:[#allocation2 + $0xf9] sm:$0xff]  ;;  %v2415_v30 = vld [vmem:[#allocation2 + $0x1a1] sm:$0xff] }
 0x642   : > { %v3285_v63 = vpop.permute.xlu1 %3284  ;;  %v8544_v9 = vpop.permute.xlu2 %3388  ;;  %v3635_v60 = vsel %vm1759_vm6, %v3603_v15, %v8346_v46  ;;  %v3490_v46 = vsel %vm1594_vm1, %v10336_v42, %v10405_v35  ;;  %v10408_v11 = vld [vmem:[#allocation31_spill] sm:$0xff]  ;;  %v10409_v15 = vld [vmem:[#allocation21_spill] sm:$0xff] }
 0x643   : > { %v8546_v49 = vpop.permute.xlu0 %3258  ;;  %v3667_v28 = vsel %vm1792_vm8, %v3635_v60, %v8462_v58  ;;  %v3522_v58 = vsel %vm1627_vm2, %v3490_v46, %v7946_v37  ;;  %v2400_v37 = vld [vmem:[#allocation2 + $0xf1] sm:$0xff]  ;;  %v5417_v35 = vld [vmem:[#allocation2 + $0x48] sm:$0xff] }
 0x644   : > { %v3554_v10 = vsel %vm1660_vm3, %v3522_v58, %v8030_v59  ;;  %v10410_v46 = vld [vmem:[#allocation5_spill] sm:$0xff] }
 0x645   : > { %5246 = vmatmul.msk.f32.gmra.mxu1 %vm1867_vm9, %v3698_v39  ;;  %v3586_v42 = vsel %vm1693_vm5, %v3554_v10, %v8188_v38  ;;  %v5416_v39 = vld [vmem:[#allocation2 + $0x38] sm:$0xff] }
 0x648   : > { %3308 = vrot.lane.b32.xlu1 %v2414_v44, %s5455_s14  ;;  %3434 = vrot.lane.b32.xlu2 %v8194_v17, %s5456_s15  ;;  %v10404_v17 = vld [vmem:[#allocation158_spill] sm:$0xff]  ;;  %v10407_v44 = vld [vmem:[#allocation91_spill] sm:$0xff] }
 0x649   : > { %3306 = vrot.lane.b32.xlu0 %v8072_v62, %s5455_s14  ;;  %v3508_v13 = vsel %vm1627_vm2, %v3476_v24, %v10404_v17  ;;  %v3699_v62 = vsel %vm1825_vm7, %v3667_v28, %v8476_v7 }
 0x64a   : > { %v3287_v47 = vpop.permute.xlu1 %3286  ;;  %v8577_v45 = vpop.permute.xlu2 %3390  ;;  %v3540_v23 = vsel %vm1660_vm3, %v3508_v13, %v8020_v1 }
 0x64b   : > { %v8573_v6 = vpop.permute.xlu0 %3262  ;;  %v3572_v57 = vsel %vm1693_vm5, %v3540_v23, %v8106_v16  ;;  %v3618_v16 = vsel %vm1726_vm4, %v3586_v42, %v8330_v4  ;;  %v5418_v23 = vld [vmem:[#allocation2 + $0xf0] sm:$0xff] }
 0x64c   : > { %v3604_v7 = vsel %vm1726_vm4, %v3572_v57, %v8256_v48  ;;  %v3650_v48 = vsel %vm1759_vm6, %v3618_v16, %v8391_v20  ;;  %v3491_v20 = vsel %vm1594_vm1, %v10341_v25, %v10408_v11  ;;  %v10413_v57 = vld [vmem:[#allocation107_spill] sm:$0xff] }
 0x64d   : > { %5247 = vmatmul.msk.f32.gmra.mxu1 %vm1867_vm9, %v3699_v62  ;;  %v3636_v1 = vsel %vm1759_vm6, %v3604_v7, %v8384_v51  ;;  %v3477_v51 = vsel %vm1594_vm1, %v5416_v39, %v10406_v26  ;;  %v3682_v27 = vsel %vm1792_vm8, %v3650_v48, %v3285_v63  ;;  %v2447_v63 = vld [vmem:[#allocation2 + $0x1a2] sm:$0xff]  ;;  %v3523_v60 = vsel %vm1627_vm2, %v3491_v20, %v10409_v15 }
 0x64e   : > { %v3668_v59 = vsel %vm1792_vm8, %v3636_v1, %v8495_v21  ;;  %v3509_v55 = vsel %vm1627_vm2, %v3477_v51, %v10407_v44  ;;  %v3555_v25 = vsel %vm1660_vm3, %v3523_v60, %v8084_v40  ;;  %v2433_v1 = vld [vmem:[#allocation2 + $0xfa] sm:$0xff] }
 0x64f   : > { %v3700_v4 = vsel %vm1825_vm7, %v3668_v59, %v8497_v2  ;;  %v3541_v12 = vsel %vm1660_vm3, %v3509_v55, %v8004_v54  ;;  %v3587_v24 = vsel %vm1693_vm5, %v3555_v25, %v8166_v5  ;;  %v5419_v59 = vld [vmem:[#allocation2 + $0x50] sm:$0xff]  ;;  %v10423_v60 = vld [vmem:[#allocation92_spill] sm:$0xff] }
 0x650   : > { %3282 = vrot.lane.b32.xlu1 %v2401_v3, %s5455_s14  ;;  %3408 = vrot.lane.b32.xlu2 %v2432_v41, %s5456_s15  ;;  %v3573_v2 = vsel %vm1693_vm5, %v3541_v12, %v8156_v53  ;;  %v3619_v53 = vsel %vm1726_vm4, %v3587_v24, %v8316_v0  ;;  %v3478_v0 = vsel %vm1594_vm1, %v5417_v35, %v10410_v46  ;;  %v10417_v55 = vld [vmem:[#allocation110_spill] sm:$0xff]  ;;  %v10421_v12 = vld [vmem:[#allocation104_spill] sm:$0xff]  ;;  %v10426_v35 = vld [vmem:[#allocation65_spill] sm:$0xff] }
 0x651   : > { %3280 = vrot.lane.b32.xlu0 %v2400_v37, %s5455_s14  ;;  %v3605_v54 = vsel %vm1726_vm4, %v3573_v2, %v8236_v19  ;;  %v3651_v40 = vsel %vm1759_vm6, %v3619_v53, %v8429_v61  ;;  %v10412_v61 = vld [vmem:[#allocation22_spill] sm:$0xff] }
 0x652   : > { %v3289_v38 = vpop.permute.xlu1 %3288  ;;  %v8627_v36 = vpop.permute.xlu2 %3292  ;;  %v3637_v28 = vsel %vm1759_vm6, %v3605_v54, %v8371_v50  ;;  %v3683_v5 = vsel %vm1792_vm8, %v3651_v40, %v3287_v47  ;;  %v3510_v47 = vsel %vm1627_vm2, %v3478_v0, %v10412_v61  ;;  %v10425_v24 = vld [vmem:[#allocation46_spill] sm:$0xff]  ;;  %v5422_v0 = vld [vmem:[#allocation2 + $0x108] sm:$0xff]  ;;  %v10430_v61 = vld [vmem:[#allocation76_spill] sm:$0xff] }
 0x653   : > { %v3413_v43 = vpop.permute.xlu0 %3412  ;;  %v3669_v17 = vsel %vm1792_vm8, %v3637_v28, %v8546_v49  ;;  %v10411_v49 = vld [vmem:[#allocation145_spill] sm:$0xff]  ;;  %v3542_v10 = vsel %vm1660_vm3, %v3510_v47, %v7982_v34 }
 0x654   : > { %v3714_v21 = vsel %vm1825_vm7, %v3682_v27, %v3413_v43  ;;  %v3701_v50 = vsel %vm1825_vm7, %v3669_v17, %v8521_v14  ;;  %v3492_v58 = vsel %vm1594_vm1, %v5418_v23, %v10411_v49  ;;  %v3574_v3 = vsel %vm1693_vm5, %v3542_v10, %v8140_v22  ;;  %v10416_v43 = vld [vmem:[#allocation106_spill] sm:$0xff]  ;;  %v10427_v23 = vld [vmem:[#allocation64_spill] sm:$0xff]  ;;  %v10428_v49 = vld [vmem:[#allocation121_spill] sm:$0xff] }
 0x655   : > { %5248 = vmatmul.msk.f32.gmra.mxu1 %vm1867_vm9, %v3700_v4  ;;  %5262 = vmatmul.msk.f32.vlgmr.msra.gmra.mxu2 %vm1867_vm9, %v3714_v21  ;;  %v3524_v14 = vsel %vm1627_vm2, %v3492_v58, %v10413_v57  ;;  %v3606_v37 = vsel %vm1726_vm4, %v3574_v3, %v8284_v18  ;;  %v10419_v21 = vld [vmem:[#allocation23_spill] sm:$0xff]  ;;  %v10429_v58 = vld [vmem:[#allocation93_spill] sm:$0xff] }
 0x656   : > { %v3556_v7 = vsel %vm1660_vm3, %v3524_v14, %v8066_v29  ;;  %v3638_v34 = vsel %vm1759_vm6, %v3606_v37, %v8355_v8  ;;  %v10431_v57 = vld [vmem:[#allocation79_spill] sm:$0xff]  ;;  %v10432_v10 = vld [vmem:[#allocation25_spill] sm:$0xff] }
 0x657   : > { %v3588_v41 = vsel %vm1693_vm5, %v3556_v7, %v8218_v33  ;;  %v10414_v33 = vld [vmem:[#allocation54_spill] sm:$0xff]  ;;  %v3670_v39 = vsel %vm1792_vm8, %v3638_v34, %v8519_v32  ;;  %v10433_v3 = vld [vmem:[#allocation81_spill] sm:$0xff] }
 0x658   : > { %3438 = vrot.lane.b32.xlu1 %v2447_v63, %s5456_s15  ;;  %3310 = vrot.lane.b32.xlu2 %v2415_v30, %s5455_s14  ;;  %v3620_v16 = vsel %vm1726_vm4, %v3588_v41, %v8294_v31  ;;  %v3479_v48 = vsel %vm1594_vm1, %v5419_v59, %v10414_v33  ;;  %v10415_v31 = vld [vmem:[#allocation108_spill] sm:$0xff]  ;;  %v3702_v8 = vsel %vm1825_vm7, %v3670_v39, %v8544_v9  ;;  %v10418_v32 = vld [vmem:[#allocation42_spill] sm:$0xff]  ;;  %v10422_v30 = vld [vmem:[#allocation29_spill] sm:$0xff]  ;;  %s5461_s14 = smov 92  }
 0x659   : > { %3436 = vrot.lane.b32.xlu0 %v2446_v56, %s5456_s15  ;;  %v3652_v29 = vsel %vm1759_vm6, %v3620_v16, %v8416_v52  ;;  %v3511_v51 = vsel %vm1627_vm2, %v3479_v48, %v10415_v31  ;;  %v5420_v52 = vld [vmem:[#allocation2 + $0xf8] sm:$0xff]  ;;  %v10420_v9 = vld [vmem:[#allocation28_spill] sm:$0xff]  ;;  %v10435_v16 = vld [vmem:[#allocation50_spill] sm:$0xff] }
 0x65a   : > { %v3291_v19 = vpop.permute.xlu1 %3290  ;;  %v8668_v42 = vpop.permute.xlu2 %3266  ;;  %v3684_v18 = vsel %vm1792_vm8, %v3652_v29, %v3289_v38  ;;  %v3493_v44 = vsel %vm1594_vm1, %v5420_v52, %v10416_v43  ;;  %v3543_v4 = vsel %vm1660_vm3, %v3511_v51, %v10417_v55  ;;  %v10424_v56 = vld [vmem:[#allocation103_spill] sm:$0xff]  ;;  %v10436_v29 = vld [vmem:[#allocation166_spill] sm:$0xff]  ;;  %v5423_v52 = vld [vmem:[#allocation2 + $0x68] sm:$0xff] }
 0x65b   : > { %v3415_v13 = vpop.permute.xlu0 %3414  ;;  %v3525_v38 = vsel %vm1627_vm2, %v3493_v44, %v10418_v32  ;;  %v3575_v11 = vsel %vm1693_vm5, %v3543_v4, %v10419_v21  ;;  %v10437_v33 = vld [vmem:[#allocation135_spill] sm:$0xff]  ;;  %v5424_v55 = vld [vmem:[#allocation2 + $0x110] sm:$0xff]  ;;  %v10440_v32 = vld [vmem:[#allocation120_spill] sm:$0xff] }
 0x65c   : > { %v3715_v62 = vsel %vm1825_vm7, %v3683_v5, %v3415_v13  ;;  %v3557_v20 = vsel %vm1660_vm3, %v3525_v38, %v10420_v9  ;;  %v3607_v63 = vsel %vm1726_vm4, %v3575_v11, %v10421_v12  ;;  %v10438_v43 = vld [vmem:[#allocation59_spill] sm:$0xff]  ;;  %v10441_v38 = vld [vmem:[#allocation136_spill] sm:$0xff] }
 0x65d   : > { %5249 = vmatmul.msk.f32.gmra.mxu1 %vm1867_vm9, %v3701_v50  ;;  %5263 = vmatmul.msk.f32.gmra.mxu2 %vm1867_vm9, %v3715_v62  ;;  %v3589_v15 = vsel %vm1693_vm5, %v3557_v20, %v10422_v30  ;;  %v3639_v2 = vsel %vm1759_vm6, %v3607_v63, %v10423_v60  ;;  %v5421_v62 = vld [vmem:[#allocation2 + $0x60] sm:$0xff]  ;;  %v3481_v44 = vsel %vm1594_vm1, %v5423_v52, %v10438_v43  ;;  %v10439_v4 = vld [vmem:[#allocation71_spill] sm:$0xff]  ;;  %v10443_v20 = vld [vmem:[#allocation26_spill] sm:$0xff] }
 0x65e   : > { %v3621_v25 = vsel %vm1726_vm4, %v3589_v15, %v10424_v56  ;;  %v3671_v54 = vsel %vm1792_vm8, %v3639_v2, %v8573_v6  ;;  %v3480_v46 = vsel %vm1594_vm1, %v5421_v62, %v10426_v35  ;;  %v3494_v6 = vsel %vm1594_vm1, %v5422_v0, %v10427_v23  ;;  %v10442_v11 = vld [vmem:[#allocation160_spill] sm:$0xff]  ;;  %v10444_v63 = vld [vmem:[#allocation149_spill] sm:$0xff]  ;;  %v10445_v15 = vld [vmem:[#allocation163_spill] sm:$0xff] }
 0x65f   : > { %v3653_v28 = vsel %vm1759_vm6, %v3621_v25, %v10425_v24  ;;  %v3703_v13 = vsel %vm1825_vm7, %v3671_v54, %v8577_v45  ;;  %v3526_v45 = vsel %vm1627_vm2, %v3494_v6, %v10429_v58  ;;  %v10446_v2 = vld [vmem:[#allocation127_spill] sm:$0xff]  ;;  %v10447_v25 = vld [vmem:[#allocation153_spill] sm:$0xff]  ;;  %v10448_v24 = vld [vmem:[#allocation78_spill] sm:$0xff] }
 0x660   : > { %v3685_v40 = vsel %vm1792_vm8, %v3653_v28, %v3291_v19  ;;  %v3512_v19 = vsel %vm1627_vm2, %v3480_v46, %v10428_v49  ;;  %v3558_v14 = vsel %vm1660_vm3, %v3526_v45, %v10431_v57  ;;  %v5425_v0 = vld [vmem:[#allocation2 + $0x78] sm:$0xff]  ;;  %v10450_v23 = vld [vmem:[#allocation38_spill] sm:$0xff] }
 0x661   : > { %3410 = vrot.lane.b32.xlu0 %v2433_v1, %s5456_s15  ;;  %v3544_v47 = vsel %vm1660_vm3, %v3512_v19, %v10430_v61  ;;  %v3590_v41 = vsel %vm1693_vm5, %v3558_v14, %v10433_v3  ;;  %v10434_v1 = vld [vmem:[#allocation30_spill] sm:$0xff]  ;;  %v3482_v6 = vsel %vm1594_vm1, %v5425_v0, %v10450_v23  ;;  %v10451_v19 = vld [vmem:[#allocation148_spill] sm:$0xff]  ;;  %v10453_v61 = vld [vmem:[#allocation51_spill] sm:$0xff]  ;;  %s5462_s15 = smov 48  }
 0x662   : > { %v3265_v22 = vpop.permute.xlu1 %3264  ;;  %v3423_v53 = vpop.permute.xlu2 %3422  ;;  %v3576_v7 = vsel %vm1693_vm5, %v3544_v47, %v10432_v10  ;;  %v3622_v34 = vsel %vm1726_vm4, %v3590_v41, %v10435_v16  ;;  %v3514_v58 = vsel %vm1627_vm2, %v3482_v6, %v10451_v19  ;;  %v10454_v57 = vld [vmem:[#allocation115_spill] sm:$0xff]  ;;  %v10455_v10 = vld [vmem:[#allocation130_spill] sm:$0xff] }
 0x663   : > { %v3417_v26 = vpop.permute.xlu0 %3416  ;;  %v3608_v37 = vsel %vm1726_vm4, %v3576_v7, %v10434_v1  ;;  %v3654_v48 = vsel %vm1759_vm6, %v3622_v34, %v10437_v33  ;;  %v5426_v1 = vld [vmem:[#allocation2 + $0x120] sm:$0xff] }
 0x664   : > { %v3716_v27 = vsel %vm1825_vm7, %v3684_v18, %v3417_v26  ;;  %v3640_v59 = vsel %vm1759_vm6, %v3608_v37, %v10436_v29  ;;  %v3686_v18 = vsel %vm1792_vm8, %v3654_v48, %v8627_v36  ;;  %v3495_v36 = vsel %vm1594_vm1, %v5424_v55, %v10439_v4  ;;  %v10456_v37 = vld [vmem:[#allocation133_spill] sm:$0xff]  ;;  %v10457_v29 = vld [vmem:[#allocation126_spill] sm:$0xff]  ;;  %v10458_v33 = vld [vmem:[#allocation140_spill] sm:$0xff] }
 0x665   : > { %5250 = vmatmul.msk.f32.gmra.mxu1 %vm1867_vm9, %v3702_v8  ;;  %5264 = vmatmul.msk.f32.gmra.mxu2 %vm1867_vm9, %v3716_v27  ;;  %v3672_v26 = vsel %vm1792_vm8, %v3640_v59, %v3265_v22  ;;  %v3513_v22 = vsel %vm1627_vm2, %v3481_v44, %v10440_v32  ;;  %v3527_v21 = vsel %vm1627_vm2, %v3495_v36, %v10441_v38  ;;  %v5427_v4 = vld [vmem:[#allocation2 + $0x80] sm:$0xff]  ;;  %v10462_v36 = vld [vmem:[#allocation134_spill] sm:$0xff]  ;;  %v10463_v38 = vld [vmem:[#allocation157_spill] sm:$0xff] }
 0x666   : > { %v3545_v9 = vsel %vm1660_vm3, %v3513_v22, %v10442_v11  ;;  %v3559_v12 = vsel %vm1660_vm3, %v3527_v21, %v10443_v20  ;;  %v3496_v16 = vsel %vm1594_vm1, %v5426_v1, %v10456_v37  ;;  %v3483_v32 = vsel %vm1594_vm1, %v5427_v4, %v10462_v36  ;;  %v5428_v22 = vld [vmem:[#allocation2 + $0x128] sm:$0xff]  ;;  %v10464_v11 = vld [vmem:[#allocation8_spill] sm:$0xff]  ;;  %v10465_v20 = vld [vmem:[#allocation119_spill] sm:$0xff] }
 0x667   : > { %v3577_v30 = vsel %vm1693_vm5, %v3545_v9, %v10444_v63  ;;  %v3591_v60 = vsel %vm1693_vm5, %v3559_v12, %v10445_v15  ;;  %v3528_v59 = vsel %vm1627_vm2, %v3496_v16, %v10457_v29  ;;  %v3497_v21 = vsel %vm1594_vm1, %v5428_v22, %v10463_v38  ;;  %v10466_v63 = vld [vmem:[#allocation101_spill] sm:$0xff]  ;;  %v10479_v1 = vld [vmem:[#allocation58_spill] sm:$0xff]  ;;  %v5431_v22 = vld [vmem:[#allocation2 + $0x98] sm:$0xff] }
 0x668   : > { %v3609_v56 = vsel %vm1726_vm4, %v3577_v30, %v10446_v2  ;;  %v3623_v54 = vsel %vm1726_vm4, %v3591_v60, %v10447_v25  ;;  %v3560_v48 = vsel %vm1660_vm3, %v3528_v59, %v10458_v33  ;;  %v3515_v9 = vsel %vm1627_vm2, %v3483_v32, %v10464_v11  ;;  %v10467_v15 = vld [vmem:[#allocation109_spill] sm:$0xff]  ;;  %v10468_v2 = vld [vmem:[#allocation90_spill] sm:$0xff]  ;;  %v10482_v33 = vld [vmem:[#allocation156_spill] sm:$0xff] }
 0x669   : > { %v3641_v28 = vsel %vm1759_vm6, %v3609_v56, %v10448_v24  ;;  %v3529_v12 = vsel %vm1627_vm2, %v3497_v21, %v10465_v20  ;;  %v3547_v30 = vsel %vm1660_vm3, %v3515_v9, %v10466_v63  ;;  %v10469_v25 = vld [vmem:[#allocation94_spill] sm:$0xff]  ;;  %v10470_v24 = vld [vmem:[#allocation89_spill] sm:$0xff]  ;;  %v10486_v38 = vld [vmem:[#allocation60_spill] sm:$0xff] }
 0x66a   : > { %v3421_v17 = vpop.permute.xlu1 %3420  ;;  %v3397_v51 = vpop.permute.xlu2 %3396  ;;  %v3561_v60 = vsel %vm1660_vm3, %v3529_v12, %v10467_v15  ;;  %v3579_v56 = vsel %vm1693_vm5, %v3547_v30, %v10468_v2  ;;  %v10480_v16 = vld [vmem:[#allocation34_spill] sm:$0xff]  ;;  %v3485_v21 = vsel %vm1594_vm1, %v5431_v22, %v10486_v38  ;;  %v10487_v11 = vld [vmem:[#allocation97_spill] sm:$0xff]  ;;  %v10489_v12 = vld [vmem:[#allocation139_spill] sm:$0xff] }
 0x66b   : > { %v3419_v5 = vpop.permute.xlu0 %3418  ;;  %v3718_v27 = vsel %vm1825_vm7, %v3686_v18, %v3421_v17  ;;  %v10481_v29 = vld [vmem:[#allocation14_spill] sm:$0xff]  ;;  %v3517_v9 = vsel %vm1627_vm2, %v3485_v21, %v10487_v11  ;;  %v10490_v30 = vld [vmem:[#allocation73_spill] sm:$0xff]  ;;  %v10491_v2 = vld [vmem:[#allocation7_spill] sm:$0xff] }
 0x66c   : > { %v3717_v50 = vsel %vm1825_vm7, %v3685_v40, %v3419_v5  ;;  %v10449_v40 = vld [vmem:[#allocation151_spill] sm:$0xff] }
 0x66d   : > { %5251 = vmatmul.msk.f32.gmra.mxu1 %vm1867_vm9, %v3703_v13  ;;  %5265 = vmatmul.msk.f32.gmra.mxu2 %vm1867_vm9, %v3717_v50  ;;  %v3655_v5 = vsel %vm1759_vm6, %v3623_v54, %v10449_v40  ;;  %v3673_v13 = vsel %vm1792_vm8, %v3641_v28, %v8668_v42  ;;  %v10452_v42 = vld [vmem:[#allocation72_spill] sm:$0xff]  ;;  %v3593_v54 = vsel %vm1693_vm5, %v3561_v60, %v10469_v25 }
 0x66e   : > { %v3546_v45 = vsel %vm1660_vm3, %v3514_v58, %v10452_v42  ;;  %v3611_v28 = vsel %vm1726_vm4, %v3579_v56, %v10470_v24  ;;  %v5429_v42 = vld [vmem:[#allocation2 + $0x90] sm:$0xff]  ;;  %v5432_v24 = vld [vmem:[#allocation2 + $0x140] sm:$0xff] }
 0x66f   : > { %v3578_v47 = vsel %vm1693_vm5, %v3546_v45, %v10453_v61  ;;  %v10474_v45 = vld [vmem:[#allocation15_spill] sm:$0xff] }
 0x670   : > { %v3610_v14 = vsel %vm1726_vm4, %v3578_v47, %v10454_v57  ;;  %v3484_v61 = vsel %vm1594_vm1, %v5429_v42, %v10474_v45  ;;  %v5430_v47 = vld [vmem:[#allocation2 + $0x138] sm:$0xff]  ;;  %v10475_v57 = vld [vmem:[#allocation96_spill] sm:$0xff] }
 0x671   : > { %v3642_v7 = vsel %vm1759_vm6, %v3610_v14, %v10455_v10  ;;  %v3498_v14 = vsel %vm1594_vm1, %v5430_v47, %v10475_v57  ;;  %v10477_v10 = vld [vmem:[#allocation39_spill] sm:$0xff]  ;;  %v5433_v57 = vld [vmem:[#allocation2 + $0xa8] sm:$0xff] }
 0x672   : > { %v3395_v39 = vpop.permute.xlu1 %3394  ;;  %v3299_v49 = vpop.permute.xlu2 %3298 }
 0x673   : > { %v3393_v31 = vpop.permute.xlu0 %3392  ;;  %v3705_v35 = vsel %vm1825_vm7, %v3673_v13, %v3395_v39  ;;  %v10459_v39 = vld [vmem:[#allocation128_spill] sm:$0xff] }
 0x674   : > { %v3704_v8 = vsel %vm1825_vm7, %v3672_v26, %v3393_v31  ;;  %v3592_v18 = vsel %vm1693_vm5, %v3560_v48, %v10459_v39  ;;  %v10460_v31 = vld [vmem:[#allocation27_spill] sm:$0xff]  ;;  %v10483_v39 = vld [vmem:[#allocation165_spill] sm:$0xff] }
 0x675   : > { %5252 = vmatmul.msk.f32.gmra.mxu1 %vm1867_vm9, %v3704_v8  ;;  %5266 = vmatmul.msk.f32.gmra.mxu2 %vm1867_vm9, %v3718_v27  ;;  %v3624_v8 = vsel %vm1726_vm4, %v3592_v18, %v10460_v31  ;;  %v10461_v27 = vld [vmem:[#allocation167_spill] sm:$0xff]  ;;  %v10484_v31 = vld [vmem:[#allocation152_spill] sm:$0xff] }
 0x676   : > { %v3656_v52 = vsel %vm1759_vm6, %v3624_v8, %v10461_v27 }
 0x67a   : > { %v3297_v17 = vpop.permute.xlu1 %3296  ;;  %v3273_v26 = vpop.permute.xlu2 %3272 }
 0x67b   : > { %v3295_v50 = vpop.permute.xlu0 %3294 }
 0x67c   : > { %v3687_v62 = vsel %vm1792_vm8, %v3655_v5, %v3295_v50  ;;  %v10472_v5 = vld [vmem:[#allocation49_spill] sm:$0xff] }
 0x67d   : > { %5253 = vmatmul.msk.f32.gmra.mxu1 %vm1867_vm9, %v3705_v35  ;;  %v3719_v46 = vsel %vm1825_vm7, %v3687_v62, %v3423_v53  ;;  %v3643_v13 = vsel %vm1759_vm6, %v3611_v28, %v10472_v5  ;;  %v10473_v50 = vld [vmem:[#allocation137_spill] sm:$0xff]  ;;  %v10492_v28 = vld [vmem:[#allocation18_spill] sm:$0xff] }
 0x67e   : > { %5267 = vmatmul.msk.f32.gmra.mxu2 %vm1867_vm9, %v3719_v46  ;;  %v10493_v5 = vld [vmem:[#allocation138_spill] sm:$0xff] }
 0x682   : > { %v3271_v53 = vpop.permute.xlu1 %3270  ;;  %v3429_v35 = vpop.permute.xlu2 %3428 }
 0x683   : > { %v3269_v3 = vpop.permute.xlu0 %3268  ;;  %v3675_v23 = vsel %vm1792_vm8, %v3643_v13, %v3271_v53 }
 0x684   : > { %v3674_v41 = vsel %vm1792_vm8, %v3642_v7, %v3269_v3  ;;  %v3530_v7 = vsel %vm1627_vm2, %v3498_v14, %v10477_v10  ;;  %v10478_v3 = vld [vmem:[#allocation24_spill] sm:$0xff]  ;;  %v10499_v10 = vld [vmem:[#allocation95_spill] sm:$0xff] }
 0x685   : > { %v3706_v34 = vsel %vm1825_vm7, %v3674_v41, %v3397_v51  ;;  %v3688_v51 = vsel %vm1792_vm8, %v3656_v52, %v3297_v17  ;;  %v10471_v17 = vld [vmem:[#allocation84_spill] sm:$0xff]  ;;  %v3562_v37 = vsel %vm1660_vm3, %v3530_v7, %v10479_v1  ;;  %v10485_v52 = vld [vmem:[#allocation69_spill] sm:$0xff]  ;;  %v10501_v1 = vld [vmem:[#allocation74_spill] sm:$0xff] }
 0x686   : > { %5254 = vmatmul.msk.f32.gmra.mxu1 %vm1867_vm9, %v3706_v34  ;;  %v3625_v40 = vsel %vm1726_vm4, %v3593_v54, %v10471_v17  ;;  %v3594_v59 = vsel %vm1693_vm5, %v3562_v37, %v10481_v29  ;;  %v3499_v17 = vsel %vm1594_vm1, %v5432_v24, %v10492_v28  ;;  %v10498_v14 = vld [vmem:[#allocation36_spill] sm:$0xff]  ;;  %v10503_v29 = vld [vmem:[#allocation41_spill] sm:$0xff]  ;;  %v10513_v24 = vld [vmem:[#allocation99_spill] sm:$0xff] }
 0x687   : > { %v3657_v62 = vsel %vm1759_vm6, %v3625_v40, %v10473_v50  ;;  %v3626_v18 = vsel %vm1726_vm4, %v3594_v59, %v10483_v39  ;;  %v3531_v13 = vsel %vm1627_vm2, %v3499_v17, %v10493_v5  ;;  %v10514_v17 = vld [vmem:[#allocation87_spill] sm:$0xff]  ;;  %v10515_v5 = vld [vmem:[#allocation100_spill] sm:$0xff] }
 0x688   : > { %v3689_v0 = vsel %vm1792_vm8, %v3657_v62, %v3299_v49  ;;  %v10476_v49 = vld [vmem:[#allocation147_spill] sm:$0xff] }
 0x689   : > { %v3516_v53 = vsel %vm1627_vm2, %v3484_v61, %v10476_v49  ;;  %v10494_v62 = vld [vmem:[#allocation155_spill] sm:$0xff]  ;;  %v3486_v49 = vsel %vm1594_vm1, %v5433_v57, %v10498_v14 }
 0x68a   : > { %v3427_v43 = vpop.permute.xlu1 %3426  ;;  %v3548_v41 = vsel %vm1660_vm3, %v3516_v53, %v10478_v3  ;;  %v5434_v53 = vld [vmem:[#allocation2 + $0x150] sm:$0xff]  ;;  %v10500_v3 = vld [vmem:[#allocation113_spill] sm:$0xff] }
 0x68b   : > { %v3425_v44 = vpop.permute.xlu0 %3424  ;;  %v3721_v58 = vsel %vm1825_vm7, %v3689_v0, %v3427_v43  ;;  %v3580_v34 = vsel %vm1693_vm5, %v3548_v41, %v10480_v16  ;;  %v3658_v43 = vsel %vm1759_vm6, %v3626_v18, %v10485_v52  ;;  %v3500_v7 = vsel %vm1594_vm1, %v5434_v53, %v10499_v10  ;;  %v10502_v16 = vld [vmem:[#allocation114_spill] sm:$0xff]  ;;  %v10505_v18 = vld [vmem:[#allocation47_spill] sm:$0xff] }
 0x68c   : > { %v3720_v55 = vsel %vm1825_vm7, %v3688_v51, %v3425_v44  ;;  %v3612_v48 = vsel %vm1726_vm4, %v3580_v34, %v10482_v33  ;;  %v3518_v41 = vsel %vm1627_vm2, %v3486_v49, %v10500_v3  ;;  %v3532_v37 = vsel %vm1627_vm2, %v3500_v7, %v10501_v1  ;;  %v8916_v33 = vld [vmem:[%s9756_s4] ss:$0 sm:$0xff] }
 0x68d   : > { %5268 = vmatmul.msk.f32.gmra.mxu2 %vm1867_vm9, %v3720_v55  ;;  %v3644_v8 = vsel %vm1759_vm6, %v3612_v48, %v10484_v31  ;;  %v3403_v55 = vpop.permute.xlu2 %3402  ;;  %v3550_v34 = vsel %vm1660_vm3, %v3518_v41, %v10502_v16  ;;  %v3564_v59 = vsel %vm1660_vm3, %v3532_v37, %v10503_v29  ;;  %v10504_v48 = vld [vmem:[#allocation102_spill] sm:$0xff]  ;;  %v5437_v37 = vld [vmem:[#allocation2 + $0xc0] sm:$0xff]  ;;  %v10523_v29 = vld [vmem:[#allocation61_spill] sm:$0xff] }
 0x68e   : > { %v3676_v51 = vsel %vm1792_vm8, %v3644_v8, %v3273_v26  ;;  %v10488_v26 = vld [vmem:[#allocation150_spill] sm:$0xff]  ;;  %v3582_v39 = vsel %vm1693_vm5, %v3550_v34, %v10504_v48  ;;  %v3596_v31 = vsel %vm1693_vm5, %v3564_v59, %v10505_v18  ;;  %v10522_v16 = vld [vmem:[#allocation16_spill] sm:$0xff] }
 0x68f   : > { %v3549_v20 = vsel %vm1660_vm3, %v3517_v9, %v10488_v26  ;;  %v3488_v34 = vsel %vm1594_vm1, %v5437_v37, %v10522_v16  ;;  %v10524_v48 = vld [vmem:[#allocation162_spill] sm:$0xff]  ;;  %v10525_v18 = vld [vmem:[#allocation164_spill] sm:$0xff]  ;;  %v10543_v37 = vld [vmem:[#allocation123_spill] sm:$0xff] }
 0x690   : > { %v3581_v63 = vsel %vm1693_vm5, %v3549_v20, %v10489_v12  ;;  %v5435_v12 = vld [vmem:[#allocation2 + $0xb0] sm:$0xff]  ;;  %v3520_v59 = vsel %vm1627_vm2, %v3488_v34, %v10523_v29  ;;  %v10544_v29 = vld [vmem:[#allocation144_spill] sm:$0xff] }
 0x691   : > { %v3613_v15 = vsel %vm1726_vm4, %v3581_v63, %v10490_v30  ;;  %v10510_v63 = vld [vmem:[#allocation17_spill] sm:$0xff] }
 0x692   : > { %v3401_v46 = vpop.permute.xlu1 %3400  ;;  %v3645_v56 = vsel %vm1759_vm6, %v3613_v15, %v10491_v2  ;;  %v3487_v30 = vsel %vm1594_vm1, %v5435_v12, %v10510_v63  ;;  %v10511_v2 = vld [vmem:[#allocation68_spill] sm:$0xff]  ;;  %v10530_v12 = vld [vmem:[#allocation45_spill] sm:$0xff] }
 0x693   : > { %v3399_v6 = vpop.permute.xlu0 %3398  ;;  %v3708_v36 = vsel %vm1825_vm7, %v3676_v51, %v3401_v46  ;;  %v10495_v46 = vld [vmem:[#allocation141_spill] sm:$0xff] }
 0x694   : > { %v3707_v19 = vsel %vm1825_vm7, %v3675_v23, %v3399_v6  ;;  %v10496_v23 = vld [vmem:[#allocation62_spill] sm:$0xff] }
 0x695   : > { %5255 = vmatmul.msk.f32.gmra.mxu1 %vm1867_vm9, %v3707_v19  ;;  %5269 = vmatmul.msk.f32.gmra.mxu2 %vm1867_vm9, %v3721_v58  ;;  %v3305_v50 = vpop.permute.xlu2 %3304  ;;  %v10497_v19 = vld [vmem:[#allocation52_spill] sm:$0xff] }
 0x69a   : > { %v3303_v27 = vpop.permute.xlu1 %3302 }
 0x69b   : > { %v3301_v44 = vpop.permute.xlu0 %3300 }
 0x69c   : > { %v3690_v4 = vsel %vm1792_vm8, %v3658_v43, %v3301_v44  ;;  %v10507_v43 = vld [vmem:[#allocation111_spill] sm:$0xff]  ;;  %v10508_v44 = vld [vmem:[#allocation105_spill] sm:$0xff] }
 0x69d   : > { %5256 = vmatmul.msk.f32.gmra.mxu1 %vm1867_vm9, %v3708_v36  ;;  %v3722_v32 = vsel %vm1825_vm7, %v3690_v4, %v3429_v35  ;;  %v3563_v35 = vsel %vm1660_vm3, %v3531_v13, %v10494_v62  ;;  %v3279_v8 = vpop.permute.xlu2 %3278  ;;  %v3628_v51 = vsel %vm1726_vm4, %v3596_v31, %v10507_v43  ;;  %v10509_v4 = vld [vmem:[#allocation124_spill] sm:$0xff]  ;;  %v10527_v43 = vld [vmem:[#allocation146_spill] sm:$0xff] }
 0x69e   : > { %5270 = vmatmul.msk.f32.gmra.mxu2 %vm1867_vm9, %v3722_v32  ;;  %v3595_v0 = vsel %vm1693_vm5, %v3563_v35, %v10495_v46  ;;  %v3660_v36 = vsel %vm1759_vm6, %v3628_v51, %v10509_v4  ;;  %v10517_v35 = vld [vmem:[#allocation80_spill] sm:$0xff] }
 0x69f   : > { %v3627_v6 = vsel %vm1726_vm4, %v3595_v0, %v10496_v23  ;;  %v3692_v22 = vsel %vm1792_vm8, %v3660_v36, %v3305_v50  ;;  %v10516_v50 = vld [vmem:[#allocation44_spill] sm:$0xff] }
 0x6a0   : > { %v3659_v58 = vsel %vm1759_vm6, %v3627_v6, %v10497_v19  ;;  %v10518_v0 = vld [vmem:[#allocation32_spill] sm:$0xff]  ;;  %v10519_v6 = vld [vmem:[#allocation63_spill] sm:$0xff] }
 0x6a1   : > { %v3691_v45 = vsel %vm1792_vm8, %v3659_v58, %v3303_v27  ;;  %v10506_v27 = vld [vmem:[#allocation112_spill] sm:$0xff] }
 0x6a2   : > { %v3277_v60 = vpop.permute.xlu1 %3276  ;;  %v3614_v52 = vsel %vm1726_vm4, %v3582_v39, %v10506_v27  ;;  %v10520_v58 = vld [vmem:[#allocation168_spill] sm:$0xff]  ;;  %v3552_v39 = vsel %vm1660_vm3, %v3520_v59, %v10524_v48  ;;  %v10545_v48 = vld [vmem:[#allocation129_spill] sm:$0xff] }
 0x6a3   : > { %v3275_v25 = vpop.permute.xlu0 %3274  ;;  %v3584_v31 = vsel %vm1693_vm5, %v3552_v39, %v10525_v18 }
 0x6a4   : > { %v3677_v54 = vsel %vm1792_vm8, %v3645_v56, %v3275_v25  ;;  %v10512_v25 = vld [vmem:[#allocation77_spill] sm:$0xff] }
 0x6a5   : > { %v3709_v40 = vsel %vm1825_vm7, %v3677_v54, %v3403_v55  ;;  %v3646_v55 = vsel %vm1759_vm6, %v3614_v52, %v10508_v44  ;;  %v3519_v54 = vsel %vm1627_vm2, %v3487_v30, %v10512_v25  ;;  %v10533_v25 = vld [vmem:[#allocation48_spill] sm:$0xff] }
 0x6a6   : > { %5257 = vmatmul.msk.f32.gmra.mxu1 %vm1867_vm9, %v3709_v40  ;;  %v3678_v38 = vsel %vm1792_vm8, %v3646_v55, %v3277_v60  ;;  %v5436_v60 = vld [vmem:[#allocation2 + $0x158] sm:$0xff]  ;;  %v3551_v40 = vsel %vm1660_vm3, %v3519_v54, %v10514_v17 }
 0x6a7   : > { %v3501_v56 = vsel %vm1594_vm1, %v5436_v60, %v10511_v2  ;;  %v3583_v62 = vsel %vm1693_vm5, %v3551_v40, %v10516_v50  ;;  %v10532_v2 = vld [vmem:[#allocation142_spill] sm:$0xff]  ;;  %v10534_v50 = vld [vmem:[#allocation117_spill] sm:$0xff] }
 0x6a8   : > { %v3533_v28 = vsel %vm1627_vm2, %v3501_v56, %v10513_v24  ;;  %v3615_v23 = vsel %vm1726_vm4, %v3583_v62, %v10518_v0 }
 0x6a9   : > { %v3565_v13 = vsel %vm1660_vm3, %v3533_v28, %v10515_v5 }
 0x6aa   : > { %v3433_v42 = vpop.permute.xlu1 %3432  ;;  %v3597_v46 = vsel %vm1693_vm5, %v3565_v13, %v10517_v35  ;;  %v5439_v13 = vld [vmem:[#allocation2 + $0xc8] sm:$0xff]  ;;  %v5440_v35 = vld [vmem:[#allocation2 + $0x170] sm:$0xff] }
 0x6ab   : > { %v3431_v61 = vpop.permute.xlu0 %3430  ;;  %v3724_v20 = vsel %vm1825_vm7, %v3692_v22, %v3433_v42  ;;  %v3629_v19 = vsel %vm1726_vm4, %v3597_v46, %v10519_v6  ;;  %v3647_v42 = vsel %vm1759_vm6, %v3615_v23, %v10520_v58  ;;  %v10528_v22 = vld [vmem:[#allocation86_spill] sm:$0xff]  ;;  %v3489_v62 = vsel %vm1594_vm1, %v5439_v13, %v10534_v50  ;;  %v10535_v46 = vld [vmem:[#allocation56_spill] sm:$0xff]  ;;  %v10537_v58 = vld [vmem:[#allocation131_spill] sm:$0xff] }
 0x6ac   : > { %v3723_v47 = vsel %vm1825_vm7, %v3691_v45, %v3431_v61  ;;  %v3435_v45 = vpop.permute.xlu2 %3434  ;;  %v3679_v14 = vsel %vm1792_vm8, %v3647_v42, %v3279_v8  ;;  %v10526_v8 = vld [vmem:[#allocation143_spill] sm:$0xff]  ;;  %v3503_v0 = vsel %vm1594_vm1, %v5440_v35, %v10535_v46  ;;  %v10536_v6 = vld [vmem:[#allocation154_spill] sm:$0xff] }
 0x6ad   : > { %5271 = vmatmul.msk.f32.gmra.mxu2 %vm1867_vm9, %v3723_v47  ;;  %v10521_v47 = vld [vmem:[#allocation98_spill] sm:$0xff]  ;;  %v3616_v27 = vsel %vm1726_vm4, %v3584_v31, %v10526_v8  ;;  %v3535_v42 = vsel %vm1627_vm2, %v3503_v0, %v10537_v58 }
 0x6ae   : > { %v3661_v57 = vsel %vm1759_vm6, %v3629_v19, %v10521_v47  ;;  %v3648_v51 = vsel %vm1759_vm6, %v3616_v27, %v10527_v43  ;;  %v3521_v19 = vsel %vm1627_vm2, %v3489_v62, %v10536_v6  ;;  %v10539_v47 = vld [vmem:[#allocation67_spill] sm:$0xff] }
 0x6b2   : > { %v3853_v32 = vpop.f32.mrf.mxu1  ;;  %v3407_v11 = vpop.permute.xlu1 %3406 }
 0x6b3   : > { %v8933_v21 = vadd.f32 %v8916_v33, %v3853_v32  ;;  %v3405_v9 = vpop.permute.xlu0 %3404  ;;  %v3711_v7 = vsel %vm1825_vm7, %v3679_v14, %v3407_v11  ;;  %v5438_v32 = vld [vmem:[#allocation2 + $0x168] sm:$0xff]  ;;  %v10540_v14 = vld [vmem:[#allocation83_spill] sm:$0xff] }
 0x6b4   : > { %v3710_v26 = vsel %vm1825_vm7, %v3678_v38, %v3405_v9  ;;  %v3409_v4 = vpop.permute.xlu2 %3408  ;;  %v3502_v38 = vsel %vm1594_vm1, %v5438_v32, %v10528_v22 }
 0x6b5   : > { %5258 = vmatmul.msk.f32.gmra.mxu1 %vm1867_vm9, %v3710_v26  ;;  %5272 = vmatmul.msk.f32.gmra.mxu2 %vm1867_vm9, %v3724_v20  ;;  %v3967_v15 = vsel %vm1594_vm1, %v8933_v21, 0.0  ;;  %v10529_v26 = vld [vmem:[#allocation11_spill] sm:$0xff] }
 0x6b6   : > { %3968 = vadd.xlane.f32.xlu2 %v3967_v15  ;;  %v3534_v20 = vsel %vm1627_vm2, %v3502_v38, %v10529_v26  ;;  %v10531_v15 = vld [vmem:[#allocation10_spill] sm:$0xff] }
 0x6b7   : > { %v3566_v63 = vsel %vm1660_vm3, %v3534_v20, %v10530_v12 }
 0x6b8   : > { %v3598_v60 = vsel %vm1693_vm5, %v3566_v63, %v10531_v15 }
 0x6b9   : > { %v3630_v56 = vsel %vm1726_vm4, %v3598_v60, %v10532_v2 }
 0x6ba   : > { %v3856_v61 = vpop.f32.mrf.mxu1  ;;  %v3309_v3 = vpop.permute.xlu1 %3308  ;;  %v3662_v54 = vsel %vm1759_vm6, %v3630_v56, %v10533_v25 }
 0x6bb   : > { %v8967_v49 = vadd.f32 %v8916_v33, %v3856_v61  ;;  %v3307_v53 = vpop.permute.xlu0 %3306  ;;  %v3694_v28 = vsel %vm1792_vm8, %v3662_v54, %v3309_v3 }
 0x6bc   : > { %v3693_v10 = vsel %vm1792_vm8, %v3661_v57, %v3307_v53  ;;  %v3567_v57 = vsel %vm1660_vm3, %v3535_v42, %v10539_v47  ;;  %v3311_v3 = vpop.permute.xlu2 %3310 }
 0x6bd   : > { %5259 = vmatmul.msk.f32.gmra.mxu1 %vm1867_vm9, %v3711_v7  ;;  %v3970_v41 = vsel %vm1594_vm1, %v8967_v49, 0.0  ;;  %v3725_v1 = vsel %vm1825_vm7, %v3693_v10, %v3435_v45  ;;  %v10538_v45 = vld [vmem:[#allocation125_spill] sm:$0xff]  ;;  %v10541_v10 = vld [vmem:[#allocation132_spill] sm:$0xff] }
 0x6be   : > { %3971 = vadd.xlane.f32.xlu0 %v3970_v41  ;;  %5273 = vmatmul.msk.f32.gmra.mxu2 %vm1867_vm9, %v3725_v1  ;;  %v3553_v61 = vsel %vm1660_vm3, %v3521_v19, %v10538_v45  ;;  %v3599_v7 = vsel %vm1693_vm5, %v3567_v57, %v10541_v10  ;;  %v10542_v41 = vld [vmem:[#allocation33_spill] sm:$0xff] }
 0x6bf   : > { %v3585_v53 = vsel %vm1693_vm5, %v3553_v61, %v10540_v14  ;;  %v3631_v16 = vsel %vm1726_vm4, %v3599_v7, %v10543_v37  ;;  %vm4187_vm5 = vcmask 1041409  }
 0x6c0   : > { %v3617_v1 = vsel %vm1726_vm4, %v3585_v53, %v10542_v41  ;;  %v3663_v39 = vsel %vm1759_vm6, %v3631_v16, %v10545_v48  ;;  %vm4140_vm4 = vcmask 154712  }
 0x6c1   : > { %v3649_v59 = vsel %vm1759_vm6, %v3617_v1, %v10544_v29  ;;  %v3695_v31 = vsel %vm1792_vm8, %v3663_v39, %v3311_v3  ;;  %vm4189_vm6 = vcmask 1042434  }
 0x6c2   : > { %v3859_v52 = vpop.f32.mrf.mxu1  ;;  %v3283_v30 = vpop.permute.xlu1 %3282 }
 0x6c3   : > { %v8989_v44 = vadd.f32 %v8916_v33, %v3859_v52  ;;  %v3281_v55 = vpop.permute.xlu0 %3280  ;;  %v3681_v8 = vsel %vm1792_vm8, %v3649_v59, %v3283_v30 }
 0x6c4   : > { %v3680_v36 = vsel %vm1792_vm8, %v3648_v51, %v3281_v55  ;;  %vm4193_vm8 = vcmask 1044484  }
 0x6c5   : > { %v3712_v11 = vsel %vm1825_vm7, %v3680_v36, %v3409_v4  ;;  %v3973_v9 = vsel %vm1594_vm1, %v8989_v44, 0.0 }
 0x6c6   : > { %5260 = vmatmul.msk.f32.gmra.mxu1 %vm1867_vm9, %v3712_v11  ;;  %3974 = vadd.xlane.f32.xlu1 %v3973_v9 }
 0x6ca   : > { %v3862_v24 = vpop.f32.mrf.mxu1  ;;  %v3439_v34 = vpop.permute.xlu1 %3438 }
 0x6cb   : > { %v9010_v17 = vadd.f32 %v8916_v33, %v3862_v24  ;;  %v3437_v40 = vpop.permute.xlu0 %3436  ;;  %v3727_v51 = vsel %vm1825_vm7, %v3695_v31, %v3439_v34 }
 0x6cc   : > { %v3726_v5 = vsel %vm1825_vm7, %v3694_v28, %v3437_v40 }
 0x6cd   : > { %5274 = vmatmul.msk.f32.gmra.mxu2 %vm1867_vm9, %v3726_v5  ;;  %v3976_v23 = vsel %vm1594_vm1, %v9010_v17, 0.0 }
 0x6ce   : > { %3977 = vadd.xlane.f32.xlu2 %v3976_v23 }
 0x6d2   : > { %v3865_v18 = vpop.f32.mrf.mxu1 }
 0x6d3   : > { %v9043_v27 = vadd.f32 %v8916_v33, %v3865_v18  ;;  %v3411_v52 = vpop.permute.xlu0 %3410 }
 0x6d4   : > { %v3713_v43 = vsel %vm1825_vm7, %v3681_v8, %v3411_v52  ;;  %vm4191_vm7 = vcmask 1043459  }
 0x6d5   : > { %5261 = vmatmul.msk.f32.gmra.mxu1 %vm1867_vm9, %v3713_v43  ;;  %5275 = vmatmul.msk.f32.gmra.mxu2 %vm1867_vm9, %v3727_v51  ;;  %v3979_v55 = vsel %vm1594_vm1, %v9043_v27, 0.0  ;;  %vm4195_vm9 = vcmask 1045509  }
 0x6d6   : > { %3980 = vadd.xlane.f32.xlu2 %v3979_v55 }
 0x6d8   : > { %v3907_v26 = vpop.f32.mrf.mxu2 }
 0x6d9   : > { %v9107_v41 = vadd.f32 %v8916_v33, %v3907_v26 }
 0x6da   : > { %v3868_v4 = vpop.f32.mrf.mxu1 }
 0x6db   : > { %v9052_v36 = vadd.f32 %v8916_v33, %v3868_v4  ;;  %v4021_v34 = vsel %vm1594_vm1, %v9107_v41, 0.0 }
 0x6dd   : > { %v3982_v32 = vsel %vm1594_vm1, %v9052_v36, 0.0 }
 0x6de   : > { %3983 = vadd.xlane.f32.xlu0 %v3982_v32 }
 0x6e0   : > { %v3910_v15 = vpop.f32.mrf.mxu2 }
 0x6e1   : > { %v9120_v48 = vadd.f32 %v8916_v33, %v3910_v15 }
 0x6e2   : > { %v3871_v22 = vpop.f32.mrf.mxu1 }
 0x6e3   : > { %v9057_v38 = vadd.f32 %v8916_v33, %v3871_v22  ;;  %v4024_v31 = vsel %vm1594_vm1, %v9120_v48, 0.0 }
 0x6e5   : > { %v3985_v11 = vsel %vm1594_vm1, %v9057_v38, 0.0 }
 0x6e6   : > { %3986 = vadd.xlane.f32.xlu1 %v3985_v11 }
 0x6e8   : > { %v3913_v54 = vpop.f32.mrf.mxu2 }
 0x6e9   : > { %v9142_v11 = vadd.f32 %v8916_v33, %v3913_v54 }
 0x6ea   : > { %v3874_v9 = vpop.f32.mrf.mxu1 }
 0x6eb   : > { %v9062_v20 = vadd.f32 %v8916_v33, %v3874_v9 }
 0x6ed   : > { %v3988_v12 = vsel %vm1594_vm1, %v9062_v20, 0.0 }
 0x6ee   : > { %3989 = vadd.xlane.f32.xlu2 %v3988_v12 }
 0x6f0   : > { %v3916_v5 = vpop.f32.mrf.mxu2 }
 0x6f1   : > { %v9117_v59 = vadd.f32 %v8916_v33, %v3916_v5 }
 0x6f2   : > { %v3877_v63 = vpop.f32.mrf.mxu1 }
 0x6f3   : > { %v9067_v30 = vadd.f32 %v8916_v33, %v3877_v63  ;;  %v4030_v18 = vsel %vm1594_vm1, %v9117_v59, 0.0  ;;  %v4027_v63 = vsel %vm1594_vm1, %v9142_v11, 0.0 }
 0x6f5   : > { %v3991_v60 = vsel %vm1594_vm1, %v9067_v30, 0.0 }
 0x6f6   : > { %3992 = vadd.xlane.f32.xlu0 %v3991_v60 }
 0x6f8   : > { %v3919_v50 = vpop.f32.mrf.mxu2 }
 0x6f9   : > { %v9130_v52 = vadd.f32 %v8916_v33, %v3919_v50 }
 0x6fa   : > { %v3880_v2 = vpop.f32.mrf.mxu1 }
 0x6fb   : > { %v9072_v56 = vadd.f32 %v8916_v33, %v3880_v2  ;;  %v4033_v22 = vsel %vm1594_vm1, %v9130_v52, 0.0 }
 0x6fd   : > { %v3994_v25 = vsel %vm1594_vm1, %v9072_v56, 0.0 }
 0x6fe   : > { %3995 = vadd.xlane.f32.xlu1 %v3994_v25 }
 0x701   : > { %v3922_v23 = vpop.f32.mrf.mxu2 }
 0x702   : > { %v9157_v2 = vadd.f32 %v8916_v33, %v3922_v23  ;;  %v4216_v23 = vsel %vm1594_vm1, %v8967_v49, -inf }
 0x703   : > { %v3883_v24 = vpop.f32.mrf.mxu1 }
 0x704   : > { %v9077_v28 = vadd.f32 %v8916_v33, %v3883_v24  ;;  %v4036_v24 = vsel %vm1594_vm1, %v9157_v2, 0.0 }
 0x706   : > { %v3997_v40 = vsel %vm1594_vm1, %v9077_v28, 0.0 }
 0x707   : > { %3998 = vadd.xlane.f32.xlu2 %v3997_v40 }
 0x710   : > { %v3925_v42 = vpop.f32.mrf.mxu2 }
 0x711   : > { %v9127_v8 = vadd.f32 %v8916_v33, %v3925_v42 }
 0x712   : > { %v3886_v13 = vpop.f32.mrf.mxu1 }
 0x713   : > { %v9082_v62 = vadd.f32 %v8916_v33, %v3886_v13  ;;  %v4039_v32 = vsel %vm1594_vm1, %v9127_v8, 0.0 }
 0x715   : > { %v4000_v35 = vsel %vm1594_vm1, %v9082_v62, 0.0 }
 0x716   : > { %4001 = vadd.xlane.f32.xlu0 %v4000_v35 }
 0x718   : > { %v3928_v61 = vpop.f32.mrf.mxu2 }
 0x719   : > { %v9148_v26 = vadd.f32 %v8916_v33, %v3928_v61  ;;  %v4219_v61 = vsel %vm1594_vm1, %v8989_v44, -inf }
 0x71a   : > { %v3889_v46 = vpop.f32.mrf.mxu1 }
 0x71b   : > { %v9087_v0 = vadd.f32 %v8916_v33, %v3889_v46  ;;  %v4042_v60 = vsel %vm1594_vm1, %v9148_v26, 0.0 }
 0x71d   : > { %v4003_v6 = vsel %vm1594_vm1, %v9087_v0, 0.0 }
 0x71e   : > { %4004 = vadd.xlane.f32.xlu1 %v4003_v6 }
 0x721   : > { %v3931_v53 = vpop.f32.mrf.mxu2 }
 0x722   : > { %v9172_v50 = vadd.f32 %v8916_v33, %v3931_v53  ;;  %v4228_v53 = vsel %vm1594_vm1, %v9052_v36, -inf }
 0x723   : > { %v3892_v19 = vpop.f32.mrf.mxu1 }
 0x724   : > { %v9092_v58 = vadd.f32 %v8916_v33, %v3892_v19  ;;  %v4045_v46 = vsel %vm1594_vm1, %v9172_v50, 0.0 }
 0x726   : > { %v4006_v45 = vsel %vm1594_vm1, %v9092_v58, 0.0 }
 0x727   : > { %4007 = vadd.xlane.f32.xlu2 %v4006_v45  ;;  %v4225_v45 = vsel %vm1594_vm1, %v9043_v27, -inf }
 0x730   : > { %v3934_v1 = vpop.f32.mrf.mxu2 }
 0x731   : > { %v9145_v9 = vadd.f32 %v8916_v33, %v3934_v1 }
 0x732   : > { %v3895_v47 = vpop.f32.mrf.mxu1 }
 0x733   : > { %v9097_v57 = vadd.f32 %v8916_v33, %v3895_v47  ;;  %v4048_v15 = vsel %vm1594_vm1, %v9145_v9, 0.0  ;;  %v4213_v47 = vsel %vm1594_vm1, %v8933_v21, -inf }
 0x735   : > { %v4009_v14 = vsel %vm1594_vm1, %v9097_v57, 0.0 }
 0x736   : > { %4010 = vadd.xlane.f32.xlu0 %v4009_v14  ;;  %v4234_v14 = vsel %vm1594_vm1, %v9062_v20, -inf }
 0x738   : > { %v3937_v39 = vpop.f32.mrf.mxu2 }
 0x739   : > { %v9163_v54 = vadd.f32 %v8916_v33, %v3937_v39  ;;  %v4231_v39 = vsel %vm1594_vm1, %v9057_v38, -inf }
 0x73a   : > { %v3898_v10 = vpop.f32.mrf.mxu1 }
 0x73b   : > { %v9102_v7 = vadd.f32 %v8916_v33, %v3898_v10  ;;  %v4051_v5 = vsel %vm1594_vm1, %v9163_v54, 0.0  ;;  %v4222_v10 = vsel %vm1594_vm1, %v9010_v17, -inf }
 0x73d   : > { %v4012_v3 = vsel %vm1594_vm1, %v9102_v7, 0.0 }
 0x73e   : > { %4013 = vadd.xlane.f32.xlu1 %v4012_v3  ;;  %v4243_v3 = vsel %vm1594_vm1, %v9077_v28, -inf }
 0x741   : > { %v3940_v55 = vpop.f32.mrf.mxu2 }
 0x742   : > { %v9184_v19 = vadd.f32 %v8916_v33, %v3940_v55  ;;  %v3975_v55 = vpop.xlane.xlu1 %3974 }
 0x743   : > { %v3901_v37 = vpop.f32.mrf.mxu1 }
 0x744   : > { %v9110_v16 = vadd.f32 %v8916_v33, %v3901_v37  ;;  %v4054_v42 = vsel %vm1594_vm1, %v9184_v19, 0.0  ;;  %v4237_v37 = vsel %vm1594_vm1, %v9067_v30, -inf }
 0x746   : > { %4022 = vadd.xlane.f32.xlu1 %v4021_v34  ;;  %v4015_v29 = vsel %vm1594_vm1, %v9110_v16, 0.0  ;;  %v5458_v34 = vmov 4.0  }
 0x747   : > { %4016 = vadd.xlane.f32.xlu2 %v4015_v29  ;;  %5375 = vrcp.f32 %v5458_v34  ;;  %v3972_v29 = vpop.xlane.xlu0 %3971  ;;  %v4279_v34 = vsel %vm1594_vm1, %v9130_v52, -inf }
 0x74e   : > { %4031 = vadd.xlane.f32.xlu1 %v4030_v18  ;;  %v4252_v18 = vsel %vm1594_vm1, %v9092_v58, -inf }
 0x74f   : > { %4025 = vadd.xlane.f32.xlu2 %v4024_v31  ;;  %v4246_v31 = vsel %vm1594_vm1, %v9082_v62, -inf }
 0x750   : > { %v3943_v12 = vpop.f32.mrf.mxu2 }
 0x751   : > { %v9160_v25 = vadd.f32 %v8916_v33, %v3943_v12  ;;  %v4240_v12 = vsel %vm1594_vm1, %v9072_v56, -inf }
 0x752   : > { %v3904_v43 = vpop.f32.mrf.mxu1 }
 0x753   : > { %v9133_v51 = vadd.f32 %v8916_v33, %v3904_v43  ;;  %v4057_v40 = vsel %vm1594_vm1, %v9160_v25, 0.0 }
 0x755   : > { %v4018_v4 = vsel %vm1594_vm1, %v9133_v51, 0.0 }
 0x756   : > { %4019 = vadd.xlane.f32.xlu0 %v4018_v4  ;;  %4040 = vadd.xlane.f32.xlu1 %v4039_v32  ;;  %v5376_v4 = vpop.eup %5375 }
 0x757   : > { %4034 = vadd.xlane.f32.xlu2 %v4033_v22  ;;  %v4064_v32 = vmul.f32 4.0, %v5376_v4  ;;  %v3984_v22 = vpop.xlane.xlu0 %3983  ;;  %vm4068_vm3 = vweird.f32 %v5376_v4 }
 0x758   : > { %v3946_v13 = vpop.f32.mrf.mxu2 }
 0x759   : > { %v9175_v35 = vadd.f32 %v8916_v33, %v3946_v13  ;;  %v9196_v33 = vpop.xlane.xlu2 %3968 }
 0x75b   : > { %v4060_v6 = vsel %vm1594_vm1, %v9175_v35, 0.0 }
 0x75e   : > { %4028 = vadd.xlane.f32.xlu0 %v4027_v63  ;;  %4049 = vadd.xlane.f32.xlu1 %v4048_v15  ;;  %v4261_v63 = vsel %vm1594_vm1, %v9110_v16, -inf  ;;  %v4255_v15 = vsel %vm1594_vm1, %v9097_v57, -inf }
 0x75f   : > { %4043 = vadd.xlane.f32.xlu2 %v4042_v60  ;;  %v10546_v60 = vmov 0.0  }
 0x760   : > { %3950 = vst.msk [vmem:[#allocation3] sm:$0x7] %vm3949_vm12, %v10546_v60 }
 0x761   : > { %v3978_v1 = vpop.xlane.xlu2 %3977  ;;  %3953 = vst.msk [vmem:[#allocation3] sm:$0xff] %vm3952_vm13, %v10546_v60 }
 0x762   : > { %3954 = vst.msk [vmem:[#allocation3 + $0x8] sm:$0xff] %vm3952_vm13, %v10546_v60  ;;  %vm3955_vm13 = vcmask 21504  }
 0x763   : > { %3958 = vst.msk [vmem:[#allocation3] sm:$0xff] %vm3957_vm14, %v10546_v60 }
 0x764   : > { %3959 = vst.msk [vmem:[#allocation3 + $0x8] sm:$0xff] %vm3957_vm14, %v10546_v60  ;;  %vm3960_vm14 = vcmask 201880  }
 0x765   : > { %3963 = vst.msk [vmem:[#allocation3] sm:$0xff] %vm3962_vm15, %v10546_v60 }
 0x766   : > { %4037 = vadd.xlane.f32.xlu0 %v4036_v24  ;;  %4058 = vadd.xlane.f32.xlu1 %v4057_v40  ;;  %v4065_v40 = vsub.f32 1.0, %v4064_v32  ;;  %3964 = vst.msk [vmem:[#allocation3 + $0x8] sm:$0xff] %vm3962_vm15, %v10546_v60  ;;  %vm3965_vm15 = vcmask 357704  }
 0x767   : > { %4052 = vadd.xlane.f32.xlu2 %v4051_v5  ;;  %v3987_v5 = vpop.xlane.xlu1 %3986  ;;  %3951 = vst.msk [vmem:[#allocation3 + $0x13] sm:$0x7] %vm3949_vm12, %v10546_v60  ;;  %vm4210_vm12 = vcmask 154648  }
 0x768   : > { %v4066_v13 = vmul.f32 %v5376_v4, %v4065_v40  ;;  %3956 = vst.msk [vmem:[#allocation3 + $0x10] sm:$0x3f] %vm3955_vm13, %v10546_v60 }
 0x769   : > { %v3981_v43 = vpop.xlane.xlu2 %3980  ;;  %3961 = vst.msk [vmem:[#allocation3 + $0x10] sm:$0x3f] %vm3960_vm14, %v10546_v60 }
 0x76a   : > { %3966 = vst.msk [vmem:[#allocation3 + $0x10] sm:$0x3f] %vm3965_vm15, %v10546_v60 }
 0x76e   : > { %4046 = vadd.xlane.f32.xlu0 %v4045_v46  ;;  %4217 = vmax.xlane.f32.xlu1 %v4216_v23  ;;  %v3993_v46 = vpop.xlane.xlu0 %3992  ;;  %v4249_v23 = vsel %vm1594_vm1, %v9087_v0, -inf }
 0x76f   : > { %4061 = vadd.xlane.f32.xlu2 %v4060_v6  ;;  %v4270_v6 = vsel %vm1594_vm1, %v9120_v48, -inf }
 0x771   : > { %v3990_v24 = vpop.xlane.xlu2 %3989 }
 0x776   : > { %4055 = vadd.xlane.f32.xlu0 %v4054_v42  ;;  %4226 = vmax.xlane.f32.xlu1 %v4225_v45  ;;  %v4264_v42 = vsel %vm1594_vm1, %v9133_v51, -inf  ;;  %v9813_v45 = vlaneseq }
 0x777   : > { %4220 = vmax.xlane.f32.xlu2 %v4219_v61 }
 0x77a   : > { %v3999_v61 = vpop.xlane.xlu2 %3998 }
 0x77e   : > { %4214 = vmax.xlane.f32.xlu0 %v4213_v47  ;;  %4235 = vmax.xlane.f32.xlu1 %v4234_v14  ;;  %v4067_v47 = vadd.f32 %v5376_v4, %v4066_v13  ;;  %v3996_v14 = vpop.xlane.xlu1 %3995  ;;  %v4282_v13 = vsel %vm1594_vm1, %v9157_v2, -inf }
 0x77f   : > { %4229 = vmax.xlane.f32.xlu2 %v4228_v53  ;;  %v9235_v53 = vand.u32 127, %v9813_v45 }
 0x786   : > { %4223 = vmax.xlane.f32.xlu0 %v4222_v10  ;;  %4244 = vmax.xlane.f32.xlu1 %v4243_v3  ;;  %v9237_v10 = vsel %vm4068_vm3, %v5376_v4, %v4067_v47  ;;  %vm4345_vm3 = vcmask 335112  }
 0x787   : > { %4238 = vmax.xlane.f32.xlu2 %v4237_v37  ;;  %v4258_v37 = vsel %vm1594_vm1, %v9102_v7, -inf  ;;  %v4071_v4 = vmul.f32 %v9237_v10, %v3972_v29  ;;  %v4075_v32 = vmul.f32 %v9237_v10, %v3984_v22  ;;  %v4070_v29 = vmul.f32 %v9237_v10, %v9196_v33 }
 0x788   : > { %v4074_v22 = vmul.f32 %v9237_v10, %v3981_v43  ;;  %v4076_v47 = vmul.f32 %v9237_v10, %v3987_v5  ;;  %v4078_v33 = vmul.f32 %v9237_v10, %v3993_v46  ;;  %v4080_v5 = vmul.f32 %v9237_v10, %v3999_v61 }
 0x789   : > { %v4002_v3 = vpop.xlane.xlu0 %4001 }
 0x78e   : > { %4232 = vmax.xlane.f32.xlu0 %v4231_v39  ;;  %4253 = vmax.xlane.f32.xlu1 %v4252_v18  ;;  %v4073_v39 = vmul.f32 %v9237_v10, %v3978_v1  ;;  %v4273_v18 = vsel %vm1594_vm1, %v9142_v11, -inf  ;;  %v4072_v1 = vmul.f32 %v9237_v10, %v3975_v55  ;;  %v4081_v55 = vmul.f32 %v9237_v10, %v4002_v3 }
 0x78f   : > { %4247 = vmax.xlane.f32.xlu2 %v4246_v31  ;;  %v9247_v31 = vadd.s32 4294967285, %v9235_v53 }
 0x796   : > { %4241 = vmax.xlane.f32.xlu0 %v4240_v12  ;;  %4262 = vmax.xlane.f32.xlu1 %v4261_v63  ;;  %v4267_v12 = vsel %vm1594_vm1, %v9107_v41, -inf  ;;  %v9254_v63 = vadd.s32 4294967293, %v9235_v53 }
 0x797   : > { %4256 = vmax.xlane.f32.xlu2 %v4255_v15  ;;  %v4077_v15 = vmul.f32 %v9237_v10, %v3990_v24  ;;  %v4288_v24 = vsel %vm1594_vm1, %v9148_v26, -inf }
 0x798   : > { %v4137_v3 = vperm.slane %v4070_v29, %v9254_v63  ;;  %v4151_v29 = vperm.slane %v4078_v33, %v9254_v63 }
 0x79a   : > { %v4008_v40 = vpop.xlane.xlu2 %4007 }
 0x79b   : > { %v4083_v43 = vmul.f32 %v9237_v10, %v4008_v40  ;;  %v4148_v40 = vperm.slane %v4076_v47, %v9254_v63 }
 0x79e   : > { %4250 = vmax.xlane.f32.xlu0 %v4249_v23  ;;  %4271 = vmax.xlane.f32.xlu1 %v4270_v6  ;;  %v4079_v23 = vmul.f32 %v9237_v10, %v3996_v14  ;;  %v4005_v6 = vpop.xlane.xlu1 %4004  ;;  %v4142_v14 = vperm.slane %v4072_v1, %v9254_v63  ;;  %v4155_v1 = vperm.slane %v4081_v55, %v9247_v31 }
 0x79f   : > { %4265 = vmax.xlane.f32.xlu2 %v4264_v42  ;;  %v4143_v42 = vperm.slane %v4073_v39, %v9247_v31  ;;  %v4149_v39 = vperm.slane %v4077_v15, %v9247_v31 }
 0x7a0   : > { %v4152_v45 = vperm.slane %v4079_v23, %v9247_v31 }
 0x7a1   : > { %v4144_v46 = vsel %vm4140_vm4, %v4143_v42, %v4142_v14  ;;  %v4150_v23 = vsel %vm4140_vm4, %v4149_v39, %v4148_v40 }
 0x7a6   : > { %4259 = vmax.xlane.f32.xlu0 %v4258_v37  ;;  %4280 = vmax.xlane.f32.xlu1 %v4279_v34  ;;  %v4139_v37 = vperm.slane %v4071_v4, %v9247_v31  ;;  %v4146_v34 = vperm.slane %v4075_v32, %v9247_v31  ;;  %v4082_v4 = vmul.f32 %v9237_v10, %v4005_v6 }
 0x7a7   : > { %4274 = vmax.xlane.f32.xlu2 %v4273_v18  ;;  %v4145_v18 = vperm.slane %v4074_v22, %v9254_v63  ;;  %v4158_v22 = vperm.slane %v4083_v43, %v9247_v31  ;;  %v4154_v6 = vperm.slane %v4080_v5, %v9254_v63 }
 0x7a8   : > { %v4141_v61 = vsel %vm4140_vm4, %v4139_v37, %v4137_v3  ;;  %v4157_v55 = vperm.slane %v4082_v4, %v9254_v63  ;;  %v4276_v3 = vsel %vm1594_vm1, %v9117_v59, -inf }
 0x7a9   : > { %v4011_v32 = vpop.xlane.xlu0 %4010  ;;  %v4147_v15 = vsel %vm4140_vm4, %v4146_v34, %v4145_v18  ;;  %v4188_v47 = vsel %vm4187_vm5, %v4144_v46, %v4141_v61  ;;  %v4297_v18 = vsel %vm1594_vm1, %v9163_v54, -inf  ;;  %v4291_v46 = vsel %vm1594_vm1, %v9172_v50, -inf }
 0x7aa   : > { %v4084_v42 = vmul.f32 %v9237_v10, %v4011_v32  ;;  %v4190_v37 = vsel %vm4189_vm6, %v4147_v15, %v4188_v47  ;;  %v4159_v43 = vsel %vm4140_vm4, %v4158_v22, %v4157_v55  ;;  %v4285_v15 = vsel %vm1594_vm1, %v9127_v8, -inf }
 0x7ab   : > { %v4192_v33 = vsel %vm4191_vm7, %v4150_v23, %v4190_v37  ;;  %v4300_v22 = vsel %vm1594_vm1, %v9184_v19, -inf }
 0x7ac   : > { %v4160_v39 = vperm.slane %v4084_v42, %v9254_v63  ;;  %v4294_v42 = vsel %vm1594_vm1, %v9145_v9, -inf }
 0x7ae   : > { %4268 = vmax.xlane.f32.xlu0 %v4267_v12  ;;  %4289 = vmax.xlane.f32.xlu1 %v4288_v24  ;;  %v4153_v12 = vsel %vm4140_vm4, %v4152_v45, %v4151_v29  ;;  %v4306_v29 = vsel %vm1594_vm1, %v9175_v35, -inf }
 0x7af   : > { %4283 = vmax.xlane.f32.xlu2 %v4282_v13  ;;  %v4156_v13 = vsel %vm4140_vm4, %v4155_v1, %v4154_v6  ;;  %v4194_v14 = vsel %vm4193_vm8, %v4153_v12, %v4192_v33 }
 0x7b0   : > { %v4196_v5 = vsel %vm4195_vm9, %v4156_v13, %v4194_v14 }
 0x7b1   : > { %v4014_v24 = vpop.xlane.xlu1 %4013  ;;  %v4198_v4 = vsel %vm4197_vm10, %v4159_v43, %v4196_v5 }
 0x7b2   : > { %v4085_v34 = vmul.f32 %v9237_v10, %v4014_v24  ;;  %v4303_v24 = vsel %vm1594_vm1, %v9160_v25, -inf }
 0x7b4   : > { %v4161_v45 = vperm.slane %v4085_v34, %v9247_v31 }
 0x7b6   : > { %v4162_v32 = vsel %vm4140_vm4, %v4161_v45, %v4160_v39  ;;  %4277 = vmax.xlane.f32.xlu0 %v4276_v3  ;;  %4298 = vmax.xlane.f32.xlu1 %v4297_v18 }
 0x7b7   : > { %v4200_v40 = vsel %vm4199_vm11, %v4162_v32, %v4198_v4  ;;  %4292 = vmax.xlane.f32.xlu2 %v4291_v46 }
 0x7b8   : > { %4211 = vst.msk [vmem:[#allocation3 + $0x3] sm:$0xff] %vm4210_vm12, %v4200_v40 }
 0x7b9   : > { %v4023_v1 = vpop.xlane.xlu1 %4022 }
 0x7ba   : > { %v4017_v61 = vpop.xlane.xlu2 %4016  ;;  %v4088_v4 = vmul.f32 %v9237_v10, %v4023_v1 }
 0x7bb   : > { %v4086_v45 = vmul.f32 %v9237_v10, %v4017_v61 }
 0x7bd   : > { %v4163_v61 = vperm.slane %v4086_v45, %v9254_v63 }
 0x7be   : > { %4286 = vmax.xlane.f32.xlu0 %v4285_v15  ;;  %4307 = vmax.xlane.f32.xlu1 %v4306_v29 }
 0x7bf   : > { %4301 = vmax.xlane.f32.xlu2 %v4300_v22 }
 0x7c1   : > { %v4032_v23 = vpop.xlane.xlu1 %4031 }
 0x7c2   : > { %v4026_v6 = vpop.xlane.xlu2 %4025  ;;  %v4091_v32 = vmul.f32 %v9237_v10, %v4032_v23 }
 0x7c3   : > { %v4089_v3 = vmul.f32 %v9237_v10, %v4026_v6 }
 0x7c6   : > { %4295 = vmax.xlane.f32.xlu0 %v4294_v42  ;;  %v4167_v42 = vperm.slane %v4089_v3, %v9247_v31 }
 0x7c9   : > { %v4020_v47 = vpop.xlane.xlu0 %4019  ;;  %v4041_v12 = vpop.xlane.xlu1 %4040 }
 0x7ca   : > { %v4035_v55 = vpop.xlane.xlu2 %4034  ;;  %v4087_v39 = vmul.f32 %v9237_v10, %v4020_v47  ;;  %v4094_v3 = vmul.f32 %v9237_v10, %v4041_v12 }
 0x7cb   : > { %v4092_v46 = vmul.f32 %v9237_v10, %v4035_v55  ;;  %v4166_v55 = vperm.slane %v4088_v4, %v9254_v63 }
 0x7cc   : > { %v4164_v60 = vperm.slane %v4087_v39, %v9247_v31 }
 0x7cd   : > { %v4168_v4 = vsel %vm4140_vm4, %v4167_v42, %v4166_v55 }
 0x7ce   : > { %4304 = vmax.xlane.f32.xlu0 %v4303_v24  ;;  %v4170_v24 = vperm.slane %v4091_v32, %v9247_v31 }
 0x7d1   : > { %v4029_v37 = vpop.xlane.xlu0 %4028  ;;  %v4050_v13 = vpop.xlane.xlu1 %4049 }
 0x7d2   : > { %v4044_v34 = vpop.xlane.xlu2 %4043  ;;  %v4090_v5 = vmul.f32 %v9237_v10, %v4029_v37  ;;  %v4172_v37 = vperm.slane %v4092_v46, %v9254_v63  ;;  %v4097_v39 = vmul.f32 %v9237_v10, %v4050_v13 }
 0x7d4   : > { %v4169_v22 = vperm.slane %v4090_v5, %v9254_v63  ;;  %v4179_v12 = vperm.slane %v4097_v39, %v9247_v31 }
 0x7d9   : > { %v4038_v33 = vpop.xlane.xlu0 %4037  ;;  %v4059_v43 = vpop.xlane.xlu1 %4058 }
 0x7da   : > { %v4053_v14 = vpop.xlane.xlu2 %4052  ;;  %v4093_v18 = vmul.f32 %v9237_v10, %v4038_v33  ;;  %v4100_v40 = vmul.f32 %v9237_v10, %v4059_v43  ;;  %v4095_v33 = vmul.f32 %v9237_v10, %v4044_v34  ;;  %v4165_v43 = vsel %vm4140_vm4, %v4164_v60, %v4163_v61 }
 0x7db   : > { %v4201_v60 = vsel %vm4187_vm5, %v4168_v4, %v4165_v43 }
 0x7dc   : > { %v4173_v1 = vperm.slane %v4093_v18, %v9247_v31  ;;  %v4184_v45 = vperm.slane %v4100_v40, %v9254_v63  ;;  %v4171_v18 = vsel %vm4140_vm4, %v4170_v24, %v4169_v22  ;;  %v4176_v13 = vperm.slane %v4095_v33, %v9247_v31 }
 0x7dd   : > { %v4098_v40 = vmul.f32 %v9237_v10, %v4053_v14 }
 0x7de   : > { %v4174_v32 = vsel %vm4140_vm4, %v4173_v1, %v4172_v37 }
 0x7df   : > { %v4181_v24 = vperm.slane %v4098_v40, %v9254_v63  ;;  %v9379_v40 = vadd.s32 4294967271, %v9235_v53 }
 0x7e1   : > { %v4047_v15 = vpop.xlane.xlu0 %4046  ;;  %v9335_v29 = vpop.xlane.xlu1 %4217 }
 0x7e2   : > { %v4062_v6 = vpop.xlane.xlu2 %4061  ;;  %v4096_v23 = vmul.f32 %v9237_v10, %v4047_v15  ;;  %v4202_v15 = vsel %vm4189_vm6, %v4171_v18, %v4201_v60 }
 0x7e3   : > { %v4101_v47 = vmul.f32 %v9237_v10, %v4062_v6  ;;  %v4175_v6 = vperm.slane %v4094_v3, %v9254_v63  ;;  %v4203_v42 = vsel %vm4191_vm7, %v4174_v32, %v4202_v15 }
 0x7e4   : > { %v4178_v46 = vperm.slane %v4096_v23, %v9254_v63 }
 0x7e5   : > { %v4185_v5 = vperm.slane %v4101_v47, %v9247_v31  ;;  %v4177_v55 = vsel %vm4140_vm4, %v4176_v13, %v4175_v6  ;;  %v9376_v13 = vadd.s32 4294967263, %v9235_v53 }
 0x7e6   : > { %v4180_v47 = vsel %vm4140_vm4, %v4179_v12, %v4178_v46  ;;  %v4204_v37 = vsel %vm4193_vm8, %v4177_v55, %v4203_v42 }
 0x7e7   : > { %v4186_v34 = vsel %vm4140_vm4, %v4185_v5, %v4184_v45  ;;  %v4205_v33 = vsel %vm4195_vm9, %v4180_v47, %v4204_v37  ;;  %v4344_v42 = vperm.slane %v9335_v29, %v9376_v13 }
 0x7e9   : > { %v4056_v61 = vpop.xlane.xlu0 %4055  ;;  %v4227_v22 = vpop.xlane.xlu1 %4226 }
 0x7ea   : > { %v4099_v1 = vmul.f32 %v9237_v10, %v4056_v61  ;;  %v4221_v23 = vpop.xlane.xlu2 %4220 }
 0x7eb   : > { %v4347_v61 = vperm.slane %v4221_v23, %v9379_v40  ;;  %v4350_v23 = vperm.slane %v4227_v22, %v9379_v40 }
 0x7ec   : > { %v4182_v14 = vperm.slane %v4099_v1, %v9247_v31 }
 0x7ee   : > { %v4183_v43 = vsel %vm4140_vm4, %v4182_v14, %v4181_v24  ;;  %vm4408_vm4 = vcmask 335048  }
 0x7ef   : > { %v4206_v39 = vsel %vm4197_vm10, %v4183_v43, %v4205_v33 }
 0x7f0   : > { %v4207_v45 = vsel %vm4199_vm11, %v4186_v34, %v4206_v39 }
 0x7f1   : > { %v4215_v10 = vpop.xlane.xlu0 %4214  ;;  %v4236_v5 = vpop.xlane.xlu1 %4235  ;;  %4212 = vst.msk [vmem:[#allocation3 + $0xb] sm:$0xff] %vm4210_vm12, %v4207_v45 }
 0x7f2   : > { %v4230_v3 = vpop.xlane.xlu2 %4229  ;;  %v4342_v6 = vperm.slane %v4215_v10, %v9379_v40  ;;  %v4354_v37 = vperm.slane %v4236_v5, %v9376_v13 }
 0x7f3   : > { %v4351_v53 = vperm.slane %v4230_v3, %v9376_v13 }
 0x7f4   : > { %v4346_v14 = vsel %vm4345_vm3, %v4344_v42, %v4342_v6 }
 0x7f5   : > { %v4352_v45 = vsel %vm4345_vm3, %v4351_v53, %v4350_v23 }
 0x7f9   : > { %v4224_v18 = vpop.xlane.xlu0 %4223  ;;  %v4245_v4 = vpop.xlane.xlu1 %4244 }
 0x7fa   : > { %v4239_v63 = vpop.xlane.xlu2 %4238  ;;  %v4348_v34 = vperm.slane %v4224_v18, %v9376_v13 }
 0x7fb   : > { %v4356_v43 = vperm.slane %v4239_v63, %v9379_v40  ;;  %v4359_v63 = vperm.slane %v4245_v4, %v9379_v40 }
 0x7fc   : > { %v4349_v1 = vsel %vm4345_vm3, %v4348_v34, %v4347_v61 }
 0x7fd   : > { %v4392_v33 = vsel %vm4187_vm5, %v4349_v1, %v4346_v14 }
 0x7fe   : > { %v4393_v18 = vsel %vm4189_vm6, %v4352_v45, %v4392_v33 }
 0x801   : > { %v4233_v32 = vpop.xlane.xlu0 %4232  ;;  %v4254_v46 = vpop.xlane.xlu1 %4253 }
 0x802   : > { %v4248_v31 = vpop.xlane.xlu2 %4247  ;;  %v4353_v47 = vperm.slane %v4233_v32, %v9379_v40  ;;  %v4363_v22 = vperm.slane %v4254_v46, %v9376_v13 }
 0x803   : > { %v4360_v32 = vperm.slane %v4248_v31, %v9376_v13 }
 0x804   : > { %v4355_v29 = vsel %vm4345_vm3, %v4354_v37, %v4353_v47 }
 0x805   : > { %v4394_v5 = vsel %vm4191_vm7, %v4355_v29, %v4393_v18  ;;  %v4361_v42 = vsel %vm4345_vm3, %v4360_v32, %v4359_v63 }
 0x809   : > { %v4242_v60 = vpop.xlane.xlu0 %4241  ;;  %v9382_v12 = vpop.xlane.xlu1 %4262 }
 0x80a   : > { %v4257_v15 = vpop.xlane.xlu2 %4256  ;;  %v4357_v55 = vperm.slane %v4242_v60, %v9376_v13  ;;  %v4368_v63 = vperm.slane %v9382_v12, %v9379_v40 }
 0x80b   : > { %v4365_v1 = vperm.slane %v4257_v15, %v9379_v40 }
 0x80c   : > { %v4358_v10 = vsel %vm4345_vm3, %v4357_v55, %v4356_v43  ;;  %v4504_v43 = vld [vmem:[%s9757_s5 + $0x78] sm:$0xff] }
 0x80d   : > { %v4395_v34 = vsel %vm4193_vm8, %v4358_v10, %v4394_v5  ;;  %4540 = vmatpush.msrb.mxu2 %v4504_v43 }
 0x80e   : > { %v4396_v31 = vsel %vm4195_vm9, %v4361_v42, %v4395_v34 }
 0x811   : > { %v4251_v24 = vpop.xlane.xlu0 %4250  ;;  %v4272_v60 = vpop.xlane.xlu1 %4271 }
 0x812   : > { %v4266_v39 = vpop.xlane.xlu2 %4265  ;;  %v4362_v3 = vperm.slane %v4251_v24, %v9379_v40  ;;  %v4372_v32 = vperm.slane %v4272_v60, %v9376_v13 }
 0x813   : > { %v4369_v5 = vperm.slane %v4266_v39, %v9376_v13 }
 0x814   : > { %v4364_v61 = vsel %vm4345_vm3, %v4363_v22, %v4362_v3 }
 0x815   : > { %v4397_v53 = vsel %vm4197_vm10, %v4364_v61, %v4396_v31  ;;  %v4503_v61 = vld [vmem:[%s9757_s5 + $0x70] sm:$0xff]  ;;  %v4370_v60 = vsel %vm4345_vm3, %v4369_v5, %v4368_v63 }
 0x816   : > { %4541 = vmatpush.msrb.mxu2 %v4503_v61 }
 0x819   : > { %v4260_v6 = vpop.xlane.xlu0 %4259  ;;  %v4281_v24 = vpop.xlane.xlu1 %4280 }
 0x81a   : > { %v4366_v47 = vperm.slane %v4260_v6, %v9376_v13  ;;  %v4275_v55 = vpop.xlane.xlu2 %4274 }
 0x81b   : > { %v4374_v22 = vperm.slane %v4275_v55, %v9379_v40 }
 0x81c   : > { %v4367_v46 = vsel %vm4345_vm3, %v4366_v47, %v4365_v1 }
 0x81d   : > { %v4398_v4 = vsel %vm4199_vm11, %v4367_v46, %v4397_v53  ;;  %v4377_v53 = vperm.slane %v4281_v24, %v9379_v40  ;;  %v4502_v24 = vld [vmem:[%s9757_s5 + $0x68] sm:$0xff] }
 0x81e   : > { %4409 = vst.msk [vmem:[#allocation3 + $0x3] sm:$0xff] %vm4408_vm4, %v4398_v4  ;;  %4542 = vmatpush.msrb.mxu2 %v4502_v24 }
 0x821   : > { %v4269_v14 = vpop.xlane.xlu0 %4268  ;;  %v4290_v33 = vpop.xlane.xlu1 %4289 }
 0x822   : > { %v4284_v15 = vpop.xlane.xlu2 %4283  ;;  %v4371_v10 = vperm.slane %v4269_v14, %v9379_v40  ;;  %v4381_v31 = vperm.slane %v4290_v33, %v9376_v13 }
 0x823   : > { %v4378_v39 = vperm.slane %v4284_v15, %v9376_v13 }
 0x824   : > { %v4373_v34 = vsel %vm4345_vm3, %v4372_v32, %v4371_v10 }
 0x825   : > { %v4417_v37 = vld [vmem:[#allocation3 + $0x3] sm:$0xff]  ;;  %v4399_v12 = vsel %vm4187_vm5, %v4373_v34, %v4370_v60  ;;  %vm4476_vm5 = vcmask 719872  }
 0x826   : > { %4443 = vrot.lane.b32.xlu1 %v4417_v37, %s5449_s8  ;;  %v4379_v37 = vsel %vm4345_vm3, %v4378_v39, %v4377_v53  ;;  %v4415_v60 = vld [vmem:[#allocation3 + $0x2] sm:$0xff] }
 0x827   : > { %v4413_v39 = vld [vmem:[#allocation3 + $0x1] sm:$0xff] }
 0x829   : > { %v4278_v23 = vpop.xlane.xlu0 %4277  ;;  %v4299_v18 = vpop.xlane.xlu1 %4298 }
 0x82a   : > { %v4293_v45 = vpop.xlane.xlu2 %4292  ;;  %v4375_v3 = vperm.slane %v4278_v23, %v9376_v13 }
 0x82b   : > { %v4383_v4 = vperm.slane %v4293_v45, %v9379_v40  ;;  %v4386_v45 = vperm.slane %v4299_v18, %v9379_v40  ;;  %v4501_v18 = vld [vmem:[%s9757_s5 + $0x60] sm:$0xff] }
 0x82c   : > { %v4376_v6 = vsel %vm4345_vm3, %v4375_v3, %v4374_v22  ;;  %4543 = vmatpush.msrb.mxu2 %v4501_v18  ;;  %v4492_v18 = vld [vmem:[%s9757_s5 + $0x18] sm:$0xff] }
 0x82d   : > { %v4400_v46 = vsel %vm4189_vm6, %v4376_v6, %v4399_v12  ;;  %v4519_v6 = vld [vmem:[%s9757_s5 + $0xf0] sm:$0xff]  ;;  %v4517_v12 = vld [vmem:[%s9757_s5 + $0xe0] sm:$0xff]  ;;  %vm4481_vm6 = vcmask 392192  }
 0x82e   : > { %v4401_v15 = vsel %vm4191_vm7, %v4379_v37, %v4400_v46  ;;  %v4497_v37 = vld [vmem:[%s9757_s5 + $0x40] sm:$0xff]  ;;  %vm4484_vm7 = vcmask 752640  }
 0x831   : > { %v4287_v29 = vpop.xlane.xlu0 %4286  ;;  %v4308_v43 = vpop.xlane.xlu1 %4307 }
 0x832   : > { %v4380_v42 = vperm.slane %v4287_v29, %v9379_v40  ;;  %v4302_v55 = vpop.xlane.xlu2 %4301  ;;  %v4390_v32 = vperm.slane %v4308_v43, %v9376_v13  ;;  %v4514_v43 = vld [vmem:[%s9757_s5 + $0xc8] sm:$0xff] }
 0x833   : > { %v4387_v29 = vperm.slane %v4302_v55, %v9376_v13 }
 0x834   : > { %v4382_v14 = vsel %vm4345_vm3, %v4381_v31, %v4380_v42  ;;  %v4499_v42 = vld [vmem:[%s9757_s5 + $0x50] sm:$0xff] }
 0x835   : > { %v4402_v33 = vsel %vm4193_vm8, %v4382_v14, %v4401_v15  ;;  %v4388_v22 = vsel %vm4345_vm3, %v4387_v29, %v4386_v45  ;;  %v4516_v14 = vld [vmem:[%s9757_s5 + $0xd8] sm:$0xff]  ;;  %v4495_v29 = vld [vmem:[%s9757_s5 + $0x30] sm:$0xff]  ;;  %vm4530_vm8 = vcmask 424960  }
 0x836   : > { %v4496_v15 = vld [vmem:[%s9757_s5 + $0x38] sm:$0xff] }
 0x839   : > { %v4296_v1 = vpop.xlane.xlu0 %4295 }
 0x83a   : > { %v4384_v47 = vperm.slane %v4296_v1, %v9376_v13  ;;  %v4520_v13 = vld [vmem:[%s9757_s5 + $0xf8] sm:$0xff]  ;;  %v4518_v1 = vld [vmem:[%s9757_s5 + $0xe8] sm:$0xff] }
 0x83b   : > { %4563 = vmatpush.msrb.mxu3 %v4520_v13  ;;  %v4510_v13 = vld [vmem:[%s9757_s5 + $0xa8] sm:$0xff] }
 0x83c   : > { %v4385_v23 = vsel %vm4345_vm3, %v4384_v47, %v4383_v4  ;;  %v4498_v47 = vld [vmem:[%s9757_s5 + $0x48] sm:$0xff] }
 0x83d   : > { %v4403_v10 = vsel %vm4195_vm9, %v4385_v23, %v4402_v33  ;;  %4564 = vmatpush.msrb.mxu3 %v4519_v6  ;;  %v4515_v23 = vld [vmem:[%s9757_s5 + $0xd0] sm:$0xff]  ;;  %v4509_v6 = vld [vmem:[%s9757_s5 + $0xa0] sm:$0xff] }
 0x83e   : > { %v4404_v34 = vsel %vm4197_vm10, %v4388_v22, %v4403_v10  ;;  %v4494_v22 = vld [vmem:[%s9757_s5 + $0x28] sm:$0xff] }
 0x83f   : > { %4565 = vmatpush.msrb.mxu3 %v4518_v1  ;;  %v4508_v1 = vld [vmem:[%s9757_s5 + $0x98] sm:$0xff] }
 0x841   : > { %v4305_v3 = vpop.xlane.xlu0 %4304  ;;  %4566 = vmatpush.msrb.mxu3 %v4517_v12  ;;  %v4506_v12 = vld [vmem:[%s9757_s5 + $0x88] sm:$0xff] }
 0x842   : > { %v4389_v5 = vperm.slane %v4305_v3, %v9379_v40  ;;  %v4500_v40 = vld [vmem:[%s9757_s5 + $0x58] sm:$0xff] }
 0x843   : > { %4544 = vmatpush.msrb.mxu2 %v4500_v40  ;;  %4567 = vmatpush.msrb.mxu3 %v4516_v14  ;;  %v4491_v40 = vld [vmem:[%s9757_s5 + $0x10] sm:$0xff]  ;;  %v4522_v14 = vld [vmem:[%s9757_s5 + $0x108] sm:$0xff] }
 0x844   : > { %v4391_v63 = vsel %vm4345_vm3, %v4390_v32, %v4389_v5  ;;  %v4513_v5 = vld [vmem:[%s9757_s5 + $0xc0] sm:$0xff] }
 0x845   : > { %v4405_v61 = vsel %vm4199_vm11, %v4391_v63, %v4404_v34  ;;  %4545 = vmatpush.msrb.mxu2 %v4499_v42  ;;  %4568 = vmatpush.msrb.mxu3 %v4515_v23  ;;  %v4512_v63 = vld [vmem:[%s9757_s5 + $0xb8] sm:$0xff]  ;;  %v4493_v34 = vld [vmem:[%s9757_s5 + $0x20] sm:$0xff]  ;;  %v4490_v42 = vld [vmem:[%s9757_s5 + $0x8] sm:$0xff] }
 0x846   : > { %4410 = vst.msk [vmem:[#allocation3 + $0xb] sm:$0xff] %vm4408_vm4, %v4405_v61  ;;  %v4511_v61 = vld [vmem:[%s9757_s5 + $0xb0] sm:$0xff] }
 0x847   : > { %4546 = vmatpush.msrb.mxu2 %v4498_v47  ;;  %4569 = vmatpush.msrb.mxu3 %v4514_v43  ;;  %v4527_v47 = vld [vmem:[%s9757_s5 + $0x130] sm:$0xf] }
 0x849   : > { %4547 = vmatpush.msrb.mxu2 %v4497_v37  ;;  %4570 = vmatpush.msrb.mxu3 %v4513_v5  ;;  %v4521_v37 = vld [vmem:[%s9757_s5 + $0x100] sm:$0xff] }
 0x84b   : > { %4548 = vmatpush.msrb.mxu2 %v4496_v15  ;;  %4571 = vmatpush.msrb.mxu3 %v4512_v63 }
 0x84d   : > { %v4423_v31 = vld [vmem:[#allocation3 + $0x6] sm:$0xff]  ;;  %4549 = vmatpush.msrb.mxu2 %v4495_v29  ;;  %v4424_v32 = vld [vmem:[#allocation3 + $0xe] sm:$0xff]  ;;  %4572 = vmatpush.msrb.mxu3 %v4511_v61 }
 0x84e   : > { %v4416_v53 = vld [vmem:[#allocation3 + $0xa] sm:$0xff]  ;;  %4467 = vrot.lane.b32.xlu1 %v4423_v31, %s5450_s9  ;;  %v4526_v31 = vld [vmem:[%s9757_s5 + $0x128] sm:$0xff] }
 0x84f   : > { %v4414_v46 = vld [vmem:[#allocation3 + $0x9] sm:$0xff]  ;;  %v5352_v4 = vpack.i.bf16 %v4416_v53, %v4415_v60  ;;  %4550 = vmatpush.msrb.mxu2 %v4494_v22  ;;  %4573 = vmatpush.msrb.mxu3 %v4510_v13 }
 0x850   : > { %v5347_v55 = vpack.i.bf16 %v4414_v46, %v4413_v39  ;;  %v4422_v33 = vld [vmem:[#allocation3 + $0xd] sm:$0xff]  ;;  %v4419_v24 = vld [vmem:[#allocation3 + $0x4] sm:$0xff] }
 0x851   : > { %5353 = vrot.lane.b32.xlu0 %v5352_v4, %s5459_s29  ;;  %v4421_v45 = vld [vmem:[#allocation3 + $0x5] sm:$0xff]  ;;  %4551 = vmatpush.msrb.mxu2 %v4493_v34  ;;  %v4489_v60 = vld [vmem:[%s9757_s5] sm:$0xff] }
 0x852   : > { %5348 = vrot.lane.b32.xlu2 %v5347_v55, %s5460_s10  ;;  %v4418_v10 = vld [vmem:[#allocation3 + $0xb] sm:$0xff]  ;;  %4574 = vmatpush.msrb.mxu3 %v4509_v6  ;;  %v4507_v39 = vld [vmem:[%s9757_s5 + $0x90] sm:$0xff] }
 0x853   : > { %v4420_v3 = vld [vmem:[#allocation3 + $0xc] sm:$0xff]  ;;  %4552 = vmatpush.msrb.mxu2 %v4492_v18  ;;  %v4523_v55 = vld [vmem:[%s9757_s5 + $0x110] sm:$0xff] }
 0x854   : > { %4575 = vmatpush.msrb.mxu3 %v4508_v1  ;;  %v4525_v53 = vld [vmem:[%s9757_s5 + $0x120] sm:$0xff]  ;;  %v4524_v4 = vld [vmem:[%s9757_s5 + $0x118] sm:$0xff] }
 0x855   : > { %4553 = vmatpush.msrb.mxu2 %v4491_v40  ;;  %v4505_v46 = vld [vmem:[%s9757_s5 + $0x80] sm:$0xff]  ;;  %v4412_v18 = vld [vmem:[#allocation3 + $0x8] sm:$0xff] }
 0x856   : > { %4461 = vrot.lane.b32.xlu1 %v4422_v33, %s5461_s14  ;;  %4576 = vmatpush.msrb.mxu3 %v4507_v39 }
 0x857   : > { %4554 = vmatpush.msrb.mxu2 %v4490_v42 }
 0x858   : > { %4577 = vmatpush.msrb.mxu3 %v4506_v12 }
 0x859   : > { %4451 = vrot.lane.b32.xlu0 %v4419_v24, %s5462_s15  ;;  %4555 = vmatpush.msrb.mxu2 %v4489_v60  ;;  %v4411_v24 = vld [vmem:[#allocation3] sm:$0xff] }
 0x85a   : > { %4459 = vrot.lane.b32.xlu2 %v4421_v45, %s5461_s14  ;;  %4578 = vmatpush.msrb.mxu3 %v4505_v46 }
 0x85b   : > { %5276 = vmatpush.msk.msra.mxu2 %vm1964_vm0, %v4527_v47  ;;  %vm4473_vm0 = vcmask 359424  }
 0x85d   : > { %4596 = vmatpush.msra.mxu2 %v4526_v31 }
 0x85f   : > { %4597 = vmatpush.msra.mxu2 %v4525_v53 }
 0x861   : > { %4445 = vrot.lane.b32.xlu0 %v4418_v10, %s5449_s8  ;;  %4598 = vmatpush.msra.mxu2 %v4524_v4 }
 0x862   : > { %4453 = vrot.lane.b32.xlu2 %v4420_v3, %s5462_s15 }
 0x863   : > { %4599 = vmatpush.msra.mxu2 %v4523_v55  ;;  %v10547_v55 = vlaneseq }
 0x865   : > { %4600 = vmatpush.msra.mxu2 %v4522_v14  ;;  %v9584_v14 = vshrl.u32 %v10547_v55, 7 }
 0x867   : > { %4601 = vmatpush.msra.mxu2 %v4521_v37  ;;  %5359 = vset.pattern.permute.xlu0 %v9584_v14  ;;  %v9589_v37 = vadd.s32 8, %v9584_v14 }
 0x868   : > { %5357 = vset.pattern.permute.xlu2 %v9584_v14 }
 0x869   : > { %4469 = vrot.lane.b32.xlu0 %v4424_v32, %s5450_s9  ;;  %5358 = vset.pattern.permute.xlu1 %v9589_v37 }
 0x898   : > { %v4444_v43 = vpop.permute.xlu1 %4443 }
 0x8ac   : > { %v5349_v23 = vpop.permute.xlu2 %5348 }
 0x8ad   : > { %v5350_v15 = vunpack.i.l.bf16 %v5349_v23  ;;  %v5351_v3 = vunpack.i.h.bf16 %v5349_v23 }
 0x8af   : > { %v4474_v45 = vsel %vm4473_vm0, %v4411_v24, %v5350_v15  ;;  %v4475_v40 = vsel %vm4473_vm0, %v4412_v18, %v5351_v3  ;;  %v4529_v15 = vstv %s4528_s23 }
 0x8b4   : > { %v4460_v32 = vpop.permute.xlu2 %4459 }
 0x8bc   : > { %v4454_v1 = vpop.permute.xlu2 %4453 }
 0x8c0   : > { %v4468_v22 = vpop.permute.xlu1 %4467 }
 0x8c1   : > { %v4487_v12 = vsel %vm1627_vm2, %v4460_v32, %v4468_v22 }
 0x8c3   : > { %v5354_v29 = vpop.permute.xlu0 %5353 }
 0x8c4   : > { %v5355_v33 = vunpack.i.l.bf16 %v5354_v29  ;;  %v5356_v5 = vunpack.i.h.bf16 %v5354_v29 }
 0x8c6   : > { %v4477_v10 = vsel %vm4476_vm5, %v4474_v45, %v5355_v33  ;;  %v4479_v34 = vsel %vm1594_vm1, %v5355_v33, %v4444_v43  ;;  %v4478_v6 = vsel %vm4476_vm5, %v4475_v40, %v5356_v5 }
 0x8c7   : > { %4556 = vmatmul.f32.vlgmr.msrb.gmra.mxu2 %v4477_v10 }
 0x8c8   : > { %v4462_v39 = vpop.permute.xlu1 %4461 }
 0x8cb   : > { %v4452_v63 = vpop.permute.xlu0 %4451 }
 0x8cc   : > { %v4482_v61 = vsel %vm4481_vm6, %v4479_v34, %v4452_v63 }
 0x8cd   : > { %v4485_v13 = vsel %vm4484_vm7, %v4482_v61, %v4460_v32 }
 0x8ce   : > { %4579 = vmatmul.f32.vlgmr.msrb.gmra.mxu3 %v4485_v13 }
 0x8cf   : > { %4559 = vmatmul.f32.gmra.mxu2 %v4478_v6 }
 0x8d3   : > { %v4446_v42 = vpop.permute.xlu0 %4445 }
 0x8d4   : > { %v4480_v60 = vsel %vm1594_vm1, %v5356_v5, %v4446_v42 }
 0x8d5   : > { %v4483_v47 = vsel %vm4481_vm6, %v4480_v60, %v4454_v1 }
 0x8d6   : > { %v4486_v31 = vsel %vm4484_vm7, %v4483_v47, %v4462_v39 }
 0x8d7   : > { %4582 = vmatmul.f32.gmra.mxu3 %v4486_v31  ;;  %5277 = vmatmul.msk.f32.vlgmr.msra.gmra.mxu2 %vm4530_vm8, %v4487_v12 }
 0x8db   : > { %v4470_v53 = vpop.permute.xlu0 %4469 }
 0x8dc   : > { %v4488_v46 = vsel %vm1627_vm2, %v4462_v39, %v4470_v53 }
 0x8df   : > { %5278 = vmatmul.msk.f32.gmra.mxu2 %vm4530_vm8, %v4488_v46 }
 0x94a   : > { %v4557_v4 = vpop.f32.mrf.mxu2 }
 0x94b   : > { %v4558_v29 = vadd.f32 %v4557_v4, %v4529_v15 }
 0x951   : > { %v4580_v43 = vpop.f32.mrf.mxu3 }
 0x952   : > { %v4560_v23 = vpop.f32.mrf.mxu2  ;;  %v4581_v33 = vadd.f32 %v4580_v43, %v4558_v29 }
 0x953   : > { %v4561_v32 = vadd.f32 %v4560_v23, %v4529_v15 }
 0x95a   : > { %v4603_v24 = vpop.f32.mrf.mxu2  ;;  %v4583_v3 = vpop.f32.mrf.mxu3 }
 0x95b   : > { %v4604_v45 = vadd.f32 %v4603_v24, %v4581_v33  ;;  %v4584_v22 = vadd.f32 %v4583_v3, %v4561_v32  ;;  %v5279_v33 = vld [vmem:[%s5520_s30 + $0x19] sm:$0xff] }
 0x95d   : > { %v4609_v10 = vsub.f32 0.0, %v4604_v45 }
 0x95f   : > { %v4611_v5 = vmul.f32 1.442695, %v4609_v10 }
 0x961   : > { %5377 = vpow2.f32 %v4611_v5 }
 0x962   : > { %v4606_v63 = vpop.f32.mrf.mxu2 }
 0x963   : > { %v4607_v34 = vadd.f32 %v4606_v63, %v4584_v22 }
 0x965   : > { %v4610_v61 = vsub.f32 0.0, %v4607_v34  ;;  %v5281_v34 = vld [vmem:[%s5520_s30 + $0x31] sm:$0xff] }
 0x967   : > { %v5378_v18 = vpop.eup %5377  ;;  %v4613_v13 = vmul.f32 1.442695, %v4610_v61 }
 0x968   : > { %v4615_v40 = vadd.f32 1.0, %v5378_v18  ;;  %v5280_v18 = vld [vmem:[%s5520_s30 + $0x21] sm:$0xff] }
 0x96a   : > { %5379 = vrcp.f32 %v4615_v40 }
 0x96b   : > { %5381 = vpow2.f32 %v4613_v13 }
 0x970   : > { %v5380_v6 = vpop.eup %5379 }
 0x971   : > { %v5382_v42 = vpop.eup %5381  ;;  %v4664_v1 = vperm.slane %v5380_v6, 1  ;;  %v4651_v60 = vperm.slane %v5380_v6, 0  ;;  %v4729_v47 = vperm.slane %v5380_v6, 6  ;;  %v4677_v31 = vperm.slane %v5380_v6, 2 }
 0x972   : > { %v4616_v39 = vadd.f32 1.0, %v5382_v42  ;;  %v4690_v46 = vperm.slane %v5380_v6, 3  ;;  %v4703_v4 = vperm.slane %v5380_v6, 4  ;;  %v4716_v23 = vperm.slane %v5380_v6, 5 }
 0x973   : > { %4669 = vperm.xlu0 %5359, %v4664_v1   ;;  %4662 = vperm.xlu1 %5358, %v4651_v60   ;;  %v4742_v43 = vperm.slane %v5380_v6, 7  ;;  %v5284_v6 = vld [vmem:[%s5520_s30 + $0x51] sm:$0xff] }
 0x974   : > { %4656 = vperm.xlu2 %5357, %v4651_v60   ;;  %5383 = vrcp.f32 %v4616_v39 }
 0x97a   : > { %v9594_v12 = vpop.eup %5383 }
 0x97b   : > { %4734 = vperm.xlu0 %5359, %v4729_v47   ;;  %5361 = vset.pattern.permute.xlu1 %v9584_v14  ;;  %v4794_v53 = vperm.slane %v9594_v12, 3  ;;  %v4755_v55 = vperm.slane %v9594_v12, 0  ;;  %v4820_v15 = vperm.slane %v9594_v12, 5  ;;  %v4768_v29 = vperm.slane %v9594_v12, 1 }
 0x97c   : > { %5360 = vset.pattern.permute.xlu2 %v9589_v37  ;;  %v4781_v3 = vperm.slane %v9594_v12, 2  ;;  %v4807_v63 = vperm.slane %v9594_v12, 4 }
 0x983   : > { %4682 = vperm.xlu1 %5361, %v4677_v31   ;;  %4799 = vperm.xlu0 %5359, %v4794_v53  }
 0x984   : > { %4675 = vperm.xlu2 %5360, %v4664_v1  }
 0x98b   : > { %4695 = vperm.xlu1 %5361, %v4690_v46   ;;  %5368 = vset.pattern.permute.xlu0 %v9589_v37 }
 0x98c   : > { %4688 = vperm.xlu2 %5360, %v4677_v31  }
 0x993   : > { %5363 = vset.pattern.permute.xlu1 %v9589_v37  ;;  %4701 = vperm.xlu0 %5368, %v4690_v46  }
 0x994   : > { %5362 = vset.pattern.permute.xlu2 %v9584_v14 }
 0x99b   : > { %4714 = vperm.xlu1 %5363, %v4703_v4   ;;  %4766 = vperm.xlu0 %5368, %v4755_v55  }
 0x99c   : > { %4708 = vperm.xlu2 %5362, %v4703_v4   ;;  %v5283_v4 = vld [vmem:[%s5520_s30 + $0x49] sm:$0xff] }
 0x9a3   : > { %4727 = vperm.xlu1 %5363, %v4716_v23   ;;  %4831 = vperm.xlu0 %5368, %v4820_v15  }
 0x9a4   : > { %4721 = vperm.xlu2 %5362, %v4716_v23   ;;  %v5287_v23 = vld [vmem:[%s5520_s30 + $0x79] sm:$0xff] }
 0x9ab   : > { %5365 = vset.pattern.permute.xlu1 %v9584_v14 }
 0x9ac   : > { %5364 = vset.pattern.permute.xlu2 %v9589_v37 }
 0x9b3   : > { %4747 = vperm.xlu1 %5365, %v4742_v43  }
 0x9b4   : > { %4740 = vperm.xlu2 %5364, %v4729_v47  }
 0x9bb   : > { %4760 = vperm.xlu1 %5365, %v4755_v55  }
 0x9bc   : > { %4753 = vperm.xlu2 %5364, %v4742_v43  }
 0x9c3   : > { %5367 = vset.pattern.permute.xlu1 %v9589_v37 }
 0x9c4   : > { %5366 = vset.pattern.permute.xlu2 %v9584_v14 }
 0x9cb   : > { %4779 = vperm.xlu1 %5367, %v4768_v29  }
 0x9cc   : > { %4773 = vperm.xlu2 %5366, %v4768_v29  }
 0x9ce   : > { %v4657_v24 = vpop.permute.xlu2 %4656 }
 0x9cf   : > { %v4859_v45 = vmul.f32 %v4657_v24, %v8933_v21  ;;  %v5282_v21 = vld [vmem:[%s5520_s30 + $0x39] sm:$0xff] }
 0x9d1   : > { %v4891_v10 = vadd.f32 %v5279_v33, %v4859_v45 }
 0x9d3   : > { %4923 = vst.msk [vmem:[%s9613_s28] sm:$0xff] %vm1594_vm1, %v4891_v10  ;;  %4792 = vperm.xlu1 %5367, %v4781_v3  }
 0x9d4   : > { %4786 = vperm.xlu2 %5366, %v4781_v3  }
 0x9db   : > { %5370 = vset.pattern.permute.xlu1 %v9584_v14 }
 0x9dc   : > { %5369 = vset.pattern.permute.xlu2 %v9589_v37 }
 0x9de   : > { %v4676_v32 = vpop.permute.xlu2 %4675 }
 0x9df   : > { %v4862_v5 = vmul.f32 %v4676_v32, %v9010_v17 }
 0x9e1   : > { %v4894_v22 = vadd.f32 %v5282_v21, %v4862_v5  ;;  %v4846_v5 = vperm.slane %v9594_v12, 7 }
 0x9e3   : > { %4926 = vst.msk [vmem:[%s9613_s28 + $0x18] sm:$0xff] %vm1594_vm1, %v4894_v22  ;;  %4812 = vperm.xlu1 %5370, %v4807_v63   ;;  %v5286_v22 = vld [vmem:[%s5520_s30 + $0x69] sm:$0xff] }
 0x9e4   : > { %4805 = vperm.xlu2 %5369, %v4794_v53  }
 0x9e5   : > { %v4670_v61 = vpop.permute.xlu0 %4669  ;;  %v4663_v13 = vpop.permute.xlu1 %4662 }
 0x9e6   : > { %v4861_v40 = vmul.f32 %v4670_v61, %v8989_v44  ;;  %v4689_v17 = vpop.permute.xlu2 %4688  ;;  %v4860_v42 = vmul.f32 %v4663_v13, %v8967_v49  ;;  %v5291_v44 = vld [vmem:[%s5520_s30 + $0xa9] sm:$0xff]  ;;  %v5292_v13 = vld [vmem:[%s5520_s30 + $0xb1] sm:$0xff] }
 0x9e7   : > { %v4864_v1 = vmul.f32 %v4689_v17, %v9052_v36  ;;  %v5301_v36 = vld [vmem:[%s5520_s30 + $0x121] sm:$0xff] }
 0x9e8   : > { %v4893_v60 = vadd.f32 %v5281_v34, %v4861_v40  ;;  %v4892_v39 = vadd.f32 %v5280_v18, %v4860_v42 }
 0x9e9   : > { %v4896_v47 = vadd.f32 %v5284_v6, %v4864_v1 }
 0x9ea   : > { %4925 = vst.msk [vmem:[%s9613_s28 + $0x10] sm:$0xff] %vm1594_vm1, %v4893_v60 }
 0x9eb   : > { %4928 = vst.msk [vmem:[%s9613_s28 + $0x28] sm:$0xff] %vm1594_vm1, %v4896_v47  ;;  %4825 = vperm.xlu1 %5370, %v4820_v15  }
 0x9ec   : > { %4924 = vst.msk [vmem:[%s9613_s28 + $0x8] sm:$0xff] %vm1594_vm1, %v4892_v39  ;;  %4818 = vperm.xlu2 %5369, %v4807_v63   ;;  %v5306_v39 = vld [vmem:[%s5520_s30 + $0x159] sm:$0xff] }
 0x9ed   : > { %v4735_v31 = vpop.permute.xlu0 %4734 }
 0x9ee   : > { %v4871_v49 = vmul.f32 %v4735_v31, %v9087_v0 }
 0x9f0   : > { %v4903_v53 = vadd.f32 %v5291_v44, %v4871_v49  ;;  %v5294_v44 = vld [vmem:[%s5520_s30 + $0xc9] sm:$0xff] }
 0x9f2   : > { %4935 = vst.msk [vmem:[%s9613_s28 + $0x60] sm:$0xff] %vm1594_vm1, %v4903_v53 }
 0x9f3   : > { %5372 = vset.pattern.permute.xlu1 %v9589_v37 }
 0x9f4   : > { %5371 = vset.pattern.permute.xlu2 %v9584_v14  ;;  %v4833_v14 = vperm.slane %v9594_v12, 6  ;;  %v5288_v12 = vld [vmem:[%s5520_s30 + $0x81] sm:$0xff] }
 0x9f5   : > { %v4800_v46 = vpop.permute.xlu0 %4799  ;;  %v4683_v55 = vpop.permute.xlu1 %4682 }
 0x9f6   : > { %v4709_v15 = vpop.permute.xlu2 %4708  ;;  %v4881_v0 = vmul.f32 %v4800_v46, %v9130_v52  ;;  %v4863_v43 = vmul.f32 %v4683_v55, %v9043_v27  ;;  %v5285_v52 = vld [vmem:[%s5520_s30 + $0x61] sm:$0xff] }
 0x9f7   : > { %v4867_v29 = vmul.f32 %v4709_v15, %v9067_v30  ;;  %v5289_v30 = vld [vmem:[%s5520_s30 + $0x91] sm:$0xff]  ;;  %v5293_v55 = vld [vmem:[%s5520_s30 + $0xc1] sm:$0xff] }
 0x9f8   : > { %v4913_v33 = vadd.f32 %v5301_v36, %v4881_v0  ;;  %v4895_v37 = vadd.f32 %v5283_v4, %v4863_v43 }
 0x9f9   : > { %v4899_v24 = vadd.f32 %v5287_v23, %v4867_v29  ;;  %v5295_v29 = vld [vmem:[%s5520_s30 + $0xd9] sm:$0xff] }
 0x9fa   : > { %4945 = vst.msk [vmem:[%s9613_s28 + $0xb0] sm:$0xff] %vm1594_vm1, %v4913_v33 }
 0x9fb   : > { %4931 = vst.msk [vmem:[%s9613_s28 + $0x40] sm:$0xff] %vm1594_vm1, %v4899_v24  ;;  %4844 = vperm.xlu1 %5372, %v4833_v14  }
 0x9fc   : > { %4927 = vst.msk [vmem:[%s9613_s28 + $0x20] sm:$0xff] %vm1594_vm1, %v4895_v37  ;;  %4838 = vperm.xlu2 %5371, %v4833_v14   ;;  %v5299_v37 = vld [vmem:[%s5520_s30 + $0x109] sm:$0xff] }
 0x9fd   : > { %v4696_v27 = vpop.permute.xlu1 %4695 }
 0x9fe   : > { %v4722_v45 = vpop.permute.xlu2 %4721  ;;  %v4865_v10 = vmul.f32 %v4696_v27, %v9057_v38  ;;  %v5298_v27 = vld [vmem:[%s5520_s30 + $0xf9] sm:$0xff] }
 0x9ff   : > { %v4869_v3 = vmul.f32 %v4722_v45, %v9077_v28  ;;  %v5296_v28 = vld [vmem:[%s5520_s30 + $0xe1] sm:$0xff]  ;;  %v5302_v45 = vld [vmem:[%s5520_s30 + $0x129] sm:$0xff] }
 0xa00   : > { %v4897_v21 = vadd.f32 %v5285_v52, %v4865_v10 }
 0xa01   : > { %v4901_v32 = vadd.f32 %v5289_v30, %v4869_v3 }
 0xa02   : > { %4929 = vst.msk [vmem:[%s9613_s28 + $0x30] sm:$0xff] %vm1594_vm1, %v4897_v21 }
 0xa03   : > { %4933 = vst.msk [vmem:[%s9613_s28 + $0x50] sm:$0xff] %vm1594_vm1, %v4901_v32  ;;  %4857 = vperm.xlu1 %5372, %v4846_v5   ;;  %v5300_v32 = vld [vmem:[%s5520_s30 + $0x111] sm:$0xff] }
 0xa04   : > { %4851 = vperm.xlu2 %5371, %v4846_v5  }
 0xa05   : > { %v4702_v63 = vpop.permute.xlu0 %4701 }
 0xa06   : > { %v4866_v34 = vmul.f32 %v4702_v63, %v9062_v20 }
 0xa08   : > { %v4898_v38 = vadd.f32 %v5286_v22, %v4866_v34  ;;  %v5304_v22 = vld [vmem:[%s5520_s30 + $0x141] sm:$0xff] }
 0xa0a   : > { %4930 = vst.msk [vmem:[%s9613_s28 + $0x38] sm:$0xff] %vm1594_vm1, %v4898_v38 }
 0xa0d   : > { %v4767_v61 = vpop.permute.xlu0 %4766  ;;  %v4715_v18 = vpop.permute.xlu1 %4714 }
 0xa0e   : > { %v4741_v40 = vpop.permute.xlu2 %4740  ;;  %v4876_v6 = vmul.f32 %v4767_v61, %v9133_v51  ;;  %v4868_v17 = vmul.f32 %v4715_v18, %v9072_v56  ;;  %v5290_v51 = vld [vmem:[%s5520_s30 + $0x99] sm:$0xff] }
 0xa0f   : > { %v4872_v20 = vmul.f32 %v4741_v40, %v9092_v58 }
 0xa10   : > { %v4908_v42 = vadd.f32 %v5296_v28, %v4876_v6  ;;  %v4900_v1 = vadd.f32 %v5288_v12, %v4868_v17  ;;  %v5303_v28 = vld [vmem:[%s5520_s30 + $0x139] sm:$0xff]  ;;  %v5307_v12 = vld [vmem:[%s5520_s30 + $0x169] sm:$0xff]  ;;  %v5305_v6 = vld [vmem:[%s5520_s30 + $0x151] sm:$0xff] }
 0xa11   : > { %v4904_v60 = vadd.f32 %v5292_v13, %v4872_v20  ;;  %v5309_v20 = vld [vmem:[%s5520_s30 + $0x181] sm:$0xff] }
 0xa12   : > { %4940 = vst.msk [vmem:[%s9613_s28 + $0x88] sm:$0xff] %vm1594_vm1, %v4908_v42 }
 0xa13   : > { %4936 = vst.msk [vmem:[%s9613_s28 + $0x68] sm:$0xff] %vm1594_vm1, %v4904_v60 }
 0xa14   : > { %4932 = vst.msk [vmem:[%s9613_s28 + $0x48] sm:$0xff] %vm1594_vm1, %v4900_v1 }
 0xa15   : > { %v4832_v47 = vpop.permute.xlu0 %4831  ;;  %v4728_v56 = vpop.permute.xlu1 %4727 }
 0xa16   : > { %v4754_v58 = vpop.permute.xlu2 %4753  ;;  %v4886_v31 = vmul.f32 %v4832_v47, %v9145_v9  ;;  %v4870_v49 = vmul.f32 %v4728_v56, %v9082_v62  ;;  %v5297_v9 = vld [vmem:[%s5520_s30 + $0xf1] sm:$0xff] }
 0xa17   : > { %v4874_v53 = vmul.f32 %v4754_v58, %v9102_v7 }
 0xa18   : > { %v4918_v36 = vadd.f32 %v5306_v39, %v4886_v31  ;;  %v4902_v46 = vadd.f32 %v5290_v51, %v4870_v49 }
 0xa19   : > { %v4906_v4 = vadd.f32 %v5294_v44, %v4874_v53  ;;  %v5310_v44 = vld [vmem:[%s5520_s30 + $0x189] sm:$0xff] }
 0xa1a   : > { %4950 = vst.msk [vmem:[%s9613_s28 + $0xd8] sm:$0xff] %vm1594_vm1, %v4918_v36 }
 0xa1b   : > { %4938 = vst.msk [vmem:[%s9613_s28 + $0x78] sm:$0xff] %vm1594_vm1, %v4906_v4 }
 0xa1c   : > { %4934 = vst.msk [vmem:[%s9613_s28 + $0x58] sm:$0xff] %vm1594_vm1, %v4902_v46 }
 0xa25   : > { %v4748_v23 = vpop.permute.xlu1 %4747 }
 0xa26   : > { %v4774_v62 = vpop.permute.xlu2 %4773  ;;  %v4873_v7 = vmul.f32 %v4748_v23, %v9097_v57 }
 0xa27   : > { %v4877_v15 = vmul.f32 %v4774_v62, %v9107_v41 }
 0xa28   : > { %v4905_v0 = vadd.f32 %v5293_v55, %v4873_v7 }
 0xa29   : > { %v4909_v43 = vadd.f32 %v5297_v9, %v4877_v15 }
 0xa2a   : > { %4937 = vst.msk [vmem:[%s9613_s28 + $0x70] sm:$0xff] %vm1594_vm1, %v4905_v0 }
 0xa2b   : > { %4941 = vst.msk [vmem:[%s9613_s28 + $0x90] sm:$0xff] %vm1594_vm1, %v4909_v43 }
 0xa2d   : > { %v4761_v33 = vpop.permute.xlu1 %4760 }
 0xa2e   : > { %v4787_v24 = vpop.permute.xlu2 %4786  ;;  %v4875_v14 = vmul.f32 %v4761_v33, %v9110_v16 }
 0xa2f   : > { %v4879_v57 = vmul.f32 %v4787_v24, %v9142_v11 }
 0xa30   : > { %v4907_v52 = vadd.f32 %v5295_v29, %v4875_v14 }
 0xa31   : > { %v4911_v41 = vadd.f32 %v5299_v37, %v4879_v57 }
 0xa32   : > { %4939 = vst.msk [vmem:[%s9613_s28 + $0x80] sm:$0xff] %vm1594_vm1, %v4907_v52 }
 0xa33   : > { %4943 = vst.msk [vmem:[%s9613_s28 + $0xa0] sm:$0xff] %vm1594_vm1, %v4911_v41 }
 0xa3d   : > { %v4780_v30 = vpop.permute.xlu1 %4779 }
 0xa3e   : > { %v4806_v10 = vpop.permute.xlu2 %4805  ;;  %v4878_v3 = vmul.f32 %v4780_v30, %v9120_v48 }
 0xa3f   : > { %v4882_v16 = vmul.f32 %v4806_v10, %v9157_v2 }
 0xa40   : > { %v4910_v21 = vadd.f32 %v5298_v27, %v4878_v3 }
 0xa41   : > { %v4914_v11 = vadd.f32 %v5302_v45, %v4882_v16 }
 0xa42   : > { %4942 = vst.msk [vmem:[%s9613_s28 + $0x98] sm:$0xff] %vm1594_vm1, %v4910_v21 }
 0xa43   : > { %4946 = vst.msk [vmem:[%s9613_s28 + $0xb8] sm:$0xff] %vm1594_vm1, %v4914_v11 }
 0xa45   : > { %v4793_v5 = vpop.permute.xlu1 %4792 }
 0xa46   : > { %v4819_v63 = vpop.permute.xlu2 %4818  ;;  %v4880_v34 = vmul.f32 %v4793_v5, %v9117_v59 }
 0xa47   : > { %v4884_v48 = vmul.f32 %v4819_v63, %v9148_v26 }
 0xa48   : > { %v4912_v38 = vadd.f32 %v5300_v32, %v4880_v34 }
 0xa49   : > { %v4916_v2 = vadd.f32 %v5304_v22, %v4884_v48 }
 0xa4a   : > { %4944 = vst.msk [vmem:[%s9613_s28 + $0xa8] sm:$0xff] %vm1594_vm1, %v4912_v38 }
 0xa4b   : > { %4948 = vst.msk [vmem:[%s9613_s28 + $0xc8] sm:$0xff] %vm1594_vm1, %v4916_v2 }
 0xa55   : > { %v4813_v61 = vpop.permute.xlu1 %4812 }
 0xa56   : > { %v4839_v18 = vpop.permute.xlu2 %4838  ;;  %v4883_v13 = vmul.f32 %v4813_v61, %v9127_v8 }
 0xa57   : > { %v4887_v59 = vmul.f32 %v4839_v18, %v9163_v54  ;;  %v5308_v54 = vld [vmem:[%s5520_s30 + $0x171] sm:$0xff] }
 0xa58   : > { %v4915_v40 = vadd.f32 %v5303_v28, %v4883_v13 }
 0xa59   : > { %v4919_v26 = vadd.f32 %v5307_v12, %v4887_v59 }
 0xa5a   : > { %4947 = vst.msk [vmem:[%s9613_s28 + $0xc0] sm:$0xff] %vm1594_vm1, %v4915_v40 }
 0xa5b   : > { %4951 = vst.msk [vmem:[%s9613_s28 + $0xe0] sm:$0xff] %vm1594_vm1, %v4919_v26 }
 0xa5d   : > { %v4826_v17 = vpop.permute.xlu1 %4825 }
 0xa5e   : > { %v4852_v42 = vpop.permute.xlu2 %4851  ;;  %v4885_v1 = vmul.f32 %v4826_v17, %v9172_v50 }
 0xa5f   : > { %v4889_v8 = vmul.f32 %v4852_v42, %v9160_v25 }
 0xa60   : > { %v4917_v60 = vadd.f32 %v5305_v6, %v4885_v1 }
 0xa61   : > { %v4921_v39 = vadd.f32 %v5309_v20, %v4889_v8 }
 0xa62   : > { %4949 = vst.msk [vmem:[%s9613_s28 + $0xd0] sm:$0xff] %vm1594_vm1, %v4917_v60 }
 0xa63   : > { %4953 = vst.msk [vmem:[%s9613_s28 + $0xf0] sm:$0xff] %vm1594_vm1, %v4921_v39 }
 0xa6d   : > { %v4845_v47 = vpop.permute.xlu1 %4844 }
 0xa6e   : > { %v4888_v51 = vmul.f32 %v4845_v47, %v9184_v19 }
 0xa70   : > { %v4920_v56 = vadd.f32 %v5308_v54, %v4888_v51 }
 0xa72   : > { %4952 = vst.msk [vmem:[%s9613_s28 + $0xe8] sm:$0xff] %vm1594_vm1, %v4920_v56 }
 0xa75   : > { %v4858_v58 = vpop.permute.xlu1 %4857 }
 0xa76   : > { %v4890_v31 = vmul.f32 %v4858_v58, %v9175_v35 }
 0xa78   : > { %v4922_v50 = vadd.f32 %v5310_v44, %v4890_v31 }
 0xa7a   : > { %4954 = vst.msk [vmem:[%s9613_s28 + $0xf8] sm:$0xff] %vm1594_vm1, %v4922_v50 }
 0xa7b PF: > { %s18_s26 = sadd.s32 1, %s5447_s26  }
 0xa7c   : > { %p15_p4 = scmp.ge.s32.totalorder %s18_s26, 4  }
 0xa7e   :  { %17 = sbr.rel (!%p15_p4) target bundleno = 2 (0x2), region = 83 }

</bundles_post_ra>
